<compile_context>
chip_gen: v5e
topology: v5e:2x2
jax: 0.10.0
libtpu: 0.0.40
codegen_flags: <defaults>
</compile_context>

<pallas_src>
import functools

import jax
import jax.numpy as jnp
from jax import lax
from jax.experimental import pallas as pl
from jax.experimental.pallas import tpu as pltpu


LANE = 128


def _round_up(n, m=LANE):
    return ((n + m - 1) // m) * m


# ----------------------------- Pallas kernel ------------------------------- #

def _bottleneck_kernel(x_ref, w1_ref, w2_ref, w3_ref, sb1_ref, sb2_ref, sb3_ref,
                       o_ref, a0_ref, a1_ref, a2_ref):
    """Whole bottleneck block for one batch element, fully resident in VMEM.

    x_ref  : (1, H+2, W+2, Cin) bf16, spatially zero-padded, channel-padded to 128
    w*_ref : (9, Cin_k, Cout_k) bf16, laid out as (kh*3+kw, cin, cout)
    sb*_ref: (2, Cout_k)        f32, row 0 = folded BN scale, row 1 = folded bias
    o_ref  : (1, H, W, Cout)    f32 output block (lane-dense last dim)
    a*_ref : f32 VMEM scratch holding padded activations between the convs
    """
    H = o_ref.shape[1]
    W = o_ref.shape[2]
    Co = o_ref.shape[3]

    def conv3x3(src_ref, w_ref, sb_ref):
        c_in = w_ref.shape[1]
        c_out = w_ref.shape[2]
        acc = jnp.zeros((H * W, c_out), jnp.float32)
        # 3x3 conv = 9 shifted windows -> 9 accumulating MXU matmuls (K = c_in).
        for kh in range(3):
            for kw in range(3):
                patch = src_ref[pl.ds(kh, H), pl.ds(kw, W), :]
                patch = patch.reshape(H * W, c_in).astype(jnp.bfloat16)
                acc = acc + jnp.dot(patch, w_ref[kh * 3 + kw],
                                    preferred_element_type=jnp.float32)
        # Folded BatchNorm (eval mode): per-channel scale + bias, in f32.
        return acc * sb_ref[pl.ds(0, 1), :] + sb_ref[pl.ds(1, 1), :]

    # Stage the padded input tile in f32 scratch (also provides the residual).
    a0_ref[...] = x_ref[0].astype(jnp.float32)

    # conv1 + bn1 + relu -> interior of padded scratch a1 (halo stays zero).
    y1 = jnp.maximum(conv3x3(a0_ref, w1_ref, sb1_ref), 0.0)
    a1_ref[...] = jnp.zeros_like(a1_ref)
    a1_ref[pl.ds(1, H), pl.ds(1, W), :] = y1.reshape(H, W, y1.shape[-1])

    # conv2 + bn2 + relu -> interior of padded scratch a2.
    y2 = jnp.maximum(conv3x3(a1_ref, w2_ref, sb2_ref), 0.0)
    a2_ref[...] = jnp.zeros_like(a2_ref)
    a2_ref[pl.ds(1, H), pl.ds(1, W), :] = y2.reshape(H, W, y2.shape[-1])

    # conv3 + bn3 + residual add + relu (residual = original input interior;
    # Cin_pad == Cout_pad because in_planes == planes * expansion).
    y3 = conv3x3(a2_ref, w3_ref, sb3_ref)
    res = a0_ref[pl.ds(1, H), pl.ds(1, W), :].reshape(H * W, Co)
    o_ref[...] = jnp.maximum(y3 + res, 0.0).reshape(1, H, W, Co).astype(o_ref.dtype)


def _bottleneck_pallas(xp, w1, w2, w3, sb1, sb2, sb3, H, W):
    N, Hp, Wp, Cin = xp.shape
    P = w1.shape[2]
    Co = w3.shape[2]

    flops = 2 * N * H * W * 9 * (Cin * P + P * P + P * Co)
    bytes_accessed = (xp.size * 2
                      + (w1.size + w2.size + w3.size) * 2
                      + (sb1.size + sb2.size + sb3.size) * 4
                      + N * H * W * Co * 4)

    return pl.pallas_call(
        _bottleneck_kernel,
        out_shape=jax.ShapeDtypeStruct((N, H, W, Co), jnp.float32),
        grid_spec=pltpu.PrefetchScalarGridSpec(
            num_scalar_prefetch=0,
            grid=(N,),
            in_specs=[
                pl.BlockSpec((1, Hp, Wp, Cin), lambda b: (b, 0, 0, 0)),
                pl.BlockSpec((9, Cin, P), lambda b: (0, 0, 0)),
                pl.BlockSpec((9, P, P), lambda b: (0, 0, 0)),
                pl.BlockSpec((9, P, Co), lambda b: (0, 0, 0)),
                pl.BlockSpec((2, P), lambda b: (0, 0)),
                pl.BlockSpec((2, P), lambda b: (0, 0)),
                pl.BlockSpec((2, Co), lambda b: (0, 0)),
            ],
            out_specs=pl.BlockSpec((1, H, W, Co), lambda b: (b, 0, 0, 0)),
            scratch_shapes=[
                pltpu.VMEM((Hp, Wp, Cin), jnp.float32),   # staged padded input / residual
                pltpu.VMEM((Hp, Wp, P), jnp.float32),     # conv1 output (padded)
                pltpu.VMEM((Hp, Wp, P), jnp.float32),     # conv2 output (padded)
            ],
        ),
        compiler_params=pltpu.CompilerParams(
            dimension_semantics=("parallel",),            # batch axis shards across TCs
            vmem_limit_bytes=32 * 1024 * 1024,            # safe on v5e/v6e/v7x
        ),
        cost_estimate=pl.CostEstimate(flops=flops, transcendentals=0,
                                      bytes_accessed=bytes_accessed),
    )(xp, w1, w2, w3, sb1, sb2, sb3)


# -------------------------- parameter preparation -------------------------- #

def _prep_weight(w_oihw, cin_pad, cout_pad):
    # (O, C, 3, 3) -> (3, 3, C, O) -> (9, C, O), channel dims zero-padded to lanes.
    O, C, KH, KW = w_oihw.shape
    w = jnp.transpose(w_oihw, (2, 3, 1, 0)).reshape(KH * KW, C, O)
    w = jnp.pad(w, ((0, 0), (0, cin_pad - C), (0, cout_pad - O)))
    return w.astype(jnp.bfloat16)


def _prep_bn(gamma, beta, mean, var, c_pad, eps=1e-5):
    scale = gamma / jnp.sqrt(var + eps)
    bias = beta - mean * scale
    sb = jnp.stack([scale, bias], axis=0).astype(jnp.float32)   # (2, C)
    return jnp.pad(sb, ((0, 0), (0, c_pad - sb.shape[1])))      # padded cols = 0


def prepare_params(params):
    """Fold BN stats and reshape/pad weights once (not per forward call)."""
    (w1, g1, b1, m1, v1,
     w2, g2, b2, m2, v2,
     w3, g3, b3, m3, v3) = params
    in_planes, out_planes = w1.shape[1], w3.shape[0]
    assert out_planes == in_planes, (
        "downsample=None: residual add needs in_planes == planes * expansion")
    cin_p = _round_up(in_planes)
    p_p = _round_up(w1.shape[0])
    co_p = _round_up(out_planes)
    assert cin_p == co_p
    return (
        _prep_weight(w1, cin_p, p_p),
        _prep_weight(w2, p_p, p_p),
        _prep_weight(w3, p_p, co_p),
        _prep_bn(g1, b1, m1, v1, p_p),
        _prep_bn(g2, b2, m2, v2, p_p),
        _prep_bn(g3, b3, m3, v3, co_p),
    )


# -------------------------------- forward ---------------------------------- #

@functools.partial(jax.jit, static_argnames=("out_planes", "stride"))
def bottlenet_forward(x_nchw, prepped, out_planes, stride=1):
    if stride != 1:
        raise NotImplementedError(
            "downsample=None -> residual add is only shape-valid for stride == 1")
    w1, w2, w3, sb1, sb2, sb3 = prepped
    N, Cin, H, W = x_nchw.shape
    cin_p = w1.shape[1]

    # NCHW -> NHWC, zero-pad spatial (pad=1 for 3x3) and channels (to 128 lanes), bf16.
    x = jnp.transpose(x_nchw, (0, 2, 3, 1))
    xp = jnp.pad(x, ((0, 0), (1, 1), (1, 1), (0, cin_p - Cin))).astype(jnp.bfloat16)

    out = _bottleneck_pallas(xp, w1, w2, w3, sb1, sb2, sb3, H, W)   # (N, H, W, Co_pad) f32
    return jnp.transpose(out[..., :out_planes], (0, 3, 1, 2))       # back to NCHW


# ----------------------- pure-JAX reference (check) ------------------------ #

def _ref_conv_bn(x, w, g, b, m, v, stride, eps=1e-5):
    y = lax.conv_general_dilated(x, w, (stride, stride), [(1, 1), (1, 1)],
                                 dimension_numbers=('NCHW', 'OIHW', 'NCHW'))
    sc = (g / jnp.sqrt(v + eps)).reshape(1, -1, 1, 1)
    bi = (b - m * g / jnp.sqrt(v + eps)).reshape(1, -1, 1, 1)
    return y * sc + bi


def bottlenet_ref(x, params, stride=1):
    (w1, g1, b1, m1, v1, w2, g2, b2, m2, v2, w3, g3, b3, m3, v3) = params
    residual = x
    out = jnp.maximum(_ref_conv_bn(x, w1, g1, b1, m1, v1, stride), 0.0)
    out = jnp.maximum(_ref_conv_bn(out, w2, g2, b2, m2, v2, 1), 0.0)
    out = _ref_conv_bn(out, w3, g3, b3, m3, v3, 1)
    return jnp.maximum(out + residual, 0.0)


# --------------------------------- main ------------------------------------ #

if __name__ == "__main__":
    key = jax.random.PRNGKey(0)
    N, in_planes, H, W = 2, 16, 16, 16
    planes = 4
    expansion = 4            # in_planes == planes * expansion -> residual add is valid
    stride = 1

    ks = jax.random.split(key, 16)
    x = jax.random.normal(ks[0], (N, in_planes, H, W), jnp.float32)

    def bn_params(k, c):
        k1, k2, k3, k4 = jax.random.split(k, 4)
        gamma = 1.0 + 0.1 * jax.random.normal(k1, (c,), jnp.float32)
        beta = 0.1 * jax.random.normal(k2, (c,), jnp.float32)
        mean = 0.1 * jax.random.normal(k3, (c,), jnp.float32)
        var = 1.0 + 0.1 * jnp.abs(jax.random.normal(k4, (c,), jnp.float32))
        return gamma, beta, mean, var

    w1 = 0.1 * jax.random.normal(ks[1], (planes, in_planes, 3, 3), jnp.float32)
    g1, b1, m1, v1 = bn_params(ks[2], planes)
    w2 = 0.1 * jax.random.normal(ks[3], (planes, planes, 3, 3), jnp.float32)
    g2, b2, m2, v2 = bn_params(ks[4], planes)
    w3 = 0.1 * jax.random.normal(ks[5], (planes * expansion, planes, 3, 3), jnp.float32)
    g3, b3, m3, v3 = bn_params(ks[6], planes * expansion)

    params = (w1, g1, b1, m1, v1, w2, g2, b2, m2, v2, w3, g3, b3, m3, v3)

    prepped = prepare_params(params)                       # folded BN + padded bf16 weights
    out = bottlenet_forward(x, prepped, out_planes=planes * expansion, stride=stride)
    out = jax.block_until_ready(out)

    ref = bottlenet_ref(x, params, stride)
    assert out.shape == (N, planes * expansion, H, W)
    max_err = float(jnp.max(jnp.abs(out - ref)))
    # bf16 matmul operands (f32 accumulation + f32 BN) -> looser tolerance than pure f32.
    assert jnp.allclose(out, ref, atol=5e-2, rtol=5e-2), f"max abs err = {max_err}"

    print("KERNEL_OK")
</pallas_src>

<mosaic_0001>
module attributes {stable_mosaic.version = 11 : i64} {
  func.func @_bottleneck_kernel(%arg0: i32, %arg1: memref<1x18x18x128xbf16, #tpu.memory_space<vmem>>, %arg2: memref<9x128x128xbf16, #tpu.memory_space<vmem>>, %arg3: memref<9x128x128xbf16, #tpu.memory_space<vmem>>, %arg4: memref<9x128x128xbf16, #tpu.memory_space<vmem>>, %arg5: memref<2x128xf32, #tpu.memory_space<vmem>>, %arg6: memref<2x128xf32, #tpu.memory_space<vmem>>, %arg7: memref<2x128xf32, #tpu.memory_space<vmem>>, %arg8: memref<1x16x16x128xf32, #tpu.memory_space<vmem>>, %arg9: memref<18x18x128xf32, #tpu.memory_space<vmem>>, %arg10: memref<18x18x128xf32, #tpu.memory_space<vmem>>, %arg11: memref<18x18x128xf32, #tpu.memory_space<vmem>>) attributes {dimension_semantics = [#tpu.dimension_semantics<parallel>], iteration_bounds = array<i64: 2>, scalar_prefetch = 0 : i64, scratch_operands = 3 : i64, tpu.core_type = #tpu.core_type<tc>, window_params = [{transform_indices = @transform_0, window_bounds = array<i64: 1, 18, 18, 128>}, {pipeline_mode = #tpu.pipeline_mode<synchronous>, transform_indices = @transform_1, window_bounds = array<i64: 9, 128, 128>}, {pipeline_mode = #tpu.pipeline_mode<synchronous>, transform_indices = @transform_2, window_bounds = array<i64: 9, 128, 128>}, {pipeline_mode = #tpu.pipeline_mode<synchronous>, transform_indices = @transform_3, window_bounds = array<i64: 9, 128, 128>}, {pipeline_mode = #tpu.pipeline_mode<synchronous>, transform_indices = @transform_4, window_bounds = array<i64: 2, 128>}, {pipeline_mode = #tpu.pipeline_mode<synchronous>, transform_indices = @transform_5, window_bounds = array<i64: 2, 128>}, {pipeline_mode = #tpu.pipeline_mode<synchronous>, transform_indices = @transform_6, window_bounds = array<i64: 2, 128>}, {transform_indices = @transform_7, window_bounds = array<i64: 1, 16, 16, 128>}]} {
    %c0 = arith.constant 0 : index
    %c0_0 = arith.constant 0 : index
    %c0_1 = arith.constant 0 : index
    %c0_2 = arith.constant 0 : index
    %0 = vector.load %arg1[%c0, %c0_0, %c0_1, %c0_2] : memref<1x18x18x128xbf16, #tpu.memory_space<vmem>>, vector<1x18x18x128xbf16>
    %1 = vector.shape_cast %0 : vector<1x18x18x128xbf16> to vector<18x18x128xbf16>
    %2 = arith.extf %1 : vector<18x18x128xbf16> to vector<18x18x128xf32>
    %c0_3 = arith.constant 0 : index
    %c0_4 = arith.constant 0 : index
    %c0_5 = arith.constant 0 : index
    %3 = vector.load %arg9[%c0_3, %c0_4, %c0_5] : memref<18x18x128xf32, #tpu.memory_space<vmem>>, vector<18x18x128xf32>
    tpu.vector_store %arg9[%c0_3, %c0_4, %c0_5], %2 {strides = array<i32>} : memref<18x18x128xf32, #tpu.memory_space<vmem>>, vector<18x18x128xf32>,
    %cst = arith.constant 0.000000e+00 : f32
    %4 = vector.broadcast %cst : f32 to vector<256x128xf32>
    %c0_6 = arith.constant 0 : index
    %c0_7 = arith.constant 0 : index
    %c0_8 = arith.constant 0 : index
    %5 = vector.load %arg9[%c0_6, %c0_7, %c0_8] : memref<18x18x128xf32, #tpu.memory_space<vmem>>, vector<16x16x128xf32>
    %6 = vector.shape_cast %5 : vector<16x16x128xf32> to vector<256x128xf32>
    %7 = arith.truncf %6 : vector<256x128xf32> to vector<256x128xbf16>
    %c0_9 = arith.constant 0 : index
    %c0_10 = arith.constant 0 : index
    %c0_11 = arith.constant 0 : index
    %8 = vector.load %arg2[%c0_9, %c0_10, %c0_11] : memref<9x128x128xbf16, #tpu.memory_space<vmem>>, vector<1x128x128xbf16>
    %9 = vector.shape_cast %8 : vector<1x128x128xbf16> to vector<128x128xbf16>
    %cst_12 = arith.constant dense<0.000000e+00> : vector<256x128xf32>
    %10 = tpu.matmul %7, %9, %cst_12 {dimension_numbers = #tpu.dot_dimension_numbers<[1], [0], [0], [1], [0, 0, 1, 1], [], []>} : vector<256x128xbf16>, vector<128x128xbf16>, vector<256x128xf32> -> vector<256x128xf32>
    %11 = arith.addf %4, %10 : vector<256x128xf32>
    %c0_13 = arith.constant 0 : index
    %c1 = arith.constant 1 : index
    %c0_14 = arith.constant 0 : index
    %12 = vector.load %arg9[%c0_13, %c1, %c0_14] : memref<18x18x128xf32, #tpu.memory_space<vmem>>, vector<16x16x128xf32>
    %13 = vector.shape_cast %12 : vector<16x16x128xf32> to vector<256x128xf32>
    %14 = arith.truncf %13 : vector<256x128xf32> to vector<256x128xbf16>
    %c1_15 = arith.constant 1 : index
    %c0_16 = arith.constant 0 : index
    %c0_17 = arith.constant 0 : index
    %15 = vector.load %arg2[%c1_15, %c0_16, %c0_17] : memref<9x128x128xbf16, #tpu.memory_space<vmem>>, vector<1x128x128xbf16>
    %16 = vector.shape_cast %15 : vector<1x128x128xbf16> to vector<128x128xbf16>
    %cst_18 = arith.constant dense<0.000000e+00> : vector<256x128xf32>
    %17 = tpu.matmul %14, %16, %cst_18 {dimension_numbers = #tpu.dot_dimension_numbers<[1], [0], [0], [1], [0, 0, 1, 1], [], []>} : vector<256x128xbf16>, vector<128x128xbf16>, vector<256x128xf32> -> vector<256x128xf32>
    %18 = arith.addf %11, %17 : vector<256x128xf32>
    %c0_19 = arith.constant 0 : index
    %c2 = arith.constant 2 : index
    %c0_20 = arith.constant 0 : index
    %19 = vector.load %arg9[%c0_19, %c2, %c0_20] : memref<18x18x128xf32, #tpu.memory_space<vmem>>, vector<16x16x128xf32>
    %20 = vector.shape_cast %19 : vector<16x16x128xf32> to vector<256x128xf32>
    %21 = arith.truncf %20 : vector<256x128xf32> to vector<256x128xbf16>
    %c2_21 = arith.constant 2 : index
    %c0_22 = arith.constant 0 : index
    %c0_23 = arith.constant 0 : index
    %22 = vector.load %arg2[%c2_21, %c0_22, %c0_23] : memref<9x128x128xbf16, #tpu.memory_space<vmem>>, vector<1x128x128xbf16>
    %23 = vector.shape_cast %22 : vector<1x128x128xbf16> to vector<128x128xbf16>
    %cst_24 = arith.constant dense<0.000000e+00> : vector<256x128xf32>
    %24 = tpu.matmul %21, %23, %cst_24 {dimension_numbers = #tpu.dot_dimension_numbers<[1], [0], [0], [1], [0, 0, 1, 1], [], []>} : vector<256x128xbf16>, vector<128x128xbf16>, vector<256x128xf32> -> vector<256x128xf32>
    %25 = arith.addf %18, %24 : vector<256x128xf32>
    %c1_25 = arith.constant 1 : index
    %c0_26 = arith.constant 0 : index
    %c0_27 = arith.constant 0 : index
    %26 = vector.load %arg9[%c1_25, %c0_26, %c0_27] : memref<18x18x128xf32, #tpu.memory_space<vmem>>, vector<16x16x128xf32>
    %27 = vector.shape_cast %26 : vector<16x16x128xf32> to vector<256x128xf32>
    %28 = arith.truncf %27 : vector<256x128xf32> to vector<256x128xbf16>
    %c3 = arith.constant 3 : index
    %c0_28 = arith.constant 0 : index
    %c0_29 = arith.constant 0 : index
    %29 = vector.load %arg2[%c3, %c0_28, %c0_29] : memref<9x128x128xbf16, #tpu.memory_space<vmem>>, vector<1x128x128xbf16>
    %30 = vector.shape_cast %29 : vector<1x128x128xbf16> to vector<128x128xbf16>
    %cst_30 = arith.constant dense<0.000000e+00> : vector<256x128xf32>
    %31 = tpu.matmul %28, %30, %cst_30 {dimension_numbers = #tpu.dot_dimension_numbers<[1], [0], [0], [1], [0, 0, 1, 1], [], []>} : vector<256x128xbf16>, vector<128x128xbf16>, vector<256x128xf32> -> vector<256x128xf32>
    %32 = arith.addf %25, %31 : vector<256x128xf32>
    %c1_31 = arith.constant 1 : index
    %c1_32 = arith.constant 1 : index
    %c0_33 = arith.constant 0 : index
    %33 = vector.load %arg9[%c1_31, %c1_32, %c0_33] : memref<18x18x128xf32, #tpu.memory_space<vmem>>, vector<16x16x128xf32>
    %34 = vector.shape_cast %33 : vector<16x16x128xf32> to vector<256x128xf32>
    %35 = arith.truncf %34 : vector<256x128xf32> to vector<256x128xbf16>
    %c4 = arith.constant 4 : index
    %c0_34 = arith.constant 0 : index
    %c0_35 = arith.constant 0 : index
    %36 = vector.load %arg2[%c4, %c0_34, %c0_35] : memref<9x128x128xbf16, #tpu.memory_space<vmem>>, vector<1x128x128xbf16>
    %37 = vector.shape_cast %36 : vector<1x128x128xbf16> to vector<128x128xbf16>
    %cst_36 = arith.constant dense<0.000000e+00> : vector<256x128xf32>
    %38 = tpu.matmul %35, %37, %cst_36 {dimension_numbers = #tpu.dot_dimension_numbers<[1], [0], [0], [1], [0, 0, 1, 1], [], []>} : vector<256x128xbf16>, vector<128x128xbf16>, vector<256x128xf32> -> vector<256x128xf32>
    %39 = arith.addf %32, %38 : vector<256x128xf32>
    %c1_37 = arith.constant 1 : index
    %c2_38 = arith.constant 2 : index
    %c0_39 = arith.constant 0 : index
    %40 = vector.load %arg9[%c1_37, %c2_38, %c0_39] : memref<18x18x128xf32, #tpu.memory_space<vmem>>, vector<16x16x128xf32>
    %41 = vector.shape_cast %40 : vector<16x16x128xf32> to vector<256x128xf32>
    %42 = arith.truncf %41 : vector<256x128xf32> to vector<256x128xbf16>
    %c5 = arith.constant 5 : index
    %c0_40 = arith.constant 0 : index
    %c0_41 = arith.constant 0 : index
    %43 = vector.load %arg2[%c5, %c0_40, %c0_41] : memref<9x128x128xbf16, #tpu.memory_space<vmem>>, vector<1x128x128xbf16>
    %44 = vector.shape_cast %43 : vector<1x128x128xbf16> to vector<128x128xbf16>
    %cst_42 = arith.constant dense<0.000000e+00> : vector<256x128xf32>
    %45 = tpu.matmul %42, %44, %cst_42 {dimension_numbers = #tpu.dot_dimension_numbers<[1], [0], [0], [1], [0, 0, 1, 1], [], []>} : vector<256x128xbf16>, vector<128x128xbf16>, vector<256x128xf32> -> vector<256x128xf32>
    %46 = arith.addf %39, %45 : vector<256x128xf32>
    %c2_43 = arith.constant 2 : index
    %c0_44 = arith.constant 0 : index
    %c0_45 = arith.constant 0 : index
    %47 = vector.load %arg9[%c2_43, %c0_44, %c0_45] : memref<18x18x128xf32, #tpu.memory_space<vmem>>, vector<16x16x128xf32>
    %48 = vector.shape_cast %47 : vector<16x16x128xf32> to vector<256x128xf32>
    %49 = arith.truncf %48 : vector<256x128xf32> to vector<256x128xbf16>
    %c6 = arith.constant 6 : index
    %c0_46 = arith.constant 0 : index
    %c0_47 = arith.constant 0 : index
    %50 = vector.load %arg2[%c6, %c0_46, %c0_47] : memref<9x128x128xbf16, #tpu.memory_space<vmem>>, vector<1x128x128xbf16>
    %51 = vector.shape_cast %50 : vector<1x128x128xbf16> to vector<128x128xbf16>
    %cst_48 = arith.constant dense<0.000000e+00> : vector<256x128xf32>
    %52 = tpu.matmul %49, %51, %cst_48 {dimension_numbers = #tpu.dot_dimension_numbers<[1], [0], [0], [1], [0, 0, 1, 1], [], []>} : vector<256x128xbf16>, vector<128x128xbf16>, vector<256x128xf32> -> vector<256x128xf32>
    %53 = arith.addf %46, %52 : vector<256x128xf32>
    %c2_49 = arith.constant 2 : index
    %c1_50 = arith.constant 1 : index
    %c0_51 = arith.constant 0 : index
    %54 = vector.load %arg9[%c2_49, %c1_50, %c0_51] : memref<18x18x128xf32, #tpu.memory_space<vmem>>, vector<16x16x128xf32>
    %55 = vector.shape_cast %54 : vector<16x16x128xf32> to vector<256x128xf32>
    %56 = arith.truncf %55 : vector<256x128xf32> to vector<256x128xbf16>
    %c7 = arith.constant 7 : index
    %c0_52 = arith.constant 0 : index
    %c0_53 = arith.constant 0 : index
    %57 = vector.load %arg2[%c7, %c0_52, %c0_53] : memref<9x128x128xbf16, #tpu.memory_space<vmem>>, vector<1x128x128xbf16>
    %58 = vector.shape_cast %57 : vector<1x128x128xbf16> to vector<128x128xbf16>
    %cst_54 = arith.constant dense<0.000000e+00> : vector<256x128xf32>
    %59 = tpu.matmul %56, %58, %cst_54 {dimension_numbers = #tpu.dot_dimension_numbers<[1], [0], [0], [1], [0, 0, 1, 1], [], []>} : vector<256x128xbf16>, vector<128x128xbf16>, vector<256x128xf32> -> vector<256x128xf32>
    %60 = arith.addf %53, %59 : vector<256x128xf32>
    %c2_55 = arith.constant 2 : index
    %c2_56 = arith.constant 2 : index
    %c0_57 = arith.constant 0 : index
    %61 = vector.load %arg9[%c2_55, %c2_56, %c0_57] : memref<18x18x128xf32, #tpu.memory_space<vmem>>, vector<16x16x128xf32>
    %62 = vector.shape_cast %61 : vector<16x16x128xf32> to vector<256x128xf32>
    %63 = arith.truncf %62 : vector<256x128xf32> to vector<256x128xbf16>
    %c8 = arith.constant 8 : index
    %c0_58 = arith.constant 0 : index
    %c0_59 = arith.constant 0 : index
    %64 = vector.load %arg2[%c8, %c0_58, %c0_59] : memref<9x128x128xbf16, #tpu.memory_space<vmem>>, vector<1x128x128xbf16>
    %65 = vector.shape_cast %64 : vector<1x128x128xbf16> to vector<128x128xbf16>
    %cst_60 = arith.constant dense<0.000000e+00> : vector<256x128xf32>
    %66 = tpu.matmul %63, %65, %cst_60 {dimension_numbers = #tpu.dot_dimension_numbers<[1], [0], [0], [1], [0, 0, 1, 1], [], []>} : vector<256x128xbf16>, vector<128x128xbf16>, vector<256x128xf32> -> vector<256x128xf32>
    %67 = arith.addf %60, %66 : vector<256x128xf32>
    %c0_61 = arith.constant 0 : index
    %c0_62 = arith.constant 0 : index
    %68 = vector.load %arg5[%c0_61, %c0_62] : memref<2x128xf32, #tpu.memory_space<vmem>>, vector<1x128xf32>
    %69 = vector.broadcast %68 : vector<1x128xf32> to vector<256x128xf32>
    %70 = arith.mulf %67, %69 : vector<256x128xf32>
    %c1_63 = arith.constant 1 : index
    %c0_64 = arith.constant 0 : index
    %71 = vector.load %arg5[%c1_63, %c0_64] : memref<2x128xf32, #tpu.memory_space<vmem>>, vector<1x128xf32>
    %72 = vector.broadcast %71 : vector<1x128xf32> to vector<256x128xf32>
    %73 = arith.addf %70, %72 : vector<256x128xf32>
    %cst_65 = arith.constant 0.000000e+00 : f32
    %74 = vector.broadcast %cst_65 : f32 to vector<256x128xf32>
    %75 = arith.maximumf %73, %74 : vector<256x128xf32>
    %cst_66 = arith.constant 0.000000e+00 : f32
    %76 = vector.broadcast %cst_66 : f32 to vector<18x18x128xf32>
    %c0_67 = arith.constant 0 : index
    %c0_68 = arith.constant 0 : index
    %c0_69 = arith.constant 0 : index
    %77 = vector.load %arg10[%c0_67, %c0_68, %c0_69] : memref<18x18x128xf32, #tpu.memory_space<vmem>>, vector<18x18x128xf32>
    tpu.vector_store %arg10[%c0_67, %c0_68, %c0_69], %76 {strides = array<i32>} : memref<18x18x128xf32, #tpu.memory_space<vmem>>, vector<18x18x128xf32>,
    %78 = vector.shape_cast %75 : vector<256x128xf32> to vector<16x16x128xf32>
    %c1_70 = arith.constant 1 : index
    %c1_71 = arith.constant 1 : index
    %c0_72 = arith.constant 0 : index
    %79 = vector.load %arg10[%c1_70, %c1_71, %c0_72] : memref<18x18x128xf32, #tpu.memory_space<vmem>>, vector<16x16x128xf32>
    tpu.vector_store %arg10[%c1_70, %c1_71, %c0_72], %78 {strides = array<i32>} : memref<18x18x128xf32, #tpu.memory_space<vmem>>, vector<16x16x128xf32>,
    %cst_73 = arith.constant 0.000000e+00 : f32
    %80 = vector.broadcast %cst_73 : f32 to vector<256x128xf32>
    %c0_74 = arith.constant 0 : index
    %c0_75 = arith.constant 0 : index
    %c0_76 = arith.constant 0 : index
    %81 = vector.load %arg10[%c0_74, %c0_75, %c0_76] : memref<18x18x128xf32, #tpu.memory_space<vmem>>, vector<16x16x128xf32>
    %82 = vector.shape_cast %81 : vector<16x16x128xf32> to vector<256x128xf32>
    %83 = arith.truncf %82 : vector<256x128xf32> to vector<256x128xbf16>
    %c0_77 = arith.constant 0 : index
    %c0_78 = arith.constant 0 : index
    %c0_79 = arith.constant 0 : index
    %84 = vector.load %arg3[%c0_77, %c0_78, %c0_79] : memref<9x128x128xbf16, #tpu.memory_space<vmem>>, vector<1x128x128xbf16>
    %85 = vector.shape_cast %84 : vector<1x128x128xbf16> to vector<128x128xbf16>
    %cst_80 = arith.constant dense<0.000000e+00> : vector<256x128xf32>
    %86 = tpu.matmul %83, %85, %cst_80 {dimension_numbers = #tpu.dot_dimension_numbers<[1], [0], [0], [1], [0, 0, 1, 1], [], []>} : vector<256x128xbf16>, vector<128x128xbf16>, vector<256x128xf32> -> vector<256x128xf32>
    %87 = arith.addf %80, %86 : vector<256x128xf32>
    %c0_81 = arith.constant 0 : index
    %c1_82 = arith.constant 1 : index
    %c0_83 = arith.constant 0 : index
    %88 = vector.load %arg10[%c0_81, %c1_82, %c0_83] : memref<18x18x128xf32, #tpu.memory_space<vmem>>, vector<16x16x128xf32>
    %89 = vector.shape_cast %88 : vector<16x16x128xf32> to vector<256x128xf32>
    %90 = arith.truncf %89 : vector<256x128xf32> to vector<256x128xbf16>
    %c1_84 = arith.constant 1 : index
    %c0_85 = arith.constant 0 : index
    %c0_86 = arith.constant 0 : index
    %91 = vector.load %arg3[%c1_84, %c0_85, %c0_86] : memref<9x128x128xbf16, #tpu.memory_space<vmem>>, vector<1x128x128xbf16>
    %92 = vector.shape_cast %91 : vector<1x128x128xbf16> to vector<128x128xbf16>
    %cst_87 = arith.constant dense<0.000000e+00> : vector<256x128xf32>
    %93 = tpu.matmul %90, %92, %cst_87 {dimension_numbers = #tpu.dot_dimension_numbers<[1], [0], [0], [1], [0, 0, 1, 1], [], []>} : vector<256x128xbf16>, vector<128x128xbf16>, vector<256x128xf32> -> vector<256x128xf32>
    %94 = arith.addf %87, %93 : vector<256x128xf32>
    %c0_88 = arith.constant 0 : index
    %c2_89 = arith.constant 2 : index
    %c0_90 = arith.constant 0 : index
    %95 = vector.load %arg10[%c0_88, %c2_89, %c0_90] : memref<18x18x128xf32, #tpu.memory_space<vmem>>, vector<16x16x128xf32>
    %96 = vector.shape_cast %95 : vector<16x16x128xf32> to vector<256x128xf32>
    %97 = arith.truncf %96 : vector<256x128xf32> to vector<256x128xbf16>
    %c2_91 = arith.constant 2 : index
    %c0_92 = arith.constant 0 : index
    %c0_93 = arith.constant 0 : index
    %98 = vector.load %arg3[%c2_91, %c0_92, %c0_93] : memref<9x128x128xbf16, #tpu.memory_space<vmem>>, vector<1x128x128xbf16>
    %99 = vector.shape_cast %98 : vector<1x128x128xbf16> to vector<128x128xbf16>
    %cst_94 = arith.constant dense<0.000000e+00> : vector<256x128xf32>
    %100 = tpu.matmul %97, %99, %cst_94 {dimension_numbers = #tpu.dot_dimension_numbers<[1], [0], [0], [1], [0, 0, 1, 1], [], []>} : vector<256x128xbf16>, vector<128x128xbf16>, vector<256x128xf32> -> vector<256x128xf32>
    %101 = arith.addf %94, %100 : vector<256x128xf32>
    %c1_95 = arith.constant 1 : index
    %c0_96 = arith.constant 0 : index
    %c0_97 = arith.constant 0 : index
    %102 = vector.load %arg10[%c1_95, %c0_96, %c0_97] : memref<18x18x128xf32, #tpu.memory_space<vmem>>, vector<16x16x128xf32>
    %103 = vector.shape_cast %102 : vector<16x16x128xf32> to vector<256x128xf32>
    %104 = arith.truncf %103 : vector<256x128xf32> to vector<256x128xbf16>
    %c3_98 = arith.constant 3 : index
    %c0_99 = arith.constant 0 : index
    %c0_100 = arith.constant 0 : index
    %105 = vector.load %arg3[%c3_98, %c0_99, %c0_100] : memref<9x128x128xbf16, #tpu.memory_space<vmem>>, vector<1x128x128xbf16>
    %106 = vector.shape_cast %105 : vector<1x128x128xbf16> to vector<128x128xbf16>
    %cst_101 = arith.constant dense<0.000000e+00> : vector<256x128xf32>
    %107 = tpu.matmul %104, %106, %cst_101 {dimension_numbers = #tpu.dot_dimension_numbers<[1], [0], [0], [1], [0, 0, 1, 1], [], []>} : vector<256x128xbf16>, vector<128x128xbf16>, vector<256x128xf32> -> vector<256x128xf32>
    %108 = arith.addf %101, %107 : vector<256x128xf32>
    %c1_102 = arith.constant 1 : index
    %c1_103 = arith.constant 1 : index
    %c0_104 = arith.constant 0 : index
    %109 = vector.load %arg10[%c1_102, %c1_103, %c0_104] : memref<18x18x128xf32, #tpu.memory_space<vmem>>, vector<16x16x128xf32>
    %110 = vector.shape_cast %109 : vector<16x16x128xf32> to vector<256x128xf32>
    %111 = arith.truncf %110 : vector<256x128xf32> to vector<256x128xbf16>
    %c4_105 = arith.constant 4 : index
    %c0_106 = arith.constant 0 : index
    %c0_107 = arith.constant 0 : index
    %112 = vector.load %arg3[%c4_105, %c0_106, %c0_107] : memref<9x128x128xbf16, #tpu.memory_space<vmem>>, vector<1x128x128xbf16>
    %113 = vector.shape_cast %112 : vector<1x128x128xbf16> to vector<128x128xbf16>
    %cst_108 = arith.constant dense<0.000000e+00> : vector<256x128xf32>
    %114 = tpu.matmul %111, %113, %cst_108 {dimension_numbers = #tpu.dot_dimension_numbers<[1], [0], [0], [1], [0, 0, 1, 1], [], []>} : vector<256x128xbf16>, vector<128x128xbf16>, vector<256x128xf32> -> vector<256x128xf32>
    %115 = arith.addf %108, %114 : vector<256x128xf32>
    %c1_109 = arith.constant 1 : index
    %c2_110 = arith.constant 2 : index
    %c0_111 = arith.constant 0 : index
    %116 = vector.load %arg10[%c1_109, %c2_110, %c0_111] : memref<18x18x128xf32, #tpu.memory_space<vmem>>, vector<16x16x128xf32>
    %117 = vector.shape_cast %116 : vector<16x16x128xf32> to vector<256x128xf32>
    %118 = arith.truncf %117 : vector<256x128xf32> to vector<256x128xbf16>
    %c5_112 = arith.constant 5 : index
    %c0_113 = arith.constant 0 : index
    %c0_114 = arith.constant 0 : index
    %119 = vector.load %arg3[%c5_112, %c0_113, %c0_114] : memref<9x128x128xbf16, #tpu.memory_space<vmem>>, vector<1x128x128xbf16>
    %120 = vector.shape_cast %119 : vector<1x128x128xbf16> to vector<128x128xbf16>
    %cst_115 = arith.constant dense<0.000000e+00> : vector<256x128xf32>
    %121 = tpu.matmul %118, %120, %cst_115 {dimension_numbers = #tpu.dot_dimension_numbers<[1], [0], [0], [1], [0, 0, 1, 1], [], []>} : vector<256x128xbf16>, vector<128x128xbf16>, vector<256x128xf32> -> vector<256x128xf32>
    %122 = arith.addf %115, %121 : vector<256x128xf32>
    %c2_116 = arith.constant 2 : index
    %c0_117 = arith.constant 0 : index
    %c0_118 = arith.constant 0 : index
    %123 = vector.load %arg10[%c2_116, %c0_117, %c0_118] : memref<18x18x128xf32, #tpu.memory_space<vmem>>, vector<16x16x128xf32>
    %124 = vector.shape_cast %123 : vector<16x16x128xf32> to vector<256x128xf32>
    %125 = arith.truncf %124 : vector<256x128xf32> to vector<256x128xbf16>
    %c6_119 = arith.constant 6 : index
    %c0_120 = arith.constant 0 : index
    %c0_121 = arith.constant 0 : index
    %126 = vector.load %arg3[%c6_119, %c0_120, %c0_121] : memref<9x128x128xbf16, #tpu.memory_space<vmem>>, vector<1x128x128xbf16>
    %127 = vector.shape_cast %126 : vector<1x128x128xbf16> to vector<128x128xbf16>
    %cst_122 = arith.constant dense<0.000000e+00> : vector<256x128xf32>
    %128 = tpu.matmul %125, %127, %cst_122 {dimension_numbers = #tpu.dot_dimension_numbers<[1], [0], [0], [1], [0, 0, 1, 1], [], []>} : vector<256x128xbf16>, vector<128x128xbf16>, vector<256x128xf32> -> vector<256x128xf32>
    %129 = arith.addf %122, %128 : vector<256x128xf32>
    %c2_123 = arith.constant 2 : index
    %c1_124 = arith.constant 1 : index
    %c0_125 = arith.constant 0 : index
    %130 = vector.load %arg10[%c2_123, %c1_124, %c0_125] : memref<18x18x128xf32, #tpu.memory_space<vmem>>, vector<16x16x128xf32>
    %131 = vector.shape_cast %130 : vector<16x16x128xf32> to vector<256x128xf32>
    %132 = arith.truncf %131 : vector<256x128xf32> to vector<256x128xbf16>
    %c7_126 = arith.constant 7 : index
    %c0_127 = arith.constant 0 : index
    %c0_128 = arith.constant 0 : index
    %133 = vector.load %arg3[%c7_126, %c0_127, %c0_128] : memref<9x128x128xbf16, #tpu.memory_space<vmem>>, vector<1x128x128xbf16>
    %134 = vector.shape_cast %133 : vector<1x128x128xbf16> to vector<128x128xbf16>
    %cst_129 = arith.constant dense<0.000000e+00> : vector<256x128xf32>
    %135 = tpu.matmul %132, %134, %cst_129 {dimension_numbers = #tpu.dot_dimension_numbers<[1], [0], [0], [1], [0, 0, 1, 1], [], []>} : vector<256x128xbf16>, vector<128x128xbf16>, vector<256x128xf32> -> vector<256x128xf32>
    %136 = arith.addf %129, %135 : vector<256x128xf32>
    %c2_130 = arith.constant 2 : index
    %c2_131 = arith.constant 2 : index
    %c0_132 = arith.constant 0 : index
    %137 = vector.load %arg10[%c2_130, %c2_131, %c0_132] : memref<18x18x128xf32, #tpu.memory_space<vmem>>, vector<16x16x128xf32>
    %138 = vector.shape_cast %137 : vector<16x16x128xf32> to vector<256x128xf32>
    %139 = arith.truncf %138 : vector<256x128xf32> to vector<256x128xbf16>
    %c8_133 = arith.constant 8 : index
    %c0_134 = arith.constant 0 : index
    %c0_135 = arith.constant 0 : index
    %140 = vector.load %arg3[%c8_133, %c0_134, %c0_135] : memref<9x128x128xbf16, #tpu.memory_space<vmem>>, vector<1x128x128xbf16>
    %141 = vector.shape_cast %140 : vector<1x128x128xbf16> to vector<128x128xbf16>
    %cst_136 = arith.constant dense<0.000000e+00> : vector<256x128xf32>
    %142 = tpu.matmul %139, %141, %cst_136 {dimension_numbers = #tpu.dot_dimension_numbers<[1], [0], [0], [1], [0, 0, 1, 1], [], []>} : vector<256x128xbf16>, vector<128x128xbf16>, vector<256x128xf32> -> vector<256x128xf32>
    %143 = arith.addf %136, %142 : vector<256x128xf32>
    %c0_137 = arith.constant 0 : index
    %c0_138 = arith.constant 0 : index
    %144 = vector.load %arg6[%c0_137, %c0_138] : memref<2x128xf32, #tpu.memory_space<vmem>>, vector<1x128xf32>
    %145 = vector.broadcast %144 : vector<1x128xf32> to vector<256x128xf32>
    %146 = arith.mulf %143, %145 : vector<256x128xf32>
    %c1_139 = arith.constant 1 : index
    %c0_140 = arith.constant 0 : index
    %147 = vector.load %arg6[%c1_139, %c0_140] : memref<2x128xf32, #tpu.memory_space<vmem>>, vector<1x128xf32>
    %148 = vector.broadcast %147 : vector<1x128xf32> to vector<256x128xf32>
    %149 = arith.addf %146, %148 : vector<256x128xf32>
    %cst_141 = arith.constant 0.000000e+00 : f32
    %150 = vector.broadcast %cst_141 : f32 to vector<256x128xf32>
    %151 = arith.maximumf %149, %150 : vector<256x128xf32>
    %cst_142 = arith.constant 0.000000e+00 : f32
    %152 = vector.broadcast %cst_142 : f32 to vector<18x18x128xf32>
    %c0_143 = arith.constant 0 : index
    %c0_144 = arith.constant 0 : index
    %c0_145 = arith.constant 0 : index
    %153 = vector.load %arg11[%c0_143, %c0_144, %c0_145] : memref<18x18x128xf32, #tpu.memory_space<vmem>>, vector<18x18x128xf32>
    tpu.vector_store %arg11[%c0_143, %c0_144, %c0_145], %152 {strides = array<i32>} : memref<18x18x128xf32, #tpu.memory_space<vmem>>, vector<18x18x128xf32>,
    %154 = vector.shape_cast %151 : vector<256x128xf32> to vector<16x16x128xf32>
    %c1_146 = arith.constant 1 : index
    %c1_147 = arith.constant 1 : index
    %c0_148 = arith.constant 0 : index
    %155 = vector.load %arg11[%c1_146, %c1_147, %c0_148] : memref<18x18x128xf32, #tpu.memory_space<vmem>>, vector<16x16x128xf32>
    tpu.vector_store %arg11[%c1_146, %c1_147, %c0_148], %154 {strides = array<i32>} : memref<18x18x128xf32, #tpu.memory_space<vmem>>, vector<16x16x128xf32>,
    %cst_149 = arith.constant 0.000000e+00 : f32
    %156 = vector.broadcast %cst_149 : f32 to vector<256x128xf32>
    %c0_150 = arith.constant 0 : index
    %c0_151 = arith.constant 0 : index
    %c0_152 = arith.constant 0 : index
    %157 = vector.load %arg11[%c0_150, %c0_151, %c0_152] : memref<18x18x128xf32, #tpu.memory_space<vmem>>, vector<16x16x128xf32>
    %158 = vector.shape_cast %157 : vector<16x16x128xf32> to vector<256x128xf32>
    %159 = arith.truncf %158 : vector<256x128xf32> to vector<256x128xbf16>
    %c0_153 = arith.constant 0 : index
    %c0_154 = arith.constant 0 : index
    %c0_155 = arith.constant 0 : index
    %160 = vector.load %arg4[%c0_153, %c0_154, %c0_155] : memref<9x128x128xbf16, #tpu.memory_space<vmem>>, vector<1x128x128xbf16>
    %161 = vector.shape_cast %160 : vector<1x128x128xbf16> to vector<128x128xbf16>
    %cst_156 = arith.constant dense<0.000000e+00> : vector<256x128xf32>
    %162 = tpu.matmul %159, %161, %cst_156 {dimension_numbers = #tpu.dot_dimension_numbers<[1], [0], [0], [1], [0, 0, 1, 1], [], []>} : vector<256x128xbf16>, vector<128x128xbf16>, vector<256x128xf32> -> vector<256x128xf32>
    %163 = arith.addf %156, %162 : vector<256x128xf32>
    %c0_157 = arith.constant 0 : index
    %c1_158 = arith.constant 1 : index
    %c0_159 = arith.constant 0 : index
    %164 = vector.load %arg11[%c0_157, %c1_158, %c0_159] : memref<18x18x128xf32, #tpu.memory_space<vmem>>, vector<16x16x128xf32>
    %165 = vector.shape_cast %164 : vector<16x16x128xf32> to vector<256x128xf32>
    %166 = arith.truncf %165 : vector<256x128xf32> to vector<256x128xbf16>
    %c1_160 = arith.constant 1 : index
    %c0_161 = arith.constant 0 : index
    %c0_162 = arith.constant 0 : index
    %167 = vector.load %arg4[%c1_160, %c0_161, %c0_162] : memref<9x128x128xbf16, #tpu.memory_space<vmem>>, vector<1x128x128xbf16>
    %168 = vector.shape_cast %167 : vector<1x128x128xbf16> to vector<128x128xbf16>
    %cst_163 = arith.constant dense<0.000000e+00> : vector<256x128xf32>
    %169 = tpu.matmul %166, %168, %cst_163 {dimension_numbers = #tpu.dot_dimension_numbers<[1], [0], [0], [1], [0, 0, 1, 1], [], []>} : vector<256x128xbf16>, vector<128x128xbf16>, vector<256x128xf32> -> vector<256x128xf32>
    %170 = arith.addf %163, %169 : vector<256x128xf32>
    %c0_164 = arith.constant 0 : index
    %c2_165 = arith.constant 2 : index
    %c0_166 = arith.constant 0 : index
    %171 = vector.load %arg11[%c0_164, %c2_165, %c0_166] : memref<18x18x128xf32, #tpu.memory_space<vmem>>, vector<16x16x128xf32>
    %172 = vector.shape_cast %171 : vector<16x16x128xf32> to vector<256x128xf32>
    %173 = arith.truncf %172 : vector<256x128xf32> to vector<256x128xbf16>
    %c2_167 = arith.constant 2 : index
    %c0_168 = arith.constant 0 : index
    %c0_169 = arith.constant 0 : index
    %174 = vector.load %arg4[%c2_167, %c0_168, %c0_169] : memref<9x128x128xbf16, #tpu.memory_space<vmem>>, vector<1x128x128xbf16>
    %175 = vector.shape_cast %174 : vector<1x128x128xbf16> to vector<128x128xbf16>
    %cst_170 = arith.constant dense<0.000000e+00> : vector<256x128xf32>
    %176 = tpu.matmul %173, %175, %cst_170 {dimension_numbers = #tpu.dot_dimension_numbers<[1], [0], [0], [1], [0, 0, 1, 1], [], []>} : vector<256x128xbf16>, vector<128x128xbf16>, vector<256x128xf32> -> vector<256x128xf32>
    %177 = arith.addf %170, %176 : vector<256x128xf32>
    %c1_171 = arith.constant 1 : index
    %c0_172 = arith.constant 0 : index
    %c0_173 = arith.constant 0 : index
    %178 = vector.load %arg11[%c1_171, %c0_172, %c0_173] : memref<18x18x128xf32, #tpu.memory_space<vmem>>, vector<16x16x128xf32>
    %179 = vector.shape_cast %178 : vector<16x16x128xf32> to vector<256x128xf32>
    %180 = arith.truncf %179 : vector<256x128xf32> to vector<256x128xbf16>
    %c3_174 = arith.constant 3 : index
    %c0_175 = arith.constant 0 : index
    %c0_176 = arith.constant 0 : index
    %181 = vector.load %arg4[%c3_174, %c0_175, %c0_176] : memref<9x128x128xbf16, #tpu.memory_space<vmem>>, vector<1x128x128xbf16>
    %182 = vector.shape_cast %181 : vector<1x128x128xbf16> to vector<128x128xbf16>
    %cst_177 = arith.constant dense<0.000000e+00> : vector<256x128xf32>
    %183 = tpu.matmul %180, %182, %cst_177 {dimension_numbers = #tpu.dot_dimension_numbers<[1], [0], [0], [1], [0, 0, 1, 1], [], []>} : vector<256x128xbf16>, vector<128x128xbf16>, vector<256x128xf32> -> vector<256x128xf32>
    %184 = arith.addf %177, %183 : vector<256x128xf32>
    %c1_178 = arith.constant 1 : index
    %c1_179 = arith.constant 1 : index
    %c0_180 = arith.constant 0 : index
    %185 = vector.load %arg11[%c1_178, %c1_179, %c0_180] : memref<18x18x128xf32, #tpu.memory_space<vmem>>, vector<16x16x128xf32>
    %186 = vector.shape_cast %185 : vector<16x16x128xf32> to vector<256x128xf32>
    %187 = arith.truncf %186 : vector<256x128xf32> to vector<256x128xbf16>
    %c4_181 = arith.constant 4 : index
    %c0_182 = arith.constant 0 : index
    %c0_183 = arith.constant 0 : index
    %188 = vector.load %arg4[%c4_181, %c0_182, %c0_183] : memref<9x128x128xbf16, #tpu.memory_space<vmem>>, vector<1x128x128xbf16>
    %189 = vector.shape_cast %188 : vector<1x128x128xbf16> to vector<128x128xbf16>
    %cst_184 = arith.constant dense<0.000000e+00> : vector<256x128xf32>
    %190 = tpu.matmul %187, %189, %cst_184 {dimension_numbers = #tpu.dot_dimension_numbers<[1], [0], [0], [1], [0, 0, 1, 1], [], []>} : vector<256x128xbf16>, vector<128x128xbf16>, vector<256x128xf32> -> vector<256x128xf32>
    %191 = arith.addf %184, %190 : vector<256x128xf32>
    %c1_185 = arith.constant 1 : index
    %c2_186 = arith.constant 2 : index
    %c0_187 = arith.constant 0 : index
    %192 = vector.load %arg11[%c1_185, %c2_186, %c0_187] : memref<18x18x128xf32, #tpu.memory_space<vmem>>, vector<16x16x128xf32>
    %193 = vector.shape_cast %192 : vector<16x16x128xf32> to vector<256x128xf32>
    %194 = arith.truncf %193 : vector<256x128xf32> to vector<256x128xbf16>
    %c5_188 = arith.constant 5 : index
    %c0_189 = arith.constant 0 : index
    %c0_190 = arith.constant 0 : index
    %195 = vector.load %arg4[%c5_188, %c0_189, %c0_190] : memref<9x128x128xbf16, #tpu.memory_space<vmem>>, vector<1x128x128xbf16>
    %196 = vector.shape_cast %195 : vector<1x128x128xbf16> to vector<128x128xbf16>
    %cst_191 = arith.constant dense<0.000000e+00> : vector<256x128xf32>
    %197 = tpu.matmul %194, %196, %cst_191 {dimension_numbers = #tpu.dot_dimension_numbers<[1], [0], [0], [1], [0, 0, 1, 1], [], []>} : vector<256x128xbf16>, vector<128x128xbf16>, vector<256x128xf32> -> vector<256x128xf32>
    %198 = arith.addf %191, %197 : vector<256x128xf32>
    %c2_192 = arith.constant 2 : index
    %c0_193 = arith.constant 0 : index
    %c0_194 = arith.constant 0 : index
    %199 = vector.load %arg11[%c2_192, %c0_193, %c0_194] : memref<18x18x128xf32, #tpu.memory_space<vmem>>, vector<16x16x128xf32>
    %200 = vector.shape_cast %199 : vector<16x16x128xf32> to vector<256x128xf32>
    %201 = arith.truncf %200 : vector<256x128xf32> to vector<256x128xbf16>
    %c6_195 = arith.constant 6 : index
    %c0_196 = arith.constant 0 : index
    %c0_197 = arith.constant 0 : index
    %202 = vector.load %arg4[%c6_195, %c0_196, %c0_197] : memref<9x128x128xbf16, #tpu.memory_space<vmem>>, vector<1x128x128xbf16>
    %203 = vector.shape_cast %202 : vector<1x128x128xbf16> to vector<128x128xbf16>
    %cst_198 = arith.constant dense<0.000000e+00> : vector<256x128xf32>
    %204 = tpu.matmul %201, %203, %cst_198 {dimension_numbers = #tpu.dot_dimension_numbers<[1], [0], [0], [1], [0, 0, 1, 1], [], []>} : vector<256x128xbf16>, vector<128x128xbf16>, vector<256x128xf32> -> vector<256x128xf32>
    %205 = arith.addf %198, %204 : vector<256x128xf32>
    %c2_199 = arith.constant 2 : index
    %c1_200 = arith.constant 1 : index
    %c0_201 = arith.constant 0 : index
    %206 = vector.load %arg11[%c2_199, %c1_200, %c0_201] : memref<18x18x128xf32, #tpu.memory_space<vmem>>, vector<16x16x128xf32>
    %207 = vector.shape_cast %206 : vector<16x16x128xf32> to vector<256x128xf32>
    %208 = arith.truncf %207 : vector<256x128xf32> to vector<256x128xbf16>
    %c7_202 = arith.constant 7 : index
    %c0_203 = arith.constant 0 : index
    %c0_204 = arith.constant 0 : index
    %209 = vector.load %arg4[%c7_202, %c0_203, %c0_204] : memref<9x128x128xbf16, #tpu.memory_space<vmem>>, vector<1x128x128xbf16>
    %210 = vector.shape_cast %209 : vector<1x128x128xbf16> to vector<128x128xbf16>
    %cst_205 = arith.constant dense<0.000000e+00> : vector<256x128xf32>
    %211 = tpu.matmul %208, %210, %cst_205 {dimension_numbers = #tpu.dot_dimension_numbers<[1], [0], [0], [1], [0, 0, 1, 1], [], []>} : vector<256x128xbf16>, vector<128x128xbf16>, vector<256x128xf32> -> vector<256x128xf32>
    %212 = arith.addf %205, %211 : vector<256x128xf32>
    %c2_206 = arith.constant 2 : index
    %c2_207 = arith.constant 2 : index
    %c0_208 = arith.constant 0 : index
    %213 = vector.load %arg11[%c2_206, %c2_207, %c0_208] : memref<18x18x128xf32, #tpu.memory_space<vmem>>, vector<16x16x128xf32>
    %214 = vector.shape_cast %213 : vector<16x16x128xf32> to vector<256x128xf32>
    %215 = arith.truncf %214 : vector<256x128xf32> to vector<256x128xbf16>
    %c8_209 = arith.constant 8 : index
    %c0_210 = arith.constant 0 : index
    %c0_211 = arith.constant 0 : index
    %216 = vector.load %arg4[%c8_209, %c0_210, %c0_211] : memref<9x128x128xbf16, #tpu.memory_space<vmem>>, vector<1x128x128xbf16>
    %217 = vector.shape_cast %216 : vector<1x128x128xbf16> to vector<128x128xbf16>
    %cst_212 = arith.constant dense<0.000000e+00> : vector<256x128xf32>
    %218 = tpu.matmul %215, %217, %cst_212 {dimension_numbers = #tpu.dot_dimension_numbers<[1], [0], [0], [1], [0, 0, 1, 1], [], []>} : vector<256x128xbf16>, vector<128x128xbf16>, vector<256x128xf32> -> vector<256x128xf32>
    %219 = arith.addf %212, %218 : vector<256x128xf32>
    %c0_213 = arith.constant 0 : index
    %c0_214 = arith.constant 0 : index
    %220 = vector.load %arg7[%c0_213, %c0_214] : memref<2x128xf32, #tpu.memory_space<vmem>>, vector<1x128xf32>
    %221 = vector.broadcast %220 : vector<1x128xf32> to vector<256x128xf32>
    %222 = arith.mulf %219, %221 : vector<256x128xf32>
    %c1_215 = arith.constant 1 : index
    %c0_216 = arith.constant 0 : index
    %223 = vector.load %arg7[%c1_215, %c0_216] : memref<2x128xf32, #tpu.memory_space<vmem>>, vector<1x128xf32>
    %224 = vector.broadcast %223 : vector<1x128xf32> to vector<256x128xf32>
    %225 = arith.addf %222, %224 : vector<256x128xf32>
    %c1_217 = arith.constant 1 : index
    %c1_218 = arith.constant 1 : index
    %c0_219 = arith.constant 0 : index
    %226 = vector.load %arg9[%c1_217, %c1_218, %c0_219] : memref<18x18x128xf32, #tpu.memory_space<vmem>>, vector<16x16x128xf32>
    %227 = vector.shape_cast %226 : vector<16x16x128xf32> to vector<256x128xf32>
    %228 = arith.addf %225, %227 : vector<256x128xf32>
    %cst_220 = arith.constant 0.000000e+00 : f32
    %229 = vector.broadcast %cst_220 : f32 to vector<256x128xf32>
    %230 = arith.maximumf %228, %229 : vector<256x128xf32>
    %231 = vector.shape_cast %230 : vector<256x128xf32> to vector<1x16x16x128xf32>
    %c0_221 = arith.constant 0 : index
    %c0_222 = arith.constant 0 : index
    %c0_223 = arith.constant 0 : index
    %c0_224 = arith.constant 0 : index
    %232 = vector.load %arg8[%c0_221, %c0_222, %c0_223, %c0_224] : memref<1x16x16x128xf32, #tpu.memory_space<vmem>>, vector<1x16x16x128xf32>
    tpu.vector_store %arg8[%c0_221, %c0_222, %c0_223, %c0_224], %231 {strides = array<i32>} : memref<1x16x16x128xf32, #tpu.memory_space<vmem>>, vector<1x16x16x128xf32>,
    return
  }
  func.func @transform_0(%arg0: i32) -> (i32, i32, i32, i32) {
    %c0_i32 = arith.constant 0 : i32
    %c0_i32_0 = arith.constant 0 : i32
    %c0_i32_1 = arith.constant 0 : i32
    %c0_i32_2 = arith.constant 0 : i32
    return %arg0, %c0_i32, %c0_i32_0, %c0_i32_1 : i32, i32, i32, i32
  }
  func.func @transform_1(%arg0: i32) -> (i32, i32, i32) {
    %c0_i32 = arith.constant 0 : i32
    %c0_i32_0 = arith.constant 0 : i32
    %c0_i32_1 = arith.constant 0 : i32
    %c0_i32_2 = arith.constant 0 : i32
    return %c0_i32, %c0_i32_0, %c0_i32_1 : i32, i32, i32
  }
  func.func @transform_2(%arg0: i32) -> (i32, i32, i32) {
    %c0_i32 = arith.constant 0 : i32
    %c0_i32_0 = arith.constant 0 : i32
    %c0_i32_1 = arith.constant 0 : i32
    %c0_i32_2 = arith.constant 0 : i32
    return %c0_i32, %c0_i32_0, %c0_i32_1 : i32, i32, i32
  }
  func.func @transform_3(%arg0: i32) -> (i32, i32, i32) {
    %c0_i32 = arith.constant 0 : i32
    %c0_i32_0 = arith.constant 0 : i32
    %c0_i32_1 = arith.constant 0 : i32
    %c0_i32_2 = arith.constant 0 : i32
    return %c0_i32, %c0_i32_0, %c0_i32_1 : i32, i32, i32
  }
  func.func @transform_4(%arg0: i32) -> (i32, i32) {
    %c0_i32 = arith.constant 0 : i32
    %c0_i32_0 = arith.constant 0 : i32
    %c0_i32_1 = arith.constant 0 : i32
    return %c0_i32, %c0_i32_0 : i32, i32
  }
  func.func @transform_5(%arg0: i32) -> (i32, i32) {
    %c0_i32 = arith.constant 0 : i32
    %c0_i32_0 = arith.constant 0 : i32
    %c0_i32_1 = arith.constant 0 : i32
    return %c0_i32, %c0_i32_0 : i32, i32
  }
  func.func @transform_6(%arg0: i32) -> (i32, i32) {
    %c0_i32 = arith.constant 0 : i32
    %c0_i32_0 = arith.constant 0 : i32
    %c0_i32_1 = arith.constant 0 : i32
    return %c0_i32, %c0_i32_0 : i32, i32
  }
  func.func @transform_7(%arg0: i32) -> (i32, i32, i32, i32) {
    %c0_i32 = arith.constant 0 : i32
    %c0_i32_0 = arith.constant 0 : i32
    %c0_i32_1 = arith.constant 0 : i32
    %c0_i32_2 = arith.constant 0 : i32
    return %arg0, %c0_i32, %c0_i32_0, %c0_i32_1 : i32, i32, i32, i32
  }
}

</mosaic_0001>

<bundles_post_ra>
// kernel: bottlenet_forward.1
= control target key start
LH: loop header
LB: loop body
LE: loop exit
PB: predicated region body
PF: predicated region fallthrough
CT: control target
= control target key end

     0   :  { %12 = vsyncpa [#allocation6], 0  ;;  %s8770_s24 = smov 0   ;;  %s11621_s0 = inlined_call_operand.vmem [shape: bf16[2,18,18,128], index: 0, kind: input, shape index: {}]   ;;  %s11622_s1 = inlined_call_operand.vmem [shape: bf16[9,128,128], index: 1, kind: input, shape index: {}]   ;;  %s11623_s2 = inlined_call_operand.vmem [shape: bf16[9,128,128], index: 2, kind: input, shape index: {}]   ;;  %s11624_s3 = inlined_call_operand.hbm [shape: bf16[9,128,128], index: 3, kind: input, shape index: {}]   ;;  %s11625_s4 = inlined_call_operand.vmem [shape: f32[2,128], index: 4, kind: input, shape index: {}]   ;;  %s11626_s5 = inlined_call_operand.vmem [shape: f32[2,128], index: 5, kind: input, shape index: {}]   ;;  %s11627_s6 = inlined_call_operand.vmem [shape: f32[2,128], index: 6, kind: input, shape index: {}]   ;;  %s11628_s7 = inlined_call_operand.vmem [shape: f32[2,16,16,128], index: 7, kind: output, shape index: {}]  }
   0x1 LB: > { %s218_s27 = sshll.u32 %s11624_s3, 4  ;;  %s7222_s28 = sadd.s32 4294967295, %s8723_s24   ;;  %s8723_s24 = sphi %s8770_s24, %s18_s24   ;;  %s219_s27 = int_to_ptr.hbm [resolvable:$true] %s218_s27 }
   0x2   : > { %p7224_p0 = scmp.ge.s32.totalorder %s8723_s24, 1  ;;  %p201_p1 = scmp.lt.s32.totalorder %s8723_s24, 3 }
   0x3   : > { %p8648_p2 = scmp.eq.s32.totalorder %s7222_s28, 0  ;;  %s8725_s29 = smov [#allocation5]  }
   0x4   : > { %p202_p3 = pnand %p7224_p0, %p201_p1  ;;  %s220_s30 = sshll.u32 %s8725_s29, 4  ;;  %s221_s30 = int_to_ptr.vmem [resolvable:$true] %s220_s30 }
   0x5   : > { %s8726_s8 = smov 64   ;;  %s8727_s9 = smov 4  }
   0x6   : > { %p8644_p4 = pneg %p202_p3  ;;  %253 = sbr.rel (%p202_p3) target bundleno = 2180 (0x884), region = 48 }
   0x8   : > { %p8645_p5 = pnand %p8648_p2, %p8644_p4 }
   0xa   : > { %8647 = dma.hbm_to_vmem [thread:$0]  (!%p8645_p5), %s219_s27, 9216, %s221_s30, [#allocation6], %s8726_s8, %s8726_s8, %s8727_s9  }
   0xb   : > { %8718 = dma.done.wait (%p8648_p2), [#allocation6], 9216  }
   0xc   : > { %8720 = vsyncadd (%p8648_p2), [#allocation6], 4294958080  ;;  %p286_p6 = scmp.lt.s32.totalorder %s7222_s28, 1  ;;  %v8370_v0 = vld [vmem:[%s11622_s1 + $0x78] sm:$0xff]  ;;  %v8369_v3 = vld [vmem:[%s11622_s1 + $0x70] sm:$0xff] }
   0xd   : > { %v8789_v1 = vld [vmem:[%s11622_s1 + $0x38] sm:$0xff]  ;;  %635 = vmatpush.bf16.msra.mxu0 %v8370_v0  ;;  %8615 = vmatpush.bf16.msra.mxu3 %v8370_v0  ;;  %v8805_v4 = vld [vmem:[%s11622_s1 + $0x30] sm:$0xff]  ;;  %v8368_v6 = vld [vmem:[%s11622_s1 + $0x68] sm:$0xff] }
   0xe   : > { %s11729_s28 = smov (!%p286_p6, %s7222_s28), 1  ;;  %v8794_v2 = vld [vmem:[%s11622_s1 + $0xb8] sm:$0xff]  ;;  %772 = vmatpush.bf16.msra.mxu1 %v8789_v1  ;;  %v8810_v5 = vld [vmem:[%s11622_s1 + $0xb0] sm:$0xff]  ;;  %v8825_v7 = vld [vmem:[%s11622_s1 + $0x28] sm:$0xff] }
   0xf   : > { %s8639_s16 = smul.u32 216, %s11729_s28  ;;  %974 = vmatpush.bf16.msra.mxu2 %v8794_v2  ;;  %v8830_v8 = vld [vmem:[%s11622_s1 + $0xa8] sm:$0xff]  ;;  %v8367_v16 = vld [vmem:[%s11622_s1 + $0x60] sm:$0xff]  ;;  %v8366_v26 = vld [vmem:[%s11622_s1 + $0x58] sm:$0xff]  ;;  %s8354_s15 = sshll.u32 %s11729_s28, 8 }
  0x10   : > { %v8842_v17 = vld [vmem:[%s11622_s1 + $0x20] sm:$0xff]  ;;  %v8868_v28 = vld [vmem:[%s11622_s1 + $0x18] sm:$0xff]  ;;  %v8365_v34 = vld [vmem:[%s11622_s1 + $0x50] sm:$0xff]  ;;  %s11418_s18 = scalar_lea.vmem %s11628_s7, %s8354_s15 }
  0x11   : > { %s8815_s26 = scalar_lea.vmem %s11621_s0, %s8639_s16  ;;  %636 = vmatpush.bf16.msra.mxu0 %v8369_v3  ;;  %8616 = vmatpush.bf16.msra.mxu3 %v8369_v3  ;;  %v8852_v20 = vld [vmem:[%s11622_s1 + $0xa0] sm:$0xff]  ;;  %v8873_v29 = vld [vmem:[%s11622_s1 + $0x98] sm:$0xff]  ;;  %v8888_v38 = vld [vmem:[%s11622_s1 + $0x10] sm:$0xff] }
  0x12   : > { %773 = vmatpush.bf16.msra.mxu1 %v8805_v4  ;;  %v8572_v9 = vld [vmem:[%s8815_s26] sm:$0xff]   ;;  %v298_v10 = vld [vmem:[%s8815_s26 + $0x8] sm:$0x1]  ;;  %v8612_v11 = vld [vmem:[%s8815_s26 + $0x90] sm:$0xff]  }
  0x13   : > { %975 = vmatpush.bf16.msra.mxu2 %v8810_v5  ;;  %v8573_v12 = vunpack.c.l.bf16 %v8572_v9  ;;  %v8574_v13 = vunpack.c.h.bf16 %v8572_v9  ;;  %v352_v14 = vunpack.c.l.bf16 %v298_v10  ;;  %v334_v15 = vld [vmem:[%s8815_s26 + $0x98] sm:$0x1]  ;;  %v8597_v18 = vunpack.c.l.bf16 %v8612_v11  ;;  %v8845_v19 = vld [vmem:[%s8815_s26 + $0xc] sm:$0xff]   ;;  %v301_v22 = vld [vmem:[%s8815_s26 + $0x14] sm:$0x1] }
  0x14   : > { %v8598_v21 = vunpack.c.h.bf16 %v8612_v11  ;;  %v388_v23 = vunpack.c.l.bf16 %v334_v15  ;;  %v8856_v24 = vld [vmem:[%s8815_s26 + $0x9c] sm:$0xff]   ;;  %v353_v25 = vunpack.c.l.bf16 %v8845_v19  ;;  %v354_v27 = vunpack.c.h.bf16 %v8845_v19  ;;  %v337_v31 = vld [vmem:[%s8815_s26 + $0xa4] sm:$0x1]  ;;  %v8893_v39 = vld [vmem:[%s11622_s1 + $0x90] sm:$0xff] }
  0x15   : > { %637 = vmatpush.bf16.msra.mxu0 %v8368_v6  ;;  %8617 = vmatpush.bf16.msra.mxu3 %v8368_v6  ;;  %404 = vst [vmem:[#allocation2] sm:$0xff] %v8573_v12  ;;  %v355_v30 = vunpack.c.l.bf16 %v301_v22  ;;  %v389_v32 = vunpack.c.l.bf16 %v8856_v24  ;;  %v390_v33 = vunpack.c.h.bf16 %v8856_v24  ;;  %v391_v35 = vunpack.c.l.bf16 %v337_v31  ;;  %v8607_v36 = vld [vmem:[%s8815_s26 + $0x18] sm:$0xff]   ;;  %v304_v37 = vld [vmem:[%s8815_s26 + $0x20] sm:$0x1]  ;;  %v8613_v43 = vld [vmem:[%s8815_s26 + $0xa8] sm:$0xff]  }
  0x16   : > { %774 = vmatpush.bf16.msra.mxu1 %v8825_v7  ;;  %405 = vst [vmem:[#allocation2 + $0x8] sm:$0xff] %v8574_v13  ;;  %v8577_v40 = vunpack.c.l.bf16 %v8607_v36  ;;  %v8578_v41 = vunpack.c.h.bf16 %v8607_v36  ;;  %v358_v42 = vunpack.c.l.bf16 %v304_v37  ;;  %v340_v44 = vld [vmem:[%s8815_s26 + $0xb0] sm:$0x1]  ;;  %v8364_v45 = vld [vmem:[%s11622_s1 + $0x48] sm:$0xff]  ;;  %v8601_v46 = vunpack.c.l.bf16 %v8613_v43  ;;  %v8363_v51 = vld [vmem:[%s11622_s1 + $0x40] sm:$0xff] }
  0x17   : > { %976 = vmatpush.bf16.msra.mxu2 %v8830_v8  ;;  %406 = vst [vmem:[#allocation2 + $0x10] sm:$0x3] %v352_v14  ;;  %v8905_v47 = vld [vmem:[%s11622_s1 + $0x8] sm:$0xff]  ;;  %v8602_v49 = vunpack.c.h.bf16 %v8613_v43  ;;  %v394_v50 = vunpack.c.l.bf16 %v340_v44  ;;  %v8918_v52 = vld [vmem:[%s11622_s1] sm:$0xff]  ;;  %v8394_v60 = vld [vmem:[%s11622_s1 + $0x138] sm:$0xff] }
  0x18   : > { %440 = vst [vmem:[#allocation2 + $0x120] sm:$0xff] %v8597_v18  ;;  %v8910_v48 = vld [vmem:[%s11622_s1 + $0x88] sm:$0xff]  ;;  %v8925_v57 = vld [vmem:[%s11622_s1 + $0x80] sm:$0xff]  ;;  %v8393_v3 = vld [vmem:[%s11622_s1 + $0x130] sm:$0xff] }
  0x19   : > { %638 = vmatpush.bf16.msra.mxu0 %v8367_v16  ;;  %8618 = vmatpush.bf16.msra.mxu3 %v8367_v16  ;;  %441 = vst [vmem:[#allocation2 + $0x128] sm:$0xff] %v8598_v21  ;;  %v8662_v63 = vld [vmem:[%s8815_s26] sm:$0xff]  ;;  %v307_v9 = vld [vmem:[%s8815_s26 + $0x2c] sm:$0x1]  ;;  %v8945_v12 = vld [vmem:[%s8815_s26 + $0xb4] sm:$0xff]  }
  0x1a   : > { %775 = vmatpush.bf16.msra.mxu1 %v8842_v17  ;;  %442 = vst [vmem:[#allocation2 + $0x130] sm:$0x3] %v388_v23  ;;  %v8938_v6 = vld [vmem:[%s8815_s26 + $0x24] sm:$0xff]   ;;  %v343_v13 = vld [vmem:[%s8815_s26 + $0xbc] sm:$0x1]  ;;  %v395_v14 = vunpack.c.l.bf16 %v8945_v12  ;;  %v396_v15 = vunpack.c.h.bf16 %v8945_v12  ;;  %v8608_v31 = vld [vmem:[%s8815_s26 + $0x30] sm:$0xff]  }
  0x1b   : > { %977 = vmatpush.bf16.msra.mxu2 %v8852_v20  ;;  %407 = vst [vmem:[#allocation2 + $0x18] sm:$0xff] %v353_v25  ;;  %v359_v10 = vunpack.c.l.bf16 %v8938_v6  ;;  %v360_v11 = vunpack.c.h.bf16 %v8938_v6  ;;  %v397_v16 = vunpack.c.l.bf16 %v343_v13  ;;  %v8972_v43 = vld [vmem:[%s8815_s26 + $0x18] sm:$0xff] }
  0x1c   : > { %408 = vst [vmem:[#allocation2 + $0x20] sm:$0xff] %v354_v27 }
  0x1d   : > { %639 = vmatpush.bf16.msra.mxu0 %v8366_v26  ;;  %8619 = vmatpush.bf16.msra.mxu3 %v8366_v26  ;;  %409 = vst [vmem:[#allocation2 + $0x28] sm:$0x3] %v355_v30  ;;  %v522_v53 = vld [vmem:[#allocation2 + $0x1] sm:$0xff] }
  0x1e   : > { %776 = vmatpush.bf16.msra.mxu1 %v8868_v28  ;;  %443 = vst [vmem:[#allocation2 + $0x138] sm:$0xff] %v389_v32  ;;  %v523_v54 = vld [vmem:[#allocation2 + $0x9] sm:$0xff]  ;;  %v8581_v32 = vunpack.c.l.bf16 %v8608_v31 }
  0x1f   : > { %978 = vmatpush.bf16.msra.mxu2 %v8873_v29  ;;  %444 = vst [vmem:[#allocation2 + $0x140] sm:$0xff] %v390_v33  ;;  %v861_v58 = vld [vmem:[#allocation2 + $0x2] sm:$0xff]  ;;  %v862_v59 = vld [vmem:[#allocation2 + $0xa] sm:$0xff]  ;;  %v554_v61 = vpack.c.bf16 %v523_v54, %v522_v53  ;;  %v8582_v33 = vunpack.c.h.bf16 %v8608_v31 }
  0x20   : > { %445 = vst [vmem:[#allocation2 + $0x148] sm:$0x3] %v391_v35  ;;  %v546_v55 = vld [vmem:[#allocation2 + $0x121] sm:$0xff]  ;;  %v893_v0 = vpack.c.bf16 %v862_v59, %v861_v58 }
  0x21   : > { %640 = vmatpush.bf16.msra.mxu0 %v8365_v34  ;;  %8620 = vmatpush.bf16.msra.mxu3 %v8365_v34  ;;  %410 = vst [vmem:[#allocation2 + $0x30] sm:$0xff] %v8577_v40  ;;  %v547_v56 = vld [vmem:[#allocation2 + $0x129] sm:$0xff] }
  0x22   : > { %777 = vmatpush.bf16.msra.mxu1 %v8888_v38  ;;  %411 = vst [vmem:[#allocation2 + $0x38] sm:$0xff] %v8578_v41  ;;  %v566_v62 = vpack.c.bf16 %v547_v56, %v546_v55  ;;  %v8609_v59 = vld [vmem:[%s8815_s26 + $0x48] sm:$0xff]  }
  0x23   : > { %979 = vmatpush.bf16.msra.mxu2 %v8893_v39  ;;  %412 = vst [vmem:[#allocation2 + $0x40] sm:$0x3] %v358_v42  ;;  %v524_v18 = vld [vmem:[#allocation2 + $0x19] sm:$0xff] }
  0x24   : > { %446 = vst [vmem:[#allocation2 + $0x150] sm:$0xff] %v8601_v46  ;;  %v525_v21 = vld [vmem:[#allocation2 + $0x21] sm:$0xff] }
  0x25   : > { %641 = vmatpush.bf16.msra.mxu0 %v8364_v45  ;;  %8621 = vmatpush.bf16.msra.mxu3 %v8364_v45  ;;  %447 = vst [vmem:[#allocation2 + $0x158] sm:$0xff] %v8602_v49  ;;  %v863_v23 = vld [vmem:[#allocation2 + $0x1a] sm:$0xff]  ;;  %v864_v25 = vld [vmem:[#allocation2 + $0x22] sm:$0xff]  ;;  %v8952_v26 = vpack.c.bf16 %v525_v21, %v524_v18 }
  0x26   : > { %778 = vmatpush.bf16.msra.mxu1 %v8905_v47  ;;  %448 = vst [vmem:[#allocation2 + $0x160] sm:$0x3] %v394_v50  ;;  %v8954_v30 = vpack.c.bf16 %v864_v25, %v863_v23  ;;  %v8980_v45 = vld [vmem:[%s8815_s26 + $0x3c] sm:$0xff]   ;;  %v313_v46 = vld [vmem:[%s8815_s26 + $0x44] sm:$0x1] }
  0x27   : > { %980 = vmatpush.bf16.msra.mxu2 %v8910_v48  ;;  %413 = vst [vmem:[#allocation2 + $0x48] sm:$0xff] %v359_v10  ;;  %v549_v22 = vld [vmem:[#allocation2 + $0x141] sm:$0xff]  ;;  %v367_v49 = vunpack.c.l.bf16 %v313_v46  ;;  %v8665_v10 = vld [vmem:[%s8815_s26 + $0x90] sm:$0xff] }
  0x28   : > { %414 = vst [vmem:[#allocation2 + $0x50] sm:$0xff] %v360_v11  ;;  %v9008_v11 = vld [vmem:[%s8815_s26 + $0x30] sm:$0xff]  ;;  %v8610_v25 = vld [vmem:[%s8815_s26 + $0x60] sm:$0xff]  }
  0x29   : > { %642 = vmatpush.bf16.msra.mxu0 %v8363_v51  ;;  %8622 = vmatpush.bf16.msra.mxu3 %v8363_v51  ;;  %449 = vst [vmem:[#allocation2 + $0x168] sm:$0xff] %v395_v14  ;;  %v865_v40 = vld [vmem:[#allocation2 + $0x32] sm:$0xff]  ;;  %v8590_v31 = vunpack.c.h.bf16 %v8610_v25 }
  0x2a   : > { %779 = vmatpush.bf16.msra.mxu1 %v8918_v52  ;;  %450 = vst [vmem:[#allocation2 + $0x170] sm:$0xff] %v396_v15  ;;  %v527_v35 = vld [vmem:[#allocation2 + $0x39] sm:$0xff]  ;;  %v325_v46 = vld [vmem:[%s8815_s26 + $0x74] sm:$0x1] }
  0x2b   : > { %981 = vmatpush.bf16.msra.mxu2 %v8925_v57  ;;  %451 = vst [vmem:[#allocation2 + $0x178] sm:$0x3] %v397_v16  ;;  %v866_v41 = vld [vmem:[#allocation2 + $0x3a] sm:$0xff] }
  0x2c   : > { %643 = vmatmul.bf16.vlgmr.msra.gmra.mxu0 %v554_v61  ;;  %703 = vmatmul.bf16.vlgmr.msra.gmra.mxu3 %v566_v62  ;;  %416 = vst [vmem:[#allocation2 + $0x60] sm:$0xff] %v8581_v32  ;;  %v550_v36 = vld [vmem:[#allocation2 + $0x151] sm:$0xff]  ;;  %v8974_v44 = vpack.c.bf16 %v866_v41, %v865_v40  ;;  %v8586_v61 = vunpack.c.h.bf16 %v8609_v59 }
  0x2d   : > { %8623 = vmatpush.bf16.msrb.mxu3 %v8789_v1  ;;  %1443 = vmatpush.bf16.msrb.mxu0 %v8394_v60  ;;  %v361_v1 = vunpack.c.l.bf16 %v307_v9  ;;  %417 = vst [vmem:[#allocation2 + $0x68] sm:$0xff] %v8582_v33  ;;  %v551_v37 = vld [vmem:[#allocation2 + $0x159] sm:$0xff]  ;;  %v8585_v60 = vunpack.c.l.bf16 %v8609_v59  ;;  %v8389_v41 = vld [vmem:[%s11622_s1 + $0x110] sm:$0xff] }
  0x2e   : > { %780 = vmatmul.bf16.vlgmr.msra.gmra.mxu1 %v8662_v63  ;;  %982 = vmatmul.bf16.vlgmr.msra.gmra.mxu2 %v893_v0  ;;  %421 = vst [vmem:[#allocation2 + $0x88] sm:$0x3] %v367_v49  ;;  %v8386_v40 = vld [vmem:[%s11622_s1 + $0xf8] sm:$0xff]  ;;  %v379_v49 = vunpack.c.l.bf16 %v325_v46 }
  0x2f   : > { %415 = vst [vmem:[#allocation2 + $0x58] sm:$0x3] %v361_v1  ;;  %v528_v50 = vld [vmem:[#allocation2 + $0x49] sm:$0xff]  ;;  %v9019_v1 = vld [vmem:[%s8815_s26 + $0x54] sm:$0xff]  }
  0x30   : > { %v867_v54 = vld [vmem:[#allocation2 + $0x4a] sm:$0xff]  ;;  %422 = vst [vmem:[#allocation2 + $0x90] sm:$0xff] %v8585_v60  ;;  %v371_v13 = vunpack.c.l.bf16 %v9019_v1  ;;  %v372_v14 = vunpack.c.h.bf16 %v9019_v1  ;;  %v8402_v59 = vld [vmem:[%s11622_s1 + $0x178] sm:$0xff]  ;;  %v328_v60 = vld [vmem:[%s8815_s26 + $0x80] sm:$0x1] }
  0x31   : > { %8624 = vmatpush.bf16.msrb.mxu3 %v8805_v4  ;;  %1444 = vmatpush.bf16.msrb.mxu0 %v8393_v3  ;;  %v548_v4 = vld [vmem:[#allocation2 + $0x139] sm:$0xff]  ;;  %423 = vst [vmem:[#allocation2 + $0x98] sm:$0xff] %v8586_v61 }
  0x32   : > { %v567_v27 = vpack.c.bf16 %v549_v22, %v548_v4  ;;  %v553_v53 = vld [vmem:[#allocation2 + $0x171] sm:$0xff]  ;;  %425 = vst [vmem:[#allocation2 + $0xa8] sm:$0xff] %v371_v13  ;;  %1677 = vmatpush.bf16.msrb.mxu1 %v8402_v59 }
  0x33   : > { %426 = vst [vmem:[#allocation2 + $0xb0] sm:$0xff] %v372_v14  ;;  %v8410_v46 = vld [vmem:[%s11622_s1 + $0x1b8] sm:$0xff]  ;;  %v8409_v59 = vld [vmem:[%s11622_s1 + $0x1b0] sm:$0xff] }
  0x34   : > { %v869_v0 = vld [vmem:[#allocation2 + $0x62] sm:$0xff]  ;;  %429 = vst [vmem:[#allocation2 + $0xc8] sm:$0xff] %v8590_v31  ;;  %1912 = vmatpush.bf16.msrb.mxu2 %v8410_v46 }
  0x35   : > { %8625 = vmatpush.bf16.msrb.mxu3 %v8825_v7  ;;  %v8392_v7 = vld [vmem:[%s11622_s1 + $0x128] sm:$0xff]  ;;  %433 = vst [vmem:[#allocation2 + $0xe8] sm:$0x3] %v379_v49  ;;  %v8401_v49 = vld [vmem:[%s11622_s1 + $0x170] sm:$0xff] }
  0x36   : > { %1445 = vmatpush.bf16.msrb.mxu0 %v8392_v7  ;;  %v529_v51 = vld [vmem:[#allocation2 + $0x51] sm:$0xff]  ;;  %v8589_v7 = vunpack.c.l.bf16 %v8610_v25  ;;  %1678 = vmatpush.bf16.msrb.mxu1 %v8401_v49 }
  0x37   : > { %v868_v55 = vld [vmem:[#allocation2 + $0x52] sm:$0xff] }
  0x38   : > { %v8990_v58 = vpack.c.bf16 %v868_v55, %v867_v54  ;;  %428 = vst [vmem:[#allocation2 + $0xc0] sm:$0xff] %v8589_v7  ;;  %v534_v32 = vld [vmem:[#allocation2 + $0x91] sm:$0xff]  ;;  %1913 = vmatpush.bf16.msrb.mxu2 %v8409_v59 }
  0x39   : > { %8626 = vmatpush.bf16.msrb.mxu3 %v8842_v17  ;;  %v310_v17 = vld [vmem:[%s8815_s26 + $0x38] sm:$0x1] }
  0x3a   : > { %v364_v34 = vunpack.c.l.bf16 %v310_v17 }
  0x3c   : > { %648 = vmatmul.bf16.gmra.mxu0 %v8952_v26  ;;  %708 = vmatmul.bf16.gmra.mxu3 %v567_v27  ;;  %418 = vst [vmem:[#allocation2 + $0x70] sm:$0x3] %v364_v34  ;;  %v322_v27 = vld [vmem:[%s8815_s26 + $0x68] sm:$0x1]  ;;  %v873_v34 = vld [vmem:[#allocation2 + $0x92] sm:$0xff] }
  0x3d   : > { %8627 = vmatpush.bf16.msrb.mxu3 %v8868_v28  ;;  %v526_v28 = vld [vmem:[#allocation2 + $0x31] sm:$0xff]  ;;  %v376_v17 = vunpack.c.l.bf16 %v322_v27 }
  0x3e   : > { %785 = vmatmul.bf16.gmra.mxu1 %v8845_v19  ;;  %987 = vmatmul.bf16.gmra.mxu2 %v8954_v30  ;;  %v8968_v42 = vpack.c.bf16 %v527_v35, %v526_v28  ;;  %v8667_v35 = vld [vmem:[%s8815_s26 + $0xa8] sm:$0xff]  ;;  %v8382_v27 = vld [vmem:[%s11622_s1 + $0xd8] sm:$0xff] }
  0x3f   : > { %430 = vst [vmem:[#allocation2 + $0xd0] sm:$0x3] %v376_v17  ;;  %v9098_v17 = vld [vmem:[%s8815_s26 + $0x84] sm:$0xff]  }
  0x41   : > { %8628 = vmatpush.bf16.msrb.mxu3 %v8888_v38  ;;  %v568_v38 = vpack.c.bf16 %v551_v37, %v550_v36  ;;  %v9038_v36 = vld [vmem:[%s8815_s26 + $0x48] sm:$0xff] }
  0x43   : > { %v531_v63 = vld [vmem:[#allocation2 + $0x69] sm:$0xff] }
  0x44   : > { %v870_v3 = vld [vmem:[#allocation2 + $0x6a] sm:$0xff] }
  0x45   : > { %8629 = vmatpush.bf16.msrb.mxu3 %v8905_v47  ;;  %v365_v47 = vunpack.c.l.bf16 %v8980_v45 }
  0x46   : > { %v878_v13 = vld [vmem:[#allocation2 + $0xca] sm:$0xff] }
  0x47   : > { %419 = vst [vmem:[#allocation2 + $0x78] sm:$0xff] %v365_v47 }
  0x49   : > { %8630 = vmatpush.bf16.msrb.mxu3 %v8918_v52  ;;  %v552_v52 = vld [vmem:[#allocation2 + $0x169] sm:$0xff] }
  0x4a   : > { %v569_v56 = vpack.c.bf16 %v553_v53, %v552_v52  ;;  %v875_v53 = vld [vmem:[#allocation2 + $0xaa] sm:$0xff] }
  0x4c   : > { %653 = vmatmul.bf16.gmra.mxu0 %v8968_v42  ;;  %713 = vmatmul.bf16.gmra.mxu3 %v568_v38  ;;  %v9052_v38 = vld [vmem:[%s8815_s26 + $0x6c] sm:$0xff]  }
  0x4d   : > { %8631 = vmatpush.bf16.msra.mxu3 %v8794_v2  ;;  %v366_v2 = vunpack.c.h.bf16 %v8980_v45  ;;  %v377_v47 = vunpack.c.l.bf16 %v9052_v38 }
  0x4e   : > { %790 = vmatmul.bf16.gmra.mxu1 %v8972_v43  ;;  %992 = vmatmul.bf16.gmra.mxu2 %v8974_v44 }
  0x4f   : > { %420 = vst [vmem:[#allocation2 + $0x80] sm:$0xff] %v366_v2  ;;  %v378_v2 = vunpack.c.h.bf16 %v9052_v38 }
  0x50   : > { %431 = vst [vmem:[#allocation2 + $0xd8] sm:$0xff] %v377_v47 }
  0x51   : > { %8632 = vmatpush.bf16.msra.mxu3 %v8810_v5  ;;  %v8988_v5 = vpack.c.bf16 %v529_v51, %v528_v50  ;;  %v8385_v50 = vld [vmem:[%s11622_s1 + $0xf0] sm:$0xff]  ;;  %432 = vst [vmem:[#allocation2 + $0xe0] sm:$0xff] %v378_v2 }
  0x52   : > { %v536_v51 = vld [vmem:[#allocation2 + $0xa9] sm:$0xff] }
  0x53   : > { %v8381_v2 = vld [vmem:[%s11622_s1 + $0xd0] sm:$0xff] }
  0x55   : > { %8633 = vmatpush.bf16.msra.mxu3 %v8830_v8  ;;  %v8391_v8 = vld [vmem:[%s11622_s1 + $0x120] sm:$0xff] }
  0x56   : > { %1446 = vmatpush.bf16.msrb.mxu0 %v8391_v8  ;;  %v532_v16 = vld [vmem:[#allocation2 + $0x79] sm:$0xff]  ;;  %v533_v18 = vld [vmem:[#allocation2 + $0x81] sm:$0xff] }
  0x57   : > { %v871_v21 = vld [vmem:[#allocation2 + $0x7a] sm:$0xff]  ;;  %v872_v4 = vld [vmem:[#allocation2 + $0x82] sm:$0xff]  ;;  %v9024_v22 = vpack.c.bf16 %v533_v18, %v532_v16 }
  0x58   : > { %v9026_v23 = vpack.c.bf16 %v872_v4, %v871_v21  ;;  %v8384_v8 = vld [vmem:[%s11622_s1 + $0xe8] sm:$0xff]  ;;  %v9085_v18 = vld [vmem:[%s8815_s26 + $0x60] sm:$0xff] }
  0x59   : > { %8634 = vmatpush.bf16.msra.mxu3 %v8852_v20  ;;  %v316_v20 = vld [vmem:[%s8815_s26 + $0x50] sm:$0x1] }
  0x5a   : > { %v370_v62 = vunpack.c.l.bf16 %v316_v20  ;;  %v8611_v20 = vld [vmem:[%s8815_s26 + $0x78] sm:$0xff]  }
  0x5b   : > { %v8593_v61 = vunpack.c.l.bf16 %v8611_v20 }
  0x5c   : > { %658 = vmatmul.bf16.gmra.mxu0 %v8988_v5  ;;  %718 = vmatmul.bf16.gmra.mxu3 %v569_v56  ;;  %424 = vst [vmem:[#allocation2 + $0xa0] sm:$0x3] %v370_v62  ;;  %v8594_v62 = vunpack.c.h.bf16 %v8611_v20 }
  0x5d   : > { %8635 = vmatpush.bf16.msra.mxu3 %v8873_v29  ;;  %v530_v29 = vld [vmem:[#allocation2 + $0x61] sm:$0xff]  ;;  %434 = vst [vmem:[#allocation2 + $0xf0] sm:$0xff] %v8593_v61 }
  0x5e   : > { %795 = vmatmul.bf16.gmra.mxu1 %v8938_v6  ;;  %997 = vmatmul.bf16.gmra.mxu2 %v8990_v58  ;;  %v9004_v9 = vpack.c.bf16 %v531_v63, %v530_v29  ;;  %v382_v29 = vunpack.c.l.bf16 %v328_v60  ;;  %v8388_v63 = vld [vmem:[%s11622_s1 + $0x108] sm:$0xff]  ;;  %435 = vst [vmem:[#allocation2 + $0xf8] sm:$0xff] %v8594_v62 }
  0x60   : > { %436 = vst [vmem:[#allocation2 + $0x100] sm:$0x3] %v382_v29 }
  0x61   : > { %8636 = vmatpush.bf16.msra.mxu3 %v8893_v39  ;;  %v9010_v39 = vpack.c.bf16 %v870_v3, %v869_v0  ;;  %v885_v0 = vld [vmem:[#allocation2 + $0x122] sm:$0xff] }
  0x62   : > { %v538_v3 = vld [vmem:[#allocation2 + $0xc1] sm:$0xff] }
  0x63   : > { %v535_v33 = vld [vmem:[#allocation2 + $0x99] sm:$0xff] }
  0x64   : > { %v9034_v28 = vpack.c.bf16 %v535_v33, %v534_v32  ;;  %v331_v32 = vld [vmem:[%s8815_s26 + $0x8c] sm:$0x1] }
  0x65   : > { %8637 = vmatpush.bf16.msra.mxu3 %v8910_v48  ;;  %v8390_v48 = vld [vmem:[%s11622_s1 + $0x118] sm:$0xff] }
  0x66   : > { %1447 = vmatpush.bf16.msrb.mxu0 %v8390_v48  ;;  %v886_v48 = vld [vmem:[#allocation2 + $0x12a] sm:$0xff] }
  0x67   : > { %v542_v46 = vld [vmem:[#allocation2 + $0xf1] sm:$0xff]  ;;  %v882_v49 = vld [vmem:[#allocation2 + $0xfa] sm:$0xff] }
  0x69   : > { %8638 = vmatpush.bf16.msra.mxu3 %v8925_v57  ;;  %v319_v57 = vld [vmem:[%s8815_s26 + $0x5c] sm:$0x1] }
  0x6a   : > { %v373_v15 = vunpack.c.l.bf16 %v319_v57  ;;  %1448 = vmatpush.bf16.msrb.mxu0 %v8389_v41  ;;  %v877_v57 = vld [vmem:[#allocation2 + $0xc2] sm:$0xff] }
  0x6b   : > { %v9087_v21 = vpack.c.bf16 %v878_v13, %v877_v57  ;;  %v8387_v57 = vld [vmem:[%s11622_s1 + $0x100] sm:$0xff]  ;;  %v8400_v13 = vld [vmem:[%s11622_s1 + $0x168] sm:$0xff] }
  0x6c   : > { %663 = vmatmul.bf16.gmra.mxu0 %v9004_v9  ;;  %840 = vmatmul.bf16.vlgmr.msrb.gmra.mxu3 %v8665_v10  ;;  %427 = vst [vmem:[#allocation2 + $0xb8] sm:$0x3] %v373_v15  ;;  %v539_v10 = vld [vmem:[#allocation2 + $0xc9] sm:$0xff]  ;;  %v905_v15 = vpack.c.bf16 %v886_v48, %v885_v0 }
  0x6d   : > { %1209 = vmatpush.bf16.msrb.mxu3 %v8386_v40  ;;  %v9082_v14 = vpack.c.bf16 %v539_v10, %v538_v3  ;;  %v385_v40 = vunpack.c.l.bf16 %v331_v32  ;;  %v8408_v3 = vld [vmem:[%s11622_s1 + $0x1a8] sm:$0xff]  ;;  %1679 = vmatpush.bf16.msrb.mxu1 %v8400_v13  ;;  %v8399_v32 = vld [vmem:[%s11622_s1 + $0x160] sm:$0xff] }
  0x6e   : > { %800 = vmatmul.bf16.gmra.mxu1 %v9008_v11  ;;  %1002 = vmatmul.bf16.gmra.mxu2 %v9010_v39  ;;  %v8380_v48 = vld [vmem:[%s11622_s1 + $0xc8] sm:$0xff] }
  0x6f   : > { %1449 = vmatpush.bf16.msrb.mxu0 %v8388_v63  ;;  %439 = vst [vmem:[#allocation2 + $0x118] sm:$0x3] %v385_v40  ;;  %1914 = vmatpush.bf16.msrb.mxu2 %v8408_v3  ;;  %v889_v40 = vld [vmem:[#allocation2 + $0x152] sm:$0xff]  ;;  %v8396_v13 = vld [vmem:[%s11622_s1 + $0x148] sm:$0xff] }
  0x70   : > { %v8397_v3 = vld [vmem:[%s11622_s1 + $0x150] sm:$0xff] }
  0x71   : > { %1210 = vmatpush.bf16.msrb.mxu3 %v8385_v50  ;;  %v887_v50 = vld [vmem:[#allocation2 + $0x13a] sm:$0xff]  ;;  %1680 = vmatpush.bf16.msrb.mxu1 %v8399_v32 }
  0x73   : > { %v537_v52 = vld [vmem:[#allocation2 + $0xb1] sm:$0xff]  ;;  %1450 = vmatpush.bf16.msrb.mxu0 %v8387_v57 }
  0x74   : > { %v876_v54 = vld [vmem:[#allocation2 + $0xb2] sm:$0xff]  ;;  %v9060_v55 = vpack.c.bf16 %v537_v52, %v536_v51  ;;  %v541_v52 = vld [vmem:[#allocation2 + $0xe1] sm:$0xff] }
  0x75   : > { %v9062_v56 = vpack.c.bf16 %v876_v54, %v875_v53  ;;  %1211 = vmatpush.bf16.msrb.mxu3 %v8384_v8  ;;  %v540_v51 = vld [vmem:[#allocation2 + $0xd9] sm:$0xff]  ;;  %v888_v53 = vld [vmem:[#allocation2 + $0x142] sm:$0xff] }
  0x76   : > { %v879_v54 = vld [vmem:[#allocation2 + $0xda] sm:$0xff]  ;;  %v880_v8 = vld [vmem:[#allocation2 + $0xe2] sm:$0xff]  ;;  %v9119_v61 = vpack.c.bf16 %v541_v52, %v540_v51  ;;  %v906_v62 = vpack.c.bf16 %v888_v53, %v887_v50  ;;  %v8405_v51 = vld [vmem:[%s11622_s1 + $0x190] sm:$0xff] }
  0x77   : > { %v9123_v63 = vpack.c.bf16 %v880_v8, %v879_v54  ;;  %v8398_v50 = vld [vmem:[%s11622_s1 + $0x158] sm:$0xff] }
  0x78   : > { %1681 = vmatpush.bf16.msrb.mxu1 %v8398_v50  ;;  %v8418_v57 = vld [vmem:[%s11622_s1 + $0x1f8] sm:$0xff] }
  0x7c   : > { %668 = vmatmul.bf16.gmra.mxu0 %v9024_v22  ;;  %845 = vmatmul.bf16.gmra.mxu3 %v8856_v24  ;;  %v874_v24 = vld [vmem:[#allocation2 + $0x9a] sm:$0xff] }
  0x7d   : > { %v9040_v37 = vpack.c.bf16 %v874_v24, %v873_v34  ;;  %v383_v24 = vunpack.c.l.bf16 %v9098_v17  ;;  %1682 = vmatpush.bf16.msrb.mxu1 %v8397_v3 }
  0x7e   : > { %805 = vmatmul.bf16.gmra.mxu1 %v8980_v45  ;;  %1007 = vmatmul.bf16.gmra.mxu2 %v9026_v23 }
  0x7f   : > { %437 = vst [vmem:[#allocation2 + $0x108] sm:$0xff] %v383_v24 }
  0x81   : > { %1683 = vmatpush.bf16.msrb.mxu1 %v8396_v13 }
  0x8c   : > { %673 = vmatmul.bf16.gmra.mxu0 %v9034_v28  ;;  %850 = vmatmul.bf16.gmra.mxu3 %v8667_v35  ;;  %v384_v35 = vunpack.c.h.bf16 %v9098_v17 }
  0x8e   : > { %810 = vmatmul.bf16.gmra.mxu1 %v9038_v36  ;;  %1012 = vmatmul.bf16.gmra.mxu2 %v9040_v37  ;;  %438 = vst [vmem:[#allocation2 + $0x110] sm:$0xff] %v384_v35  ;;  %v8379_v35 = vld [vmem:[%s11622_s1 + $0xc0] sm:$0xff] }
  0x95   : > { %v884_v50 = vld [vmem:[#allocation2 + $0x112] sm:$0xff] }
  0x9c   : > { %678 = vmatmul.bf16.gmra.mxu0 %v9060_v55  ;;  %855 = vmatmul.bf16.gmra.mxu3 %v8945_v12  ;;  %v8383_v12 = vld [vmem:[%s11622_s1 + $0xe0] sm:$0xff] }
  0x9d   : > { %1212 = vmatpush.bf16.msrb.mxu3 %v8383_v12 }
  0x9e   : > { %815 = vmatmul.bf16.gmra.mxu1 %v9019_v1  ;;  %1017 = vmatmul.bf16.gmra.mxu2 %v9062_v56 }
  0xa1   : > { %1213 = vmatpush.bf16.msrb.mxu3 %v8382_v27 }
  0xa5   : > { %1214 = vmatpush.bf16.msrb.mxu3 %v8381_v2  ;;  %v881_v2 = vld [vmem:[#allocation2 + $0xf2] sm:$0xff] }
  0xa9   : > { %v644_v16 = vpop.f32.mrf.mxu0  ;;  %1215 = vmatpush.bf16.msrb.mxu3 %v8380_v48 }
  0xab   : > { %v781_v4 = vpop.f32.mrf.mxu1 }
  0xac   : > { %v782_v25 = vadd.f32 %v781_v4, %v644_v16  ;;  %683 = vmatmul.bf16.gmra.mxu0 %v9082_v14  ;;  %1042 = vmatmul.bf16.vlgmr.msra.gmra.mxu3 %v905_v15  ;;  %v8407_v15 = vld [vmem:[%s11622_s1 + $0x1a0] sm:$0xff] }
  0xad   : > { %1915 = vmatpush.bf16.msrb.mxu2 %v8407_v15  ;;  %1216 = vmatpush.bf16.msrb.mxu3 %v8379_v35  ;;  %v8403_v15 = vld [vmem:[%s11622_s1 + $0x180] sm:$0xff] }
  0xae   : > { %820 = vmatmul.bf16.gmra.mxu1 %v9085_v18  ;;  %1022 = vmatmul.bf16.gmra.mxu2 %v9087_v21 }
  0xaf   : > { %v9095_v7 = vpop.f32.mrf.mxu3 }
  0xb1   : > { %v983_v31 = vpop.f32.mrf.mxu2  ;;  %v646_v34 = vpop.f32.mrf.mxu0  ;;  %2146 = vmatpush.bf16.msra.mxu3 %v8418_v57 }
  0xb2   : > { %v9101_v33 = vadd.f32 %v983_v31, %v782_v25 }
  0xb3   : > { %v783_v41 = vpop.f32.mrf.mxu1 }
  0xb4   : > { %v784_v47 = vadd.f32 %v783_v41, %v646_v34  ;;  %v8406_v34 = vld [vmem:[%s11622_s1 + $0x198] sm:$0xff] }
  0xb5   : > { %v890_v41 = vld [vmem:[#allocation2 + $0x15a] sm:$0xff]  ;;  %1916 = vmatpush.bf16.msrb.mxu2 %v8406_v34 }
  0xb6   : > { %v907_v8 = vpack.c.bf16 %v890_v41, %v889_v40  ;;  %v8426_v40 = vld [vmem:[%s11622_s1 + $0x238] sm:$0xff]  ;;  %v891_v41 = vld [vmem:[#allocation2 + $0x16a] sm:$0xff] }
  0xb7   : > { %v9117_v20 = vpop.f32.mrf.mxu3  ;;  %2380 = vmatpush.bf16.msra.mxu0 %v8426_v40 }
  0xb9   : > { %v985_v60 = vpop.f32.mrf.mxu2  ;;  %v649_v12 = vpop.f32.mrf.mxu0  ;;  %1917 = vmatpush.bf16.msrb.mxu2 %v8405_v51 }
  0xba   : > { %v9121_v29 = vadd.f32 %v985_v60, %v784_v47  ;;  %v543_v47 = vld [vmem:[#allocation2 + $0xf9] sm:$0xff] }
  0xbb   : > { %v786_v0 = vpop.f32.mrf.mxu1  ;;  %v9164_v54 = vpack.c.bf16 %v543_v47, %v542_v46  ;;  %v544_v46 = vld [vmem:[#allocation2 + $0x109] sm:$0xff]  ;;  %v545_v47 = vld [vmem:[#allocation2 + $0x111] sm:$0xff] }
  0xbc   : > { %v787_v10 = vadd.f32 %v786_v0, %v649_v12  ;;  %688 = vmatmul.bf16.gmra.mxu0 %v9119_v61  ;;  %1047 = vmatmul.bf16.gmra.mxu3 %v906_v62  ;;  %v9169_v62 = vld [vmem:[%s8815_s26 + $0x78] sm:$0xff]  ;;  %v9171_v12 = vpack.c.bf16 %v882_v49, %v881_v2  ;;  %v883_v49 = vld [vmem:[#allocation2 + $0x10a] sm:$0xff] }
  0xbd   : > { %v892_v2 = vld [vmem:[#allocation2 + $0x172] sm:$0xff] }
  0xbe   : > { %825 = vmatmul.bf16.gmra.mxu1 %v9052_v38  ;;  %1027 = vmatmul.bf16.gmra.mxu2 %v9123_v63 }
  0xbf   : > { %v9143_v16 = vpop.f32.mrf.mxu3 }
  0xc1   : > { %v988_v4 = vpop.f32.mrf.mxu2  ;;  %v651_v27 = vpop.f32.mrf.mxu0 }
  0xc2   : > { %v9145_v25 = vadd.f32 %v988_v4, %v787_v10  ;;  %v8404_v10 = vld [vmem:[%s11622_s1 + $0x188] sm:$0xff] }
  0xc3   : > { %v788_v31 = vpop.f32.mrf.mxu1  ;;  %1918 = vmatpush.bf16.msrb.mxu2 %v8404_v10  ;;  %v9207_v10 = vpack.c.bf16 %v884_v50, %v883_v49  ;;  %v8417_v49 = vld [vmem:[%s11622_s1 + $0x1f0] sm:$0xff] }
  0xc4   : > { %v789_v24 = vadd.f32 %v788_v31, %v651_v27  ;;  %2147 = vmatpush.bf16.msra.mxu3 %v8417_v49 }
  0xc7   : > { %v9162_v52 = vpop.f32.mrf.mxu3  ;;  %1919 = vmatpush.bf16.msrb.mxu2 %v8403_v15 }
  0xc9   : > { %v990_v53 = vpop.f32.mrf.mxu2  ;;  %v654_v60 = vpop.f32.mrf.mxu0 }
  0xca   : > { %v9166_v59 = vadd.f32 %v990_v53, %v789_v24  ;;  %v8395_v24 = vld [vmem:[%s11622_s1 + $0x140] sm:$0xff] }
  0xcb   : > { %v791_v0 = vpop.f32.mrf.mxu1  ;;  %1684 = vmatpush.bf16.msrb.mxu1 %v8395_v24 }
  0xcc   : > { %v792_v48 = vadd.f32 %v791_v0, %v654_v60  ;;  %693 = vmatmul.bf16.gmra.mxu0 %v9164_v54  ;;  %1052 = vmatmul.bf16.gmra.mxu3 %v907_v8  ;;  %v9203_v8 = vpack.c.bf16 %v545_v47, %v544_v46  ;;  %v908_v60 = vpack.c.bf16 %v892_v2, %v891_v41 }
  0xce   : > { %830 = vmatmul.bf16.gmra.mxu1 %v9169_v62  ;;  %1032 = vmatmul.bf16.gmra.mxu2 %v9171_v12 }
  0xcf   : > { %v9191_v4 = vpop.f32.mrf.mxu3 }
  0xd1   : > { %v993_v27 = vpop.f32.mrf.mxu2  ;;  %v656_v32 = vpop.f32.mrf.mxu0 }
  0xd2   : > { %v9193_v31 = vadd.f32 %v993_v27, %v792_v48 }
  0xd3   : > { %v793_v34 = vpop.f32.mrf.mxu1 }
  0xd4   : > { %v794_v35 = vadd.f32 %v793_v34, %v656_v32 }
  0xd7   : > { %v9201_v51 = vpop.f32.mrf.mxu3 }
  0xd9   : > { %v995_v53 = vpop.f32.mrf.mxu2  ;;  %v659_v3 = vpop.f32.mrf.mxu0 }
  0xda   : > { %v9205_v0 = vadd.f32 %v995_v53, %v794_v35 }
  0xdb   : > { %v796_v48 = vpop.f32.mrf.mxu1 }
  0xdc   : > { %v797_v57 = vadd.f32 %v796_v48, %v659_v3  ;;  %698 = vmatmul.bf16.gmra.mxu0 %v9203_v8  ;;  %1057 = vmatmul.bf16.gmra.mxu3 %v908_v60 }
  0xde   : > { %835 = vmatmul.bf16.gmra.mxu1 %v9098_v17  ;;  %1037 = vmatmul.bf16.gmra.mxu2 %v9207_v10 }
  0xdf   : > { %v9212_v13 = vpop.f32.mrf.mxu3 }
  0xe1   : > { %v998_v15 = vpop.f32.mrf.mxu2  ;;  %v661_v32 = vpop.f32.mrf.mxu0 }
  0xe2   : > { %v9214_v27 = vadd.f32 %v998_v15, %v797_v57 }
  0xe3   : > { %v798_v34 = vpop.f32.mrf.mxu1 }
  0xe4   : > { %v799_v24 = vadd.f32 %v798_v34, %v661_v32 }
  0xe7   : > { %v9216_v35 = vpop.f32.mrf.mxu3 }
  0xe9   : > { %v1000_v40 = vpop.f32.mrf.mxu2  ;;  %v664_v46 = vpop.f32.mrf.mxu0 }
  0xea   : > { %v9218_v41 = vadd.f32 %v1000_v40, %v799_v24 }
  0xeb   : > { %v801_v47 = vpop.f32.mrf.mxu1 }
  0xec   : > { %v802_v2 = vadd.f32 %v801_v47, %v664_v46  ;;  %1217 = vmatmul.bf16.vlgmr.msrb.gmra.mxu3 %v8845_v19  ;;  %1451 = vmatmul.bf16.vlgmr.msrb.gmra.mxu0 %v8952_v26  ;;  %v8425_v26 = vld [vmem:[%s11622_s1 + $0x230] sm:$0xff] }
  0xed   : > { %2381 = vmatpush.bf16.msra.mxu0 %v8425_v26 }
  0xee   : > { %1920 = vmatmul.bf16.vlgmr.msrb.gmra.mxu2 %v8972_v43  ;;  %1685 = vmatmul.bf16.vlgmr.msrb.gmra.mxu1 %v8954_v30 }
  0xef   : > { %v841_v50 = vpop.f32.mrf.mxu3 }
  0xf0   : > { %v9228_v53 = vadd.f32 %v841_v50, %v9095_v7 }
  0xf1   : > { %v1003_v60 = vpop.f32.mrf.mxu2  ;;  %v666_v48 = vpop.f32.mrf.mxu0 }
  0xf2   : > { %v9230_v3 = vadd.f32 %v1003_v60, %v802_v2 }
  0xf3   : > { %v803_v19 = vpop.f32.mrf.mxu1 }
  0xf4   : > { %v804_v57 = vadd.f32 %v803_v19, %v666_v48 }
  0xf7   : > { %v843_v15 = vpop.f32.mrf.mxu3 }
  0xf8   : > { %v9236_v32 = vadd.f32 %v843_v15, %v9117_v20 }
  0xf9   : > { %v1005_v30 = vpop.f32.mrf.mxu2  ;;  %v669_v7 = vpop.f32.mrf.mxu0 }
  0xfa   : > { %v9238_v34 = vadd.f32 %v1005_v30, %v804_v57 }
  0xfb   : > { %v806_v24 = vpop.f32.mrf.mxu1 }
  0xfc   : > { %v807_v40 = vadd.f32 %v806_v24, %v669_v7  ;;  %1222 = vmatmul.bf16.gmra.mxu3 %v8972_v43  ;;  %1456 = vmatmul.bf16.gmra.mxu0 %v8968_v42 }
  0xfe   : > { %1925 = vmatmul.bf16.gmra.mxu2 %v8938_v6  ;;  %1690 = vmatmul.bf16.gmra.mxu1 %v8974_v44 }
  0xff   : > { %v846_v46 = vpop.f32.mrf.mxu3 }
 0x100   : > { %v9245_v47 = vadd.f32 %v846_v46, %v9143_v16  ;;  %v8416_v16 = vld [vmem:[%s11622_s1 + $0x1e8] sm:$0xff] }
 0x101   : > { %v1008_v20 = vpop.f32.mrf.mxu2  ;;  %v671_v49 = vpop.f32.mrf.mxu0  ;;  %2148 = vmatpush.bf16.msra.mxu3 %v8416_v16 }
 0x102   : > { %v9247_v2 = vadd.f32 %v1008_v20, %v807_v40 }
 0x103   : > { %v808_v50 = vpop.f32.mrf.mxu1 }
 0x104   : > { %v809_v60 = vadd.f32 %v808_v50, %v671_v49 }
 0x107   : > { %v848_v48 = vpop.f32.mrf.mxu3 }
 0x108   : > { %v9250_v19 = vadd.f32 %v848_v48, %v9162_v52 }
 0x109   : > { %v1010_v43 = vpop.f32.mrf.mxu2  ;;  %v674_v57 = vpop.f32.mrf.mxu0 }
 0x10a   : > { %v9252_v42 = vadd.f32 %v1010_v43, %v809_v60 }
 0x10b   : > { %v811_v26 = vpop.f32.mrf.mxu1 }
 0x10c   : > { %v812_v44 = vadd.f32 %v811_v26, %v674_v57  ;;  %1227 = vmatmul.bf16.gmra.mxu3 %v8938_v6  ;;  %1461 = vmatmul.bf16.gmra.mxu0 %v8988_v5  ;;  %v8424_v5 = vld [vmem:[%s11622_s1 + $0x228] sm:$0xff] }
 0x10d   : > { %2382 = vmatpush.bf16.msra.mxu0 %v8424_v5 }
 0x10e   : > { %1930 = vmatmul.bf16.gmra.mxu2 %v9008_v11  ;;  %1695 = vmatmul.bf16.gmra.mxu1 %v8990_v58 }
 0x10f   : > { %v851_v52 = vpop.f32.mrf.mxu3 }
 0x110   : > { %v9262_v15 = vadd.f32 %v851_v52, %v9191_v4 }
 0x111   : > { %v1013_v30 = vpop.f32.mrf.mxu2  ;;  %v676_v24 = vpop.f32.mrf.mxu0 }
 0x112   : > { %v9264_v7 = vadd.f32 %v1013_v30, %v812_v44 }
 0x113   : > { %v813_v6 = vpop.f32.mrf.mxu1 }
 0x114   : > { %v814_v40 = vadd.f32 %v813_v6, %v676_v24 }
 0x117   : > { %v853_v46 = vpop.f32.mrf.mxu3 }
 0x118   : > { %v9270_v20 = vadd.f32 %v853_v46, %v9201_v51 }
 0x119   : > { %v1015_v58 = vpop.f32.mrf.mxu2  ;;  %v679_v4 = vpop.f32.mrf.mxu0 }
 0x11a   : > { %v9272_v49 = vadd.f32 %v1015_v58, %v814_v40 }
 0x11b   : > { %v816_v50 = vpop.f32.mrf.mxu1 }
 0x11c   : > { %v817_v60 = vadd.f32 %v816_v50, %v679_v4  ;;  %1232 = vmatmul.bf16.gmra.mxu3 %v9008_v11  ;;  %1466 = vmatmul.bf16.gmra.mxu0 %v9004_v9 }
 0x11e   : > { %1935 = vmatmul.bf16.gmra.mxu2 %v8980_v45  ;;  %1700 = vmatmul.bf16.gmra.mxu1 %v9010_v39 }
 0x11f   : > { %v856_v48 = vpop.f32.mrf.mxu3 }
 0x120   : > { %v9279_v43 = vadd.f32 %v856_v48, %v9212_v13  ;;  %v8415_v13 = vld [vmem:[%s11622_s1 + $0x1e0] sm:$0xff] }
 0x121   : > { %v1018_v51 = vpop.f32.mrf.mxu2  ;;  %v681_v26 = vpop.f32.mrf.mxu0  ;;  %2149 = vmatpush.bf16.msra.mxu3 %v8415_v13 }
 0x122   : > { %v9281_v57 = vadd.f32 %v1018_v51, %v817_v60 }
 0x123   : > { %v818_v44 = vpop.f32.mrf.mxu1 }
 0x124   : > { %v819_v16 = vadd.f32 %v818_v44, %v681_v26 }
 0x127   : > { %v858_v52 = vpop.f32.mrf.mxu3 }
 0x128   : > { %v9284_v30 = vadd.f32 %v858_v52, %v9216_v35 }
 0x129   : > { %v1020_v11 = vpop.f32.mrf.mxu2  ;;  %v684_v24 = vpop.f32.mrf.mxu0 }
 0x12a   : > { %v9286_v9 = vadd.f32 %v1020_v11, %v819_v16 }
 0x12b   : > { %v821_v6 = vpop.f32.mrf.mxu1 }
 0x12c   : > { %v822_v39 = vadd.f32 %v821_v6, %v684_v24  ;;  %1237 = vmatmul.bf16.gmra.mxu3 %v8980_v45  ;;  %1471 = vmatmul.bf16.gmra.mxu0 %v9024_v22  ;;  %v8423_v22 = vld [vmem:[%s11622_s1 + $0x220] sm:$0xff] }
 0x12d   : > { %2383 = vmatpush.bf16.msra.mxu0 %v8423_v22 }
 0x12e   : > { %1940 = vmatmul.bf16.gmra.mxu2 %v9038_v36  ;;  %1705 = vmatmul.bf16.gmra.mxu1 %v9026_v23 }
 0x12f   : > { %v1043_v35 = vpop.f32.mrf.mxu3 }
 0x130   : > { %v9296_v5 = vadd.f32 %v1043_v35, %v9228_v53 }
 0x131   : > { %v1023_v40 = vpop.f32.mrf.mxu2  ;;  %v686_v58 = vpop.f32.mrf.mxu0 }
 0x132   : > { %v9298_v46 = vadd.f32 %v1023_v40, %v822_v39 }
 0x133   : > { %v823_v45 = vpop.f32.mrf.mxu1 }
 0x134   : > { %v824_v4 = vadd.f32 %v823_v45, %v686_v58 }
 0x137   : > { %v1045_v50 = vpop.f32.mrf.mxu3 }
 0x138   : > { %v9304_v23 = vadd.f32 %v1045_v50, %v9236_v32 }
 0x139   : > { %v1025_v60 = vpop.f32.mrf.mxu2  ;;  %v689_v51 = vpop.f32.mrf.mxu0 }
 0x13a   : > { %v9306_v48 = vadd.f32 %v1025_v60, %v824_v4 }
 0x13b   : > { %v826_v53 = vpop.f32.mrf.mxu1 }
 0x13c   : > { %v827_v26 = vadd.f32 %v826_v53, %v689_v51  ;;  %1242 = vmatmul.bf16.gmra.mxu3 %v9038_v36  ;;  %1476 = vmatmul.bf16.gmra.mxu0 %v9034_v28 }
 0x13e   : > { %1945 = vmatmul.bf16.gmra.mxu2 %v9019_v1  ;;  %1710 = vmatmul.bf16.gmra.mxu1 %v9040_v37 }
 0x13f   : > { %v1048_v44 = vpop.f32.mrf.mxu3 }
 0x140   : > { %v9313_v52 = vadd.f32 %v1048_v44, %v9245_v47  ;;  %v8414_v47 = vld [vmem:[%s11622_s1 + $0x1d8] sm:$0xff] }
 0x141   : > { %v1028_v16 = vpop.f32.mrf.mxu2  ;;  %v691_v11 = vpop.f32.mrf.mxu0  ;;  %2150 = vmatpush.bf16.msra.mxu3 %v8414_v47 }
 0x142   : > { %v9315_v32 = vadd.f32 %v1028_v16, %v827_v26  ;;  %v8442_v16 = vld [vmem:[%s11623_s2 + $0x78] sm:$0xff] }
 0x143   : > { %v828_v24 = vpop.f32.mrf.mxu1  ;;  %2865 = vmatpush.bf16.msra.mxu1 %v8442_v16  ;;  %v8441_v16 = vld [vmem:[%s11623_s2 + $0x70] sm:$0xff] }
 0x144   : > { %v829_v6 = vadd.f32 %v828_v24, %v691_v11 }
 0x147   : > { %v1050_v39 = vpop.f32.mrf.mxu3  ;;  %2866 = vmatpush.bf16.msra.mxu1 %v8441_v16  ;;  %v1586_v16 = vld [vmem:[#allocation2 + $0x122] sm:$0xff] }
 0x148   : > { %v9318_v36 = vadd.f32 %v1050_v39, %v9250_v19 }
 0x149   : > { %v1030_v13 = vpop.f32.mrf.mxu2  ;;  %v694_v35 = vpop.f32.mrf.mxu0 }
 0x14a   : > { %11634 = vst [vmem:[#allocation8_spill] sm:$0xff] %v9318_v36  ;;  %v9320_v28 = vadd.f32 %v1030_v13, %v829_v6 }
 0x14b   : > { %v831_v40 = vpop.f32.mrf.mxu1 }
 0x14c   : > { %v832_v37 = vadd.f32 %v831_v40, %v694_v35  ;;  %1247 = vmatmul.bf16.gmra.mxu3 %v9019_v1  ;;  %1481 = vmatmul.bf16.gmra.mxu0 %v9060_v55  ;;  %v8422_v55 = vld [vmem:[%s11622_s1 + $0x218] sm:$0xff] }
 0x14d   : > { %2384 = vmatpush.bf16.msra.mxu0 %v8422_v55 }
 0x14e   : > { %1950 = vmatmul.bf16.gmra.mxu2 %v9085_v18  ;;  %1715 = vmatmul.bf16.gmra.mxu1 %v9062_v56 }
 0x14f   : > { %v1053_v19 = vpop.f32.mrf.mxu3 }
 0x150   : > { %v9330_v45 = vadd.f32 %v1053_v19, %v9262_v15 }
 0x151   : > { %v1033_v58 = vpop.f32.mrf.mxu2  ;;  %v696_v22 = vpop.f32.mrf.mxu0 }
 0x152   : > { %v9332_v4 = vadd.f32 %v1033_v58, %v832_v37 }
 0x153   : > { %v833_v1 = vpop.f32.mrf.mxu1 }
 0x154   : > { %v834_v50 = vadd.f32 %v833_v1, %v696_v22 }
 0x157   : > { %v1055_v60 = vpop.f32.mrf.mxu3 }
 0x158   : > { %v9338_v56 = vadd.f32 %v1055_v60, %v9270_v20 }
 0x159   : > { %v1035_v51 = vpop.f32.mrf.mxu2  ;;  %v699_v26 = vpop.f32.mrf.mxu0 }
 0x15a   : > { %11635 = vst [vmem:[#allocation9_spill] sm:$0xff] %v9338_v56  ;;  %v9340_v53 = vadd.f32 %v1035_v51, %v834_v50  ;;  %v8450_v56 = vld [vmem:[%s11623_s2 + $0xb8] sm:$0xff] }
 0x15b   : > { %v836_v15 = vpop.f32.mrf.mxu1 }
 0x15c   : > { %v837_v44 = vadd.f32 %v836_v15, %v699_v26  ;;  %1252 = vmatmul.bf16.gmra.mxu3 %v9085_v18  ;;  %1486 = vmatmul.bf16.gmra.mxu0 %v9082_v14 }
 0x15e   : > { %1955 = vmatmul.bf16.gmra.mxu2 %v9052_v38  ;;  %1720 = vmatmul.bf16.gmra.mxu1 %v9087_v21 }
 0x15f   : > { %v1058_v20 = vpop.f32.mrf.mxu3 }
 0x160   : > { %v9350_v24 = vadd.f32 %v1058_v20, %v9279_v43  ;;  %v8413_v43 = vld [vmem:[%s11622_s1 + $0x1d0] sm:$0xff] }
 0x161   : > { %v1038_v11 = vpop.f32.mrf.mxu2  ;;  %v701_v39 = vpop.f32.mrf.mxu0  ;;  %2151 = vmatpush.bf16.msra.mxu3 %v8413_v43 }
 0x162   : > { %v9352_v6 = vadd.f32 %v1038_v11, %v837_v44 }
 0x163   : > { %v838_v18 = vpop.f32.mrf.mxu1 }
 0x164   : > { %v839_v13 = vadd.f32 %v838_v18, %v701_v39 }
 0x167   : > { %v1060_v14 = vpop.f32.mrf.mxu3 }
 0x168   : > { %v9355_v40 = vadd.f32 %v1060_v14, %v9284_v30 }
 0x169   : > { %v1040_v35 = vpop.f32.mrf.mxu2  ;;  %v1452_v47 = vpop.f32.mrf.mxu0 }
 0x16a   : > { %11636 = vst [vmem:[#allocation10_spill] sm:$0xff] %v9355_v40  ;;  %v9357_v37 = vadd.f32 %v1040_v35, %v839_v13  ;;  %v1819_v35 = vld [vmem:[#allocation2 + $0x120] sm:$0xff]  ;;  %v2283_v40 = vld [vmem:[#allocation2 + $0xf2] sm:$0xff] }
 0x16b   : > { %v1686_v21 = vpop.f32.mrf.mxu1 }
 0x16c   : > { %1257 = vmatmul.bf16.gmra.mxu3 %v9052_v38  ;;  %1491 = vmatmul.bf16.gmra.mxu0 %v9119_v61  ;;  %v8421_v38 = vld [vmem:[%s11622_s1 + $0x210] sm:$0xff] }
 0x16d   : > { %2385 = vmatpush.bf16.msra.mxu0 %v8421_v38 }
 0x16e   : > { %1960 = vmatmul.bf16.gmra.mxu2 %v9169_v62  ;;  %1725 = vmatmul.bf16.gmra.mxu1 %v9123_v63 }
 0x16f   : > { %v1218_v19 = vpop.f32.mrf.mxu3 }
 0x170   : > { %v1298_v30 = vadd.f32 %v1218_v19, %v9101_v33 }
 0x171   : > { %v1921_v58 = vpop.f32.mrf.mxu2  ;;  %v1454_v22 = vpop.f32.mrf.mxu0 }
 0x172   : > { %v1532_v1 = vadd.f32 %v1452_v47, %v1298_v30  ;;  %v1820_v47 = vld [vmem:[#allocation2 + $0x128] sm:$0xff] }
 0x173   : > { %v1688_v50 = vpop.f32.mrf.mxu1  ;;  %v1841_v30 = vpack.c.bf16 %v1820_v47, %v1819_v35 }
 0x174   : > { %v1766_v55 = vadd.f32 %v1686_v21, %v1532_v1 }
 0x176   : > { %v9370_v61 = vadd.f32 %v1921_v58, %v1766_v55 }
 0x177   : > { %v1220_v60 = vpop.f32.mrf.mxu3 }
 0x178   : > { %v1299_v51 = vadd.f32 %v1220_v60, %v9121_v29 }
 0x179   : > { %v1923_v63 = vpop.f32.mrf.mxu2  ;;  %v1457_v26 = vpop.f32.mrf.mxu0 }
 0x17a   : > { %v1533_v15 = vadd.f32 %v1454_v22, %v1299_v51 }
 0x17b   : > { %v1691_v44 = vpop.f32.mrf.mxu1 }
 0x17c   : > { %v1767_v33 = vadd.f32 %v1688_v50, %v1533_v15  ;;  %1262 = vmatmul.bf16.gmra.mxu3 %v9169_v62  ;;  %1496 = vmatmul.bf16.gmra.mxu0 %v9164_v54  ;;  %v1353_v15 = vld [vmem:[#allocation2 + $0x129] sm:$0xff] }
 0x17e   : > { %1965 = vmatmul.bf16.gmra.mxu2 %v9098_v17  ;;  %1730 = vmatmul.bf16.gmra.mxu1 %v9171_v12  ;;  %v9380_v20 = vadd.f32 %v1923_v63, %v1767_v33 }
 0x17f   : > { %v1223_v29 = vpop.f32.mrf.mxu3 }
 0x180   : > { %v1300_v11 = vadd.f32 %v1223_v29, %v9145_v25  ;;  %v8412_v25 = vld [vmem:[%s11622_s1 + $0x1c8] sm:$0xff] }
 0x181   : > { %v1926_v39 = vpop.f32.mrf.mxu2  ;;  %v1459_v18 = vpop.f32.mrf.mxu0  ;;  %2152 = vmatpush.bf16.msra.mxu3 %v8412_v25  ;;  %v1587_v29 = vld [vmem:[#allocation2 + $0x12a] sm:$0xff] }
 0x182   : > { %v1534_v13 = vadd.f32 %v1457_v26, %v1300_v11  ;;  %v1352_v26 = vld [vmem:[#allocation2 + $0x121] sm:$0xff] }
 0x183   : > { %v1693_v62 = vpop.f32.mrf.mxu1 }
 0x184   : > { %v1768_v14 = vadd.f32 %v1691_v44, %v1534_v13  ;;  %v1821_v44 = vld [vmem:[#allocation2 + $0x138] sm:$0xff] }
 0x186   : > { %v9383_v54 = vadd.f32 %v1926_v39, %v1768_v14  ;;  %v1373_v39 = vpack.c.bf16 %v1353_v15, %v1352_v26  ;;  %v1607_v14 = vpack.c.bf16 %v1587_v29, %v1586_v16 }
 0x187   : > { %v1225_v21 = vpop.f32.mrf.mxu3 }
 0x188   : > { %v1301_v43 = vadd.f32 %v1225_v21, %v9166_v59 }
 0x189   : > { %v1928_v19 = vpop.f32.mrf.mxu2  ;;  %v1462_v12 = vpop.f32.mrf.mxu0 }
 0x18a   : > { %v1535_v58 = vadd.f32 %v1459_v18, %v1301_v43  ;;  %v8440_v43 = vld [vmem:[%s11623_s2 + $0x68] sm:$0xff] }
 0x18b   : > { %v1696_v22 = vpop.f32.mrf.mxu1  ;;  %2867 = vmatpush.bf16.msra.mxu1 %v8440_v43 }
 0x18c   : > { %v1769_v1 = vadd.f32 %v1693_v62, %v1535_v58  ;;  %1267 = vmatmul.bf16.gmra.mxu3 %v9098_v17  ;;  %1501 = vmatmul.bf16.gmra.mxu0 %v9203_v8  ;;  %v8420_v8 = vld [vmem:[%s11622_s1 + $0x208] sm:$0xff] }
 0x18d   : > { %2386 = vmatpush.bf16.msra.mxu0 %v8420_v8 }
 0x18e   : > { %1970 = vmatmul.bf16.gmra.mxu2 %v1841_v30  ;;  %1735 = vmatmul.bf16.gmra.mxu1 %v9207_v10  ;;  %v9392_v50 = vadd.f32 %v1928_v19, %v1769_v1  ;;  %v1822_v10 = vld [vmem:[#allocation2 + $0x140] sm:$0xff] }
 0x18f   : > { %v1228_v59 = vpop.f32.mrf.mxu3  ;;  %v1842_v62 = vpack.c.bf16 %v1822_v10, %v1821_v44 }
 0x190   : > { %v1302_v55 = vadd.f32 %v1228_v59, %v9193_v31 }
 0x191   : > { %v1931_v38 = vpop.f32.mrf.mxu2  ;;  %v1464_v60 = vpop.f32.mrf.mxu0 }
 0x192   : > { %v1536_v51 = vadd.f32 %v1462_v12, %v1302_v55  ;;  %v1354_v55 = vld [vmem:[#allocation2 + $0x139] sm:$0xff] }
 0x193   : > { %v1698_v63 = vpop.f32.mrf.mxu1 }
 0x194   : > { %v1770_v17 = vadd.f32 %v1696_v22, %v1536_v51  ;;  %v1824_v51 = vld [vmem:[#allocation2 + $0x158] sm:$0xff] }
 0x196   : > { %v9398_v33 = vadd.f32 %v1931_v38, %v1770_v17  ;;  %v1823_v38 = vld [vmem:[#allocation2 + $0x150] sm:$0xff]  ;;  %v1589_v17 = vld [vmem:[#allocation2 + $0x142] sm:$0xff] }
 0x197   : > { %v1230_v11 = vpop.f32.mrf.mxu3  ;;  %v1843_v10 = vpack.c.bf16 %v1824_v51, %v1823_v38  ;;  %v1590_v38 = vld [vmem:[#allocation2 + $0x152] sm:$0xff]  ;;  %v1591_v51 = vld [vmem:[#allocation2 + $0x15a] sm:$0xff] }
 0x198   : > { %v1303_v31 = vadd.f32 %v1230_v11, %v9205_v0 }
 0x199   : > { %v1933_v18 = vpop.f32.mrf.mxu2  ;;  %v1467_v13 = vpop.f32.mrf.mxu0 }
 0x19a   : > { %v1537_v35 = vadd.f32 %v1464_v60, %v1303_v31 }
 0x19b   : > { %v1701_v47 = vpop.f32.mrf.mxu1 }
 0x19c   : > { %v1771_v21 = vadd.f32 %v1698_v63, %v1537_v35  ;;  %1272 = vmatmul.bf16.gmra.mxu3 %v1841_v30  ;;  %1506 = vmatmul.bf16.gmra.mxu0 %v1373_v39  ;;  %v1355_v30 = vld [vmem:[#allocation2 + $0x141] sm:$0xff] }
 0x19d   : > { %v1588_v63 = vld [vmem:[#allocation2 + $0x13a] sm:$0xff]  ;;  %v1374_v15 = vpack.c.bf16 %v1355_v30, %v1354_v55  ;;  %v346_v35 = vld [vmem:[%s8815_s26 + $0xc8] sm:$0x1]  ;;  %v1826_v30 = vld [vmem:[#allocation2 + $0x170] sm:$0xff] }
 0x19e   : > { %1975 = vmatmul.bf16.gmra.mxu2 %v1842_v62  ;;  %1740 = vmatmul.bf16.gmra.mxu1 %v1607_v14  ;;  %v9404_v19 = vadd.f32 %v1933_v18, %v1771_v21  ;;  %v1608_v16 = vpack.c.bf16 %v1589_v17, %v1588_v63  ;;  %v8411_v39 = vld [vmem:[%s11622_s1 + $0x1c0] sm:$0xff] }
 0x19f   : > { %v1233_v0 = vpop.f32.mrf.mxu3  ;;  %2153 = vmatpush.bf16.msra.mxu3 %v8411_v39  ;;  %v8614_v14 = vld [vmem:[%s8815_s26 + $0xc0] sm:$0xff]  }
 0x1a0   : > { %v1304_v12 = vadd.f32 %v1233_v0, %v9214_v27  ;;  %v8605_v21 = vunpack.c.l.bf16 %v8614_v14  ;;  %v8606_v43 = vunpack.c.h.bf16 %v8614_v14  ;;  %v400_v0 = vunpack.c.l.bf16 %v346_v35 }
 0x1a1   : > { %v1936_v58 = vpop.f32.mrf.mxu2  ;;  %v1469_v22 = vpop.f32.mrf.mxu0 }
 0x1a2   : > { %v1538_v1 = vadd.f32 %v1467_v13, %v1304_v12  ;;  %452 = vst [vmem:[#allocation2 + $0x180] sm:$0xff] %v8605_v21  ;;  %v1359_v21 = vld [vmem:[#allocation2 + $0x171] sm:$0xff] }
 0x1a3   : > { %v1703_v25 = vpop.f32.mrf.mxu1  ;;  %453 = vst [vmem:[#allocation2 + $0x188] sm:$0xff] %v8606_v43  ;;  %v1592_v43 = vld [vmem:[#allocation2 + $0x16a] sm:$0xff]  ;;  %3204 = vmatpush.bf16.msrb.mxu3 %v8450_v56 }
 0x1a4   : > { %v1772_v59 = vadd.f32 %v1701_v47, %v1538_v1  ;;  %v8419_v1 = vld [vmem:[%s11622_s1 + $0x200] sm:$0xff]  ;;  %454 = vst [vmem:[#allocation2 + $0x190] sm:$0x3] %v400_v0  ;;  %v1593_v0 = vld [vmem:[#allocation2 + $0x172] sm:$0xff] }
 0x1a5   : > { %2387 = vmatpush.bf16.msra.mxu0 %v8419_v1 }
 0x1a6   : > { %v9407_v60 = vadd.f32 %v1936_v58, %v1772_v59  ;;  %v1357_v59 = vld [vmem:[#allocation2 + $0x159] sm:$0xff] }
 0x1a7   : > { %v1235_v8 = vpop.f32.mrf.mxu3 }
 0x1a8   : > { %v1305_v26 = vadd.f32 %v1235_v8, %v9218_v41 }
 0x1a9   : > { %v1472_v44 = vpop.f32.mrf.mxu0  ;;  %v1938_v27 = vpop.f32.mrf.mxu2 }
 0x1aa   : > { %v1539_v29 = vadd.f32 %v1469_v22, %v1305_v26 }
 0x1ab   : > { %v1706_v11 = vpop.f32.mrf.mxu1 }
 0x1ac   : > { %v1773_v31 = vadd.f32 %v1703_v25, %v1539_v29  ;;  %1277 = vmatmul.bf16.gmra.mxu3 %v1842_v62  ;;  %1511 = vmatmul.bf16.gmra.mxu0 %v1374_v15  ;;  %v1356_v25 = vld [vmem:[#allocation2 + $0x151] sm:$0xff]  ;;  %v8439_v29 = vld [vmem:[%s11623_s2 + $0x60] sm:$0xff] }
 0x1ad   : > { %v1375_v8 = vpack.c.bf16 %v1357_v59, %v1356_v25  ;;  %2868 = vmatpush.bf16.msra.mxu1 %v8439_v29  ;;  %v1610_v25 = vpack.c.bf16 %v1593_v0, %v1592_v43 }
 0x1ae   : > { %1980 = vmatmul.bf16.gmra.mxu2 %v1843_v10  ;;  %1745 = vmatmul.bf16.gmra.mxu1 %v1608_v16  ;;  %v9413_v18 = vadd.f32 %v1938_v27, %v1773_v31 }
 0x1af   : > { %v1238_v41 = vpop.f32.mrf.mxu3 }
 0x1b0   : > { %v1306_v13 = vadd.f32 %v1238_v41, %v9230_v3  ;;  %v1825_v3 = vld [vmem:[#allocation2 + $0x168] sm:$0xff] }
 0x1b1   : > { %v1474_v47 = vpop.f32.mrf.mxu0  ;;  %v1941_v58 = vpop.f32.mrf.mxu2  ;;  %v1844_v15 = vpack.c.bf16 %v1826_v30, %v1825_v3 }
 0x1b2   : > { %v1540_v62 = vadd.f32 %v1472_v44, %v1306_v13  ;;  %v1609_v44 = vpack.c.bf16 %v1591_v51, %v1590_v38 }
 0x1b3   : > { %v9418_v12 = vpop.f32.mrf.mxu1 }
 0x1b4   : > { %v1774_v22 = vadd.f32 %v1706_v11, %v1540_v62  ;;  %v347_v11 = vld [vmem:[%s8815_s26 + $0xcc] sm:$0xff]  }
 0x1b5   : > { %v401_v39 = vunpack.c.l.bf16 %v347_v11  ;;  %v402_v41 = vunpack.c.h.bf16 %v347_v11 }
 0x1b6   : > { %v9423_v55 = vadd.f32 %v1941_v58, %v1774_v22 }
 0x1b7   : > { %v1240_v63 = vpop.f32.mrf.mxu3  ;;  %455 = vst [vmem:[#allocation2 + $0x198] sm:$0xff] %v401_v39 }
 0x1b8   : > { %v1307_v17 = vadd.f32 %v1240_v63, %v9238_v34  ;;  %456 = vst [vmem:[#allocation2 + $0x1a0] sm:$0xff] %v402_v41 }
 0x1b9   : > { %v1477_v26 = vpop.f32.mrf.mxu0 }
 0x1ba   : > { %v9426_v27 = vadd.f32 %v1474_v47, %v1307_v17  ;;  %v1358_v47 = vld [vmem:[#allocation2 + $0x169] sm:$0xff] }
 0x1bb   : > { %v1711_v16 = vpop.f32.mrf.mxu1  ;;  %v1376_v22 = vpack.c.bf16 %v1359_v21, %v1358_v47 }
 0x1bc   : > { %1282 = vmatmul.bf16.gmra.mxu3 %v1843_v10  ;;  %1516 = vmatmul.bf16.gmra.mxu0 %v1375_v8 }
 0x1be   : > { %1985 = vmatmul.bf16.gmra.mxu2 %v1844_v15  ;;  %1750 = vmatmul.bf16.gmra.mxu1 %v1609_v44  ;;  %v1594_v44 = vld [vmem:[#allocation2 + $0x182] sm:$0xff] }
 0x1bf   : > { %v1243_v31 = vpop.f32.mrf.mxu3 }
 0x1c0   : > { %v1308_v34 = vadd.f32 %v1243_v31, %v9247_v2  ;;  %v8670_v2 = vld [vmem:[%s8815_s26 + $0xc0] sm:$0xff] }
 0x1c1   : > { %v1479_v13 = vpop.f32.mrf.mxu0 }
 0x1c2   : > { %v1542_v14 = vadd.f32 %v1477_v26, %v1308_v34  ;;  %v1361_v26 = vld [vmem:[#allocation2 + $0x189] sm:$0xff] }
 0x1c3   : > { %v9433_v35 = vpop.f32.mrf.mxu1 }
 0x1c4   : > { %v9435_v10 = vadd.f32 %v1711_v16, %v1542_v14  ;;  %v1595_v16 = vld [vmem:[#allocation2 + $0x18a] sm:$0xff] }
 0x1c5   : > { %v1611_v34 = vpack.c.bf16 %v1595_v16, %v1594_v44 }
 0x1c7   : > { %v1245_v62 = vpop.f32.mrf.mxu3 }
 0x1c8   : > { %v1309_v58 = vadd.f32 %v1245_v62, %v9252_v42  ;;  %v1360_v42 = vld [vmem:[#allocation2 + $0x181] sm:$0xff]  ;;  %v2033_v62 = vld [vmem:[#allocation2 + $0x31] sm:$0xff] }
 0x1c9   : > { %v1482_v1 = vpop.f32.mrf.mxu0 }
 0x1ca   : > { %v9439_v59 = vadd.f32 %v1479_v13, %v1309_v58  ;;  %v8434_v58 = vld [vmem:[%s11623_s2 + $0x38] sm:$0xff] }
 0x1cb   : > { %v1716_v3 = vpop.f32.mrf.mxu1  ;;  %3002 = vmatpush.bf16.msra.mxu2 %v8434_v58 }
 0x1cc   : > { %1287 = vmatmul.bf16.gmra.mxu3 %v1844_v15  ;;  %1521 = vmatmul.bf16.gmra.mxu0 %v1376_v22  ;;  %v1377_v15 = vpack.c.bf16 %v1361_v26, %v1360_v42  ;;  %v2034_v22 = vld [vmem:[#allocation2 + $0x39] sm:$0xff] }
 0x1ce   : > { %1990 = vmatmul.bf16.gmra.mxu2 %v8670_v2  ;;  %1755 = vmatmul.bf16.gmra.mxu1 %v1610_v25 }
 0x1cf   : > { %v1248_v30 = vpop.f32.mrf.mxu3 }
 0x1d0   : > { %v1310_v38 = vadd.f32 %v1248_v30, %v9264_v7  ;;  %v8438_v7 = vld [vmem:[%s11623_s2 + $0x58] sm:$0xff] }
 0x1d1   : > { %v1484_v51 = vpop.f32.mrf.mxu0  ;;  %2869 = vmatpush.bf16.msra.mxu1 %v8438_v7 }
 0x1d2   : > { %v1544_v63 = vadd.f32 %v1482_v1, %v1310_v38  ;;  %v2267_v1 = vld [vmem:[#allocation2 + $0x32] sm:$0xff] }
 0x1d3   : > { %v9442_v17 = vpop.f32.mrf.mxu1 }
 0x1d4   : > { %v9444_v8 = vadd.f32 %v1716_v3, %v1544_v63  ;;  %v2065_v3 = vpack.c.bf16 %v2034_v22, %v2033_v62 }
 0x1d7   : > { %v1250_v29 = vpop.f32.mrf.mxu3 }
 0x1d8   : > { %v1311_v31 = vadd.f32 %v1250_v29, %v9272_v49 }
 0x1d9   : > { %v1487_v39 = vpop.f32.mrf.mxu0 }
 0x1da   : > { %v9447_v41 = vadd.f32 %v1484_v51, %v1311_v31  ;;  %v2035_v31 = vld [vmem:[#allocation2 + $0x49] sm:$0xff] }
 0x1db   : > { %v1721_v13 = vpop.f32.mrf.mxu1 }
 0x1dc   : > { %1292 = vmatmul.bf16.gmra.mxu3 %v8670_v2  ;;  %1526 = vmatmul.bf16.gmra.mxu0 %v1377_v15  ;;  %v2268_v2 = vld [vmem:[#allocation2 + $0x3a] sm:$0xff]  ;;  %v2036_v15 = vld [vmem:[#allocation2 + $0x51] sm:$0xff] }
 0x1dd   : > { %v2066_v7 = vpack.c.bf16 %v2036_v15, %v2035_v31 }
 0x1de   : > { %1995 = vmatmul.bf16.gmra.mxu2 %v347_v11  ;;  %1760 = vmatmul.bf16.gmra.mxu1 %v1611_v34 }
 0x1df   : > { %v1253_v14 = vpop.f32.mrf.mxu3 }
 0x1e0   : > { %v1312_v47 = vadd.f32 %v1253_v14, %v9281_v57  ;;  %v2299_v57 = vpack.c.bf16 %v2268_v2, %v2267_v1 }
 0x1e1   : > { %v1489_v21 = vpop.f32.mrf.mxu0 }
 0x1e2   : > { %v1546_v49 = vadd.f32 %v1487_v39, %v1312_v47  ;;  %v2270_v39 = vld [vmem:[#allocation2 + $0x52] sm:$0xff] }
 0x1e3   : > { %v9453_v43 = vpop.f32.mrf.mxu1 }
 0x1e4   : > { %v9455_v0 = vadd.f32 %v1721_v13, %v1546_v49 }
 0x1e7   : > { %v1255_v11 = vpop.f32.mrf.mxu3 }
 0x1e8   : > { %v1313_v25 = vadd.f32 %v1255_v11, %v9286_v9  ;;  %v2269_v9 = vld [vmem:[#allocation2 + $0x4a] sm:$0xff]  ;;  %v2037_v11 = vld [vmem:[#allocation2 + $0x61] sm:$0xff] }
 0x1e9   : > { %v1492_v30 = vpop.f32.mrf.mxu0  ;;  %v2300_v14 = vpack.c.bf16 %v2270_v39, %v2269_v9 }
 0x1ea   : > { %v9461_v38 = vadd.f32 %v1489_v21, %v1313_v25  ;;  %v8433_v25 = vld [vmem:[%s11623_s2 + $0x30] sm:$0xff] }
 0x1eb   : > { %v1726_v51 = vpop.f32.mrf.mxu1  ;;  %3003 = vmatpush.bf16.msra.mxu2 %v8433_v25 }
 0x1ec   : > { %2154 = vmatmul.bf16.vlgmr.msra.gmra.mxu3 %v2065_v3  ;;  %2388 = vmatmul.bf16.vlgmr.msra.gmra.mxu0 %v2299_v57  ;;  %v2038_v3 = vld [vmem:[#allocation2 + $0x69] sm:$0xff] }
 0x1ed   : > { %v2271_v57 = vld [vmem:[#allocation2 + $0x62] sm:$0xff] }
 0x1ef   : > { %v1258_v63 = vpop.f32.mrf.mxu3 }
 0x1f0   : > { %v1314_v42 = vadd.f32 %v1258_v63, %v9298_v46  ;;  %v8437_v46 = vld [vmem:[%s11623_s2 + $0x50] sm:$0xff] }
 0x1f1   : > { %v1494_v26 = vpop.f32.mrf.mxu0  ;;  %2870 = vmatpush.bf16.msra.mxu1 %v8437_v46 }
 0x1f2   : > { %v1548_v44 = vadd.f32 %v1492_v30, %v1314_v42  ;;  %v2272_v30 = vld [vmem:[#allocation2 + $0x6a] sm:$0xff]  ;;  %v2067_v42 = vpack.c.bf16 %v2038_v3, %v2037_v11 }
 0x1f3   : > { %v9464_v16 = vpop.f32.mrf.mxu1  ;;  %v8436_v3 = vld [vmem:[%s11623_s2 + $0x48] sm:$0xff] }
 0x1f4   : > { %v9466_v29 = vadd.f32 %v1726_v51, %v1548_v44 }
 0x1f5   : > { %2871 = vmatpush.bf16.msra.mxu1 %v8436_v3 }
 0x1f7   : > { %v1260_v34 = vpop.f32.mrf.mxu3 }
 0x1f8   : > { %v1315_v13 = vadd.f32 %v1260_v34, %v9306_v48 }
 0x1f9   : > { %v1497_v47 = vpop.f32.mrf.mxu0 }
 0x1fa   : > { %v9469_v21 = vadd.f32 %v1494_v26, %v1315_v13 }
 0x1fb   : > { %v1731_v49 = vpop.f32.mrf.mxu1 }
 0x1fc   : > { %2159 = vmatmul.bf16.gmra.mxu3 %v2066_v7  ;;  %2393 = vmatmul.bf16.gmra.mxu0 %v2300_v14  ;;  %v2039_v14 = vld [vmem:[#allocation2 + $0x79] sm:$0xff] }
 0x1ff   : > { %v1263_v62 = vpop.f32.mrf.mxu3 }
 0x200   : > { %v1316_v58 = vadd.f32 %v1263_v62, %v9315_v32  ;;  %v2301_v32 = vpack.c.bf16 %v2272_v30, %v2271_v57 }
 0x201   : > { %v1499_v22 = vpop.f32.mrf.mxu0 }
 0x202   : > { %v1550_v1 = vadd.f32 %v1497_v47, %v1316_v58  ;;  %v2040_v47 = vld [vmem:[#allocation2 + $0x81] sm:$0xff] }
 0x203   : > { %v9475_v2 = vpop.f32.mrf.mxu1  ;;  %v2068_v58 = vpack.c.bf16 %v2040_v47, %v2039_v14 }
 0x204   : > { %v9477_v48 = vadd.f32 %v1731_v49, %v1550_v1  ;;  %v2274_v49 = vld [vmem:[#allocation2 + $0x82] sm:$0xff]  ;;  %v9491_v1 = vpop.f32.mrf.mxu2 }
 0x207   : > { %v1265_v51 = vpop.f32.mrf.mxu3 }
 0x208   : > { %v1317_v63 = vadd.f32 %v1265_v51, %v9320_v28  ;;  %v2273_v28 = vld [vmem:[#allocation2 + $0x7a] sm:$0xff] }
 0x209   : > { %v1502_v26 = vpop.f32.mrf.mxu0 }
 0x20a   : > { %v9483_v44 = vadd.f32 %v1499_v22, %v1317_v63  ;;  %v2302_v22 = vpack.c.bf16 %v2274_v49, %v2273_v28 }
 0x20b   : > { %v1736_v31 = vpop.f32.mrf.mxu1 }
 0x20c   : > { %2164 = vmatmul.bf16.gmra.mxu3 %v2067_v42  ;;  %2398 = vmatmul.bf16.gmra.mxu0 %v2301_v32  ;;  %v9501_v42 = vpop.f32.mrf.mxu2 }
 0x20f   : > { %v1268_v15 = vpop.f32.mrf.mxu3 }
 0x210   : > { %v1318_v9 = vadd.f32 %v1268_v15, %v9332_v4  ;;  %v2042_v15 = vld [vmem:[#allocation2 + $0x99] sm:$0xff] }
 0x211   : > { %v1504_v39 = vpop.f32.mrf.mxu0 }
 0x212   : > { %v1552_v34 = vadd.f32 %v1502_v26, %v1318_v9  ;;  %v2041_v26 = vld [vmem:[#allocation2 + $0x91] sm:$0xff] }
 0x213   : > { %v9486_v13 = vpop.f32.mrf.mxu1  ;;  %v2275_v9 = vld [vmem:[#allocation2 + $0x92] sm:$0xff]  ;;  %v2069_v14 = vpack.c.bf16 %v2042_v15, %v2041_v26 }
 0x214   : > { %v9488_v7 = vadd.f32 %v1736_v31, %v1552_v34  ;;  %v8432_v31 = vld [vmem:[%s11623_s2 + $0x28] sm:$0xff]  ;;  %v2278_v26 = vld [vmem:[#allocation2 + $0xb2] sm:$0xff] }
 0x215   : > { %3004 = vmatpush.bf16.msra.mxu2 %v8432_v31  ;;  %v8430_v31 = vld [vmem:[%s11623_s2 + $0x18] sm:$0xff] }
 0x217   : > { %v1270_v46 = vpop.f32.mrf.mxu3 }
 0x218   : > { %v1319_v62 = vadd.f32 %v1270_v46, %v9340_v53 }
 0x219   : > { %v1507_v11 = vpop.f32.mrf.mxu0 }
 0x21a   : > { %v9493_v25 = vadd.f32 %v1504_v39, %v1319_v62  ;;  %v2276_v39 = vld [vmem:[#allocation2 + $0x9a] sm:$0xff]  ;;  %v9511_v62 = vpop.f32.mrf.mxu2 }
 0x21b   : > { %v1741_v4 = vpop.f32.mrf.mxu1  ;;  %v2303_v47 = vpack.c.bf16 %v2276_v39, %v2275_v9 }
 0x21c   : > { %2169 = vmatmul.bf16.gmra.mxu3 %v2068_v58  ;;  %2403 = vmatmul.bf16.gmra.mxu0 %v2302_v22 }
 0x21f   : > { %v1273_v57 = vpop.f32.mrf.mxu3 }
 0x220   : > { %v1320_v30 = vadd.f32 %v1273_v57, %v9352_v6 }
 0x221   : > { %v1509_v51 = vpop.f32.mrf.mxu0 }
 0x222   : > { %v1554_v53 = vadd.f32 %v1507_v11, %v1320_v30  ;;  %v2043_v30 = vld [vmem:[#allocation2 + $0xa9] sm:$0xff] }
 0x223   : > { %v9499_v63 = vpop.f32.mrf.mxu1 }
 0x224   : > { %11637 = vst [vmem:[#allocation11_spill] sm:$0xff] %v9499_v63  ;;  %v9503_v32 = vadd.f32 %v1741_v4, %v1554_v53  ;;  %v2277_v53 = vld [vmem:[#allocation2 + $0xaa] sm:$0xff] }
 0x227   : > { %v1275_v34 = vpop.f32.mrf.mxu3 }
 0x228   : > { %v1321_v6 = vadd.f32 %v1275_v34, %v9357_v37  ;;  %v8431_v37 = vld [vmem:[%s11623_s2 + $0x20] sm:$0xff]  ;;  %v2304_v34 = vpack.c.bf16 %v2278_v26, %v2277_v53  ;;  %v8728_v53 = vmov 0.0  }
 0x229   : > { %v1512_v28 = vpop.f32.mrf.mxu0  ;;  %3005 = vmatpush.bf16.msra.mxu2 %v8431_v37  ;;  %2601 = vst [vmem:[#allocation3] sm:$0xff] %v8728_v53 }
 0x22a   : > { %v9509_v49 = vadd.f32 %v1509_v51, %v1321_v6  ;;  %v2044_v51 = vld [vmem:[#allocation2 + $0xb1] sm:$0xff]  ;;  %2602 = vst [vmem:[#allocation3 + $0x8] sm:$0xff] %v8728_v53 }
 0x22b   : > { %v1746_v46 = vpop.f32.mrf.mxu1  ;;  %v2070_v39 = vpack.c.bf16 %v2044_v51, %v2043_v30  ;;  %v8427_v30 = vld [vmem:[%s11623_s2] sm:$0xff]  ;;  %2603 = vst [vmem:[#allocation3 + $0x10] sm:$0x3] %v8728_v53 }
 0x22c   : > { %2174 = vmatmul.bf16.gmra.mxu3 %v2069_v14  ;;  %2408 = vmatmul.bf16.gmra.mxu0 %v2303_v47  ;;  %2604 = vst [vmem:[#allocation3 + $0x18] sm:$0xff] %v8728_v53 }
 0x22d   : > { %3006 = vmatpush.bf16.msra.mxu2 %v8430_v31  ;;  %v2045_v31 = vld [vmem:[#allocation2 + $0xc1] sm:$0xff]  ;;  %2605 = vst [vmem:[#allocation3 + $0x20] sm:$0xff] %v8728_v53 }
 0x22e   : > { %2606 = vst [vmem:[#allocation3 + $0x28] sm:$0x3] %v8728_v53 }
 0x22f   : > { %v1278_v58 = vpop.f32.mrf.mxu3  ;;  %2607 = vst [vmem:[#allocation3 + $0x30] sm:$0xff] %v8728_v53 }
 0x230   : > { %v1322_v22 = vadd.f32 %v1278_v58, %v9296_v5  ;;  %v9524_v5 = vpop.f32.mrf.mxu2  ;;  %2608 = vst [vmem:[#allocation3 + $0x38] sm:$0xff] %v8728_v53 }
 0x231   : > { %v1514_v11 = vpop.f32.mrf.mxu0  ;;  %2609 = vst [vmem:[#allocation3 + $0x40] sm:$0x3] %v8728_v53 }
 0x232   : > { %v1556_v4 = vadd.f32 %v1512_v28, %v1322_v22  ;;  %v8429_v28 = vld [vmem:[%s11623_s2 + $0x10] sm:$0xff]  ;;  %2610 = vst [vmem:[#allocation3 + $0x48] sm:$0xff] %v8728_v53 }
 0x233   : > { %v9514_v3 = vpop.f32.mrf.mxu1  ;;  %3007 = vmatpush.bf16.msra.mxu2 %v8429_v28  ;;  %v8729_v28 = vmov 0.0|0.0   ;;  %2611 = vst [vmem:[#allocation3 + $0x50] sm:$0xff] %v8728_v53 }
 0x234   : > { %11638 = vst [vmem:[#allocation12_spill] sm:$0xff] %v9514_v3  ;;  %v9519_v57 = vadd.f32 %v1746_v46, %v1556_v4  ;;  %v8435_v46 = vld [vmem:[%s11623_s2 + $0x40] sm:$0xff] }
 0x235   : > { %2872 = vmatpush.bf16.msra.mxu1 %v8435_v46  ;;  %2612 = vst [vmem:[#allocation3 + $0x58] sm:$0x3] %v8728_v53 }
 0x236   : > { %11639 = vst [vmem:[#allocation13_spill] sm:$0xff] %v9519_v57 }
 0x237   : > { %v1280_v15 = vpop.f32.mrf.mxu3  ;;  %2613 = vst [vmem:[#allocation3 + $0x60] sm:$0xff] %v8728_v53 }
 0x238   : > { %v1323_v9 = vadd.f32 %v1280_v15, %v9304_v23  ;;  %v8428_v23 = vld [vmem:[%s11623_s2 + $0x8] sm:$0xff]  ;;  %2614 = vst [vmem:[#allocation3 + $0x68] sm:$0xff] %v8728_v53 }
 0x239   : > { %v1517_v6 = vpop.f32.mrf.mxu0  ;;  %3008 = vmatpush.bf16.msra.mxu2 %v8428_v23  ;;  %v2279_v15 = vld [vmem:[#allocation2 + $0xc2] sm:$0xff]  ;;  %2615 = vst [vmem:[#allocation3 + $0x70] sm:$0x3] %v8728_v53 }
 0x23a   : > { %v9527_v14 = vadd.f32 %v1514_v11, %v1323_v9  ;;  %v9539_v11 = vpop.f32.mrf.mxu2  ;;  %v2280_v9 = vld [vmem:[#allocation2 + $0xca] sm:$0xff]  ;;  %2616 = vst [vmem:[#allocation3 + $0x78] sm:$0xff] %v8728_v53 }
 0x23b   : > { %v1751_v47 = vpop.f32.mrf.mxu1  ;;  %2617 = vst [vmem:[#allocation3 + $0x80] sm:$0xff] %v8728_v53 }
 0x23c   : > { %11640 = vst [vmem:[#allocation14_spill] sm:$0xff] %v9527_v14  ;;  %2179 = vmatmul.bf16.gmra.mxu3 %v2070_v39  ;;  %2413 = vmatmul.bf16.gmra.mxu0 %v2304_v34 }
 0x23d   : > { %3009 = vmatpush.bf16.msra.mxu2 %v8427_v30  ;;  %2618 = vst [vmem:[#allocation3 + $0x88] sm:$0x3] %v8728_v53 }
 0x23e   : > { %2619 = vst [vmem:[#allocation3 + $0x90] sm:$0xff] %v8728_v53 }
 0x23f   : > { %v1283_v58 = vpop.f32.mrf.mxu3  ;;  %2620 = vst [vmem:[#allocation3 + $0x98] sm:$0xff] %v8728_v53 }
 0x240   : > { %v1324_v22 = vadd.f32 %v1283_v58, %v9313_v52  ;;  %v2046_v52 = vld [vmem:[#allocation2 + $0xc9] sm:$0xff]  ;;  %3010 = vmatmul.bf16.vlgmr.msra.gmra.mxu2 %v8729_v28  ;;  %2621 = vst [vmem:[#allocation3 + $0xa0] sm:$0x3] %v8728_v53 }
 0x241   : > { %v9541_v4 = vpop.f32.mrf.mxu0  ;;  %v2071_v34 = vpack.c.bf16 %v2046_v52, %v2045_v31  ;;  %v2047_v31 = vld [vmem:[#allocation2 + $0xd9] sm:$0xff]  ;;  %2622 = vst [vmem:[#allocation3 + $0xa8] sm:$0xff] %v8728_v53 }
 0x242   : > { %11641 = vst [vmem:[#allocation15_spill] sm:$0xff] %v9541_v4  ;;  %v1558_v37 = vadd.f32 %v1517_v6, %v1324_v22  ;;  %v2305_v6 = vpack.c.bf16 %v2280_v9, %v2279_v15  ;;  %v2048_v15 = vld [vmem:[#allocation2 + $0xe1] sm:$0xff]  ;;  %v2286_v4 = vld [vmem:[#allocation2 + $0x112] sm:$0xff] }
 0x243   : > { %v9546_v51 = vpop.f32.mrf.mxu1  ;;  %v2281_v9 = vld [vmem:[#allocation2 + $0xda] sm:$0xff]  ;;  %2623 = vst [vmem:[#allocation3 + $0xb0] sm:$0xff] %v8728_v53 }
 0x244   : > { %11642 = vst [vmem:[#allocation16_spill] sm:$0xff] %v9546_v51  ;;  %v9549_v26 = vadd.f32 %v1751_v47, %v1558_v37  ;;  %v9560_v47 = vpop.f32.mrf.mxu2 }
 0x245   : > { %2624 = vst [vmem:[#allocation3 + $0xb8] sm:$0x3] %v8728_v53 }
 0x246   : > { %11643 = vst [vmem:[#allocation17_spill] sm:$0xff] %v9549_v26  ;;  %v8466_v26 = vld [vmem:[%s11623_s2 + $0x138] sm:$0xff] }
 0x247   : > { %v9554_v39 = vpop.f32.mrf.mxu3  ;;  %2625 = vst [vmem:[#allocation3 + $0xc0] sm:$0xff] %v8728_v53  ;;  %3672 = vmatpush.bf16.msrb.mxu1 %v8466_v26 }
 0x248   : > { %11644 = vst [vmem:[#allocation18_spill] sm:$0xff] %v9554_v39 }
 0x249   : > { %v1522_v46 = vpop.f32.mrf.mxu0  ;;  %2626 = vst [vmem:[#allocation3 + $0xc8] sm:$0xff] %v8728_v53 }
 0x24a   : > { %2627 = vst [vmem:[#allocation3 + $0xd0] sm:$0x3] %v8728_v53 }
 0x24b   : > { %v1756_v23 = vpop.f32.mrf.mxu1  ;;  %2628 = vst [vmem:[#allocation3 + $0xd8] sm:$0xff] %v8728_v53 }
 0x24c   : > { %2184 = vmatmul.bf16.gmra.mxu3 %v2071_v34  ;;  %2418 = vmatmul.bf16.gmra.mxu0 %v2305_v6  ;;  %v9575_v52 = vpop.f32.mrf.mxu2  ;;  %v2282_v34 = vld [vmem:[#allocation2 + $0xe2] sm:$0xff]  ;;  %2629 = vst [vmem:[#allocation3 + $0xe0] sm:$0xff] %v8728_v53 }
 0x24d   : > { %2630 = vst [vmem:[#allocation3 + $0xe8] sm:$0x3] %v8728_v53 }
 0x24e   : > { %2631 = vst [vmem:[#allocation3 + $0xf0] sm:$0xff] %v8728_v53 }
 0x24f   : > { %v1288_v58 = vpop.f32.mrf.mxu3  ;;  %2632 = vst [vmem:[#allocation3 + $0xf8] sm:$0xff] %v8728_v53 }
 0x250   : > { %v1326_v22 = vadd.f32 %v1288_v58, %v9330_v45  ;;  %2633 = vst [vmem:[#allocation3 + $0x100] sm:$0x3] %v8728_v53 }
 0x251   : > { %v9578_v45 = vpop.f32.mrf.mxu0  ;;  %2634 = vst [vmem:[#allocation3 + $0x108] sm:$0xff] %v8728_v53 }
 0x252   : > { %v1560_v37 = vadd.f32 %v1522_v46, %v1326_v22  ;;  %11646 = vst [vmem:[#allocation20_spill] sm:$0xff] %v9578_v45  ;;  %v2072_v46 = vpack.c.bf16 %v2048_v15, %v2047_v31  ;;  %v2051_v45 = vld [vmem:[#allocation2 + $0x109] sm:$0xff] }
 0x253   : > { %v9583_v28 = vpop.f32.mrf.mxu1  ;;  %2635 = vst [vmem:[#allocation3 + $0x110] sm:$0xff] %v8728_v53 }
 0x254   : > { %v9572_v30 = vadd.f32 %v1756_v23, %v1560_v37  ;;  %11648 = vst [vmem:[#allocation22_spill] sm:$0xff] %v9583_v28  ;;  %v2306_v23 = vpack.c.bf16 %v2282_v34, %v2281_v9  ;;  %v9593_v58 = vpop.f32.mrf.mxu2  ;;  %v2284_v28 = vld [vmem:[#allocation2 + $0xfa] sm:$0xff] }
 0x255   : > { %2636 = vst [vmem:[#allocation3 + $0x118] sm:$0x3] %v8728_v53 }
 0x256   : > { %11645 = vst [vmem:[#allocation19_spill] sm:$0xff] %v9572_v30  ;;  %v2052_v30 = vld [vmem:[#allocation2 + $0x111] sm:$0xff] }
 0x257   : > { %v9581_v6 = vpop.f32.mrf.mxu3  ;;  %2637 = vst [vmem:[#allocation3 + $0x120] sm:$0xff] %v8728_v53  ;;  %v2074_v51 = vpack.c.bf16 %v2052_v30, %v2051_v45 }
 0x258   : > { %11647 = vst [vmem:[#allocation21_spill] sm:$0xff] %v9581_v6  ;;  %v2285_v6 = vld [vmem:[#allocation2 + $0x10a] sm:$0xff] }
 0x259   : > { %v1527_v31 = vpop.f32.mrf.mxu0  ;;  %2638 = vst [vmem:[#allocation3 + $0x128] sm:$0xff] %v8728_v53 }
 0x25a   : > { %2639 = vst [vmem:[#allocation3 + $0x130] sm:$0x3] %v8728_v53 }
 0x25b   : > { %v1761_v15 = vpop.f32.mrf.mxu1  ;;  %2640 = vst [vmem:[#allocation3 + $0x138] sm:$0xff] %v8728_v53 }
 0x25c   : > { %2189 = vmatmul.bf16.gmra.mxu3 %v2072_v46  ;;  %2423 = vmatmul.bf16.gmra.mxu0 %v2306_v23  ;;  %v2049_v46 = vld [vmem:[#allocation2 + $0xf1] sm:$0xff]  ;;  %v2050_v23 = vld [vmem:[#allocation2 + $0xf9] sm:$0xff]  ;;  %2641 = vst [vmem:[#allocation3 + $0x140] sm:$0xff] %v8728_v53 }
 0x25d   : > { %2642 = vst [vmem:[#allocation3 + $0x148] sm:$0x3] %v8728_v53 }
 0x25e   : > { %2643 = vst [vmem:[#allocation3 + $0x150] sm:$0xff] %v8728_v53 }
 0x25f   : > { %v1293_v22 = vpop.f32.mrf.mxu3  ;;  %2644 = vst [vmem:[#allocation3 + $0x158] sm:$0xff] %v8728_v53 }
 0x260   : > { %v1328_v37 = vadd.f32 %v1293_v22, %v9350_v24  ;;  %v2073_v24 = vpack.c.bf16 %v2050_v23, %v2049_v46  ;;  %v2307_v22 = vpack.c.bf16 %v2284_v28, %v2283_v40  ;;  %2645 = vst [vmem:[#allocation3 + $0x160] sm:$0x3] %v8728_v53  ;;  %v2752_v46 = vld [vmem:[#allocation3 + $0x1] sm:$0xff]  ;;  %v2753_v23 = vld [vmem:[#allocation3 + $0x9] sm:$0xff] }
 0x261   : > { %2646 = vst [vmem:[#allocation3 + $0x168] sm:$0xff] %v8728_v53  ;;  %v9619_v40 = vpop.f32.mrf.mxu0 }
 0x262   : > { %v1562_v9 = vadd.f32 %v1527_v31, %v1328_v37  ;;  %v9608_v37 = vpop.f32.mrf.mxu2  ;;  %2647 = vst [vmem:[#allocation3 + $0x170] sm:$0xff] %v8728_v53 }
 0x263   : > { %11650 = vst [vmem:[#allocation24_spill] sm:$0xff] %v9619_v40 }
 0x264   : > { %v9601_v34 = vadd.f32 %v1761_v15, %v1562_v9  ;;  %2648 = vst [vmem:[#allocation3 + $0x178] sm:$0x3] %v8728_v53 }
 0x265   : > { %2649 = vst [vmem:[#allocation3 + $0x180] sm:$0xff] %v8728_v53 }
 0x266   : > { %11649 = vst [vmem:[#allocation23_spill] sm:$0xff] %v9601_v34 }
 0x267   : > { %2650 = vst [vmem:[#allocation3 + $0x188] sm:$0xff] %v8728_v53  ;;  %v9629_v31 = vpop.f32.mrf.mxu3 }
 0x268   : > { %2651 = vst [vmem:[#allocation3 + $0x190] sm:$0x3] %v8728_v53 }
 0x269   : > { %2652 = vst [vmem:[#allocation3 + $0x198] sm:$0xff] %v8728_v53  ;;  %v2389_v15 = vpop.f32.mrf.mxu0 }
 0x26a   : > { %v9622_v28 = vpop.f32.mrf.mxu2  ;;  %2653 = vst [vmem:[#allocation3 + $0x1a0] sm:$0xff] %v8728_v53 }
 0x26b   : > { %11651 = vst [vmem:[#allocation25_spill] sm:$0xff] %v9629_v31 }
 0x26c   : > { %2194 = vmatmul.bf16.gmra.mxu3 %v2073_v24  ;;  %2428 = vmatmul.bf16.gmra.mxu0 %v2307_v22  ;;  %2654 = vst [vmem:[#allocation3 + $0x1a8] sm:$0x3] %v8728_v53  ;;  %v2784_v24 = vpack.c.bf16 %v2753_v23, %v2752_v46 }
 0x26d   : > { %4830 = vst [vmem:[#allocation4] sm:$0xff] %v8728_v53 }
 0x26e   : > { %4831 = vst [vmem:[#allocation4 + $0x8] sm:$0xff] %v8728_v53  ;;  %2873 = vmatmul.bf16.vlgmr.msra.gmra.mxu1 %v2784_v24  ;;  %v9657_v24 = vld [vmem:[%s11625_s4] ss:$0 sm:$0xff] }
 0x26f   : > { %4832 = vst [vmem:[#allocation4 + $0x10] sm:$0x3] %v8728_v53  ;;  %v2155_v22 = vpop.f32.mrf.mxu3 }
 0x270   : > { %4833 = vst [vmem:[#allocation4 + $0x18] sm:$0xff] %v8728_v53  ;;  %v2235_v40 = vadd.f32 %v2155_v22, %v9370_v61 }
 0x271   : > { %4834 = vst [vmem:[#allocation4 + $0x20] sm:$0xff] %v8728_v53  ;;  %v2391_v34 = vpop.f32.mrf.mxu0 }
 0x272   : > { %v9636_v9 = vpop.f32.mrf.mxu2  ;;  %4835 = vst [vmem:[#allocation4 + $0x28] sm:$0x3] %v8728_v53  ;;  %v2469_v23 = vadd.f32 %v2389_v15, %v2235_v40  ;;  %v9667_v40 = vld [vmem:[%s11625_s4 + $0x1] ss:$0 sm:$0xff] }
 0x273   : > { %4836 = vst [vmem:[#allocation4 + $0x30] sm:$0xff] %v8728_v53 }
 0x274   : > { %4837 = vst [vmem:[#allocation4 + $0x38] sm:$0xff] %v8728_v53  ;;  %v2503_v22 = vmul.f32 %v9657_v24, %v2469_v23 }
 0x275   : > { %4838 = vst [vmem:[#allocation4 + $0x40] sm:$0x3] %v8728_v53 }
 0x276   : > { %4839 = vst [vmem:[#allocation4 + $0x48] sm:$0xff] %v8728_v53  ;;  %v9686_v36 = vadd.f32 %v9667_v40, %v2503_v22 }
 0x277   : > { %4840 = vst [vmem:[#allocation4 + $0x50] sm:$0xff] %v8728_v53  ;;  %v2157_v61 = vpop.f32.mrf.mxu3 }
 0x278   : > { %4841 = vst [vmem:[#allocation4 + $0x58] sm:$0x3] %v8728_v53  ;;  %v2236_v15 = vadd.f32 %v2157_v61, %v9380_v20  ;;  %v8458_v20 = vld [vmem:[%s11623_s2 + $0xf8] sm:$0xff]  ;;  %v2308_v61 = vpack.c.bf16 %v2286_v4, %v2285_v6  ;;  %v11630_v56 = vmax.f32 %v9686_v36, 0.0 }
 0x279   : > { %4842 = vst [vmem:[#allocation4 + $0x60] sm:$0xff] %v8728_v53  ;;  %v2394_v31 = vpop.f32.mrf.mxu0  ;;  %3438 = vmatpush.bf16.msrb.mxu0 %v8458_v20  ;;  %v2053_v20 = vld [vmem:[#allocation2 + $0x121] sm:$0xff] }
 0x27a   : > { %4843 = vst [vmem:[#allocation4 + $0x68] sm:$0xff] %v8728_v53  ;;  %v9649_v46 = vpop.f32.mrf.mxu2  ;;  %v2470_v23 = vadd.f32 %v2391_v34, %v2236_v15  ;;  %v8457_v15 = vld [vmem:[%s11623_s2 + $0xf0] sm:$0xff] }
 0x27b   : > { %4844 = vst [vmem:[#allocation4 + $0x70] sm:$0x3] %v8728_v53 }
 0x27c   : > { %4845 = vst [vmem:[#allocation4 + $0x78] sm:$0xff] %v8728_v53  ;;  %v2504_v30 = vmul.f32 %v9657_v24, %v2470_v23  ;;  %2199 = vmatmul.bf16.gmra.mxu3 %v2074_v51  ;;  %2433 = vmatmul.bf16.gmra.mxu0 %v2308_v61  ;;  %v2054_v61 = vld [vmem:[#allocation2 + $0x129] sm:$0xff] }
 0x27d   : > { %4846 = vst [vmem:[#allocation4 + $0x80] sm:$0xff] %v8728_v53  ;;  %3439 = vmatpush.bf16.msrb.mxu0 %v8457_v15 }
 0x27e   : > { %4847 = vst [vmem:[#allocation4 + $0x88] sm:$0x3] %v8728_v53  ;;  %v9692_v4 = vadd.f32 %v9667_v40, %v2504_v30  ;;  %v2287_v30 = vld [vmem:[#allocation2 + $0x122] sm:$0xff] }
 0x27f   : > { %4848 = vst [vmem:[#allocation4 + $0x90] sm:$0xff] %v8728_v53  ;;  %v2160_v45 = vpop.f32.mrf.mxu3 }
 0x280   : > { %4849 = vst [vmem:[#allocation4 + $0x98] sm:$0xff] %v8728_v53  ;;  %v11629_v6 = vmax.f32 %v9692_v4, 0.0  ;;  %v2237_v34 = vadd.f32 %v2160_v45, %v9383_v54  ;;  %v8449_v54 = vld [vmem:[%s11623_s2 + $0xb0] sm:$0xff]  ;;  %v11654_v63 = vmax.f32 %v9692_v4, 0.0 }
 0x281   : > { %4850 = vst [vmem:[#allocation4 + $0xa0] sm:$0x3] %v8728_v53  ;;  %v2396_v51 = vpop.f32.mrf.mxu0  ;;  %v2288_v45 = vld [vmem:[#allocation2 + $0x12a] sm:$0xff]  ;;  %3205 = vmatpush.bf16.msrb.mxu3 %v8449_v54 }
 0x282   : > { %4851 = vst [vmem:[#allocation4 + $0xa8] sm:$0xff] %v8728_v53  ;;  %v9682_v39 = vpop.f32.mrf.mxu2  ;;  %v2785_v26 = vpack.c.bf16 %v11629_v6, %v11630_v56  ;;  %v2471_v22 = vadd.f32 %v2394_v31, %v2237_v34  ;;  %v2075_v56 = vpack.c.bf16 %v2054_v61, %v2053_v20  ;;  %v2309_v14 = vpack.c.bf16 %v2288_v45, %v2287_v30 }
 0x283   : > { %4852 = vst [vmem:[#allocation4 + $0xb0] sm:$0xff] %v8728_v53 }
 0x284   : > { %4853 = vst [vmem:[#allocation4 + $0xb8] sm:$0x3] %v8728_v53  ;;  %2878 = vmatmul.bf16.gmra.mxu1 %v2785_v26  ;;  %v2505_v34 = vmul.f32 %v9657_v24, %v2471_v22 }
 0x285   : > { %4854 = vst [vmem:[#allocation4 + $0xc0] sm:$0xff] %v8728_v53 }
 0x286   : > { %4855 = vst [vmem:[#allocation4 + $0xc8] sm:$0xff] %v8728_v53  ;;  %v2539_v54 = vadd.f32 %v9667_v40, %v2505_v34  ;;  %v2055_v34 = vld [vmem:[#allocation2 + $0x139] sm:$0xff] }
 0x287   : > { %4856 = vst [vmem:[#allocation4 + $0xd0] sm:$0x3] %v8728_v53  ;;  %v2162_v31 = vpop.f32.mrf.mxu3 }
 0x288   : > { %4857 = vst [vmem:[#allocation4 + $0xd8] sm:$0xff] %v8728_v53  ;;  %v2238_v26 = vadd.f32 %v2162_v31, %v9392_v50  ;;  %v2571_v20 = vmax.f32 %v2539_v54, 0.0  ;;  %v2289_v54 = vld [vmem:[#allocation2 + $0x13a] sm:$0xff] }
 0x289   : > { %4858 = vst [vmem:[#allocation4 + $0xe0] sm:$0xff] %v8728_v53  ;;  %v2399_v6 = vpop.f32.mrf.mxu0 }
 0x28a   : > { %4859 = vst [vmem:[#allocation4 + $0xe8] sm:$0x3] %v8728_v53  ;;  %v9714_v23 = vpop.f32.mrf.mxu2  ;;  %v2472_v3 = vadd.f32 %v2396_v51, %v2238_v26 }
 0x28b   : > { %4860 = vst [vmem:[#allocation4 + $0xf0] sm:$0xff] %v8728_v53 }
 0x28c   : > { %4861 = vst [vmem:[#allocation4 + $0xf8] sm:$0xff] %v8728_v53  ;;  %v2506_v15 = vmul.f32 %v9657_v24, %v2472_v3  ;;  %2204 = vmatmul.bf16.gmra.mxu3 %v2075_v56  ;;  %2438 = vmatmul.bf16.gmra.mxu0 %v2309_v14 }
 0x28d   : > { %4862 = vst [vmem:[#allocation4 + $0x100] sm:$0x3] %v8728_v53 }
 0x28e   : > { %4863 = vst [vmem:[#allocation4 + $0x108] sm:$0xff] %v8728_v53  ;;  %v2540_v50 = vadd.f32 %v9667_v40, %v2506_v15  ;;  %v2290_v15 = vld [vmem:[#allocation2 + $0x142] sm:$0xff] }
 0x28f   : > { %4864 = vst [vmem:[#allocation4 + $0x110] sm:$0xff] %v8728_v53  ;;  %v2165_v51 = vpop.f32.mrf.mxu3 }
 0x290   : > { %4865 = vst [vmem:[#allocation4 + $0x118] sm:$0x3] %v8728_v53  ;;  %v2572_v61 = vmax.f32 %v2540_v50, 0.0  ;;  %v2239_v31 = vadd.f32 %v2165_v51, %v9398_v33  ;;  %v8465_v33 = vld [vmem:[%s11623_s2 + $0x130] sm:$0xff] }
 0x291   : > { %4866 = vst [vmem:[#allocation4 + $0x120] sm:$0xff] %v8728_v53  ;;  %v2401_v3 = vpop.f32.mrf.mxu0  ;;  %3673 = vmatpush.bf16.msrb.mxu1 %v8465_v33 }
 0x292   : > { %4867 = vst [vmem:[#allocation4 + $0x128] sm:$0xff] %v8728_v53  ;;  %v9731_v22 = vpop.f32.mrf.mxu2  ;;  %v2473_v56 = vadd.f32 %v2399_v6, %v2239_v31  ;;  %v2786_v30 = vpack.c.bf16 %v2572_v61, %v2571_v20  ;;  %v2056_v6 = vld [vmem:[#allocation2 + $0x141] sm:$0xff] }
 0x293   : > { %4868 = vst [vmem:[#allocation4 + $0x130] sm:$0x3] %v8728_v53  ;;  %v2076_v31 = vpack.c.bf16 %v2056_v6, %v2055_v34 }
 0x294   : > { %4869 = vst [vmem:[#allocation4 + $0x138] sm:$0xff] %v8728_v53  ;;  %v2507_v14 = vmul.f32 %v9657_v24, %v2473_v56  ;;  %2883 = vmatmul.bf16.gmra.mxu1 %v2786_v30  ;;  %v11653_v30 = vmax.f32 %v9686_v36, 0.0 }
 0x295   : > { %4870 = vst [vmem:[#allocation4 + $0x140] sm:$0xff] %v8728_v53 }
 0x296   : > { %4871 = vst [vmem:[#allocation4 + $0x148] sm:$0x3] %v8728_v53  ;;  %v2541_v45 = vadd.f32 %v9667_v40, %v2507_v14 }
 0x297   : > { %4872 = vst [vmem:[#allocation4 + $0x150] sm:$0xff] %v8728_v53  ;;  %v2167_v26 = vpop.f32.mrf.mxu3 }
 0x298   : > { %4873 = vst [vmem:[#allocation4 + $0x158] sm:$0xff] %v8728_v53  ;;  %v2240_v50 = vadd.f32 %v2167_v26, %v9404_v19  ;;  %v2573_v14 = vmax.f32 %v2541_v45, 0.0 }
 0x299   : > { %11652 = vst [vmem:[#allocation26_spill] sm:$0xff] %v9731_v22  ;;  %v2404_v51 = vpop.f32.mrf.mxu0  ;;  %v2310_v22 = vpack.c.bf16 %v2290_v15, %v2289_v54  ;;  %v2057_v54 = vld [vmem:[#allocation2 + $0x151] sm:$0xff]  ;;  %v2058_v15 = vld [vmem:[#allocation2 + $0x159] sm:$0xff] }
 0x29a   : > { %4874 = vst [vmem:[#allocation4 + $0x160] sm:$0x3] %v8728_v53  ;;  %v9750_v56 = vpop.f32.mrf.mxu2  ;;  %v2474_v57 = vadd.f32 %v2401_v3, %v2240_v50 }
 0x29b   : > { %4875 = vst [vmem:[#allocation4 + $0x168] sm:$0xff] %v8728_v53 }
 0x29c   : > { %4876 = vst [vmem:[#allocation4 + $0x170] sm:$0xff] %v8728_v53  ;;  %v2508_v33 = vmul.f32 %v9657_v24, %v2474_v57  ;;  %2209 = vmatmul.bf16.gmra.mxu3 %v2076_v31  ;;  %2443 = vmatmul.bf16.gmra.mxu0 %v2310_v22  ;;  %v8448_v22 = vld [vmem:[%s11623_s2 + $0xa8] sm:$0xff]  ;;  %v2292_v31 = vld [vmem:[#allocation2 + $0x15a] sm:$0xff] }
 0x29d   : > { %4877 = vst [vmem:[#allocation4 + $0x178] sm:$0x3] %v8728_v53  ;;  %3206 = vmatpush.bf16.msrb.mxu3 %v8448_v22 }
 0x29e   : > { %4878 = vst [vmem:[#allocation4 + $0x180] sm:$0xff] %v8728_v53  ;;  %v2542_v19 = vadd.f32 %v9667_v40, %v2508_v33 }
 0x29f   : > { %4879 = vst [vmem:[#allocation4 + $0x188] sm:$0xff] %v8728_v53 }
 0x2a0   : > { %4880 = vst [vmem:[#allocation4 + $0x190] sm:$0x3] %v8728_v53  ;;  %v2574_v34 = vmax.f32 %v2542_v19, 0.0  ;;  %v2077_v19 = vpack.c.bf16 %v2058_v15, %v2057_v54 }
 0x2a1   : > { %4881 = vst [vmem:[#allocation4 + $0x198] sm:$0xff] %v8728_v53  ;;  %v2406_v6 = vpop.f32.mrf.mxu0 }
 0x2a2   : > { %4882 = vst [vmem:[#allocation4 + $0x1a0] sm:$0xff] %v8728_v53  ;;  %v2787_v4 = vpack.c.bf16 %v2574_v34, %v2573_v14 }
 0x2a3   : > { %4883 = vst [vmem:[#allocation4 + $0x1a8] sm:$0x3] %v8728_v53  ;;  %v2170_v53 = vpop.f32.mrf.mxu3 }
 0x2a4   : > { %2656 = vst [vmem:[#allocation3 + $0x19] sm:$0xff] %v11653_v30  ;;  %v2241_v36 = vadd.f32 %v2170_v53, %v9407_v60  ;;  %2888 = vmatmul.bf16.gmra.mxu1 %v2787_v4  ;;  %v8456_v60 = vld [vmem:[%s11623_s2 + $0xe8] sm:$0xff] }
 0x2a5   : > { %2657 = vst [vmem:[#allocation3 + $0x21] sm:$0xff] %v11654_v63  ;;  %3440 = vmatpush.bf16.msrb.mxu0 %v8456_v60 }
 0x2a6   : > { %2658 = vst [vmem:[#allocation3 + $0x31] sm:$0xff] %v2571_v20  ;;  %v2475_v26 = vadd.f32 %v2404_v51, %v2241_v36  ;;  %v9761_v20 = vpop.f32.mrf.mxu2  ;;  %v2291_v51 = vld [vmem:[#allocation2 + $0x152] sm:$0xff] }
 0x2a7   : > { %2659 = vst [vmem:[#allocation3 + $0x39] sm:$0xff] %v2572_v61 }
 0x2a8   : > { %2660 = vst [vmem:[#allocation3 + $0x49] sm:$0xff] %v2573_v14  ;;  %v2509_v57 = vmul.f32 %v9657_v24, %v2475_v26 }
 0x2a9   : > { %2661 = vst [vmem:[#allocation3 + $0x51] sm:$0xff] %v2574_v34  ;;  %v2409_v33 = vpop.f32.mrf.mxu0  ;;  %v2311_v34 = vpack.c.bf16 %v2292_v31, %v2291_v51  ;;  %v8464_v51 = vld [vmem:[%s11623_s2 + $0x128] sm:$0xff] }
 0x2aa   : > { %v2543_v61 = vadd.f32 %v9667_v40, %v2509_v57  ;;  %3674 = vmatpush.bf16.msrb.mxu1 %v8464_v51 }
 0x2ab   : > { %v2690_v45 = vld [vmem:[#allocation3 + $0x18] sm:$0xff]  ;;  %v2172_v50 = vpop.f32.mrf.mxu3 }
 0x2ac   : > { %v2691_v3 = vld [vmem:[#allocation3 + $0x20] sm:$0xff]  ;;  %v2575_v30 = vmax.f32 %v2543_v61, 0.0  ;;  %v2242_v14 = vadd.f32 %v2172_v50, %v9413_v18  ;;  %2214 = vmatmul.bf16.gmra.mxu3 %v2077_v19  ;;  %2448 = vmatmul.bf16.gmra.mxu0 %v2311_v34 }
 0x2ad   : > { %v9759_v63 = vpack.c.bf16 %v2691_v3, %v2690_v45  ;;  %v2692_v57 = vld [vmem:[#allocation3 + $0x30] sm:$0xff]  ;;  %v2060_v19 = vld [vmem:[#allocation2 + $0x171] sm:$0xff] }
 0x2ae   : > { %2662 = vst [vmem:[#allocation3 + $0x61] sm:$0xff] %v2575_v30  ;;  %v2476_v53 = vadd.f32 %v2406_v6, %v2242_v14  ;;  %v9774_v45 = vpop.f32.mrf.mxu2  ;;  %v2693_v3 = vld [vmem:[#allocation3 + $0x38] sm:$0xff]  ;;  %v1775_v6 = vadd.f32 %v9418_v12, %v9426_v27  ;;  %v2294_v27 = vld [vmem:[#allocation2 + $0x172] sm:$0xff] }
 0x2af   : > { %3015 = vmatmul.bf16.gmra.mxu2 %v9759_v63  ;;  %v9778_v18 = vpack.c.bf16 %v2693_v3, %v2692_v57  ;;  %v2059_v14 = vld [vmem:[#allocation2 + $0x169] sm:$0xff] }
 0x2b0   : > { %v2510_v36 = vmul.f32 %v9657_v24, %v2476_v53  ;;  %v2293_v12 = vld [vmem:[#allocation2 + $0x16a] sm:$0xff]  ;;  %v2078_v3 = vpack.c.bf16 %v2060_v19, %v2059_v14  ;;  %v8447_v19 = vld [vmem:[%s11623_s2 + $0xa0] sm:$0xff] }
 0x2b1   : > { %v2411_v61 = vpop.f32.mrf.mxu0  ;;  %3207 = vmatpush.bf16.msrb.mxu3 %v8447_v19 }
 0x2b2   : > { %v2544_v26 = vadd.f32 %v9667_v40, %v2510_v36 }
 0x2b3   : > { %v2175_v4 = vpop.f32.mrf.mxu3 }
 0x2b4   : > { %v2576_v22 = vmax.f32 %v2544_v26, 0.0  ;;  %v2243_v60 = vadd.f32 %v2175_v4, %v9423_v55  ;;  %v2010_v55 = vadd.f32 %v9491_v1, %v1775_v6  ;;  %v2312_v4 = vpack.c.bf16 %v2294_v27, %v2293_v12  ;;  %v349_v12 = vld [vmem:[%s8815_s26 + $0xd4] sm:$0x1]  ;;  %v2061_v27 = vld [vmem:[#allocation2 + $0x181] sm:$0xff] }
 0x2b5   : > { %v2011_v1 = vadd.f32 %v9501_v42, %v9435_v10 }
 0x2b6   : > { %2663 = vst [vmem:[#allocation3 + $0x69] sm:$0xff] %v2576_v22  ;;  %v2477_v54 = vadd.f32 %v2409_v33, %v2243_v60  ;;  %v2788_v15 = vpack.c.bf16 %v2576_v22, %v2575_v30  ;;  %v9789_v30 = vpop.f32.mrf.mxu2  ;;  %v2695_v22 = vld [vmem:[#allocation3 + $0x50] sm:$0xff] }
 0x2b8   : > { %v2511_v50 = vmul.f32 %v9657_v24, %v2477_v54  ;;  %2893 = vmatmul.bf16.gmra.mxu1 %v2788_v15  ;;  %v2694_v54 = vld [vmem:[#allocation3 + $0x48] sm:$0xff] }
 0x2b9   : > { %v2414_v36 = vpop.f32.mrf.mxu0  ;;  %v9795_v51 = vpack.c.bf16 %v2695_v22, %v2694_v54 }
 0x2ba   : > { %v2545_v31 = vadd.f32 %v9667_v40, %v2511_v50 }
 0x2bb   : > { %v2177_v53 = vpop.f32.mrf.mxu3 }
 0x2bc   : > { %v2577_v33 = vmax.f32 %v2545_v31, 0.0  ;;  %v2244_v34 = vadd.f32 %v2177_v53, %v2010_v55  ;;  %2219 = vmatmul.bf16.gmra.mxu3 %v2078_v3  ;;  %2453 = vmatmul.bf16.gmra.mxu0 %v2312_v4  ;;  %v8455_v53 = vld [vmem:[%s11623_s2 + $0xe0] sm:$0xff] }
 0x2bd   : > { %v2295_v3 = vld [vmem:[#allocation2 + $0x182] sm:$0xff]  ;;  %3441 = vmatpush.bf16.msrb.mxu0 %v8455_v53 }
 0x2be   : > { %2664 = vst [vmem:[#allocation3 + $0x79] sm:$0xff] %v2577_v33  ;;  %v2478_v26 = vadd.f32 %v2411_v61, %v2244_v34  ;;  %v1777_v61 = vadd.f32 %v9433_v35, %v9439_v59  ;;  %v9799_v31 = vpop.f32.mrf.mxu2  ;;  %v403_v34 = vunpack.c.l.bf16 %v349_v12  ;;  %v1779_v12 = vadd.f32 %v9442_v17, %v9447_v41  ;;  %v8454_v17 = vld [vmem:[%s11623_s2 + $0xd8] sm:$0xff] }
 0x2bf   : > { %3020 = vmatmul.bf16.gmra.mxu2 %v9778_v18 }
 0x2c0   : > { %v2512_v57 = vmul.f32 %v9657_v24, %v2478_v26  ;;  %v2012_v35 = vadd.f32 %v9511_v62, %v1777_v61  ;;  %v2296_v26 = vld [vmem:[#allocation2 + $0x18a] sm:$0xff]  ;;  %457 = vst [vmem:[#allocation2 + $0x1a8] sm:$0x3] %v403_v34  ;;  %v2014_v41 = vadd.f32 %v9539_v11, %v1779_v12 }
 0x2c1   : > { %v2416_v55 = vpop.f32.mrf.mxu0  ;;  %3442 = vmatpush.bf16.msrb.mxu0 %v8454_v17  ;;  %v8453_v11 = vld [vmem:[%s11623_s2 + $0xd0] sm:$0xff] }
 0x2c2   : > { %v2546_v60 = vadd.f32 %v9667_v40, %v2512_v57 }
 0x2c3   : > { %v2180_v6 = vpop.f32.mrf.mxu3 }
 0x2c4   : > { %v2578_v15 = vmax.f32 %v2546_v60, 0.0  ;;  %v2245_v50 = vadd.f32 %v2180_v6, %v2011_v1  ;;  %v2313_v6 = vpack.c.bf16 %v2296_v26, %v2295_v3 }
 0x2c5   : > { %3443 = vmatpush.bf16.msrb.mxu0 %v8453_v11 }
 0x2c6   : > { %2665 = vst [vmem:[#allocation3 + $0x81] sm:$0xff] %v2578_v15  ;;  %v2479_v14 = vadd.f32 %v2414_v36, %v2245_v50  ;;  %v2789_v10 = vpack.c.bf16 %v2578_v15, %v2577_v33  ;;  %v2062_v33 = vld [vmem:[#allocation2 + $0x189] sm:$0xff]  ;;  %v9812_v54 = vpop.f32.mrf.mxu2  ;;  %v2013_v15 = vadd.f32 %v9524_v5, %v9444_v8  ;;  %v2697_v50 = vld [vmem:[#allocation3 + $0x68] sm:$0xff]  ;;  %v8463_v8 = vld [vmem:[%s11623_s2 + $0x120] sm:$0xff] }
 0x2c7   : > { %v2079_v22 = vpack.c.bf16 %v2062_v33, %v2061_v27  ;;  %v8446_v5 = vld [vmem:[%s11623_s2 + $0x98] sm:$0xff]  ;;  %v2064_v3 = vld [vmem:[#allocation2 + $0x1a1] sm:$0xff]  ;;  %3675 = vmatpush.bf16.msrb.mxu1 %v8463_v8 }
 0x2c8   : > { %v2513_v42 = vmul.f32 %v9657_v24, %v2479_v14  ;;  %2898 = vmatmul.bf16.gmra.mxu1 %v2789_v10  ;;  %v2696_v10 = vld [vmem:[#allocation3 + $0x60] sm:$0xff]  ;;  %3208 = vmatpush.bf16.msrb.mxu3 %v8446_v5 }
 0x2c9   : > { %v2419_v1 = vpop.f32.mrf.mxu0  ;;  %v9818_v53 = vpack.c.bf16 %v2697_v50, %v2696_v10  ;;  %v8452_v10 = vld [vmem:[%s11623_s2 + $0xc8] sm:$0xff] }
 0x2ca   : > { %v2547_v59 = vadd.f32 %v9667_v40, %v2513_v42  ;;  %3444 = vmatpush.bf16.msrb.mxu0 %v8452_v10 }
 0x2cb   : > { %v2182_v36 = vpop.f32.mrf.mxu3 }
 0x2cc   : > { %v2579_v4 = vmax.f32 %v2547_v59, 0.0  ;;  %v2246_v57 = vadd.f32 %v2182_v36, %v2012_v35  ;;  %2224 = vmatmul.bf16.gmra.mxu3 %v2079_v22  ;;  %2458 = vmatmul.bf16.gmra.mxu0 %v2313_v6  ;;  %v2063_v36 = vld [vmem:[#allocation2 + $0x199] sm:$0xff] }
 0x2ce   : > { %2666 = vst [vmem:[#allocation3 + $0x91] sm:$0xff] %v2579_v4  ;;  %v2480_v60 = vadd.f32 %v2416_v55, %v2246_v57  ;;  %v9834_v33 = vpop.f32.mrf.mxu2  ;;  %v2298_v57 = vld [vmem:[#allocation2 + $0x1a2] sm:$0xff] }
 0x2cf   : > { %3025 = vmatmul.bf16.gmra.mxu2 %v9795_v51 }
 0x2d0   : > { %v2514_v62 = vmul.f32 %v9657_v24, %v2480_v60 }
 0x2d1   : > { %v2421_v55 = vpop.f32.mrf.mxu0 }
 0x2d2   : > { %v2548_v61 = vadd.f32 %v9667_v40, %v2514_v62  ;;  %v2080_v62 = vpack.c.bf16 %v2064_v3, %v2063_v36 }
 0x2d3   : > { %v2185_v14 = vpop.f32.mrf.mxu3 }
 0x2d4   : > { %v2580_v42 = vmax.f32 %v2548_v61, 0.0  ;;  %v2247_v19 = vadd.f32 %v2185_v14, %v2013_v15  ;;  %v8444_v61 = vld [vmem:[%s11623_s2 + $0x88] sm:$0xff] }
 0x2d6   : > { %2667 = vst [vmem:[#allocation3 + $0x99] sm:$0xff] %v2580_v42  ;;  %v2481_v35 = vadd.f32 %v2419_v1, %v2247_v19  ;;  %v2790_v59 = vpack.c.bf16 %v2580_v42, %v2579_v4  ;;  %v2297_v4 = vld [vmem:[#allocation2 + $0x19a] sm:$0xff]  ;;  %v8445_v1 = vld [vmem:[%s11623_s2 + $0x90] sm:$0xff]  ;;  %v2015_v42 = vadd.f32 %v9560_v47, %v9455_v0  ;;  %v9861_v47 = vpop.f32.mrf.mxu1 }
 0x2d7   : > { %v2314_v50 = vpack.c.bf16 %v2298_v57, %v2297_v4  ;;  %3209 = vmatpush.bf16.msrb.mxu3 %v8445_v1  ;;  %v2699_v19 = vld [vmem:[#allocation3 + $0x80] sm:$0xff]  ;;  %v8451_v0 = vld [vmem:[%s11623_s2 + $0xc0] sm:$0xff] }
 0x2d8   : > { %v2515_v27 = vmul.f32 %v9657_v24, %v2481_v35  ;;  %2903 = vmatmul.bf16.gmra.mxu1 %v2790_v59  ;;  %v8443_v35 = vld [vmem:[%s11623_s2 + $0x80] sm:$0xff]  ;;  %v9856_v59 = vpop.f32.mrf.mxu2  ;;  %3445 = vmatpush.bf16.msrb.mxu0 %v8451_v0  ;;  %v3091_v1 = vld [vmem:[#allocation3 + $0x2] sm:$0xff] }
 0x2d9   : > { %v2424_v6 = vpop.f32.mrf.mxu0 }
 0x2da   : > { %v2549_v34 = vadd.f32 %v9667_v40, %v2515_v27  ;;  %v2698_v27 = vld [vmem:[#allocation3 + $0x78] sm:$0xff] }
 0x2db   : > { %v2187_v26 = vpop.f32.mrf.mxu3  ;;  %3210 = vmatpush.bf16.msrb.mxu3 %v8444_v61  ;;  %v9863_v17 = vpack.c.bf16 %v2699_v19, %v2698_v27 }
 0x2dc   : > { %v2581_v22 = vmax.f32 %v2549_v34, 0.0  ;;  %v2248_v60 = vadd.f32 %v2187_v26, %v2014_v41  ;;  %2229 = vmatmul.bf16.gmra.mxu3 %v2080_v62  ;;  %2463 = vmatmul.bf16.gmra.mxu0 %v2314_v50  ;;  %v1781_v34 = vadd.f32 %v9453_v43, %v9461_v38 }
 0x2dd   : > { %v2701_v10 = vld [vmem:[#allocation3 + $0x98] sm:$0xff] }
 0x2de   : > { %2668 = vst [vmem:[#allocation3 + $0xa9] sm:$0xff] %v2581_v22  ;;  %v2482_v15 = vadd.f32 %v2421_v55, %v2248_v60  ;;  %v2016_v4 = vadd.f32 %v9575_v52, %v1781_v34  ;;  %v3092_v60 = vld [vmem:[#allocation3 + $0xa] sm:$0xff]  ;;  %v2017_v52 = vadd.f32 %v9593_v58, %v9466_v29 }
 0x2df   : > { %3030 = vmatmul.bf16.gmra.mxu2 %v9818_v53  ;;  %3211 = vmatpush.bf16.msrb.mxu3 %v8443_v35  ;;  %v8462_v58 = vld [vmem:[%s11623_s2 + $0x118] sm:$0xff] }
 0x2e0   : > { %v2516_v14 = vmul.f32 %v9657_v24, %v2482_v15  ;;  %v3011_v43 = vpop.f32.mrf.mxu2  ;;  %3676 = vmatpush.bf16.msrb.mxu1 %v8462_v58 }
 0x2e1   : > { %v2426_v41 = vpop.f32.mrf.mxu0 }
 0x2e2   : > { %v2550_v55 = vadd.f32 %v9667_v40, %v2516_v14 }
 0x2e3   : > { %v2190_v12 = vpop.f32.mrf.mxu3 }
 0x2e4   : > { %v2582_v8 = vmax.f32 %v2550_v55, 0.0  ;;  %v2249_v5 = vadd.f32 %v2190_v12, %v2015_v42  ;;  %v2700_v55 = vld [vmem:[#allocation3 + $0x90] sm:$0xff] }
 0x2e5   : > { %v9878_v27 = vpack.c.bf16 %v2701_v10, %v2700_v55 }
 0x2e6   : > { %2669 = vst [vmem:[#allocation3 + $0xb1] sm:$0xff] %v2582_v8  ;;  %v2483_v36 = vadd.f32 %v2424_v6, %v2249_v5  ;;  %v2791_v3 = vpack.c.bf16 %v2582_v8, %v2581_v22  ;;  %v3123_v6 = vpack.c.bf16 %v3092_v60, %v3091_v1  ;;  %v1783_v5 = vadd.f32 %v9464_v16, %v9469_v21 }
 0x2e8   : > { %v2517_v26 = vmul.f32 %v9657_v24, %v2483_v36  ;;  %2908 = vmatmul.bf16.gmra.mxu1 %v2791_v3  ;;  %v2018_v34 = vadd.f32 %v9608_v37, %v1783_v5 }
 0x2e9   : > { %v2429_v38 = vpop.f32.mrf.mxu0 }
 0x2ea   : > { %v2551_v57 = vadd.f32 %v9667_v40, %v2517_v26  ;;  %v3093_v26 = vld [vmem:[#allocation3 + $0x1a] sm:$0xff] }
 0x2eb   : > { %v2192_v11 = vpop.f32.mrf.mxu3  ;;  %v2874_v22 = vpop.f32.mrf.mxu1 }
 0x2ec   : > { %v2583_v62 = vmax.f32 %v2551_v57, 0.0  ;;  %v2250_v15 = vadd.f32 %v2192_v11, %v2016_v4  ;;  %v9871_v61 = vadd.f32 %v3011_v43, %v2874_v22  ;;  %3212 = vmatmul.bf16.vlgmr.msrb.gmra.mxu3 %v3123_v6  ;;  %3446 = vmatmul.bf16.vlgmr.msrb.gmra.mxu0 %v9759_v63  ;;  %v8474_v63 = vld [vmem:[%s11623_s2 + $0x178] sm:$0xff]  ;;  %v2019_v43 = vadd.f32 %v9622_v28, %v9477_v48 }
 0x2ed   : > { %3906 = vmatpush.bf16.msrb.mxu2 %v8474_v63  ;;  %v3094_v4 = vld [vmem:[#allocation3 + $0x22] sm:$0xff]  ;;  %v2703_v37 = vld [vmem:[#allocation3 + $0xb0] sm:$0xff] }
 0x2ee   : > { %2670 = vst [vmem:[#allocation3 + $0xc1] sm:$0xff] %v2583_v62  ;;  %v2484_v50 = vadd.f32 %v2426_v41, %v2250_v15  ;;  %v9894_v11 = vpack.c.bf16 %v3094_v4, %v3093_v26 }
 0x2ef   : > { %3035 = vmatmul.bf16.gmra.mxu2 %v9863_v17 }
 0x2f0   : > { %v2518_v14 = vmul.f32 %v9657_v24, %v2484_v50 }
 0x2f1   : > { %v2431_v8 = vpop.f32.mrf.mxu0 }
 0x2f2   : > { %v2552_v42 = vadd.f32 %v9667_v40, %v2518_v14 }
 0x2f3   : > { %v2195_v19 = vpop.f32.mrf.mxu3  ;;  %v9892_v57 = vpop.f32.mrf.mxu1 }
 0x2f4   : > { %v2584_v12 = vmax.f32 %v2552_v42, 0.0  ;;  %v2251_v35 = vadd.f32 %v2195_v19, %v2017_v52  ;;  %v1785_v42 = vadd.f32 %v9475_v2, %v9483_v44 }
 0x2f6   : > { %2671 = vst [vmem:[#allocation3 + $0xc9] sm:$0xff] %v2584_v12  ;;  %v2485_v0 = vadd.f32 %v2429_v38, %v2251_v35  ;;  %v2792_v41 = vpack.c.bf16 %v2584_v12, %v2583_v62  ;;  %v2702_v38 = vld [vmem:[#allocation3 + $0xa8] sm:$0xff]  ;;  %v2020_v28 = vadd.f32 %v9636_v9, %v1785_v42  ;;  %v3095_v35 = vld [vmem:[#allocation3 + $0x32] sm:$0xff]  ;;  %v2021_v9 = vadd.f32 %v9649_v46, %v9488_v7  ;;  %v8461_v46 = vld [vmem:[%s11623_s2 + $0x110] sm:$0xff] }
 0x2f7   : > { %v9902_v50 = vpack.c.bf16 %v2703_v37, %v2702_v38  ;;  %3677 = vmatpush.bf16.msrb.mxu1 %v8461_v46 }
 0x2f8   : > { %v2519_v29 = vmul.f32 %v9657_v24, %v2485_v0  ;;  %2913 = vmatmul.bf16.gmra.mxu1 %v2792_v41 }
 0x2f9   : > { %v2434_v60 = vpop.f32.mrf.mxu0 }
 0x2fa   : > { %v2553_v16 = vadd.f32 %v9667_v40, %v2519_v29 }
 0x2fb   : > { %v2197_v21 = vpop.f32.mrf.mxu3 }
 0x2fc   : > { %v2585_v36 = vmax.f32 %v2553_v16, 0.0  ;;  %v2252_v3 = vadd.f32 %v2197_v21, %v2018_v34  ;;  %3217 = vmatmul.bf16.gmra.mxu3 %v9894_v11  ;;  %3451 = vmatmul.bf16.gmra.mxu0 %v9778_v18  ;;  %v2704_v16 = vld [vmem:[#allocation3 + $0xc0] sm:$0xff] }
 0x2fd   : > { %v2705_v63 = vld [vmem:[#allocation3 + $0xc8] sm:$0xff] }
 0x2fe   : > { %2672 = vst [vmem:[#allocation3 + $0xd9] sm:$0xff] %v2585_v36  ;;  %v2486_v1 = vadd.f32 %v2431_v8, %v2252_v3  ;;  %v3096_v8 = vld [vmem:[#allocation3 + $0x3a] sm:$0xff] }
 0x2ff   : > { %3040 = vmatmul.bf16.gmra.mxu2 %v9878_v27  ;;  %v9914_v29 = vpack.c.bf16 %v3096_v8, %v3095_v35 }
 0x300   : > { %v2520_v62 = vmul.f32 %v9657_v24, %v2486_v1  ;;  %v1787_v1 = vadd.f32 %v9486_v13, %v9493_v25  ;;  %v3097_v13 = vld [vmem:[#allocation3 + $0x4a] sm:$0xff]  ;;  %v3098_v25 = vld [vmem:[#allocation3 + $0x52] sm:$0xff] }
 0x301   : > { %v9904_v52 = vpop.f32.mrf.mxu1  ;;  %v2436_v55 = vpop.f32.mrf.mxu0 }
 0x302   : > { %v2554_v15 = vadd.f32 %v9667_v40, %v2520_v62  ;;  %v2022_v37 = vadd.f32 %v9682_v39, %v1787_v1  ;;  %v3100_v1 = vld [vmem:[#allocation3 + $0x6a] sm:$0xff] }
 0x303   : > { %v2200_v22 = vpop.f32.mrf.mxu3 }
 0x304   : > { %v2586_v6 = vmax.f32 %v2554_v15, 0.0  ;;  %v2253_v14 = vadd.f32 %v2200_v22, %v2019_v43 }
 0x306   : > { %2673 = vst [vmem:[#allocation3 + $0xe1] sm:$0xff] %v2586_v6  ;;  %v2793_v10 = vpack.c.bf16 %v2586_v6, %v2585_v36  ;;  %v2487_v19 = vadd.f32 %v2434_v60, %v2253_v14  ;;  %v9922_v36 = vpack.c.bf16 %v2705_v63, %v2704_v16  ;;  %v8473_v14 = vld [vmem:[%s11623_s2 + $0x170] sm:$0xff] }
 0x307   : > { %3907 = vmatpush.bf16.msrb.mxu2 %v8473_v14 }
 0x308   : > { %2918 = vmatmul.bf16.gmra.mxu1 %v2793_v10  ;;  %v2521_v48 = vmul.f32 %v9657_v24, %v2487_v19  ;;  %v9940_v19 = vpack.c.bf16 %v3098_v25, %v3097_v13  ;;  %v11657_v13 = vld [vmem:[#allocation13_spill] sm:$0xff] }
 0x309   : > { %v9912_v41 = vpop.f32.mrf.mxu1  ;;  %v2439_v44 = vpop.f32.mrf.mxu0 }
 0x30a   : > { %v2555_v18 = vadd.f32 %v9667_v40, %v2521_v48  ;;  %v2023_v48 = vadd.f32 %v9714_v23, %v9503_v32  ;;  %v11656_v23 = vld [vmem:[#allocation26_spill] sm:$0xff] }
 0x30b   : > { %v2202_v12 = vpop.f32.mrf.mxu3 }
 0x30c   : > { %v2587_v5 = vmax.f32 %v2555_v18, 0.0  ;;  %v2254_v0 = vadd.f32 %v2202_v12, %v2020_v28  ;;  %3222 = vmatmul.bf16.gmra.mxu3 %v9914_v29  ;;  %3456 = vmatmul.bf16.gmra.mxu0 %v9795_v51  ;;  %v9948_v18 = vpop.f32.mrf.mxu2  ;;  %v2706_v12 = vld [vmem:[#allocation3 + $0xd8] sm:$0xff] }
 0x30e   : > { %2674 = vst [vmem:[#allocation3 + $0xf1] sm:$0xff] %v2587_v5  ;;  %v2488_v2 = vadd.f32 %v2436_v55, %v2254_v0  ;;  %v2707_v55 = vld [vmem:[#allocation3 + $0xe0] sm:$0xff] }
 0x30f   : > { %3045 = vmatmul.bf16.gmra.mxu2 %v9902_v50  ;;  %v9950_v8 = vpack.c.bf16 %v2707_v55, %v2706_v12  ;;  %v11659_v12 = vld [vmem:[#allocation12_spill] sm:$0xff] }
 0x310   : > { %v2522_v58 = vmul.f32 %v9657_v24, %v2488_v2 }
 0x311   : > { %v9924_v4 = vpop.f32.mrf.mxu1  ;;  %v2441_v62 = vpop.f32.mrf.mxu0 }
 0x312   : > { %v2556_v34 = vadd.f32 %v9667_v40, %v2522_v58 }
 0x313   : > { %v2205_v21 = vpop.f32.mrf.mxu3 }
 0x314   : > { %v2588_v3 = vmax.f32 %v2556_v34, 0.0  ;;  %v2255_v26 = vadd.f32 %v2205_v21, %v2021_v9 }
 0x316   : > { %2675 = vst [vmem:[#allocation3 + $0xf9] sm:$0xff] %v2588_v3  ;;  %v2489_v60 = vadd.f32 %v2439_v44, %v2255_v26  ;;  %v2794_v51 = vpack.c.bf16 %v2588_v3, %v2587_v5  ;;  %v11655_v44 = vld [vmem:[#allocation11_spill] sm:$0xff]  ;;  %v3099_v26 = vld [vmem:[#allocation3 + $0x62] sm:$0xff] }
 0x317   : > { %v1789_v58 = vadd.f32 %v11655_v44, %v9509_v49 }
 0x318   : > { %v2523_v7 = vmul.f32 %v9657_v24, %v2489_v60  ;;  %2923 = vmatmul.bf16.gmra.mxu1 %v2794_v51 }
 0x319   : > { %v9935_v22 = vpop.f32.mrf.mxu1  ;;  %v2444_v42 = vpop.f32.mrf.mxu0  ;;  %v2024_v34 = vadd.f32 %v11656_v23, %v1789_v58 }
 0x31a   : > { %v2557_v15 = vadd.f32 %v9667_v40, %v2523_v7 }
 0x31b   : > { %v2207_v43 = vpop.f32.mrf.mxu3 }
 0x31c   : > { %v2589_v38 = vmax.f32 %v2557_v15, 0.0  ;;  %v2256_v6 = vadd.f32 %v2207_v43, %v2022_v37  ;;  %3227 = vmatmul.bf16.gmra.mxu3 %v9940_v19  ;;  %3461 = vmatmul.bf16.gmra.mxu0 %v9818_v53  ;;  %v9965_v37 = vpack.c.bf16 %v3100_v1, %v3099_v26  ;;  %v11660_v26 = vld [vmem:[#allocation8_spill] sm:$0xff] }
 0x31d   : > { %v2709_v43 = vld [vmem:[#allocation3 + $0xf8] sm:$0xff] }
 0x31e   : > { %2676 = vst [vmem:[#allocation3 + $0x109] sm:$0xff] %v2589_v38  ;;  %v2490_v10 = vadd.f32 %v2441_v62, %v2256_v6  ;;  %v2708_v6 = vld [vmem:[#allocation3 + $0xf0] sm:$0xff] }
 0x31f   : > { %3050 = vmatmul.bf16.gmra.mxu2 %v9922_v36 }
 0x320   : > { %v2524_v39 = vmul.f32 %v9657_v24, %v2490_v10 }
 0x321   : > { %v9952_v2 = vpop.f32.mrf.mxu1  ;;  %v2446_v63 = vpop.f32.mrf.mxu0 }
 0x322   : > { %v2558_v28 = vadd.f32 %v9667_v40, %v2524_v39 }
 0x323   : > { %v2210_v35 = vpop.f32.mrf.mxu3 }
 0x324   : > { %v2590_v5 = vmax.f32 %v2558_v28, 0.0  ;;  %v2257_v0 = vadd.f32 %v2210_v35, %v2023_v48  ;;  %v11658_v28 = vld [vmem:[#allocation14_spill] sm:$0xff] }
 0x326   : > { %2677 = vst [vmem:[#allocation3 + $0x111] sm:$0xff] %v2590_v5  ;;  %v2491_v53 = vadd.f32 %v2444_v42, %v2257_v0  ;;  %v2795_v9 = vpack.c.bf16 %v2590_v5, %v2589_v38  ;;  %v9976_v42 = vpack.c.bf16 %v2709_v43, %v2708_v6  ;;  %v2710_v6 = vld [vmem:[#allocation3 + $0x108] sm:$0xff] }
 0x328   : > { %v2525_v32 = vmul.f32 %v9657_v24, %v2491_v53  ;;  %2928 = vmatmul.bf16.gmra.mxu1 %v2795_v9  ;;  %v3101_v9 = vld [vmem:[#allocation3 + $0x7a] sm:$0xff] }
 0x329   : > { %v9963_v51 = vpop.f32.mrf.mxu1  ;;  %v2449_v46 = vpop.f32.mrf.mxu0 }
 0x32a   : > { %v2559_v16 = vadd.f32 %v9667_v40, %v2525_v32  ;;  %v3102_v32 = vld [vmem:[#allocation3 + $0x82] sm:$0xff] }
 0x32b   : > { %v2212_v3 = vpop.f32.mrf.mxu3 }
 0x32c   : > { %v2591_v49 = vmax.f32 %v2559_v16, 0.0  ;;  %v2258_v62 = vadd.f32 %v2212_v3, %v2024_v34  ;;  %3232 = vmatmul.bf16.gmra.mxu3 %v9965_v37  ;;  %3466 = vmatmul.bf16.gmra.mxu0 %v9863_v17  ;;  %v1791_v17 = vadd.f32 %v11659_v12, %v11658_v28  ;;  %v8472_v3 = vld [vmem:[%s11623_s2 + $0x168] sm:$0xff] }
 0x32d   : > { %3908 = vmatpush.bf16.msrb.mxu2 %v8472_v3  ;;  %v11665_v3 = vld [vmem:[#allocation9_spill] sm:$0xff] }
 0x32e   : > { %2678 = vst [vmem:[#allocation3 + $0x121] sm:$0xff] %v2591_v49  ;;  %v2492_v7 = vadd.f32 %v2446_v63, %v2258_v62  ;;  %v2026_v44 = vadd.f32 %v9761_v20, %v1791_v17  ;;  %v11661_v20 = vld [vmem:[#allocation18_spill] sm:$0xff] }
 0x32f   : > { %3055 = vmatmul.bf16.gmra.mxu2 %v9950_v8  ;;  %v1325_v1 = vadd.f32 %v11661_v20, %v11660_v26 }
 0x330   : > { %v2526_v15 = vmul.f32 %v9657_v24, %v2492_v7  ;;  %v9999_v7 = vpack.c.bf16 %v3102_v32, %v3101_v9 }
 0x332   : > { %v3016_v21 = vpop.f32.mrf.mxu2  ;;  %v2560_v25 = vadd.f32 %v9667_v40, %v2526_v15  ;;  %v11662_v15 = vld [vmem:[#allocation17_spill] sm:$0xff] }
 0x333   : > { %v9961_v60 = vadd.f32 %v3016_v21, %v9904_v52  ;;  %v2025_v52 = vadd.f32 %v9750_v56, %v11657_v13  ;;  %v2215_v14 = vpop.f32.mrf.mxu3  ;;  %v2451_v56 = vpop.f32.mrf.mxu0  ;;  %v2027_v43 = vadd.f32 %v9774_v45, %v11662_v15  ;;  %v11663_v13 = vld [vmem:[#allocation15_spill] sm:$0xff]  ;;  %v11668_v15 = vld [vmem:[#allocation20_spill] sm:$0xff] }
 0x334   : > { %v2592_v39 = vmax.f32 %v2560_v25, 0.0 }
 0x335   : > { %v2259_v55 = vadd.f32 %v2215_v14, %v2025_v52  ;;  %v9978_v48 = vpop.f32.mrf.mxu1  ;;  %v1559_v52 = vadd.f32 %v11663_v13, %v1325_v1 }
 0x336   : > { %2679 = vst [vmem:[#allocation3 + $0x129] sm:$0xff] %v2592_v39  ;;  %v2796_v5 = vpack.c.bf16 %v2592_v39, %v2591_v49 }
 0x337   : > { %v2493_v35 = vadd.f32 %v2449_v46, %v2259_v55  ;;  %v2711_v46 = vld [vmem:[#allocation3 + $0x110] sm:$0xff] }
 0x338   : > { %2933 = vmatmul.bf16.gmra.mxu1 %v2796_v5  ;;  %v10011_v55 = vpack.c.bf16 %v2711_v46, %v2710_v6 }
 0x339   : > { %v2527_v0 = vmul.f32 %v9657_v24, %v2493_v35 }
 0x33a   : > { %v3018_v38 = vpop.f32.mrf.mxu2 }
 0x33b   : > { %v9974_v10 = vadd.f32 %v3018_v38, %v9912_v41  ;;  %v8460_v41 = vld [vmem:[%s11623_s2 + $0x108] sm:$0xff]  ;;  %v2561_v58 = vadd.f32 %v9667_v40, %v2527_v0  ;;  %v2217_v63 = vpop.f32.mrf.mxu3  ;;  %v2454_v62 = vpop.f32.mrf.mxu0  ;;  %v10027_v0 = vld [vmem:[%s11625_s4 + $0x1] ss:$0 sm:$0xff] }
 0x33c   : > { %3678 = vmatpush.bf16.msrb.mxu1 %v8460_v41  ;;  %v2260_v16 = vadd.f32 %v2217_v63, %v2026_v44  ;;  %3237 = vmatmul.bf16.gmra.mxu3 %v9999_v7  ;;  %v3104_v63 = vld [vmem:[#allocation3 + $0x9a] sm:$0xff] }
 0x33d   : > { %v2593_v34 = vmax.f32 %v2561_v58, 0.0  ;;  %v9992_v21 = vpop.f32.mrf.mxu1  ;;  %3471 = vmatmul.bf16.gmra.mxu0 %v9878_v27  ;;  %v11664_v27 = vld [vmem:[#allocation16_spill] sm:$0xff] }
 0x33e   : > { %v2494_v49 = vadd.f32 %v2451_v56, %v2260_v16  ;;  %v1793_v17 = vadd.f32 %v11664_v27, %v1559_v52 }
 0x33f   : > { %3060 = vmatmul.bf16.gmra.mxu2 %v9976_v42  ;;  %2680 = vst [vmem:[#allocation3 + $0x139] sm:$0xff] %v2593_v34 }
 0x340   : > { %v2028_v5 = vadd.f32 %v9789_v30, %v1793_v17  ;;  %v11666_v30 = vld [vmem:[#allocation21_spill] sm:$0xff] }
 0x341   : > { %v1327_v26 = vadd.f32 %v11666_v30, %v11665_v3  ;;  %v8471_v30 = vld [vmem:[%s11623_s2 + $0x160] sm:$0xff] }
 0x342   : > { %v3021_v53 = vpop.f32.mrf.mxu2  ;;  %3909 = vmatpush.bf16.msrb.mxu2 %v8471_v30 }
 0x343   : > { %v9990_v23 = vadd.f32 %v3021_v53, %v9924_v4  ;;  %v2528_v4 = vmul.f32 %v9657_v24, %v2494_v49  ;;  %v2220_v14 = vpop.f32.mrf.mxu3  ;;  %v2456_v35 = vpop.f32.mrf.mxu0  ;;  %v3103_v53 = vld [vmem:[#allocation3 + $0x92] sm:$0xff] }
 0x344   : > { %v2261_v28 = vadd.f32 %v2220_v14, %v2027_v43  ;;  %v10037_v49 = vpack.c.bf16 %v3104_v63, %v3103_v53  ;;  %v1561_v43 = vadd.f32 %v11668_v15, %v1327_v26  ;;  %v3106_v53 = vld [vmem:[#allocation3 + $0xb2] sm:$0xff] }
 0x345   : > { %v2562_v25 = vadd.f32 %v9667_v40, %v2528_v4  ;;  %v10013_v12 = vpop.f32.mrf.mxu1  ;;  %v10020_v40 = vld [vmem:[%s11625_s4] ss:$0 sm:$0xff]  ;;  %v2713_v4 = vld [vmem:[#allocation3 + $0x128] sm:$0xff] }
 0x346   : > { %v2495_v45 = vadd.f32 %v2454_v62, %v2261_v28  ;;  %v11670_v26 = vld [vmem:[#allocation10_spill] sm:$0xff] }
 0x347   : > { %v2594_v24 = vmax.f32 %v2562_v25, 0.0  ;;  %v2712_v25 = vld [vmem:[#allocation3 + $0x120] sm:$0xff] }
 0x348   : > { %v10049_v14 = vpack.c.bf16 %v2713_v4, %v2712_v25 }
 0x349   : > { %2681 = vst [vmem:[#allocation3 + $0x141] sm:$0xff] %v2594_v24  ;;  %v2797_v56 = vpack.c.bf16 %v2594_v24, %v2593_v34 }
 0x34a   : > { %v3023_v38 = vpop.f32.mrf.mxu2 }
 0x34b   : > { %v10009_v39 = vadd.f32 %v3023_v38, %v9935_v22  ;;  %v2529_v22 = vmul.f32 %v10020_v40, %v2495_v45  ;;  %2938 = vmatmul.bf16.gmra.mxu1 %v2797_v56  ;;  %v2222_v58 = vpop.f32.mrf.mxu3  ;;  %v2459_v1 = vpop.f32.mrf.mxu0 }
 0x34c   : > { %v2262_v34 = vadd.f32 %v2222_v58, %v2028_v5  ;;  %3242 = vmatmul.bf16.gmra.mxu3 %v10037_v49  ;;  %v3105_v58 = vld [vmem:[#allocation3 + $0xaa] sm:$0xff] }
 0x34d   : > { %v2563_v41 = vadd.f32 %v10027_v0, %v2529_v22  ;;  %v10033_v16 = vpop.f32.mrf.mxu1  ;;  %3476 = vmatmul.bf16.gmra.mxu0 %v9902_v50  ;;  %v11669_v50 = vld [vmem:[#allocation22_spill] sm:$0xff]  ;;  %v10071_v4 = vpack.c.bf16 %v3106_v53, %v3105_v58 }
 0x34e   : > { %v2496_v20 = vadd.f32 %v2456_v35, %v2262_v34  ;;  %v1795_v17 = vadd.f32 %v11669_v50, %v1561_v43  ;;  %v11673_v43 = vld [vmem:[#allocation24_spill] sm:$0xff]  ;;  %v3108_v58 = vld [vmem:[#allocation3 + $0xca] sm:$0xff] }
 0x34f   : > { %3065 = vmatmul.bf16.gmra.mxu2 %v10011_v55  ;;  %v2595_v32 = vmax.f32 %v2563_v41, 0.0 }
 0x350   : > { %v2530_v62 = vmul.f32 %v10020_v40, %v2496_v20  ;;  %v2030_v22 = vadd.f32 %v9812_v54, %v1795_v17  ;;  %v11671_v54 = vld [vmem:[#allocation25_spill] sm:$0xff] }
 0x351   : > { %2682 = vst [vmem:[#allocation3 + $0x151] sm:$0xff] %v2595_v32  ;;  %v1329_v20 = vadd.f32 %v11671_v54, %v11670_v26  ;;  %v8469_v26 = vld [vmem:[%s11623_s2 + $0x150] sm:$0xff] }
 0x352   : > { %v3026_v44 = vpop.f32.mrf.mxu2  ;;  %v2564_v13 = vadd.f32 %v10027_v0, %v2530_v62 }
 0x353   : > { %v10031_v9 = vadd.f32 %v3026_v44, %v9952_v2  ;;  %v11667_v2 = vld [vmem:[#allocation19_spill] sm:$0xff]  ;;  %v2225_v38 = vpop.f32.mrf.mxu3  ;;  %v2461_v45 = vpop.f32.mrf.mxu0 }
 0x354   : > { %v2029_v46 = vadd.f32 %v9799_v31, %v11667_v2  ;;  %v2596_v24 = vmax.f32 %v2564_v13, 0.0  ;;  %v2715_v2 = vld [vmem:[#allocation3 + $0x140] sm:$0xff]  ;;  %v1563_v13 = vadd.f32 %v11673_v43, %v1329_v20 }
 0x355   : > { %v10051_v27 = vpop.f32.mrf.mxu1 }
 0x356   : > { %v2263_v28 = vadd.f32 %v2225_v38, %v2029_v46  ;;  %2683 = vst [vmem:[#allocation3 + $0x159] sm:$0xff] %v2596_v24  ;;  %v2798_v35 = vpack.c.bf16 %v2596_v24, %v2595_v32  ;;  %v11672_v46 = vld [vmem:[#allocation23_spill] sm:$0xff] }
 0x357   : > { %v2031_v15 = vadd.f32 %v9834_v33, %v11672_v46  ;;  %v2714_v38 = vld [vmem:[#allocation3 + $0x138] sm:$0xff] }
 0x358   : > { %v2497_v31 = vadd.f32 %v2459_v1, %v2263_v28  ;;  %v10083_v50 = vpack.c.bf16 %v2715_v2, %v2714_v38 }
 0x35a   : > { %v3028_v52 = vpop.f32.mrf.mxu2  ;;  %v2531_v56 = vmul.f32 %v10020_v40, %v2497_v31 }
 0x35b   : > { %v10047_v6 = vadd.f32 %v3028_v52, %v9963_v51  ;;  %2943 = vmatmul.bf16.gmra.mxu1 %v2798_v35  ;;  %v8459_v51 = vld [vmem:[%s11623_s2 + $0x100] sm:$0xff]  ;;  %v2227_v44 = vpop.f32.mrf.mxu3  ;;  %v2464_v62 = vpop.f32.mrf.mxu0 }
 0x35c   : > { %v2565_v5 = vadd.f32 %v10027_v0, %v2531_v56  ;;  %3679 = vmatpush.bf16.msrb.mxu1 %v8459_v51  ;;  %v2264_v34 = vadd.f32 %v2227_v44, %v2030_v22  ;;  %3247 = vmatmul.bf16.gmra.mxu3 %v10071_v4  ;;  %v3107_v44 = vld [vmem:[#allocation3 + $0xc2] sm:$0xff] }
 0x35d   : > { %v10064_v3 = vpop.f32.mrf.mxu1  ;;  %3481 = vmatmul.bf16.gmra.mxu0 %v9922_v36  ;;  %v1797_v36 = vadd.f32 %v9861_v47, %v1563_v13  ;;  %v3560_v13 = vld [vmem:[#allocation3 + $0x21] sm:$0xff] }
 0x35e   : > { %v2597_v32 = vmax.f32 %v2565_v5, 0.0  ;;  %v2498_v1 = vadd.f32 %v2461_v45, %v2264_v34 }
 0x35f   : > { %3070 = vmatmul.bf16.gmra.mxu2 %v10049_v14  ;;  %v2032_v22 = vadd.f32 %v9856_v59, %v1797_v36  ;;  %v8482_v59 = vld [vmem:[%s11623_s2 + $0x1b8] sm:$0xff] }
 0x360   : > { %2684 = vst [vmem:[#allocation3 + $0x169] sm:$0xff] %v2597_v32  ;;  %4141 = vmatpush.bf16.msra.mxu3 %v8482_v59 }
 0x362   : > { %v3031_v41 = vpop.f32.mrf.mxu2 }
 0x363   : > { %v10062_v63 = vadd.f32 %v3031_v41, %v9978_v48  ;;  %v2532_v48 = vmul.f32 %v10020_v40, %v2498_v1  ;;  %v2230_v24 = vpop.f32.mrf.mxu3  ;;  %v2466_v35 = vpop.f32.mrf.mxu0  ;;  %v10106_v1 = vpack.c.bf16 %v3108_v58, %v3107_v44 }
 0x364   : > { %v2265_v31 = vadd.f32 %v2230_v24, %v2031_v15  ;;  %v2716_v15 = vld [vmem:[#allocation3 + $0x150] sm:$0xff] }
 0x365   : > { %v2566_v52 = vadd.f32 %v10027_v0, %v2532_v48  ;;  %v10085_v45 = vpop.f32.mrf.mxu1  ;;  %v2717_v48 = vld [vmem:[#allocation3 + $0x158] sm:$0xff] }
 0x366   : > { %v2499_v33 = vadd.f32 %v2464_v62, %v2265_v31 }
 0x367   : > { %v2598_v17 = vmax.f32 %v2566_v52, 0.0 }
 0x368   : > { %v2533_v51 = vmul.f32 %v10020_v40, %v2499_v33  ;;  %v3014_v33 = vadd.f32 %v9948_v18, %v9892_v57  ;;  %v2718_v18 = vld [vmem:[#allocation3 + $0x168] sm:$0xff] }
 0x369   : > { %2685 = vst [vmem:[#allocation3 + $0x171] sm:$0xff] %v2598_v17  ;;  %v2799_v56 = vpack.c.bf16 %v2598_v17, %v2597_v32  ;;  %v3559_v17 = vld [vmem:[#allocation3 + $0x19] sm:$0xff] }
 0x36a   : > { %v3033_v25 = vpop.f32.mrf.mxu2  ;;  %v2567_v5 = vadd.f32 %v10027_v0, %v2533_v51  ;;  %v3109_v51 = vld [vmem:[#allocation3 + $0xda] sm:$0xff] }
 0x36b   : > { %v10081_v28 = vadd.f32 %v3033_v25, %v9992_v21  ;;  %2948 = vmatmul.bf16.gmra.mxu1 %v2799_v56  ;;  %v8470_v21 = vld [vmem:[%s11623_s2 + $0x158] sm:$0xff]  ;;  %v2232_v47 = vpop.f32.mrf.mxu3  ;;  %v3447_v20 = vpop.f32.mrf.mxu0  ;;  %v10118_v25 = vpack.c.bf16 %v2717_v48, %v2716_v15  ;;  %v3112_v15 = vld [vmem:[#allocation3 + $0xfa] sm:$0xff] }
 0x36c   : > { %3910 = vmatpush.bf16.msrb.mxu2 %v8470_v21  ;;  %v2599_v32 = vmax.f32 %v2567_v5, 0.0  ;;  %v2266_v34 = vadd.f32 %v2232_v47, %v2032_v22  ;;  %3252 = vmatmul.bf16.gmra.mxu3 %v10106_v1  ;;  %v3110_v21 = vld [vmem:[#allocation3 + $0xe2] sm:$0xff] }
 0x36d   : > { %v10098_v30 = vpop.f32.mrf.mxu1  ;;  %3486 = vmatmul.bf16.gmra.mxu0 %v9950_v8  ;;  %v8467_v8 = vld [vmem:[%s11623_s2 + $0x140] sm:$0xff]  ;;  %v10142_v44 = vpack.c.bf16 %v3110_v21, %v3109_v51 }
 0x36e   : > { %2686 = vst [vmem:[#allocation3 + $0x181] sm:$0xff] %v2599_v32  ;;  %v2500_v54 = vadd.f32 %v2466_v35, %v2266_v34 }
 0x36f   : > { %3075 = vmatmul.bf16.gmra.mxu2 %v10083_v50 }
 0x370   : > { %3911 = vmatpush.bf16.msrb.mxu2 %v8469_v26  ;;  %v2534_v62 = vmul.f32 %v10020_v40, %v2500_v54  ;;  %v2719_v32 = vld [vmem:[#allocation3 + $0x170] sm:$0xff]  ;;  %v3562_v26 = vld [vmem:[#allocation3 + $0x39] sm:$0xff] }
 0x371   : > { %v10151_v59 = vpack.c.bf16 %v2719_v32, %v2718_v18 }
 0x372   : > { %v3036_v41 = vpop.f32.mrf.mxu2  ;;  %v2568_v2 = vadd.f32 %v10027_v0, %v2534_v62  ;;  %v8490_v0 = vld [vmem:[%s11623_s2 + $0x1f8] sm:$0xff] }
 0x373   : > { %v10096_v53 = vadd.f32 %v3036_v41, %v10013_v12  ;;  %v8468_v12 = vld [vmem:[%s11623_s2 + $0x148] sm:$0xff]  ;;  %v3213_v43 = vpop.f32.mrf.mxu3  ;;  %v3449_v31 = vpop.f32.mrf.mxu0  ;;  %4375 = vmatpush.bf16.msra.mxu0 %v8490_v0 }
 0x374   : > { %3912 = vmatpush.bf16.msrb.mxu2 %v8468_v12  ;;  %v2600_v38 = vmax.f32 %v2568_v2, 0.0  ;;  %v3293_v40 = vadd.f32 %v3213_v43, %v9871_v61  ;;  %v8498_v61 = vld [vmem:[%s11623_s2 + $0x238] sm:$0xff]  ;;  %v3561_v12 = vld [vmem:[#allocation3 + $0x31] sm:$0xff] }
 0x375   : > { %v10121_v24 = vpop.f32.mrf.mxu1  ;;  %4609 = vmatpush.bf16.msra.mxu1 %v8498_v61  ;;  %v10156_v48 = vpack.c.bf16 %v3562_v26, %v3561_v12  ;;  %v8489_v61 = vld [vmem:[%s11623_s2 + $0x1f0] sm:$0xff] }
 0x376   : > { %2687 = vst [vmem:[#allocation3 + $0x189] sm:$0xff] %v2600_v38  ;;  %v10129_v36 = vadd.f32 %v3447_v20, %v3293_v40  ;;  %v8481_v38 = vld [vmem:[%s11623_s2 + $0x1b0] sm:$0xff] }
 0x377   : > { %4142 = vmatpush.bf16.msra.mxu3 %v8481_v38  ;;  %4376 = vmatpush.bf16.msra.mxu0 %v8489_v61 }
 0x378   : > { %3913 = vmatpush.bf16.msrb.mxu2 %v8467_v8 }
 0x37a   : > { %v3038_v46 = vpop.f32.mrf.mxu2 }
 0x37b   : > { %v10116_v52 = vadd.f32 %v3038_v46, %v10033_v16  ;;  %v3591_v16 = vpack.c.bf16 %v3560_v13, %v3559_v17  ;;  %v3215_v56 = vpop.f32.mrf.mxu3  ;;  %v3452_v47 = vpop.f32.mrf.mxu0 }
 0x37c   : > { %v3294_v5 = vadd.f32 %v3215_v56, %v3014_v33  ;;  %3257 = vmatmul.bf16.gmra.mxu3 %v10142_v44 }
 0x37d   : > { %3680 = vmatmul.bf16.vlgmr.msrb.gmra.mxu1 %v3591_v16  ;;  %v10140_v41 = vpop.f32.mrf.mxu1  ;;  %3491 = vmatmul.bf16.gmra.mxu0 %v9976_v42 }
 0x37e   : > { %v10144_v58 = vadd.f32 %v3449_v31, %v3294_v5  ;;  %v3564_v31 = vld [vmem:[#allocation3 + $0x51] sm:$0xff] }
 0x37f   : > { %3080 = vmatmul.bf16.gmra.mxu2 %v10118_v25  ;;  %v3113_v5 = vld [vmem:[#allocation3 + $0x10a] sm:$0xff] }
 0x382   : > { %v3041_v35 = vpop.f32.mrf.mxu2 }
 0x383   : > { %v10138_v22 = vadd.f32 %v3041_v35, %v10051_v27  ;;  %v3218_v34 = vpop.f32.mrf.mxu3  ;;  %v3454_v62 = vpop.f32.mrf.mxu0  ;;  %v3563_v35 = vld [vmem:[#allocation3 + $0x49] sm:$0xff] }
 0x384   : > { %v3295_v54 = vadd.f32 %v3218_v34, %v9961_v60  ;;  %v10186_v51 = vpack.c.bf16 %v3564_v31, %v3563_v35 }
 0x385   : > { %v10154_v20 = vpop.f32.mrf.mxu1 }
 0x386   : > { %v10158_v2 = vadd.f32 %v3452_v47, %v3295_v54  ;;  %v3114_v47 = vld [vmem:[#allocation3 + $0x112] sm:$0xff] }
 0x38a   : > { %v3043_v57 = vpop.f32.mrf.mxu2 }
 0x38b   : > { %v10149_v27 = vadd.f32 %v3043_v57, %v10064_v3  ;;  %v3220_v46 = vpop.f32.mrf.mxu3  ;;  %v3111_v3 = vld [vmem:[#allocation3 + $0xf2] sm:$0xff]  ;;  %v3457_v40 = vpop.f32.mrf.mxu0 }
 0x38c   : > { %v3296_v60 = vadd.f32 %v3220_v46, %v9974_v10  ;;  %v10171_v8 = vpack.c.bf16 %v3112_v15, %v3111_v3  ;;  %v3565_v46 = vld [vmem:[#allocation3 + $0x61] sm:$0xff] }
 0x38d   : > { %3685 = vmatmul.bf16.gmra.mxu1 %v10156_v48  ;;  %v10166_v13 = vpop.f32.mrf.mxu1  ;;  %3496 = vmatmul.bf16.gmra.mxu0 %v10011_v55 }
 0x38e   : > { %v10173_v0 = vadd.f32 %v3454_v62, %v3296_v60  ;;  %3262 = vmatmul.bf16.gmra.mxu3 %v10171_v8  ;;  %v3566_v62 = vld [vmem:[#allocation3 + $0x69] sm:$0xff] }
 0x38f   : > { %3085 = vmatmul.bf16.gmra.mxu2 %v10151_v59  ;;  %v10213_v15 = vpack.c.bf16 %v3566_v62, %v3565_v46 }
 0x392   : > { %v3046_v42 = vpop.f32.mrf.mxu2 }
 0x393   : > { %v10163_v43 = vadd.f32 %v3046_v42, %v10085_v45  ;;  %v3223_v17 = vpop.f32.mrf.mxu3  ;;  %v3459_v56 = vpop.f32.mrf.mxu0 }
 0x394   : > { %v3297_v16 = vadd.f32 %v3223_v17, %v9990_v23  ;;  %v8497_v23 = vld [vmem:[%s11623_s2 + $0x230] sm:$0xff]  ;;  %v8480_v17 = vld [vmem:[%s11623_s2 + $0x1a8] sm:$0xff] }
 0x395   : > { %v10184_v33 = vpop.f32.mrf.mxu1  ;;  %4610 = vmatpush.bf16.msra.mxu1 %v8497_v23  ;;  %4143 = vmatpush.bf16.msra.mxu3 %v8480_v17  ;;  %v3569_v17 = vld [vmem:[#allocation3 + $0x91] sm:$0xff] }
 0x396   : > { %v10188_v55 = vadd.f32 %v3457_v40, %v3297_v16  ;;  %v3115_v40 = vld [vmem:[#allocation3 + $0x122] sm:$0xff] }
 0x39a   : > { %v3048_v45 = vpop.f32.mrf.mxu2 }
 0x39b   : > { %v10178_v10 = vadd.f32 %v3048_v45, %v10098_v30  ;;  %v3225_v21 = vpop.f32.mrf.mxu3  ;;  %v3462_v34 = vpop.f32.mrf.mxu0  ;;  %v3116_v45 = vld [vmem:[#allocation3 + $0x12a] sm:$0xff] }
 0x39c   : > { %v3298_v57 = vadd.f32 %v3225_v21, %v10009_v39  ;;  %v10228_v61 = vpack.c.bf16 %v3116_v45, %v3115_v40  ;;  %v3570_v45 = vld [vmem:[#allocation3 + $0x99] sm:$0xff] }
 0x39d   : > { %3690 = vmatmul.bf16.gmra.mxu1 %v10186_v51  ;;  %v10199_v18 = vpop.f32.mrf.mxu1  ;;  %3501 = vmatmul.bf16.gmra.mxu0 %v10049_v14 }
 0x39e   : > { %v10203_v26 = vadd.f32 %v3459_v56, %v3298_v57  ;;  %v3568_v56 = vld [vmem:[#allocation3 + $0x81] sm:$0xff] }
 0x39f   : > { %3914 = vmatmul.bf16.vlgmr.msrb.gmra.mxu2 %v9894_v11  ;;  %v10201_v11 = vpack.c.bf16 %v3114_v47, %v3113_v5  ;;  %v3567_v5 = vld [vmem:[#allocation3 + $0x79] sm:$0xff] }
 0x3a0   : > { %v10243_v57 = vpack.c.bf16 %v3568_v56, %v3567_v5  ;;  %v8479_v5 = vld [vmem:[%s11623_s2 + $0x1a0] sm:$0xff] }
 0x3a1   : > { %3267 = vmatmul.bf16.gmra.mxu3 %v10201_v11 }
 0x3a2   : > { %v3051_v30 = vpop.f32.mrf.mxu2  ;;  %4144 = vmatpush.bf16.msra.mxu3 %v8479_v5  ;;  %v8485_v5 = vld [vmem:[%s11623_s2 + $0x1d0] sm:$0xff] }
 0x3a3   : > { %v10196_v32 = vadd.f32 %v3051_v30, %v10121_v24  ;;  %v3228_v12 = vpop.f32.mrf.mxu3  ;;  %v3464_v3 = vpop.f32.mrf.mxu0  ;;  %v8488_v30 = vld [vmem:[%s11623_s2 + $0x1e8] sm:$0xff] }
 0x3a4   : > { %v3299_v24 = vadd.f32 %v3228_v12, %v10031_v9  ;;  %4377 = vmatpush.bf16.msra.mxu0 %v8488_v30  ;;  %v3118_v12 = vld [vmem:[#allocation3 + $0x142] sm:$0xff]  ;;  %v3120_v30 = vld [vmem:[#allocation3 + $0x15a] sm:$0xff] }
 0x3a5   : > { %v10211_v39 = vpop.f32.mrf.mxu1 }
 0x3a6   : > { %v10215_v60 = vadd.f32 %v3462_v34, %v3299_v24 }
 0x3aa   : > { %v3053_v54 = vpop.f32.mrf.mxu2 }
 0x3ab   : > { %v10208_v42 = vadd.f32 %v3053_v54, %v10140_v41  ;;  %v3230_v38 = vpop.f32.mrf.mxu3  ;;  %v3467_v16 = vpop.f32.mrf.mxu0  ;;  %v3117_v54 = vld [vmem:[#allocation3 + $0x13a] sm:$0xff] }
 0x3ac   : > { %v3300_v9 = vadd.f32 %v3230_v38, %v10047_v6 }
 0x3ad   : > { %3695 = vmatmul.bf16.gmra.mxu1 %v10213_v15  ;;  %v10226_v31 = vpop.f32.mrf.mxu1  ;;  %3506 = vmatmul.bf16.gmra.mxu0 %v10083_v50 }
 0x3af   : > { %3919 = vmatmul.bf16.gmra.mxu2 %v9914_v29  ;;  %v10230_v29 = vadd.f32 %v3464_v3, %v3300_v9 }
 0x3b1   : > { %3272 = vmatmul.bf16.gmra.mxu3 %v10228_v61 }
 0x3b2   : > { %v3056_v14 = vpop.f32.mrf.mxu2 }
 0x3b3   : > { %v10220_v41 = vadd.f32 %v3056_v14, %v10154_v20  ;;  %v3233_v35 = vpop.f32.mrf.mxu3  ;;  %v3469_v47 = vpop.f32.mrf.mxu0 }
 0x3b4   : > { %v3301_v23 = vadd.f32 %v3233_v35, %v10062_v63  ;;  %v8496_v63 = vld [vmem:[%s11623_s2 + $0x228] sm:$0xff] }
 0x3b5   : > { %v10241_v21 = vpop.f32.mrf.mxu1  ;;  %4611 = vmatpush.bf16.msra.mxu1 %v8496_v63 }
 0x3b6   : > { %v10245_v50 = vadd.f32 %v3467_v16, %v3301_v23  ;;  %v3119_v23 = vld [vmem:[#allocation3 + $0x152] sm:$0xff] }
 0x3ba   : > { %v3058_v20 = vpop.f32.mrf.mxu2 }
 0x3bb   : > { %v10235_v6 = vadd.f32 %v3058_v20, %v10166_v13  ;;  %v3235_v34 = vpop.f32.mrf.mxu3  ;;  %v3472_v3 = vpop.f32.mrf.mxu0  ;;  %v10270_v20 = vpack.c.bf16 %v3570_v45, %v3569_v17 }
 0x3bc   : > { %v3302_v24 = vadd.f32 %v3235_v34, %v10081_v28 }
 0x3bd   : > { %3700 = vmatmul.bf16.gmra.mxu1 %v10243_v57  ;;  %v10256_v46 = vpop.f32.mrf.mxu1  ;;  %3511 = vmatmul.bf16.gmra.mxu0 %v10118_v25 }
 0x3be   : > { %v10260_v14 = vadd.f32 %v3469_v47, %v3302_v24  ;;  %v8487_v24 = vld [vmem:[%s11623_s2 + $0x1e0] sm:$0xff] }
 0x3bf   : > { %3924 = vmatmul.bf16.gmra.mxu2 %v9940_v19  ;;  %v10258_v19 = vpack.c.bf16 %v3118_v12, %v3117_v54  ;;  %v3572_v54 = vld [vmem:[#allocation3 + $0xb1] sm:$0xff]  ;;  %4378 = vmatpush.bf16.msra.mxu0 %v8487_v24 }
 0x3c0   : > { %v8484_v24 = vld [vmem:[%s11623_s2 + $0x1c8] sm:$0xff] }
 0x3c1   : > { %3277 = vmatmul.bf16.gmra.mxu3 %v10258_v19 }
 0x3c2   : > { %v3061_v13 = vpop.f32.mrf.mxu2 }
 0x3c3   : > { %v10253_v62 = vadd.f32 %v3061_v13, %v10184_v33  ;;  %v3238_v40 = vpop.f32.mrf.mxu3  ;;  %v3474_v16 = vpop.f32.mrf.mxu0  ;;  %v10285_v13 = vpack.c.bf16 %v3120_v30, %v3119_v23  ;;  %v3356_v30 = vld [vmem:[#allocation3 + $0x188] sm:$0xff] }
 0x3c4   : > { %v3303_v33 = vadd.f32 %v3238_v40, %v10096_v53 }
 0x3c6   : > { %v10272_v35 = vadd.f32 %v3472_v3, %v3303_v33  ;;  %v8486_v33 = vld [vmem:[%s11623_s2 + $0x1d8] sm:$0xff] }
 0x3c7   : > { %4379 = vmatpush.bf16.msra.mxu0 %v8486_v33 }
 0x3c8   : > { %v10268_v28 = vpop.f32.mrf.mxu1 }
 0x3ca   : > { %v3063_v38 = vpop.f32.mrf.mxu2 }
 0x3cb   : > { %v10265_v9 = vadd.f32 %v3063_v38, %v10199_v18  ;;  %v3240_v56 = vpop.f32.mrf.mxu3  ;;  %v3477_v63 = vpop.f32.mrf.mxu0  ;;  %v3571_v38 = vld [vmem:[#allocation3 + $0xa9] sm:$0xff]  ;;  %4380 = vmatpush.bf16.msra.mxu0 %v8485_v5  ;;  %v4029_v5 = vld [vmem:[#allocation3 + $0x38] sm:$0xff] }
 0x3cc   : > { %v3304_v53 = vadd.f32 %v3240_v56, %v10116_v52  ;;  %v10300_v45 = vpack.c.bf16 %v3572_v54, %v3571_v38  ;;  %v3355_v54 = vld [vmem:[#allocation3 + $0x180] sm:$0xff] }
 0x3cd   : > { %3705 = vmatmul.bf16.gmra.mxu1 %v10270_v20  ;;  %3516 = vmatmul.bf16.gmra.mxu0 %v10151_v59 }
 0x3cf   : > { %3929 = vmatmul.bf16.gmra.mxu2 %v9965_v37  ;;  %v10287_v37 = vadd.f32 %v3474_v16, %v3304_v53  ;;  %v8477_v53 = vld [vmem:[%s11623_s2 + $0x190] sm:$0xff]  ;;  %4381 = vmatpush.bf16.msra.mxu0 %v8484_v24 }
 0x3d0   : > { %v10283_v47 = vpop.f32.mrf.mxu1 }
 0x3d1   : > { %3282 = vmatmul.bf16.gmra.mxu3 %v10285_v13 }
 0x3d2   : > { %v3066_v25 = vpop.f32.mrf.mxu2 }
 0x3d3   : > { %v10277_v18 = vadd.f32 %v3066_v25, %v10211_v39  ;;  %v3243_v34 = vpop.f32.mrf.mxu3  ;;  %v3479_v40 = vpop.f32.mrf.mxu0  ;;  %v3121_v25 = vld [vmem:[#allocation3 + $0x16a] sm:$0xff] }
 0x3d4   : > { %v3305_v12 = vadd.f32 %v3243_v34, %v10138_v22  ;;  %v8495_v22 = vld [vmem:[%s11623_s2 + $0x220] sm:$0xff] }
 0x3d5   : > { %4612 = vmatpush.bf16.msra.mxu1 %v8495_v22 }
 0x3d6   : > { %v10302_v59 = vadd.f32 %v3477_v63, %v3305_v12  ;;  %v3372_v12 = vpack.c.bf16 %v3356_v30, %v3355_v54 }
 0x3d8   : > { %v10298_v3 = vpop.f32.mrf.mxu1 }
 0x3da   : > { %v3068_v39 = vpop.f32.mrf.mxu2 }
 0x3db   : > { %v10292_v52 = vadd.f32 %v3068_v39, %v10226_v31  ;;  %v8478_v31 = vld [vmem:[%s11623_s2 + $0x198] sm:$0xff]  ;;  %v3245_v16 = vpop.f32.mrf.mxu3  ;;  %v3482_v39 = vpop.f32.mrf.mxu0 }
 0x3dc   : > { %4145 = vmatpush.bf16.msra.mxu3 %v8478_v31  ;;  %v3306_v23 = vadd.f32 %v3245_v16, %v10149_v27  ;;  %v8476_v27 = vld [vmem:[%s11623_s2 + $0x188] sm:$0xff]  ;;  %v3574_v31 = vld [vmem:[#allocation3 + $0xc9] sm:$0xff] }
 0x3dd   : > { %3710 = vmatmul.bf16.gmra.mxu1 %v10300_v45  ;;  %3521 = vmatmul.bf16.gmra.mxu0 %v3372_v12  ;;  %v8483_v16 = vld [vmem:[%s11623_s2 + $0x1c0] sm:$0xff] }
 0x3de   : > { %4382 = vmatpush.bf16.msra.mxu0 %v8483_v16  ;;  %v4028_v12 = vld [vmem:[#allocation3 + $0x30] sm:$0xff] }
 0x3df   : > { %3934 = vmatmul.bf16.gmra.mxu2 %v9999_v7  ;;  %v3122_v7 = vld [vmem:[#allocation3 + $0x172] sm:$0xff] }
 0x3e0   : > { %v10325_v63 = vpop.f32.mrf.mxu1  ;;  %v10327_v34 = vpack.c.bf16 %v3122_v7, %v3121_v25  ;;  %4146 = vmatpush.bf16.msra.mxu3 %v8477_v53  ;;  %v3573_v7 = vld [vmem:[#allocation3 + $0xc1] sm:$0xff] }
 0x3e1   : > { %v10350_v30 = vpack.c.bf16 %v3574_v31, %v3573_v7 }
 0x3e2   : > { %v3071_v17 = vpop.f32.mrf.mxu2  ;;  %3287 = vmatmul.bf16.gmra.mxu3 %v10327_v34 }
 0x3e3   : > { %v10316_v56 = vadd.f32 %v3071_v17, %v10241_v21  ;;  %v10332_v21 = vadd.f32 %v3479_v40, %v3306_v23  ;;  %v3248_v22 = vpop.f32.mrf.mxu3  ;;  %v8475_v17 = vld [vmem:[%s11623_s2 + $0x180] sm:$0xff]  ;;  %v3484_v23 = vpop.f32.mrf.mxu0 }
 0x3e4   : > { %4147 = vmatpush.bf16.msra.mxu3 %v8476_v27  ;;  %v3307_v40 = vadd.f32 %v3248_v22, %v10163_v43  ;;  %v4060_v22 = vpack.c.bf16 %v4029_v5, %v4028_v12  ;;  %v4031_v5 = vld [vmem:[#allocation3 + $0x50] sm:$0xff]  ;;  %v8514_v12 = vld [vmem:[#allocation5 + $0x78] sm:$0xff] }
 0x3e5   : > { %5094 = vmatpush.bf16.msra.mxu2 %v8514_v12 }
 0x3e6   : > { %v10352_v53 = vadd.f32 %v3482_v39, %v3307_v40  ;;  %v3576_v40 = vld [vmem:[#allocation3 + $0xe1] sm:$0xff] }
 0x3e8   : > { %v10348_v25 = vpop.f32.mrf.mxu1  ;;  %4148 = vmatpush.bf16.msra.mxu3 %v8475_v17 }
 0x3ea   : > { %v3073_v38 = vpop.f32.mrf.mxu2 }
 0x3eb   : > { %v10339_v33 = vadd.f32 %v3073_v38, %v10256_v46  ;;  %v3250_v46 = vpop.f32.mrf.mxu3  ;;  %v3487_v38 = vpop.f32.mrf.mxu0 }
 0x3ec   : > { %v3308_v27 = vadd.f32 %v3250_v46, %v10178_v10  ;;  %v3575_v10 = vld [vmem:[#allocation3 + $0xd9] sm:$0xff] }
 0x3ed   : > { %3715 = vmatmul.bf16.gmra.mxu1 %v10350_v30  ;;  %4383 = vmatmul.bf16.vlgmr.msra.gmra.mxu0 %v10156_v48  ;;  %v10372_v46 = vpack.c.bf16 %v3576_v40, %v3575_v10  ;;  %v8494_v48 = vld [vmem:[%s11623_s2 + $0x218] sm:$0xff] }
 0x3ee   : > { %v10362_v39 = vadd.f32 %v3484_v23, %v3308_v27  ;;  %4613 = vmatpush.bf16.msra.mxu1 %v8494_v48 }
 0x3ef   : > { %3939 = vmatmul.bf16.gmra.mxu2 %v10037_v49 }
 0x3f0   : > { %v10360_v24 = vpop.f32.mrf.mxu1 }
 0x3f2   : > { %v3076_v43 = vpop.f32.mrf.mxu2  ;;  %4149 = vmatmul.bf16.vlgmr.msra.gmra.mxu3 %v4060_v22 }
 0x3f3   : > { %v10357_v54 = vadd.f32 %v3076_v43, %v10268_v28  ;;  %v3253_v31 = vpop.f32.mrf.mxu3  ;;  %v3489_v7 = vpop.f32.mrf.mxu0 }
 0x3f4   : > { %v3309_v28 = vadd.f32 %v3253_v31, %v10196_v32 }
 0x3f6   : > { %v10374_v23 = vadd.f32 %v3487_v38, %v3309_v28  ;;  %v4030_v38 = vld [vmem:[#allocation3 + $0x48] sm:$0xff] }
 0x3fa   : > { %v3078_v49 = vpop.f32.mrf.mxu2  ;;  %v3681_v16 = vpop.f32.mrf.mxu1 }
 0x3fb   : > { %v10366_v17 = vadd.f32 %v3078_v49, %v10283_v47  ;;  %v10370_v43 = vadd.f32 %v3681_v16, %v10129_v36  ;;  %v3255_v47 = vpop.f32.mrf.mxu3  ;;  %v3492_v49 = vpop.f32.mrf.mxu0 }
 0x3fc   : > { %v3310_v36 = vadd.f32 %v3255_v47, %v10208_v42 }
 0x3fd   : > { %3720 = vmatmul.bf16.gmra.mxu1 %v10372_v46  ;;  %4388 = vmatmul.bf16.gmra.mxu0 %v10186_v51 }
 0x3fe   : > { %v10388_v40 = vadd.f32 %v3489_v7, %v3310_v36 }
 0x3ff   : > { %3944 = vmatmul.bf16.gmra.mxu2 %v10071_v4  ;;  %v4061_v4 = vpack.c.bf16 %v4031_v5, %v4030_v38  ;;  %v4032_v38 = vld [vmem:[#allocation3 + $0x60] sm:$0xff] }
 0x402   : > { %v3081_v32 = vpop.f32.mrf.mxu2  ;;  %v3683_v22 = vpop.f32.mrf.mxu1  ;;  %4154 = vmatmul.bf16.gmra.mxu3 %v4061_v4 }
 0x403   : > { %v10382_v27 = vadd.f32 %v3081_v32, %v10298_v3  ;;  %v10386_v31 = vadd.f32 %v3683_v22, %v10144_v58  ;;  %v3258_v16 = vpop.f32.mrf.mxu3  ;;  %v3578_v3 = vld [vmem:[#allocation3 + $0xf9] sm:$0xff]  ;;  %v3577_v32 = vld [vmem:[#allocation3 + $0xf1] sm:$0xff]  ;;  %v3494_v47 = vpop.f32.mrf.mxu0 }
 0x404   : > { %v3311_v42 = vadd.f32 %v3258_v16, %v10220_v41  ;;  %v10398_v5 = vpack.c.bf16 %v3578_v3, %v3577_v32  ;;  %v3580_v3 = vld [vmem:[#allocation3 + $0x111] sm:$0xff] }
 0x406   : > { %v10400_v7 = vadd.f32 %v3492_v49, %v3311_v42 }
 0x40a   : > { %v3083_v28 = vpop.f32.mrf.mxu2  ;;  %v3686_v48 = vpop.f32.mrf.mxu1 }
 0x40b   : > { %v10392_v10 = vadd.f32 %v3083_v28, %v10325_v63  ;;  %v10396_v58 = vadd.f32 %v3686_v48, %v10158_v2  ;;  %v3260_v36 = vpop.f32.mrf.mxu3  ;;  %v4033_v63 = vld [vmem:[#allocation3 + $0x68] sm:$0xff]  ;;  %v3497_v2 = vpop.f32.mrf.mxu0 }
 0x40c   : > { %v3312_v41 = vadd.f32 %v3260_v36, %v10235_v6  ;;  %v4062_v4 = vpack.c.bf16 %v4033_v63, %v4032_v38  ;;  %v3579_v48 = vld [vmem:[#allocation3 + $0x109] sm:$0xff]  ;;  %v4035_v36 = vld [vmem:[#allocation3 + $0x80] sm:$0xff]  ;;  %v4034_v38 = vld [vmem:[#allocation3 + $0x78] sm:$0xff] }
 0x40d   : > { %3725 = vmatmul.bf16.gmra.mxu1 %v10398_v5  ;;  %4393 = vmatmul.bf16.gmra.mxu0 %v10213_v15  ;;  %v8493_v15 = vld [vmem:[%s11623_s2 + $0x210] sm:$0xff] }
 0x40e   : > { %v10411_v49 = vadd.f32 %v3494_v47, %v3312_v41  ;;  %4614 = vmatpush.bf16.msra.mxu1 %v8493_v15  ;;  %v8513_v41 = vld [vmem:[#allocation5 + $0x70] sm:$0xff] }
 0x40f   : > { %3949 = vmatmul.bf16.gmra.mxu2 %v10106_v1 }
 0x410   : > { %5095 = vmatpush.bf16.msra.mxu2 %v8513_v41 }
 0x412   : > { %v3086_v51 = vpop.f32.mrf.mxu2  ;;  %v3688_v22 = vpop.f32.mrf.mxu1  ;;  %4159 = vmatmul.bf16.gmra.mxu3 %v4062_v4 }
 0x413   : > { %v10405_v12 = vadd.f32 %v3086_v51, %v10348_v25  ;;  %v10409_v28 = vadd.f32 %v3688_v22, %v10173_v0  ;;  %v3263_v16 = vpop.f32.mrf.mxu3  ;;  %v3499_v32 = vpop.f32.mrf.mxu0  ;;  %v10421_v0 = vpack.c.bf16 %v3580_v3, %v3579_v48  ;;  %v3581_v48 = vld [vmem:[#allocation3 + $0x121] sm:$0xff] }
 0x414   : > { %v3313_v6 = vadd.f32 %v3263_v16, %v10253_v62 }
 0x416   : > { %v10423_v47 = vadd.f32 %v3497_v2, %v3313_v6 }
 0x41a   : > { %v3088_v1 = vpop.f32.mrf.mxu2  ;;  %v3691_v42 = vpop.f32.mrf.mxu1 }
 0x41b   : > { %v10415_v25 = vadd.f32 %v3088_v1, %v10360_v24  ;;  %v10419_v51 = vadd.f32 %v3691_v42, %v10188_v55  ;;  %v3265_v24 = vpop.f32.mrf.mxu3  ;;  %v3502_v2 = vpop.f32.mrf.mxu0 }
 0x41c   : > { %v3314_v55 = vadd.f32 %v3265_v24, %v10265_v9 }
 0x41d   : > { %3730 = vmatmul.bf16.gmra.mxu1 %v10421_v0  ;;  %4398 = vmatmul.bf16.gmra.mxu0 %v10243_v57 }
 0x41e   : > { %v10437_v1 = vadd.f32 %v3499_v32, %v3314_v55  ;;  %v4036_v55 = vld [vmem:[#allocation3 + $0x90] sm:$0xff] }
 0x41f   : > { %3954 = vmatmul.bf16.gmra.mxu2 %v10142_v44  ;;  %v4063_v44 = vpack.c.bf16 %v4035_v36, %v4034_v38 }
 0x422   : > { %v3915_v62 = vpop.f32.mrf.mxu2  ;;  %v3693_v22 = vpop.f32.mrf.mxu1  ;;  %4164 = vmatmul.bf16.gmra.mxu3 %v4063_v44 }
 0x423   : > { %v10431_v63 = vadd.f32 %v3915_v62, %v10370_v43  ;;  %v10435_v4 = vadd.f32 %v3693_v22, %v10203_v26  ;;  %v3582_v43 = vld [vmem:[#allocation3 + $0x129] sm:$0xff]  ;;  %v3504_v15 = vpop.f32.mrf.mxu0 }
 0x424   : > { %v3268_v3 = vpop.f32.mrf.mxu3  ;;  %v10447_v62 = vpack.c.bf16 %v3582_v43, %v3581_v48  ;;  %v3583_v43 = vld [vmem:[#allocation3 + $0x139] sm:$0xff] }
 0x425   : > { %v3315_v9 = vadd.f32 %v3268_v3, %v10277_v18 }
 0x427   : > { %v10449_v32 = vadd.f32 %v3502_v2, %v3315_v9 }
 0x42a   : > { %v3917_v16 = vpop.f32.mrf.mxu2  ;;  %v3696_v42 = vpop.f32.mrf.mxu1 }
 0x42b   : > { %v10441_v6 = vadd.f32 %v3917_v16, %v10386_v31  ;;  %v10445_v26 = vadd.f32 %v3696_v42, %v10215_v60  ;;  %v4037_v31 = vld [vmem:[#allocation3 + $0x98] sm:$0xff]  ;;  %v3507_v60 = vpop.f32.mrf.mxu0  ;;  %v3584_v16 = vld [vmem:[#allocation3 + $0x141] sm:$0xff] }
 0x42c   : > { %v3270_v24 = vpop.f32.mrf.mxu3  ;;  %v4064_v38 = vpack.c.bf16 %v4037_v31, %v4036_v55  ;;  %v4038_v31 = vld [vmem:[#allocation3 + $0xa8] sm:$0xff] }
 0x42d   : > { %3735 = vmatmul.bf16.gmra.mxu1 %v10447_v62  ;;  %v3316_v18 = vadd.f32 %v3270_v24, %v10292_v52  ;;  %4403 = vmatmul.bf16.gmra.mxu0 %v10270_v20  ;;  %v8492_v20 = vld [vmem:[%s11623_s2 + $0x208] sm:$0xff]  ;;  %v8512_v24 = vld [vmem:[#allocation5 + $0x68] sm:$0xff] }
 0x42e   : > { %4615 = vmatpush.bf16.msra.mxu1 %v8492_v20  ;;  %5096 = vmatpush.bf16.msra.mxu2 %v8512_v24 }
 0x42f   : > { %3959 = vmatmul.bf16.gmra.mxu2 %v10171_v8  ;;  %v10460_v2 = vadd.f32 %v3504_v15, %v3316_v18  ;;  %v4039_v15 = vld [vmem:[#allocation3 + $0xb0] sm:$0xff] }
 0x432   : > { %v3920_v57 = vpop.f32.mrf.mxu2  ;;  %v3698_v41 = vpop.f32.mrf.mxu1  ;;  %4169 = vmatmul.bf16.gmra.mxu3 %v4064_v38 }
 0x433   : > { %v10454_v36 = vadd.f32 %v3920_v57, %v10396_v58  ;;  %v10458_v22 = vadd.f32 %v3698_v41, %v10230_v29  ;;  %v3509_v9 = vpop.f32.mrf.mxu0  ;;  %v10470_v29 = vpack.c.bf16 %v3584_v16, %v3583_v43 }
 0x434   : > { %v3273_v44 = vpop.f32.mrf.mxu3 }
 0x435   : > { %v3317_v52 = vadd.f32 %v3273_v44, %v10316_v56 }
 0x437   : > { %v10472_v48 = vadd.f32 %v3507_v60, %v3317_v52  ;;  %v3585_v52 = vld [vmem:[#allocation3 + $0x151] sm:$0xff] }
 0x43a   : > { %v3922_v8 = vpop.f32.mrf.mxu2  ;;  %v3701_v3 = vpop.f32.mrf.mxu1 }
 0x43b   : > { %v10464_v58 = vadd.f32 %v3922_v8, %v10409_v28  ;;  %v10468_v42 = vadd.f32 %v3701_v3, %v10245_v50  ;;  %v3512_v55 = vpop.f32.mrf.mxu0 }
 0x43c   : > { %v3275_v28 = vpop.f32.mrf.mxu3 }
 0x43d   : > { %3740 = vmatmul.bf16.gmra.mxu1 %v10470_v29  ;;  %v3318_v50 = vadd.f32 %v3275_v28, %v10339_v33  ;;  %4408 = vmatmul.bf16.gmra.mxu0 %v10300_v45  ;;  %v4040_v28 = vld [vmem:[#allocation3 + $0xc0] sm:$0xff] }
 0x43f   : > { %3964 = vmatmul.bf16.gmra.mxu2 %v10201_v11  ;;  %v4065_v11 = vpack.c.bf16 %v4039_v15, %v4038_v31  ;;  %v10486_v60 = vadd.f32 %v3509_v9, %v3318_v50 }
 0x442   : > { %v3925_v56 = vpop.f32.mrf.mxu2  ;;  %v3703_v18 = vpop.f32.mrf.mxu1  ;;  %4174 = vmatmul.bf16.gmra.mxu3 %v4065_v11 }
 0x443   : > { %v10480_v57 = vadd.f32 %v3925_v56, %v10419_v51  ;;  %v10484_v41 = vadd.f32 %v3703_v18, %v10260_v14  ;;  %v3586_v51 = vld [vmem:[#allocation3 + $0x159] sm:$0xff]  ;;  %v3514_v3 = vpop.f32.mrf.mxu0 }
 0x444   : > { %v3278_v8 = vpop.f32.mrf.mxu3  ;;  %v10496_v43 = vpack.c.bf16 %v3586_v51, %v3585_v52 }
 0x445   : > { %v3319_v33 = vadd.f32 %v3278_v8, %v10357_v54 }
 0x447   : > { %v10498_v9 = vadd.f32 %v3512_v55, %v3319_v33  ;;  %v3588_v55 = vld [vmem:[#allocation3 + $0x171] sm:$0xff] }
 0x44a   : > { %v3927_v38 = vpop.f32.mrf.mxu2  ;;  %v3706_v16 = vpop.f32.mrf.mxu1 }
 0x44b   : > { %v10490_v44 = vadd.f32 %v3927_v38, %v10435_v4  ;;  %v10494_v14 = vadd.f32 %v3706_v16, %v10272_v35  ;;  %v4041_v4 = vld [vmem:[#allocation3 + $0xc8] sm:$0xff]  ;;  %v3517_v35 = vpop.f32.mrf.mxu0  ;;  %v4043_v16 = vld [vmem:[#allocation3 + $0xe0] sm:$0xff] }
 0x44c   : > { %v3280_v20 = vpop.f32.mrf.mxu3  ;;  %v4066_v50 = vpack.c.bf16 %v4041_v4, %v4040_v28  ;;  %v3587_v38 = vld [vmem:[#allocation3 + $0x169] sm:$0xff] }
 0x44d   : > { %3745 = vmatmul.bf16.gmra.mxu1 %v10496_v43  ;;  %v3320_v54 = vadd.f32 %v3280_v20, %v10366_v17  ;;  %4413 = vmatmul.bf16.gmra.mxu0 %v10350_v30  ;;  %v8491_v30 = vld [vmem:[%s11623_s2 + $0x200] sm:$0xff] }
 0x44e   : > { %4616 = vmatpush.bf16.msra.mxu1 %v8491_v30  ;;  %v4044_v30 = vld [vmem:[#allocation3 + $0xf0] sm:$0xff] }
 0x44f   : > { %3969 = vmatmul.bf16.gmra.mxu2 %v10228_v61  ;;  %v10509_v31 = vadd.f32 %v3514_v3, %v3320_v54  ;;  %v8511_v3 = vld [vmem:[#allocation5 + $0x60] sm:$0xff] }
 0x450   : > { %5097 = vmatpush.bf16.msra.mxu2 %v8511_v3 }
 0x452   : > { %v3930_v45 = vpop.f32.mrf.mxu2  ;;  %v3708_v15 = vpop.f32.mrf.mxu1  ;;  %4179 = vmatmul.bf16.gmra.mxu3 %v4066_v50 }
 0x453   : > { %v10503_v56 = vadd.f32 %v3930_v45, %v10445_v26  ;;  %v10507_v24 = vadd.f32 %v3708_v15, %v10287_v37  ;;  %v3519_v8 = vpop.f32.mrf.mxu0  ;;  %v10517_v37 = vpack.c.bf16 %v3588_v55, %v3587_v38  ;;  %v4042_v45 = vld [vmem:[#allocation3 + $0xd8] sm:$0xff] }
 0x454   : > { %v3283_v18 = vpop.f32.mrf.mxu3  ;;  %v4045_v38 = vld [vmem:[#allocation3 + $0xf8] sm:$0xff] }
 0x455   : > { %v3321_v17 = vadd.f32 %v3283_v18, %v10382_v27 }
 0x457   : > { %v10519_v33 = vadd.f32 %v3517_v35, %v3321_v17  ;;  %v3590_v35 = vld [vmem:[#allocation3 + $0x189] sm:$0xff] }
 0x45a   : > { %v3932_v61 = vpop.f32.mrf.mxu2  ;;  %v3711_v11 = vpop.f32.mrf.mxu1 }
 0x45b   : > { %v10513_v26 = vadd.f32 %v3932_v61, %v10458_v22  ;;  %v3773_v51 = vadd.f32 %v3711_v11, %v10302_v59  ;;  %v3522_v4 = vpop.f32.mrf.mxu0  ;;  %v3589_v61 = vld [vmem:[#allocation3 + $0x181] sm:$0xff] }
 0x45c   : > { %v3285_v27 = vpop.f32.mrf.mxu3 }
 0x45d   : > { %3750 = vmatmul.bf16.gmra.mxu1 %v10517_v37  ;;  %v3322_v59 = vadd.f32 %v3285_v27, %v10392_v10  ;;  %4418 = vmatmul.bf16.gmra.mxu0 %v10372_v46  ;;  %v4068_v27 = vpack.c.bf16 %v4045_v38, %v4044_v30 }
 0x45f   : > { %3974 = vmatmul.bf16.gmra.mxu2 %v10258_v19  ;;  %v4067_v19 = vpack.c.bf16 %v4043_v16, %v4042_v45  ;;  %v10533_v28 = vadd.f32 %v3519_v8, %v3322_v59  ;;  %v4496_v45 = vld [vmem:[#allocation3 + $0x32] sm:$0xff] }
 0x462   : > { %v3935_v22 = vpop.f32.mrf.mxu2  ;;  %v3713_v20 = vpop.f32.mrf.mxu1  ;;  %4184 = vmatmul.bf16.gmra.mxu3 %v4067_v19 }
 0x463   : > { %v10527_v52 = vadd.f32 %v3935_v22, %v10468_v42  ;;  %v10531_v54 = vadd.f32 %v3713_v20, %v10332_v21  ;;  %v3524_v18 = vpop.f32.mrf.mxu0  ;;  %v10542_v21 = vpack.c.bf16 %v3590_v35, %v3589_v61 }
 0x465   : > { %v3288_v42 = vpop.f32.mrf.mxu3 }
 0x466   : > { %v3323_v10 = vadd.f32 %v3288_v42, %v10405_v12 }
 0x468   : > { %v10544_v17 = vadd.f32 %v3522_v4, %v3323_v10 }
 0x46a   : > { %v10536_v15 = vpop.f32.mrf.mxu2  ;;  %v3716_v50 = vpop.f32.mrf.mxu1 }
 0x46b   : > { %v10540_v55 = vadd.f32 %v3716_v50, %v10352_v53  ;;  %v4384_v53 = vpop.f32.mrf.mxu0 }
 0x46d   : > { %3755 = vmatmul.bf16.gmra.mxu1 %v10542_v21  ;;  %v3290_v11 = vpop.f32.mrf.mxu3  ;;  %4423 = vmatmul.bf16.gmra.mxu0 %v10398_v5  ;;  %v4047_v5 = vld [vmem:[#allocation3 + $0x110] sm:$0xff] }
 0x46e   : > { %v3324_v12 = vadd.f32 %v3290_v11, %v10415_v25 }
 0x46f   : > { %3979 = vmatmul.bf16.gmra.mxu2 %v10285_v13 }
 0x470   : > { %v10555_v59 = vadd.f32 %v3524_v18, %v3324_v12  ;;  %v8510_v18 = vld [vmem:[#allocation5 + $0x58] sm:$0xff] }
 0x471   : > { %5098 = vmatpush.bf16.msra.mxu2 %v8510_v18 }
 0x472   : > { %v3940_v46 = vpop.f32.mrf.mxu2  ;;  %v3718_v22 = vpop.f32.mrf.mxu1  ;;  %4189 = vmatmul.bf16.gmra.mxu3 %v4068_v27 }
 0x473   : > { %v10549_v8 = vadd.f32 %v3940_v46, %v10494_v14  ;;  %v10553_v16 = vadd.f32 %v3718_v22, %v10362_v39  ;;  %v4497_v14 = vld [vmem:[#allocation3 + $0x3a] sm:$0xff]  ;;  %v4386_v4 = vpop.f32.mrf.mxu0  ;;  %v4046_v46 = vld [vmem:[#allocation3 + $0x108] sm:$0xff] }
 0x474   : > { %v4528_v42 = vpack.c.bf16 %v4497_v14, %v4496_v45  ;;  %v4069_v38 = vpack.c.bf16 %v4047_v5, %v4046_v46  ;;  %v3824_v22 = vld [vmem:[#allocation3 + $0x18a] sm:$0xff]  ;;  %v4048_v5 = vld [vmem:[#allocation3 + $0x120] sm:$0xff] }
 0x475   : > { %v4150_v3 = vpop.f32.mrf.mxu3 }
 0x476   : > { %v4230_v20 = vadd.f32 %v4150_v3, %v10431_v63 }
 0x478   : > { %v10562_v35 = vadd.f32 %v4384_v53, %v4230_v20  ;;  %v4499_v53 = vld [vmem:[#allocation3 + $0x52] sm:$0xff] }
 0x47a   : > { %v10558_v13 = vpop.f32.mrf.mxu2  ;;  %v3721_v25 = vpop.f32.mrf.mxu1 }
 0x47b   : > { %v3777_v19 = vadd.f32 %v3721_v25, %v10374_v23  ;;  %v4389_v11 = vpop.f32.mrf.mxu0 }
 0x47d   : > { %4617 = vmatmul.bf16.vlgmr.msra.gmra.mxu1 %v4528_v42  ;;  %v4152_v10 = vpop.f32.mrf.mxu3  ;;  %4428 = vmatmul.bf16.gmra.mxu0 %v10421_v0  ;;  %v4049_v42 = vld [vmem:[#allocation3 + $0x128] sm:$0xff] }
 0x47e   : > { %v4231_v61 = vadd.f32 %v4152_v10, %v10441_v6  ;;  %v4070_v18 = vpack.c.bf16 %v4049_v42, %v4048_v5  ;;  %v4502_v5 = vld [vmem:[#allocation3 + $0x7a] sm:$0xff] }
 0x47f   : > { %3984 = vmatmul.bf16.gmra.mxu2 %v10327_v34  ;;  %v4498_v34 = vld [vmem:[#allocation3 + $0x4a] sm:$0xff] }
 0x480   : > { %v10571_v12 = vadd.f32 %v4386_v4, %v4231_v61  ;;  %v4529_v20 = vpack.c.bf16 %v4499_v53, %v4498_v34 }
 0x482   : > { %v3945_v39 = vpop.f32.mrf.mxu2  ;;  %v3723_v63 = vpop.f32.mrf.mxu1  ;;  %4194 = vmatmul.bf16.gmra.mxu3 %v4069_v38  ;;  %v4500_v38 = vld [vmem:[#allocation3 + $0x62] sm:$0xff] }
 0x483   : > { %v10565_v50 = vadd.f32 %v3945_v39, %v3773_v51  ;;  %v10569_v23 = vadd.f32 %v3723_v63, %v10388_v40  ;;  %v3823_v51 = vld [vmem:[#allocation3 + $0x182] sm:$0xff]  ;;  %v4391_v14 = vpop.f32.mrf.mxu0 }
 0x484   : > { %v3840_v45 = vpack.c.bf16 %v3824_v22, %v3823_v51 }
 0x485   : > { %v4155_v6 = vpop.f32.mrf.mxu3 }
 0x486   : > { %v4232_v27 = vadd.f32 %v4155_v6, %v10454_v36 }
 0x488   : > { %v10578_v25 = vadd.f32 %v4389_v11, %v4232_v27 }
 0x48a   : > { %v10574_v30 = vpop.f32.mrf.mxu2  ;;  %v3726_v3 = vpop.f32.mrf.mxu1 }
 0x48b   : > { %v3779_v40 = vadd.f32 %v3726_v3, %v10400_v7  ;;  %v4394_v61 = vpop.f32.mrf.mxu0  ;;  %v4051_v3 = vld [vmem:[#allocation3 + $0x140] sm:$0xff] }
 0x48d   : > { %4622 = vmatmul.bf16.gmra.mxu1 %v4529_v20  ;;  %v4157_v4 = vpop.f32.mrf.mxu3  ;;  %4433 = vmatmul.bf16.gmra.mxu0 %v10447_v62  ;;  %v4050_v20 = vld [vmem:[#allocation3 + $0x138] sm:$0xff] }
 0x48e   : > { %v4233_v10 = vadd.f32 %v4157_v4, %v10464_v58 }
 0x48f   : > { %3989 = vmatmul.bf16.gmra.mxu2 %v3840_v45 }
 0x490   : > { %v10587_v7 = vadd.f32 %v4391_v14, %v4233_v10  ;;  %v8509_v14 = vld [vmem:[#allocation5 + $0x50] sm:$0xff] }
 0x491   : > { %5099 = vmatpush.bf16.msra.mxu2 %v8509_v14 }
 0x492   : > { %v3950_v0 = vpop.f32.mrf.mxu2  ;;  %v3728_v36 = vpop.f32.mrf.mxu1  ;;  %4199 = vmatmul.bf16.gmra.mxu3 %v4070_v18 }
 0x493   : > { %v10581_v39 = vadd.f32 %v3950_v0, %v10540_v55  ;;  %v10585_v46 = vadd.f32 %v3728_v36, %v10411_v49  ;;  %v4501_v55 = vld [vmem:[#allocation3 + $0x6a] sm:$0xff]  ;;  %v4396_v51 = vpop.f32.mrf.mxu0  ;;  %v4503_v36 = vld [vmem:[#allocation3 + $0x82] sm:$0xff] }
 0x494   : > { %v4530_v6 = vpack.c.bf16 %v4501_v55, %v4500_v38  ;;  %v4531_v38 = vpack.c.bf16 %v4503_v36, %v4502_v5 }
 0x495   : > { %v4160_v11 = vpop.f32.mrf.mxu3 }
 0x496   : > { %v4234_v34 = vadd.f32 %v4160_v11, %v10480_v57  ;;  %v4071_v57 = vpack.c.bf16 %v4051_v3, %v4050_v20  ;;  %v4504_v20 = vld [vmem:[#allocation3 + $0x92] sm:$0xff] }
 0x498   : > { %v10594_v53 = vadd.f32 %v4394_v61, %v4234_v34 }
 0x49a   : > { %v10590_v63 = vpop.f32.mrf.mxu2  ;;  %v3731_v58 = vpop.f32.mrf.mxu1 }
 0x49b   : > { %v3781_v22 = vadd.f32 %v3731_v58, %v10423_v47  ;;  %v4399_v4 = vpop.f32.mrf.mxu0  ;;  %v4053_v58 = vld [vmem:[#allocation3 + $0x158] sm:$0xff] }
 0x49d   : > { %4627 = vmatmul.bf16.gmra.mxu1 %v4530_v6  ;;  %v4162_v27 = vpop.f32.mrf.mxu3  ;;  %4438 = vmatmul.bf16.gmra.mxu0 %v10470_v29  ;;  %v4052_v6 = vld [vmem:[#allocation3 + $0x150] sm:$0xff] }
 0x49e   : > { %v4235_v62 = vadd.f32 %v4162_v27, %v10490_v44  ;;  %v4072_v3 = vpack.c.bf16 %v4053_v58, %v4052_v6  ;;  %v4507_v6 = vld [vmem:[#allocation3 + $0xb2] sm:$0xff] }
 0x4a0   : > { %v10602_v47 = vadd.f32 %v4396_v51, %v4235_v62 }
 0x4a2   : > { %v3955_v49 = vpop.f32.mrf.mxu2  ;;  %v3733_v0 = vpop.f32.mrf.mxu1  ;;  %4204 = vmatmul.bf16.gmra.mxu3 %v4071_v57 }
 0x4a3   : > { %v10596_v45 = vadd.f32 %v3955_v49, %v3777_v19  ;;  %v10600_v42 = vadd.f32 %v3733_v0, %v10437_v1  ;;  %v4401_v18 = vpop.f32.mrf.mxu0 }
 0x4a5   : > { %11674 = vst [vmem:[#allocation11_spill] sm:$0xff] %v10600_v42  ;;  %v4165_v19 = vpop.f32.mrf.mxu3 }
 0x4a6   : > { %v4236_v44 = vadd.f32 %v4165_v19, %v10503_v56 }
 0x4a8   : > { %v10609_v1 = vadd.f32 %v4399_v4, %v4236_v44  ;;  %v4055_v44 = vld [vmem:[#allocation3 + $0x170] sm:$0xff] }
 0x4aa   : > { %v10605_v10 = vpop.f32.mrf.mxu2  ;;  %v3736_v61 = vpop.f32.mrf.mxu1 }
 0x4ab   : > { %v3783_v11 = vadd.f32 %v3736_v61, %v10449_v32  ;;  %v4404_v27 = vpop.f32.mrf.mxu0 }
 0x4ad   : > { %4632 = vmatmul.bf16.gmra.mxu1 %v4531_v38  ;;  %v4167_v34 = vpop.f32.mrf.mxu3  ;;  %4443 = vmatmul.bf16.gmra.mxu0 %v10496_v43  ;;  %v8508_v38 = vld [vmem:[#allocation5 + $0x48] sm:$0xff] }
 0x4ae   : > { %v4237_v29 = vadd.f32 %v4167_v34, %v10513_v26  ;;  %5100 = vmatpush.bf16.msra.mxu2 %v8508_v38 }
 0x4b0   : > { %v10617_v62 = vadd.f32 %v4401_v18, %v4237_v29 }
 0x4b2   : > { %v3960_v55 = vpop.f32.mrf.mxu2  ;;  %v3738_v49 = vpop.f32.mrf.mxu1  ;;  %4209 = vmatmul.bf16.gmra.mxu3 %v4072_v3 }
 0x4b3   : > { %v10611_v51 = vadd.f32 %v3960_v55, %v3779_v40  ;;  %v10615_v56 = vadd.f32 %v3738_v49, %v10460_v2  ;;  %v4505_v40 = vld [vmem:[#allocation3 + $0x9a] sm:$0xff]  ;;  %v4406_v4 = vpop.f32.mrf.mxu0  ;;  %v4004_v2 = vadd.f32 %v10536_v15, %v10484_v41  ;;  %v4054_v55 = vld [vmem:[#allocation3 + $0x168] sm:$0xff] }
 0x4b4   : > { %v4532_v19 = vpack.c.bf16 %v4505_v40, %v4504_v20  ;;  %v4073_v58 = vpack.c.bf16 %v4055_v44, %v4054_v55  ;;  %v4057_v40 = vld [vmem:[#allocation3 + $0x188] sm:$0xff] }
 0x4b5   : > { %11675 = vst [vmem:[#allocation26_spill] sm:$0xff] %v10615_v56  ;;  %v4170_v14 = vpop.f32.mrf.mxu3 }
 0x4b6   : > { %v4238_v0 = vadd.f32 %v4170_v14, %v10527_v52 }
 0x4b8   : > { %v10624_v5 = vadd.f32 %v4404_v27, %v4238_v0 }
 0x4ba   : > { %v10620_v32 = vpop.f32.mrf.mxu2  ;;  %v3741_v26 = vpop.f32.mrf.mxu1 }
 0x4bb   : > { %v3785_v57 = vadd.f32 %v3741_v26, %v10472_v48  ;;  %v10630_v34 = vpop.f32.mrf.mxu0 }
 0x4bd   : > { %4637 = vmatmul.bf16.gmra.mxu1 %v4532_v19  ;;  %v4172_v43 = vpop.f32.mrf.mxu3  ;;  %4448 = vmatmul.bf16.gmra.mxu0 %v10517_v37  ;;  %v4056_v37 = vld [vmem:[#allocation3 + $0x180] sm:$0xff] }
 0x4be   : > { %v4239_v18 = vadd.f32 %v4172_v43, %v4004_v2  ;;  %v4074_v19 = vpack.c.bf16 %v4057_v40, %v4056_v37  ;;  %v8679_v40 = vld [vmem:[#allocation3] sm:$0xff] }
 0x4bf   : > { %v4075_v37 = vpack.c.bf16 %v8679_v40, %v8679_v40 }
 0x4c0   : > { %v10635_v29 = vadd.f32 %v4406_v4, %v4239_v18  ;;  %v4509_v18 = vld [vmem:[#allocation3 + $0xca] sm:$0xff] }
 0x4c2   : > { %v3965_v36 = vpop.f32.mrf.mxu2  ;;  %v3743_v52 = vpop.f32.mrf.mxu1  ;;  %4214 = vmatmul.bf16.gmra.mxu3 %v4073_v58  ;;  %v8504_v58 = vld [vmem:[#allocation5 + $0x28] sm:$0xff] }
 0x4c3   : > { %v10628_v61 = vadd.f32 %v3965_v36, %v3781_v22  ;;  %v10633_v48 = vadd.f32 %v3743_v52, %v10486_v60  ;;  %v4506_v22 = vld [vmem:[#allocation3 + $0xaa] sm:$0xff]  ;;  %v10642_v27 = vpop.f32.mrf.mxu0  ;;  %v8506_v36 = vld [vmem:[#allocation5 + $0x38] sm:$0xff] }
 0x4c4   : > { %v4533_v60 = vpack.c.bf16 %v4507_v6, %v4506_v22  ;;  %5231 = vmatpush.bf16.msrb.mxu3 %v8506_v36  ;;  %v8522_v22 = vld [vmem:[#allocation5 + $0xb8] sm:$0xff]  ;;  %v8521_v6 = vld [vmem:[#allocation5 + $0xb0] sm:$0xff]  ;;  %v8507_v36 = vld [vmem:[#allocation5 + $0x40] sm:$0xff] }
 0x4c5   : > { %11676 = vst [vmem:[#allocation13_spill] sm:$0xff] %v10633_v48  ;;  %v10640_v15 = vpop.f32.mrf.mxu3  ;;  %5433 = vmatpush.bf16.msrb.mxu0 %v8522_v22  ;;  %5101 = vmatpush.bf16.msra.mxu2 %v8507_v36  ;;  %v8500_v36 = vld [vmem:[#allocation5 + $0x8] sm:$0xff] }
 0x4c9   : > { %5434 = vmatpush.bf16.msrb.mxu0 %v8521_v6 }
 0x4ca   : > { %v10638_v41 = vpop.f32.mrf.mxu2  ;;  %v3746_v49 = vpop.f32.mrf.mxu1 }
 0x4cb   : > { %11677 = vst [vmem:[#allocation14_spill] sm:$0xff] %v10638_v41  ;;  %v10645_v3 = vadd.f32 %v3746_v49, %v10498_v9  ;;  %v10651_v4 = vpop.f32.mrf.mxu0  ;;  %v8505_v9 = vld [vmem:[#allocation5 + $0x30] sm:$0xff] }
 0x4cc   : > { %5232 = vmatpush.bf16.msrb.mxu3 %v8505_v9  ;;  %v8529_v41 = vld [vmem:[#allocation5 + $0xf0] sm:$0xff] }
 0x4cd   : > { %4642 = vmatmul.bf16.gmra.mxu1 %v4533_v60  ;;  %v10647_v20 = vpop.f32.mrf.mxu3  ;;  %4453 = vmatmul.bf16.gmra.mxu0 %v10542_v21  ;;  %v8503_v21 = vld [vmem:[#allocation5 + $0x20] sm:$0xff] }
 0x4d0   : > { %5233 = vmatpush.bf16.msrb.mxu3 %v8504_v58  ;;  %v8519_v58 = vld [vmem:[#allocation5 + $0xa0] sm:$0xff] }
 0x4d2   : > { %v3970_v14 = vpop.f32.mrf.mxu2  ;;  %v3748_v26 = vpop.f32.mrf.mxu1  ;;  %4219 = vmatmul.bf16.gmra.mxu3 %v4074_v19  ;;  %v4293_v19 = vld [vmem:[#allocation3 + $0x1a1] sm:$0xff] }
 0x4d3   : > { %v10649_v0 = vadd.f32 %v3970_v14, %v3783_v11  ;;  %v10654_v2 = vadd.f32 %v3748_v26, %v10509_v31  ;;  %v4508_v11 = vld [vmem:[#allocation3 + $0xc2] sm:$0xff]  ;;  %v10661_v55 = vpop.f32.mrf.mxu0  ;;  %v4292_v26 = vld [vmem:[#allocation3 + $0x199] sm:$0xff] }
 0x4d4   : > { %v4534_v31 = vpack.c.bf16 %v4509_v18, %v4508_v11  ;;  %v4309_v9 = vpack.c.bf16 %v4293_v19, %v4292_v26  ;;  %5234 = vmatpush.bf16.msrb.mxu3 %v8503_v21  ;;  %v4511_v21 = vld [vmem:[#allocation3 + $0xe2] sm:$0xff] }
 0x4d5   : > { %11678 = vst [vmem:[#allocation12_spill] sm:$0xff] %v10649_v0  ;;  %v10659_v44 = vpop.f32.mrf.mxu3 }
 0x4d6   : > { %11679 = vst [vmem:[#allocation8_spill] sm:$0xff] %v10654_v2  ;;  %v4982_v2 = vld [vmem:[#allocation4 + $0x9] sm:$0xff] }
 0x4da   : > { %v10657_v43 = vpop.f32.mrf.mxu2  ;;  %v3751_v38 = vpop.f32.mrf.mxu1 }
 0x4db   : > { %11680 = vst [vmem:[#allocation18_spill] sm:$0xff] %v10657_v43  ;;  %v10664_v52 = vadd.f32 %v3751_v38, %v10519_v33  ;;  %v10670_v11 = vpop.f32.mrf.mxu0  ;;  %v8502_v38 = vld [vmem:[#allocation5 + $0x18] sm:$0xff] }
 0x4dc   : > { %5235 = vmatpush.bf16.msrb.mxu3 %v8502_v38  ;;  %v8517_v38 = vld [vmem:[#allocation5 + $0x90] sm:$0xff] }
 0x4dd   : > { %4647 = vmatmul.bf16.gmra.mxu1 %v4534_v31  ;;  %v10666_v60 = vpop.f32.mrf.mxu3  ;;  %v8520_v31 = vld [vmem:[#allocation5 + $0xa8] sm:$0xff]  ;;  %4458 = vmatmul.bf16.gmra.mxu0 %v4309_v9  ;;  %v8499_v9 = vld [vmem:[#allocation5] sm:$0xff] }
 0x4de   : > { %5435 = vmatpush.bf16.msrb.mxu0 %v8520_v31 }
 0x4e2   : > { %v3975_v49 = vpop.f32.mrf.mxu2  ;;  %v3753_v33 = vpop.f32.mrf.mxu1  ;;  %4224 = vmatmul.bf16.gmra.mxu3 %v4075_v37  ;;  %5436 = vmatpush.bf16.msrb.mxu0 %v8519_v58 }
 0x4e3   : > { %v10668_v14 = vadd.f32 %v3975_v49, %v3785_v57  ;;  %v10673_v18 = vadd.f32 %v3753_v33, %v10533_v28  ;;  %v8501_v57 = vld [vmem:[#allocation5 + $0x10] sm:$0xff]  ;;  %v4510_v49 = vld [vmem:[#allocation3 + $0xda] sm:$0xff]  ;;  %v10679_v28 = vpop.f32.mrf.mxu0 }
 0x4e4   : > { %5236 = vmatpush.bf16.msrb.mxu3 %v8501_v57  ;;  %v4535_v19 = vpack.c.bf16 %v4511_v21, %v4510_v49  ;;  %v8518_v33 = vld [vmem:[#allocation5 + $0x98] sm:$0xff] }
 0x4e5   : > { %11681 = vst [vmem:[#allocation17_spill] sm:$0xff] %v10668_v14  ;;  %v10677_v6 = vpop.f32.mrf.mxu3  ;;  %v4981_v57 = vld [vmem:[#allocation4 + $0x1] sm:$0xff] }
 0x4e6   : > { %11682 = vst [vmem:[#allocation15_spill] sm:$0xff] %v10673_v18  ;;  %5437 = vmatpush.bf16.msrb.mxu0 %v8518_v33  ;;  %v4512_v33 = vld [vmem:[#allocation3 + $0xf2] sm:$0xff] }
 0x4e8   : > { %5237 = vmatpush.bf16.msrb.mxu3 %v8500_v36 }
 0x4ea   : > { %v10675_v22 = vpop.f32.mrf.mxu2  ;;  %v3756_v40 = vpop.f32.mrf.mxu1  ;;  %5438 = vmatpush.bf16.msrb.mxu0 %v8517_v38  ;;  %v4513_v38 = vld [vmem:[#allocation3 + $0xfa] sm:$0xff] }
 0x4eb   : > { %11683 = vst [vmem:[#allocation16_spill] sm:$0xff] %v10675_v22  ;;  %v10682_v26 = vadd.f32 %v3756_v40, %v10544_v17  ;;  %v5013_v17 = vpack.c.bf16 %v4982_v2, %v4981_v57  ;;  %v10689_v49 = vpop.f32.mrf.mxu0  ;;  %v8516_v40 = vld [vmem:[#allocation5 + $0x88] sm:$0xff]  ;;  %v10701_v2 = vld [vmem:[%s11626_s5] ss:$0 sm:$0xff]  ;;  %v8530_v57 = vld [vmem:[#allocation5 + $0xf8] sm:$0xff] }
 0x4ec   : > { %5238 = vmatpush.bf16.msrb.mxu3 %v8499_v9  ;;  %v5320_v9 = vld [vmem:[#allocation4 + $0x2] sm:$0xff]  ;;  %5667 = vmatpush.bf16.msrb.mxu1 %v8530_v57 }
 0x4ed   : > { %4652 = vmatmul.bf16.gmra.mxu1 %v4535_v19  ;;  %v10684_v18 = vpop.f32.mrf.mxu3  ;;  %5102 = vmatmul.bf16.vlgmr.msra.gmra.mxu2 %v5013_v17  ;;  %v8515_v19 = vld [vmem:[#allocation5 + $0x80] sm:$0xff] }
 0x4ee   : > { %5439 = vmatpush.bf16.msrb.mxu0 %v8516_v40  ;;  %v10709_v40 = vld [vmem:[%s11626_s5 + $0x1] ss:$0 sm:$0xff] }
 0x4f0   : > { %5668 = vmatpush.bf16.msrb.mxu1 %v8529_v41 }
 0x4f2   : > { %v3980_v31 = vpop.f32.mrf.mxu2  ;;  %v3758_v22 = vpop.f32.mrf.mxu1  ;;  %5239 = vmatmul.bf16.vlgmr.msrb.gmra.mxu3 %v4075_v37  ;;  %5440 = vmatpush.bf16.msrb.mxu0 %v8515_v19 }
 0x4f3   : > { %v10687_v58 = vadd.f32 %v3980_v31, %v10645_v3  ;;  %v10692_v21 = vadd.f32 %v3758_v22, %v10555_v59  ;;  %v5321_v22 = vld [vmem:[#allocation4 + $0xa] sm:$0xff]  ;;  %v10703_v37 = vpop.f32.mrf.mxu0 }
 0x4f4   : > { %v8538_v31 = vld [vmem:[#allocation5 + $0x138] sm:$0xff] }
 0x4f5   : > { %11684 = vst [vmem:[#allocation9_spill] sm:$0xff] %v10687_v58  ;;  %v10696_v3 = vpop.f32.mrf.mxu3  ;;  %5901 = vmatpush.bf16.msrb.mxu2 %v8538_v31  ;;  %v4515_v31 = vld [vmem:[#allocation3 + $0x112] sm:$0xff] }
 0x4f6   : > { %11685 = vst [vmem:[#allocation21_spill] sm:$0xff] %v10692_v21  ;;  %v4536_v21 = vpack.c.bf16 %v4513_v38, %v4512_v33 }
 0x4fa   : > { %v10694_v36 = vpop.f32.mrf.mxu2  ;;  %v4618_v59 = vpop.f32.mrf.mxu1 }
 0x4fb   : > { %11686 = vst [vmem:[#allocation19_spill] sm:$0xff] %v10694_v36  ;;  %v4698_v17 = vadd.f32 %v4618_v59, %v10562_v35  ;;  %v5352_v36 = vpack.c.bf16 %v5321_v22, %v5320_v9  ;;  %v10718_v56 = vpop.f32.mrf.mxu0  ;;  %v4514_v22 = vld [vmem:[#allocation3 + $0x10a] sm:$0xff] }
 0x4fd   : > { %v4732_v19 = vmul.f32 %v10701_v2, %v4698_v17  ;;  %4657 = vmatmul.bf16.gmra.mxu1 %v4536_v21  ;;  %5441 = vmatmul.bf16.vlgmr.msrb.gmra.mxu0 %v5352_v36  ;;  %v10713_v14 = vpop.f32.mrf.mxu3  ;;  %v4537_v17 = vpack.c.bf16 %v4515_v31, %v4514_v22 }
 0x4ff   : > { %v4766_v58 = vadd.f32 %v10709_v40, %v4732_v19 }
 0x501   : > { %v4798_v59 = vmax.f32 %v4766_v58, 0.0 }
 0x502   : > { %v3985_v48 = vpop.f32.mrf.mxu2  ;;  %v4620_v43 = vpop.f32.mrf.mxu1 }
 0x503   : > { %v10716_v35 = vadd.f32 %v3985_v48, %v10664_v52  ;;  %4885 = vst [vmem:[#allocation4 + $0x19] sm:$0xff] %v4798_v59  ;;  %v4699_v33 = vadd.f32 %v4620_v43, %v10571_v12  ;;  %v10727_v52 = vpop.f32.mrf.mxu0  ;;  %v8537_v12 = vld [vmem:[#allocation5 + $0x130] sm:$0xff] }
 0x504   : > { %5902 = vmatpush.bf16.msrb.mxu2 %v8537_v12 }
 0x505   : > { %11687 = vst [vmem:[#allocation20_spill] sm:$0xff] %v10716_v35  ;;  %v4733_v38 = vmul.f32 %v10701_v2, %v4699_v33  ;;  %v10725_v9 = vpop.f32.mrf.mxu3 }
 0x507   : > { %v4767_v21 = vadd.f32 %v10709_v40, %v4733_v38 }
 0x509   : > { %v4799_v57 = vmax.f32 %v4767_v21, 0.0 }
 0x50a   : > { %v10723_v36 = vpop.f32.mrf.mxu2  ;;  %v4623_v48 = vpop.f32.mrf.mxu1  ;;  %v4919_v0 = vld [vmem:[#allocation4 + $0x18] sm:$0xff] }
 0x50b   : > { %11688 = vst [vmem:[#allocation22_spill] sm:$0xff] %v10723_v36  ;;  %v4700_v58 = vadd.f32 %v4623_v48, %v10578_v25  ;;  %v5014_v19 = vpack.c.bf16 %v4799_v57, %v4798_v59 }
 0x50c   : > { %4886 = vst [vmem:[#allocation4 + $0x21] sm:$0xff] %v4799_v57  ;;  %v10737_v57 = vpop.f32.mrf.mxu0 }
 0x50d   : > { %v4734_v43 = vmul.f32 %v10701_v2, %v4700_v58  ;;  %4662 = vmatmul.bf16.gmra.mxu1 %v4537_v17  ;;  %5107 = vmatmul.bf16.gmra.mxu2 %v5014_v19  ;;  %v10732_v36 = vpop.f32.mrf.mxu3  ;;  %11690 = vst [vmem:[#allocation25_spill] sm:$0xff] %v10737_v57 }
 0x50f   : > { %v4768_v33 = vadd.f32 %v10709_v40, %v4734_v43  ;;  %v4516_v43 = vld [vmem:[#allocation3 + $0x122] sm:$0xff] }
 0x511   : > { %v4800_v35 = vmax.f32 %v4768_v33, 0.0  ;;  %v4517_v33 = vld [vmem:[#allocation3 + $0x12a] sm:$0xff] }
 0x512   : > { %v3990_v38 = vpop.f32.mrf.mxu2  ;;  %v4625_v25 = vpop.f32.mrf.mxu1 }
 0x513   : > { %v10735_v21 = vadd.f32 %v3990_v38, %v10682_v26  ;;  %v4920_v22 = vld [vmem:[#allocation4 + $0x20] sm:$0xff]  ;;  %4887 = vst [vmem:[#allocation4 + $0x31] sm:$0xff] %v4800_v35  ;;  %v4701_v48 = vadd.f32 %v4625_v25, %v10587_v7 }
 0x514   : > { %v5322_v59 = vld [vmem:[#allocation4 + $0x1a] sm:$0xff]  ;;  %v5323_v31 = vld [vmem:[#allocation4 + $0x22] sm:$0xff]  ;;  %v10740_v58 = vpack.c.bf16 %v4920_v22, %v4919_v0  ;;  %v10747_v42 = vpop.f32.mrf.mxu0  ;;  %v4538_v0 = vpack.c.bf16 %v4517_v33, %v4516_v43 }
 0x515   : > { %11689 = vst [vmem:[#allocation10_spill] sm:$0xff] %v10735_v21  ;;  %v5353_v17 = vpack.c.bf16 %v5323_v31, %v5322_v59  ;;  %v4735_v19 = vmul.f32 %v10701_v2, %v4701_v48  ;;  %v10745_v12 = vpop.f32.mrf.mxu3 }
 0x516   : > { %5244 = vmatmul.bf16.gmra.mxu3 %v10740_v58  ;;  %11691 = vst [vmem:[#allocation23_spill] sm:$0xff] %v10747_v42 }
 0x517   : > { %5446 = vmatmul.bf16.gmra.mxu0 %v5353_v17  ;;  %v4769_v26 = vadd.f32 %v10709_v40, %v4735_v19 }
 0x519   : > { %v4801_v38 = vmax.f32 %v4769_v26, 0.0 }
 0x51a   : > { %v4628_v21 = vpop.f32.mrf.mxu1  ;;  %v4921_v48 = vld [vmem:[#allocation4 + $0x30] sm:$0xff] }
 0x51b   : > { %4888 = vst [vmem:[#allocation4 + $0x39] sm:$0xff] %v4801_v38  ;;  %v4702_v7 = vadd.f32 %v4628_v21, %v10594_v53  ;;  %v5015_v41 = vpack.c.bf16 %v4801_v38, %v4800_v35 }
 0x51c   : > { %v10754_v42 = vpop.f32.mrf.mxu0 }
 0x51d   : > { %v4736_v25 = vmul.f32 %v10701_v2, %v4702_v7  ;;  %4667 = vmatmul.bf16.gmra.mxu1 %v4538_v0  ;;  %5112 = vmatmul.bf16.gmra.mxu2 %v5015_v41  ;;  %v10752_v59 = vpop.f32.mrf.mxu3  ;;  %11693 = vst [vmem:[#allocation27_spill] sm:$0xff] %v10754_v42  ;;  %v4518_v7 = vld [vmem:[#allocation3 + $0x13a] sm:$0xff]  ;;  %v4519_v0 = vld [vmem:[#allocation3 + $0x142] sm:$0xff] }
 0x51e   : > { %11692 = vst [vmem:[#allocation24_spill] sm:$0xff] %v10752_v59 }
 0x51f   : > { %v4770_v22 = vadd.f32 %v10709_v40, %v4736_v25 }
 0x521   : > { %v4802_v31 = vmax.f32 %v4770_v22, 0.0 }
 0x522   : > { %v4630_v17 = vpop.f32.mrf.mxu1  ;;  %v4922_v19 = vld [vmem:[#allocation4 + $0x38] sm:$0xff] }
 0x523   : > { %v5324_v26 = vld [vmem:[#allocation4 + $0x32] sm:$0xff]  ;;  %v5325_v57 = vld [vmem:[#allocation4 + $0x3a] sm:$0xff]  ;;  %4889 = vst [vmem:[#allocation4 + $0x49] sm:$0xff] %v4802_v31  ;;  %v4703_v53 = vadd.f32 %v4630_v17, %v10602_v47  ;;  %v10757_v35 = vpack.c.bf16 %v4922_v19, %v4921_v48  ;;  %v4539_v48 = vpack.c.bf16 %v4519_v0, %v4518_v7 }
 0x524   : > { %v5354_v21 = vpack.c.bf16 %v5325_v57, %v5324_v26  ;;  %v10764_v22 = vpop.f32.mrf.mxu0  ;;  %v8536_v17 = vld [vmem:[#allocation5 + $0x128] sm:$0xff] }
 0x525   : > { %v4737_v43 = vmul.f32 %v10701_v2, %v4703_v53  ;;  %v10762_v38 = vpop.f32.mrf.mxu3  ;;  %11695 = vst [vmem:[#allocation29_spill] sm:$0xff] %v10764_v22  ;;  %5903 = vmatpush.bf16.msrb.mxu2 %v8536_v17 }
 0x526   : > { %5249 = vmatmul.bf16.gmra.mxu3 %v10757_v35  ;;  %11694 = vst [vmem:[#allocation28_spill] sm:$0xff] %v10762_v38 }
 0x527   : > { %5451 = vmatmul.bf16.gmra.mxu0 %v5354_v21  ;;  %v4771_v33 = vadd.f32 %v10709_v40, %v4737_v43 }
 0x529   : > { %v4803_v41 = vmax.f32 %v4771_v33, 0.0  ;;  %v8528_v33 = vld [vmem:[#allocation5 + $0xe8] sm:$0xff] }
 0x52a   : > { %v4633_v25 = vpop.f32.mrf.mxu1  ;;  %v4923_v43 = vld [vmem:[#allocation4 + $0x48] sm:$0xff]  ;;  %5669 = vmatpush.bf16.msrb.mxu1 %v8528_v33 }
 0x52b   : > { %4890 = vst [vmem:[#allocation4 + $0x51] sm:$0xff] %v4803_v41  ;;  %v4704_v47 = vadd.f32 %v4633_v25, %v10609_v1  ;;  %v5016_v57 = vpack.c.bf16 %v4803_v41, %v4802_v31 }
 0x52c   : > { %v10771_v1 = vpop.f32.mrf.mxu0 }
 0x52d   : > { %v4738_v19 = vmul.f32 %v10701_v2, %v4704_v47  ;;  %4672 = vmatmul.bf16.gmra.mxu1 %v4539_v48  ;;  %5117 = vmatmul.bf16.gmra.mxu2 %v5016_v57  ;;  %v10769_v53 = vpop.f32.mrf.mxu3  ;;  %11696 = vst [vmem:[#allocation30_spill] sm:$0xff] %v10771_v1  ;;  %v4520_v48 = vld [vmem:[#allocation3 + $0x152] sm:$0xff]  ;;  %v4521_v57 = vld [vmem:[#allocation3 + $0x15a] sm:$0xff] }
 0x52f   : > { %v4772_v26 = vadd.f32 %v10709_v40, %v4738_v19 }
 0x531   : > { %v4804_v21 = vmax.f32 %v4772_v26, 0.0 }
 0x532   : > { %v4635_v42 = vpop.f32.mrf.mxu1  ;;  %v4924_v22 = vld [vmem:[#allocation4 + $0x50] sm:$0xff] }
 0x533   : > { %v5326_v38 = vld [vmem:[#allocation4 + $0x4a] sm:$0xff]  ;;  %v5327_v59 = vld [vmem:[#allocation4 + $0x52] sm:$0xff]  ;;  %4891 = vst [vmem:[#allocation4 + $0x61] sm:$0xff] %v4804_v21  ;;  %v4705_v31 = vadd.f32 %v4635_v42, %v10617_v62  ;;  %v10774_v7 = vpack.c.bf16 %v4924_v22, %v4923_v43  ;;  %v4540_v62 = vpack.c.bf16 %v4521_v57, %v4520_v48  ;;  %v4240_v57 = vadd.f32 %v10640_v15, %v10549_v8 }
 0x534   : > { %v5355_v0 = vpack.c.bf16 %v5327_v59, %v5326_v38  ;;  %v10781_v26 = vpop.f32.mrf.mxu0 }
 0x535   : > { %v4739_v41 = vmul.f32 %v10701_v2, %v4705_v31  ;;  %v10779_v47 = vpop.f32.mrf.mxu3  ;;  %11697 = vst [vmem:[#allocation31_spill] sm:$0xff] %v10781_v26 }
 0x536   : > { %5254 = vmatmul.bf16.gmra.mxu3 %v10774_v7 }
 0x537   : > { %5456 = vmatmul.bf16.gmra.mxu0 %v5355_v0  ;;  %v4773_v25 = vadd.f32 %v10709_v40, %v4739_v41 }
 0x539   : > { %v4805_v17 = vmax.f32 %v4773_v25, 0.0 }
 0x53a   : > { %v4638_v19 = vpop.f32.mrf.mxu1  ;;  %v4925_v31 = vld [vmem:[#allocation4 + $0x60] sm:$0xff] }
 0x53b   : > { %4892 = vst [vmem:[#allocation4 + $0x69] sm:$0xff] %v4805_v17  ;;  %v4706_v42 = vadd.f32 %v4638_v19, %v10624_v5  ;;  %v5017_v59 = vpack.c.bf16 %v4805_v17, %v4804_v21 }
 0x53c   : > { %v10788_v26 = vpop.f32.mrf.mxu0 }
 0x53d   : > { %v4740_v38 = vmul.f32 %v10701_v2, %v4706_v42  ;;  %4677 = vmatmul.bf16.gmra.mxu1 %v4540_v62  ;;  %5122 = vmatmul.bf16.gmra.mxu2 %v5017_v59  ;;  %v10786_v43 = vpop.f32.mrf.mxu3  ;;  %v4522_v62 = vld [vmem:[#allocation3 + $0x16a] sm:$0xff]  ;;  %v4523_v59 = vld [vmem:[#allocation3 + $0x172] sm:$0xff] }
 0x53e   : > { %v4541_v15 = vpack.c.bf16 %v4523_v59, %v4522_v62 }
 0x53f   : > { %v4774_v22 = vadd.f32 %v10709_v40, %v4740_v38 }
 0x541   : > { %v4806_v33 = vmax.f32 %v4774_v22, 0.0 }
 0x542   : > { %v4640_v0 = vpop.f32.mrf.mxu1  ;;  %v4926_v41 = vld [vmem:[#allocation4 + $0x68] sm:$0xff] }
 0x543   : > { %v5328_v25 = vld [vmem:[#allocation4 + $0x62] sm:$0xff]  ;;  %v5329_v1 = vld [vmem:[#allocation4 + $0x6a] sm:$0xff]  ;;  %4893 = vst [vmem:[#allocation4 + $0x79] sm:$0xff] %v4806_v33  ;;  %v4707_v5 = vadd.f32 %v4640_v0, %v10635_v29  ;;  %v10791_v21 = vpack.c.bf16 %v4926_v41, %v4925_v31  ;;  %v4474_v29 = vadd.f32 %v10630_v34, %v4240_v57 }
 0x544   : > { %v5356_v48 = vpack.c.bf16 %v5329_v1, %v5328_v25  ;;  %v4006_v1 = vadd.f32 %v10558_v13, %v10507_v24  ;;  %v10803_v31 = vpop.f32.mrf.mxu0  ;;  %v8535_v41 = vld [vmem:[#allocation5 + $0x120] sm:$0xff] }
 0x545   : > { %v4741_v17 = vmul.f32 %v10701_v2, %v4707_v5  ;;  %v10798_v42 = vpop.f32.mrf.mxu3  ;;  %5904 = vmatpush.bf16.msrb.mxu2 %v8535_v41  ;;  %v4524_v41 = vld [vmem:[#allocation3 + $0x182] sm:$0xff] }
 0x546   : > { %5259 = vmatmul.bf16.gmra.mxu3 %v10791_v21  ;;  %v4241_v25 = vadd.f32 %v10647_v20, %v4006_v1 }
 0x547   : > { %5461 = vmatmul.bf16.gmra.mxu0 %v5356_v48  ;;  %v4775_v19 = vadd.f32 %v10709_v40, %v4741_v17  ;;  %v8527_v17 = vld [vmem:[#allocation5 + $0xe0] sm:$0xff] }
 0x548   : > { %v4475_v24 = vadd.f32 %v10642_v27, %v4241_v25  ;;  %5670 = vmatpush.bf16.msrb.mxu1 %v8527_v17  ;;  %v4525_v25 = vld [vmem:[#allocation3 + $0x18a] sm:$0xff] }
 0x549   : > { %v4807_v38 = vmax.f32 %v4775_v19, 0.0 }
 0x54a   : > { %v4643_v22 = vpop.f32.mrf.mxu1  ;;  %v4927_v13 = vld [vmem:[#allocation4 + $0x78] sm:$0xff] }
 0x54b   : > { %4894 = vst [vmem:[#allocation4 + $0x81] sm:$0xff] %v4807_v38  ;;  %v4708_v8 = vadd.f32 %v4643_v22, %v4474_v29  ;;  %v5018_v0 = vpack.c.bf16 %v4807_v38, %v4806_v33  ;;  %v8526_v22 = vld [vmem:[#allocation5 + $0xd8] sm:$0xff] }
 0x54c   : > { %v10813_v1 = vpop.f32.mrf.mxu0  ;;  %5671 = vmatpush.bf16.msrb.mxu1 %v8526_v22 }
 0x54d   : > { %v4742_v5 = vmul.f32 %v10701_v2, %v4708_v8  ;;  %4682 = vmatmul.bf16.gmra.mxu1 %v4541_v15  ;;  %5127 = vmatmul.bf16.gmra.mxu2 %v5018_v0  ;;  %v10808_v48 = vpop.f32.mrf.mxu3  ;;  %v4242_v8 = vadd.f32 %v10659_v44, %v10565_v50  ;;  %v4542_v44 = vpack.c.bf16 %v4525_v25, %v4524_v41 }
 0x54f   : > { %v4776_v34 = vadd.f32 %v10709_v40, %v4742_v5 }
 0x551   : > { %v4808_v57 = vmax.f32 %v4776_v34, 0.0  ;;  %v4476_v34 = vadd.f32 %v10651_v4, %v4242_v8 }
 0x552   : > { %v4645_v19 = vpop.f32.mrf.mxu1  ;;  %v4928_v62 = vld [vmem:[#allocation4 + $0x80] sm:$0xff] }
 0x553   : > { %v5330_v33 = vld [vmem:[#allocation4 + $0x7a] sm:$0xff]  ;;  %v5331_v59 = vld [vmem:[#allocation4 + $0x82] sm:$0xff]  ;;  %4895 = vst [vmem:[#allocation4 + $0x91] sm:$0xff] %v4808_v57  ;;  %v4709_v20 = vadd.f32 %v4645_v19, %v4475_v24  ;;  %v10811_v38 = vpack.c.bf16 %v4928_v62, %v4927_v13  ;;  %v4008_v13 = vadd.f32 %v10574_v30, %v10531_v54 }
 0x554   : > { %v5357_v29 = vpack.c.bf16 %v5331_v59, %v5330_v33  ;;  %v8525_v19 = vld [vmem:[#allocation5 + $0xd0] sm:$0xff]  ;;  %v10827_v59 = vpop.f32.mrf.mxu0 }
 0x555   : > { %v4743_v27 = vmul.f32 %v10701_v2, %v4709_v20  ;;  %v10820_v0 = vpop.f32.mrf.mxu3  ;;  %v4243_v62 = vadd.f32 %v10666_v60, %v4008_v13  ;;  %5672 = vmatpush.bf16.msrb.mxu1 %v8525_v19  ;;  %v8524_v20 = vld [vmem:[#allocation5 + $0xc8] sm:$0xff]  ;;  %v4526_v13 = vld [vmem:[#allocation3 + $0x19a] sm:$0xff] }
 0x556   : > { %5264 = vmatmul.bf16.gmra.mxu3 %v10811_v38 }
 0x557   : > { %5466 = vmatmul.bf16.gmra.mxu0 %v5357_v29  ;;  %v4777_v15 = vadd.f32 %v10709_v40, %v4743_v27  ;;  %v4477_v30 = vadd.f32 %v10661_v55, %v4243_v62 }
 0x559   : > { %v4809_v5 = vmax.f32 %v4777_v15, 0.0  ;;  %5673 = vmatpush.bf16.msrb.mxu1 %v8524_v20 }
 0x55a   : > { %v4648_v24 = vpop.f32.mrf.mxu1  ;;  %v4929_v22 = vld [vmem:[#allocation4 + $0x90] sm:$0xff] }
 0x55b   : > { %4896 = vst [vmem:[#allocation4 + $0x99] sm:$0xff] %v4809_v5  ;;  %v4710_v50 = vadd.f32 %v4648_v24, %v4476_v34  ;;  %v5019_v17 = vpack.c.bf16 %v4809_v5, %v4808_v57  ;;  %v8523_v5 = vld [vmem:[#allocation5 + $0xc0] sm:$0xff]  ;;  %v4244_v34 = vadd.f32 %v10677_v6, %v10581_v39  ;;  %v4010_v39 = vadd.f32 %v10590_v63, %v10553_v16 }
 0x55c   : > { %v10839_v55 = vpop.f32.mrf.mxu0 }
 0x55d   : > { %v4744_v33 = vmul.f32 %v10701_v2, %v4710_v50  ;;  %4687 = vmatmul.bf16.gmra.mxu1 %v4542_v44  ;;  %5132 = vmatmul.bf16.gmra.mxu2 %v5019_v17  ;;  %v10830_v29 = vpop.f32.mrf.mxu3  ;;  %v4527_v50 = vld [vmem:[#allocation3 + $0x1a2] sm:$0xff]  ;;  %v4478_v62 = vadd.f32 %v10670_v11, %v4244_v34 }
 0x55e   : > { %5674 = vmatpush.bf16.msrb.mxu1 %v8523_v5 }
 0x55f   : > { %v4778_v4 = vadd.f32 %v10709_v40, %v4744_v33  ;;  %v4543_v33 = vpack.c.bf16 %v4527_v50, %v4526_v13  ;;  %v4246_v50 = vadd.f32 %v10696_v3, %v10596_v45 }
 0x561   : > { %v4810_v54 = vmax.f32 %v4778_v4, 0.0 }
 0x562   : > { %v4650_v57 = vpop.f32.mrf.mxu1  ;;  %v4930_v8 = vld [vmem:[#allocation4 + $0x98] sm:$0xff] }
 0x563   : > { %v5332_v27 = vld [vmem:[#allocation4 + $0x92] sm:$0xff]  ;;  %v5333_v60 = vld [vmem:[#allocation4 + $0x9a] sm:$0xff]  ;;  %4897 = vst [vmem:[#allocation4 + $0xa9] sm:$0xff] %v4810_v54  ;;  %v4711_v15 = vadd.f32 %v4650_v57, %v4477_v30  ;;  %v10833_v41 = vpack.c.bf16 %v4930_v8, %v4929_v22  ;;  %v8534_v30 = vld [vmem:[#allocation5 + $0x118] sm:$0xff]  ;;  %v4245_v22 = vadd.f32 %v10684_v18, %v4010_v39  ;;  %v10849_v8 = vpop.f32.mrf.mxu2 }
 0x564   : > { %v5358_v25 = vpack.c.bf16 %v5333_v60, %v5332_v27  ;;  %5905 = vmatpush.bf16.msrb.mxu2 %v8534_v30  ;;  %v10854_v60 = vpop.f32.mrf.mxu0  ;;  %v4012_v30 = vadd.f32 %v10605_v10, %v10569_v23 }
 0x565   : > { %v4745_v24 = vmul.f32 %v10701_v2, %v4711_v15  ;;  %v10842_v17 = vpop.f32.mrf.mxu3  ;;  %v4479_v63 = vadd.f32 %v10679_v28, %v4245_v22 }
 0x566   : > { %5269 = vmatmul.bf16.gmra.mxu3 %v10833_v41 }
 0x567   : > { %5471 = vmatmul.bf16.gmra.mxu0 %v5358_v25  ;;  %v4779_v44 = vadd.f32 %v10709_v40, %v4745_v24 }
 0x569   : > { %v4811_v19 = vmax.f32 %v4779_v44, 0.0 }
 0x56a   : > { %v4653_v20 = vpop.f32.mrf.mxu1 }
 0x56b   : > { %4898 = vst [vmem:[#allocation4 + $0xb1] sm:$0xff] %v4811_v19  ;;  %v4712_v6 = vadd.f32 %v4653_v20, %v4478_v62  ;;  %v5020_v4 = vpack.c.bf16 %v4811_v19, %v4810_v54  ;;  %v4931_v54 = vld [vmem:[#allocation4 + $0xa8] sm:$0xff]  ;;  %v4480_v20 = vadd.f32 %v10689_v49, %v4246_v50 }
 0x56d   : > { %v4746_v57 = vmul.f32 %v10701_v2, %v4712_v6  ;;  %4692 = vmatmul.bf16.gmra.mxu1 %v4543_v33  ;;  %5137 = vmatmul.bf16.gmra.mxu2 %v5020_v4  ;;  %v10852_v27 = vpop.f32.mrf.mxu3 }
 0x56f   : > { %v4780_v11 = vadd.f32 %v10709_v40, %v4746_v57  ;;  %v4247_v57 = vadd.f32 %v10713_v14, %v4012_v30 }
 0x570   : > { %v5103_v19 = vpop.f32.mrf.mxu2 }
 0x571   : > { %v4812_v16 = vmax.f32 %v4780_v11, 0.0 }
 0x572   : > { %v4655_v15 = vpop.f32.mrf.mxu1  ;;  %v4932_v25 = vld [vmem:[#allocation4 + $0xb0] sm:$0xff] }
 0x573   : > { %v5334_v18 = vld [vmem:[#allocation4 + $0xaa] sm:$0xff]  ;;  %v5335_v5 = vld [vmem:[#allocation4 + $0xb2] sm:$0xff]  ;;  %4899 = vst [vmem:[#allocation4 + $0xc1] sm:$0xff] %v4812_v16  ;;  %v4713_v34 = vadd.f32 %v4655_v15, %v4479_v63  ;;  %v10857_v24 = vpack.c.bf16 %v4932_v25, %v4931_v54  ;;  %v4481_v54 = vadd.f32 %v10703_v37, %v4247_v57 }
 0x574   : > { %v5359_v13 = vpack.c.bf16 %v5335_v5, %v5334_v18 }
 0x575   : > { %v4747_v44 = vmul.f32 %v10701_v2, %v4713_v34  ;;  %v5240_v62 = vpop.f32.mrf.mxu3  ;;  %v4248_v34 = vadd.f32 %v10725_v9, %v10611_v51 }
 0x576   : > { %5274 = vmatmul.bf16.gmra.mxu3 %v10857_v24  ;;  %v5241_v39 = vadd.f32 %v5240_v62, %v5103_v19  ;;  %v4014_v62 = vadd.f32 %v10620_v32, %v10585_v46 }
 0x577   : > { %5476 = vmatmul.bf16.gmra.mxu0 %v5359_v13  ;;  %v4781_v28 = vadd.f32 %v10709_v40, %v4747_v44  ;;  %v4482_v44 = vadd.f32 %v10718_v56, %v4248_v34 }
 0x578   : > { %v10881_v13 = vpop.f32.mrf.mxu2 }
 0x579   : > { %v4813_v33 = vmax.f32 %v4781_v28, 0.0 }
 0x57a   : > { %v4658_v6 = vpop.f32.mrf.mxu1  ;;  %v5442_v4 = vpop.f32.mrf.mxu0  ;;  %v4933_v15 = vld [vmem:[#allocation4 + $0xc0] sm:$0xff] }
 0x57b   : > { %4900 = vst [vmem:[#allocation4 + $0xc9] sm:$0xff] %v4813_v33  ;;  %v4714_v45 = vadd.f32 %v4658_v6, %v4480_v20  ;;  %v10867_v3 = vadd.f32 %v5442_v4, %v5241_v39  ;;  %v5021_v22 = vpack.c.bf16 %v4813_v33, %v4812_v16  ;;  %v8533_v33 = vld [vmem:[#allocation5 + $0x110] sm:$0xff]  ;;  %v4249_v20 = vadd.f32 %v10732_v36, %v4014_v62  ;;  %v11701_v62 = vld [vmem:[#allocation24_spill] sm:$0xff] }
 0x57c   : > { %5906 = vmatpush.bf16.msrb.mxu2 %v8533_v33 }
 0x57d   : > { %v4748_v11 = vmul.f32 %v10701_v2, %v4714_v45  ;;  %5675 = vmatmul.bf16.vlgmr.msrb.gmra.mxu1 %v10740_v58  ;;  %5142 = vmatmul.bf16.gmra.mxu2 %v5021_v22  ;;  %v10892_v6 = vpop.f32.mrf.mxu3  ;;  %v4483_v46 = vadd.f32 %v10727_v52, %v4249_v20 }
 0x57f   : > { %v4782_v49 = vadd.f32 %v10709_v40, %v4748_v11 }
 0x581   : > { %v4814_v63 = vmax.f32 %v4782_v49, 0.0 }
 0x582   : > { %v4660_v25 = vpop.f32.mrf.mxu1  ;;  %v4934_v23 = vld [vmem:[#allocation4 + $0xc8] sm:$0xff]  ;;  %v10884_v19 = vpop.f32.mrf.mxu0 }
 0x583   : > { %v5336_v10 = vld [vmem:[#allocation4 + $0xc2] sm:$0xff]  ;;  %v5337_v18 = vld [vmem:[#allocation4 + $0xca] sm:$0xff]  ;;  %4901 = vst [vmem:[#allocation4 + $0xd9] sm:$0xff] %v4814_v63  ;;  %v4715_v5 = vadd.f32 %v4660_v25, %v4481_v54  ;;  %v10874_v16 = vpack.c.bf16 %v4934_v23, %v4933_v15  ;;  %v4250_v54 = vadd.f32 %v10745_v12, %v10628_v61 }
 0x584   : > { %v5360_v14 = vpack.c.bf16 %v5337_v18, %v5336_v10 }
 0x585   : > { %v4749_v58 = vmul.f32 %v10701_v2, %v4715_v5  ;;  %v11698_v5 = vld [vmem:[#allocation25_spill] sm:$0xff] }
 0x586   : > { %5279 = vmatmul.bf16.gmra.mxu3 %v10874_v16 }
 0x587   : > { %5481 = vmatmul.bf16.gmra.mxu0 %v5360_v14  ;;  %v4783_v37 = vadd.f32 %v10709_v40, %v4749_v58  ;;  %v4484_v14 = vadd.f32 %v11698_v5, %v4250_v54 }
 0x589   : > { %v4815_v50 = vmax.f32 %v4783_v37, 0.0  ;;  %v11699_v37 = vld [vmem:[#allocation11_spill] sm:$0xff] }
 0x58a   : > { %v4663_v28 = vpop.f32.mrf.mxu1  ;;  %v4935_v32 = vld [vmem:[#allocation4 + $0xd8] sm:$0xff] }
 0x58b   : > { %4902 = vst [vmem:[#allocation4 + $0xe1] sm:$0xff] %v4815_v50  ;;  %v4716_v51 = vadd.f32 %v4663_v28, %v4482_v44  ;;  %v5022_v9 = vpack.c.bf16 %v4815_v50, %v4814_v63  ;;  %v11700_v50 = vld [vmem:[#allocation14_spill] sm:$0xff] }
 0x58c   : > { %v4016_v44 = vadd.f32 %v11700_v50, %v11699_v37  ;;  %v11705_v37 = vld [vmem:[#allocation27_spill] sm:$0xff] }
 0x58d   : > { %v4750_v39 = vmul.f32 %v10701_v2, %v4716_v51  ;;  %5680 = vmatmul.bf16.gmra.mxu1 %v10757_v35  ;;  %5147 = vmatmul.bf16.gmra.mxu2 %v5022_v9 }
 0x58e   : > { %v4251_v51 = vadd.f32 %v11701_v62, %v4016_v44 }
 0x58f   : > { %v4784_v56 = vadd.f32 %v10709_v40, %v4750_v39 }
 0x590   : > { %v5108_v4 = vpop.f32.mrf.mxu2 }
 0x591   : > { %v4816_v30 = vmax.f32 %v4784_v56, 0.0 }
 0x592   : > { %v4665_v45 = vpop.f32.mrf.mxu1  ;;  %v4936_v57 = vld [vmem:[#allocation4 + $0xe0] sm:$0xff] }
 0x593   : > { %v5338_v11 = vld [vmem:[#allocation4 + $0xda] sm:$0xff]  ;;  %v5339_v36 = vld [vmem:[#allocation4 + $0xe2] sm:$0xff]  ;;  %4903 = vst [vmem:[#allocation4 + $0xf1] sm:$0xff] %v4816_v30  ;;  %v4717_v49 = vadd.f32 %v4665_v45, %v4483_v46  ;;  %v10895_v63 = vpack.c.bf16 %v4936_v57, %v4935_v32 }
 0x594   : > { %v5447_v22 = vpop.f32.mrf.mxu0  ;;  %v5361_v35 = vpack.c.bf16 %v5339_v36, %v5338_v11  ;;  %v11702_v46 = vld [vmem:[#allocation23_spill] sm:$0xff] }
 0x595   : > { %v4751_v15 = vmul.f32 %v10701_v2, %v4717_v49  ;;  %v4485_v32 = vadd.f32 %v11702_v46, %v4251_v51 }
 0x596   : > { %5284 = vmatmul.bf16.gmra.mxu3 %v10895_v63 }
 0x597   : > { %5486 = vmatmul.bf16.gmra.mxu0 %v5361_v35  ;;  %v4785_v52 = vadd.f32 %v10709_v40, %v4751_v15  ;;  %v11703_v15 = vld [vmem:[#allocation12_spill] sm:$0xff] }
 0x598   : > { %v5110_v23 = vpop.f32.mrf.mxu2 }
 0x599   : > { %v5245_v25 = vpop.f32.mrf.mxu3  ;;  %v4817_v10 = vmax.f32 %v4785_v52, 0.0  ;;  %v11704_v52 = vld [vmem:[#allocation28_spill] sm:$0xff] }
 0x59a   : > { %v5246_v18 = vadd.f32 %v5245_v25, %v5108_v4  ;;  %v4668_v34 = vpop.f32.mrf.mxu1  ;;  %v4937_v45 = vld [vmem:[#allocation4 + $0xf0] sm:$0xff]  ;;  %v4252_v25 = vadd.f32 %v11704_v52, %v11703_v15 }
 0x59b   : > { %4904 = vst [vmem:[#allocation4 + $0xf9] sm:$0xff] %v4817_v10  ;;  %v4718_v61 = vadd.f32 %v4668_v34, %v4484_v14  ;;  %v5023_v12 = vpack.c.bf16 %v4817_v10, %v4816_v30 }
 0x59c   : > { %v5449_v58 = vpop.f32.mrf.mxu0  ;;  %v10905_v28 = vadd.f32 %v5447_v22, %v5246_v18  ;;  %v4486_v50 = vadd.f32 %v11705_v37, %v4252_v25 }
 0x59d   : > { %v4752_v9 = vmul.f32 %v10701_v2, %v4718_v61  ;;  %5685 = vmatmul.bf16.gmra.mxu1 %v10774_v7  ;;  %5152 = vmatmul.bf16.gmra.mxu2 %v5023_v12  ;;  %v11707_v12 = vld [vmem:[#allocation18_spill] sm:$0xff] }
 0x59f   : > { %v4786_v33 = vadd.f32 %v10709_v40, %v4752_v9 }
 0x5a0   : > { %v5113_v39 = vpop.f32.mrf.mxu2 }
 0x5a1   : > { %v5247_v20 = vpop.f32.mrf.mxu3  ;;  %v4818_v56 = vmax.f32 %v4786_v33, 0.0  ;;  %v8532_v33 = vld [vmem:[#allocation5 + $0x108] sm:$0xff] }
 0x5a2   : > { %v5248_v4 = vadd.f32 %v5247_v20, %v5110_v23  ;;  %v4670_v57 = vpop.f32.mrf.mxu1  ;;  %v4938_v22 = vld [vmem:[#allocation4 + $0xf8] sm:$0xff]  ;;  %5907 = vmatpush.bf16.msrb.mxu2 %v8532_v33 }
 0x5a3   : > { %v5340_v11 = vld [vmem:[#allocation4 + $0xf2] sm:$0xff]  ;;  %v5341_v36 = vld [vmem:[#allocation4 + $0xfa] sm:$0xff]  ;;  %4905 = vst [vmem:[#allocation4 + $0x109] sm:$0xff] %v4818_v56  ;;  %v4719_v49 = vadd.f32 %v4670_v57, %v4485_v32  ;;  %v10912_v35 = vpack.c.bf16 %v4938_v22, %v4937_v45 }
 0x5a4   : > { %v5452_v30 = vpop.f32.mrf.mxu0  ;;  %v5362_v7 = vpack.c.bf16 %v5341_v36, %v5340_v11  ;;  %v10914_v54 = vadd.f32 %v5449_v58, %v5248_v4  ;;  %v11706_v58 = vld [vmem:[#allocation26_spill] sm:$0xff]  ;;  %v11708_v11 = vld [vmem:[#allocation29_spill] sm:$0xff] }
 0x5a5   : > { %v4753_v23 = vmul.f32 %v10701_v2, %v4719_v49  ;;  %v4018_v62 = vadd.f32 %v11707_v12, %v11706_v58  ;;  %v11710_v58 = vld [vmem:[#allocation30_spill] sm:$0xff] }
 0x5a6   : > { %5289 = vmatmul.bf16.gmra.mxu3 %v10912_v35 }
 0x5a7   : > { %5491 = vmatmul.bf16.gmra.mxu0 %v5362_v7  ;;  %v4787_v10 = vadd.f32 %v10709_v40, %v4753_v23  ;;  %v4253_v4 = vadd.f32 %v10769_v53, %v4018_v62 }
 0x5a8   : > { %v5115_v5 = vpop.f32.mrf.mxu2 }
 0x5a9   : > { %v5250_v18 = vpop.f32.mrf.mxu3  ;;  %v4819_v14 = vmax.f32 %v4787_v10, 0.0  ;;  %v4487_v36 = vadd.f32 %v11708_v11, %v4253_v4  ;;  %v11709_v10 = vld [vmem:[#allocation17_spill] sm:$0xff] }
 0x5aa   : > { %v5251_v34 = vadd.f32 %v5250_v18, %v5113_v39  ;;  %v4673_v44 = vpop.f32.mrf.mxu1  ;;  %v4254_v18 = vadd.f32 %v10779_v47, %v11709_v10 }
 0x5ab   : > { %4906 = vst [vmem:[#allocation4 + $0x111] sm:$0xff] %v4819_v14  ;;  %v4720_v51 = vadd.f32 %v4673_v44, %v4486_v50  ;;  %v5024_v9 = vpack.c.bf16 %v4819_v14, %v4818_v56  ;;  %v4939_v56 = vld [vmem:[#allocation4 + $0x108] sm:$0xff] }
 0x5ac   : > { %v5454_v61 = vpop.f32.mrf.mxu0  ;;  %v10924_v20 = vadd.f32 %v5452_v30, %v5251_v34  ;;  %v4488_v12 = vadd.f32 %v11710_v58, %v4254_v18 }
 0x5ad   : > { %v4754_v46 = vmul.f32 %v10701_v2, %v4720_v51  ;;  %5690 = vmatmul.bf16.gmra.mxu1 %v10791_v21  ;;  %5157 = vmatmul.bf16.gmra.mxu2 %v5024_v9  ;;  %v11712_v9 = vld [vmem:[#allocation16_spill] sm:$0xff] }
 0x5af   : > { %v4788_v39 = vadd.f32 %v10709_v40, %v4754_v46 }
 0x5b0   : > { %v5118_v45 = vpop.f32.mrf.mxu2 }
 0x5b1   : > { %v5252_v32 = vpop.f32.mrf.mxu3  ;;  %v4820_v57 = vmax.f32 %v4788_v39, 0.0 }
 0x5b2   : > { %v5253_v22 = vadd.f32 %v5252_v32, %v5115_v5  ;;  %v4675_v49 = vpop.f32.mrf.mxu1  ;;  %v4940_v7 = vld [vmem:[#allocation4 + $0x110] sm:$0xff] }
 0x5b3   : > { %v5342_v15 = vld [vmem:[#allocation4 + $0x10a] sm:$0xff]  ;;  %v5343_v53 = vld [vmem:[#allocation4 + $0x112] sm:$0xff]  ;;  %4907 = vst [vmem:[#allocation4 + $0x121] sm:$0xff] %v4820_v57  ;;  %v4721_v52 = vadd.f32 %v4675_v49, %v4487_v36  ;;  %v10931_v25 = vpack.c.bf16 %v4940_v7, %v4939_v56 }
 0x5b4   : > { %v5457_v30 = vpop.f32.mrf.mxu0  ;;  %v5363_v21 = vpack.c.bf16 %v5343_v53, %v5342_v15  ;;  %v10933_v23 = vadd.f32 %v5454_v61, %v5253_v22  ;;  %v11711_v61 = vld [vmem:[#allocation13_spill] sm:$0xff]  ;;  %v11713_v49 = vld [vmem:[#allocation31_spill] sm:$0xff] }
 0x5b5   : > { %v4755_v5 = vmul.f32 %v10701_v2, %v4721_v52  ;;  %v4020_v33 = vadd.f32 %v11712_v9, %v11711_v61 }
 0x5b6   : > { %5294 = vmatmul.bf16.gmra.mxu3 %v10931_v25 }
 0x5b7   : > { %5496 = vmatmul.bf16.gmra.mxu0 %v5363_v21  ;;  %v4789_v14 = vadd.f32 %v10709_v40, %v4755_v5  ;;  %v4255_v39 = vadd.f32 %v10786_v43, %v4020_v33  ;;  %v11714_v5 = vld [vmem:[#allocation9_spill] sm:$0xff]  ;;  %v11716_v33 = vld [vmem:[#allocation19_spill] sm:$0xff] }
 0x5b8   : > { %v5120_v37 = vpop.f32.mrf.mxu2 }
 0x5b9   : > { %v5255_v34 = vpop.f32.mrf.mxu3  ;;  %v4821_v50 = vmax.f32 %v4789_v14, 0.0  ;;  %v4489_v7 = vadd.f32 %v11713_v49, %v4255_v39  ;;  %v4256_v14 = vadd.f32 %v10798_v42, %v11714_v5  ;;  %v8531_v39 = vld [vmem:[#allocation5 + $0x100] sm:$0xff] }
 0x5ba   : > { %v5256_v44 = vadd.f32 %v5255_v34, %v5118_v45  ;;  %v4678_v62 = vpop.f32.mrf.mxu1  ;;  %v4941_v15 = vld [vmem:[#allocation4 + $0x120] sm:$0xff]  ;;  %5908 = vmatpush.bf16.msrb.mxu2 %v8531_v39 }
 0x5bb   : > { %4908 = vst [vmem:[#allocation4 + $0x129] sm:$0xff] %v4821_v50  ;;  %v4722_v47 = vadd.f32 %v4678_v62, %v4488_v12  ;;  %v5025_v4 = vpack.c.bf16 %v4821_v50, %v4820_v57  ;;  %v4490_v62 = vadd.f32 %v10788_v26, %v4256_v14  ;;  %v8545_v14 = vld [vmem:[#allocation5 + $0x170] sm:$0xff] }
 0x5bc   : > { %v5459_v51 = vpop.f32.mrf.mxu0  ;;  %v10943_v46 = vadd.f32 %v5457_v30, %v5256_v44 }
 0x5bd   : > { %v4756_v32 = vmul.f32 %v10701_v2, %v4722_v47  ;;  %5695 = vmatmul.bf16.gmra.mxu1 %v10811_v38  ;;  %5162 = vmatmul.bf16.gmra.mxu2 %v5025_v4 }
 0x5bf   : > { %v4790_v45 = vadd.f32 %v10709_v40, %v4756_v32  ;;  %v8546_v32 = vld [vmem:[#allocation5 + $0x178] sm:$0xff] }
 0x5c0   : > { %v5123_v11 = vpop.f32.mrf.mxu2  ;;  %6135 = vmatpush.bf16.msra.mxu3 %v8546_v32 }
 0x5c1   : > { %v5257_v22 = vpop.f32.mrf.mxu3  ;;  %v4822_v36 = vmax.f32 %v4790_v45, 0.0  ;;  %v8554_v45 = vld [vmem:[#allocation5 + $0x1b8] sm:$0xff] }
 0x5c2   : > { %v5258_v56 = vadd.f32 %v5257_v22, %v5120_v37  ;;  %v4680_v53 = vpop.f32.mrf.mxu1  ;;  %v4942_v30 = vld [vmem:[#allocation4 + $0x128] sm:$0xff]  ;;  %6370 = vmatpush.bf16.msra.mxu0 %v8554_v45 }
 0x5c3   : > { %v5344_v52 = vld [vmem:[#allocation4 + $0x122] sm:$0xff]  ;;  %v5345_v21 = vld [vmem:[#allocation4 + $0x12a] sm:$0xff]  ;;  %4909 = vst [vmem:[#allocation4 + $0x139] sm:$0xff] %v4822_v36  ;;  %v4723_v43 = vadd.f32 %v4680_v53, %v4489_v7  ;;  %v10950_v10 = vpack.c.bf16 %v4942_v30, %v4941_v15 }
 0x5c4   : > { %v5462_v57 = vpop.f32.mrf.mxu0  ;;  %v5364_v38 = vpack.c.bf16 %v5345_v21, %v5344_v52  ;;  %v10952_v18 = vadd.f32 %v5459_v51, %v5258_v56  ;;  %v11715_v51 = vld [vmem:[#allocation8_spill] sm:$0xff]  ;;  %6136 = vmatpush.bf16.msra.mxu3 %v8545_v14 }
 0x5c5   : > { %v4757_v34 = vmul.f32 %v10701_v2, %v4723_v43  ;;  %v4022_v47 = vadd.f32 %v11716_v33, %v11715_v51 }
 0x5c6   : > { %5299 = vmatmul.bf16.gmra.mxu3 %v10950_v10 }
 0x5c7   : > { %5501 = vmatmul.bf16.gmra.mxu0 %v5364_v38  ;;  %v4791_v37 = vadd.f32 %v10709_v40, %v4757_v34  ;;  %v4257_v56 = vadd.f32 %v10808_v48, %v4022_v47  ;;  %v8553_v34 = vld [vmem:[#allocation5 + $0x1b0] sm:$0xff] }
 0x5c8   : > { %v5125_v44 = vpop.f32.mrf.mxu2  ;;  %6371 = vmatpush.bf16.msra.mxu0 %v8553_v34 }
 0x5c9   : > { %v5260_v50 = vpop.f32.mrf.mxu3  ;;  %v4823_v58 = vmax.f32 %v4791_v37, 0.0  ;;  %v4491_v53 = vadd.f32 %v10803_v31, %v4257_v56  ;;  %v8543_v56 = vld [vmem:[#allocation5 + $0x160] sm:$0xff] }
 0x5ca   : > { %v5261_v12 = vadd.f32 %v5260_v50, %v5123_v11  ;;  %v4683_v61 = vpop.f32.mrf.mxu1  ;;  %v11717_v50 = vld [vmem:[#allocation20_spill] sm:$0xff] }
 0x5cb   : > { %4910 = vst [vmem:[#allocation4 + $0x141] sm:$0xff] %v4823_v58  ;;  %v4724_v42 = vadd.f32 %v4683_v61, %v4490_v62  ;;  %v5026_v4 = vpack.c.bf16 %v4823_v58, %v4822_v36  ;;  %v8544_v58 = vld [vmem:[#allocation5 + $0x168] sm:$0xff] }
 0x5cc   : > { %v5464_v9 = vpop.f32.mrf.mxu0  ;;  %v10962_v22 = vadd.f32 %v5462_v57, %v5261_v12  ;;  %v4943_v57 = vld [vmem:[#allocation4 + $0x138] sm:$0xff]  ;;  %6137 = vmatpush.bf16.msra.mxu3 %v8544_v58 }
 0x5cd   : > { %v4758_v49 = vmul.f32 %v10701_v2, %v4724_v42  ;;  %5700 = vmatmul.bf16.gmra.mxu1 %v10833_v41  ;;  %5167 = vmatmul.bf16.gmra.mxu2 %v5026_v4  ;;  %v8552_v12 = vld [vmem:[#allocation5 + $0x1a8] sm:$0xff] }
 0x5ce   : > { %6372 = vmatpush.bf16.msra.mxu0 %v8552_v12 }
 0x5cf   : > { %v4792_v26 = vadd.f32 %v10709_v40, %v4758_v49  ;;  %v8551_v49 = vld [vmem:[#allocation5 + $0x1a0] sm:$0xff] }
 0x5d0   : > { %v5128_v7 = vpop.f32.mrf.mxu2  ;;  %6138 = vmatpush.bf16.msra.mxu3 %v8543_v56 }
 0x5d1   : > { %v5262_v11 = vpop.f32.mrf.mxu3  ;;  %v4824_v36 = vmax.f32 %v4792_v26, 0.0 }
 0x5d2   : > { %v5263_v15 = vadd.f32 %v5262_v11, %v5125_v44  ;;  %v4685_v30 = vpop.f32.mrf.mxu1  ;;  %v4944_v48 = vld [vmem:[#allocation4 + $0x140] sm:$0xff]  ;;  %v4258_v44 = vadd.f32 %v10820_v0, %v11717_v50  ;;  %6373 = vmatpush.bf16.msra.mxu0 %v8551_v49 }
 0x5d3   : > { %v5346_v21 = vld [vmem:[#allocation4 + $0x13a] sm:$0xff]  ;;  %v5347_v43 = vld [vmem:[#allocation4 + $0x142] sm:$0xff]  ;;  %4911 = vst [vmem:[#allocation4 + $0x151] sm:$0xff] %v4824_v36  ;;  %v4725_v41 = vadd.f32 %v4685_v30, %v4491_v53  ;;  %v10969_v38 = vpack.c.bf16 %v4944_v48, %v4943_v57 }
 0x5d4   : > { %v5467_v52 = vpop.f32.mrf.mxu0  ;;  %v5365_v5 = vpack.c.bf16 %v5347_v43, %v5346_v21  ;;  %v10971_v37 = vadd.f32 %v5464_v9, %v5263_v15  ;;  %v4492_v9 = vadd.f32 %v10813_v1, %v4258_v44  ;;  %v11719_v0 = vld [vmem:[#allocation22_spill] sm:$0xff] }
 0x5d5   : > { %v4759_v31 = vmul.f32 %v10701_v2, %v4725_v41  ;;  %v11718_v2 = vld [vmem:[#allocation15_spill] sm:$0xff]  ;;  %v10987_v1 = vld [vmem:[%s11626_s5] ss:$0 sm:$0xff]  ;;  %v10994_v15 = vld [vmem:[%s11626_s5 + $0x1] ss:$0 sm:$0xff] }
 0x5d6   : > { %5304 = vmatmul.bf16.gmra.mxu3 %v10969_v38  ;;  %v4024_v39 = vadd.f32 %v11719_v0, %v11718_v2  ;;  %v8549_v43 = vld [vmem:[#allocation5 + $0x190] sm:$0xff] }
 0x5d7   : > { %5506 = vmatmul.bf16.gmra.mxu0 %v5365_v5  ;;  %v4793_v62 = vadd.f32 %v10709_v40, %v4759_v31 }
 0x5d8   : > { %v5130_v51 = vpop.f32.mrf.mxu2  ;;  %v4259_v40 = vadd.f32 %v10830_v29, %v4024_v39 }
 0x5d9   : > { %v5265_v61 = vpop.f32.mrf.mxu3  ;;  %v4825_v33 = vmax.f32 %v4793_v62, 0.0  ;;  %v11720_v62 = vld [vmem:[#allocation10_spill] sm:$0xff] }
 0x5da   : > { %v5266_v47 = vadd.f32 %v5265_v61, %v5128_v7  ;;  %v4688_v42 = vpop.f32.mrf.mxu1  ;;  %v8542_v7 = vld [vmem:[#allocation5 + $0x158] sm:$0xff]  ;;  %v4493_v48 = vadd.f32 %v10827_v59, %v4259_v40  ;;  %v4945_v21 = vld [vmem:[#allocation4 + $0x150] sm:$0xff]  ;;  %v4260_v59 = vadd.f32 %v10842_v17, %v11720_v62 }
 0x5db   : > { %4912 = vst [vmem:[#allocation4 + $0x159] sm:$0xff] %v4825_v33  ;;  %v4726_v32 = vadd.f32 %v4688_v42, %v4492_v9  ;;  %v5027_v45 = vpack.c.bf16 %v4825_v33, %v4824_v36  ;;  %v8550_v36 = vld [vmem:[#allocation5 + $0x198] sm:$0xff]  ;;  %6139 = vmatpush.bf16.msra.mxu3 %v8542_v7  ;;  %v8540_v33 = vld [vmem:[#allocation5 + $0x148] sm:$0xff]  ;;  %v8539_v40 = vld [vmem:[#allocation5 + $0x140] sm:$0xff] }
 0x5dc   : > { %v5469_v4 = vpop.f32.mrf.mxu0  ;;  %v10981_v26 = vadd.f32 %v5467_v52, %v5266_v47  ;;  %6374 = vmatpush.bf16.msra.mxu0 %v8550_v36  ;;  %v8548_v47 = vld [vmem:[#allocation5 + $0x188] sm:$0xff]  ;;  %v8562_v17 = vld [vmem:[#allocation5 + $0x1f8] sm:$0xff] }
 0x5dd   : > { %v4760_v11 = vmul.f32 %v10987_v1, %v4726_v32  ;;  %5705 = vmatmul.bf16.gmra.mxu1 %v10857_v24  ;;  %5172 = vmatmul.bf16.gmra.mxu2 %v5027_v45  ;;  %v8541_v24 = vld [vmem:[#allocation5 + $0x150] sm:$0xff]  ;;  %v11721_v32 = vld [vmem:[#allocation21_spill] sm:$0xff] }
 0x5de   : > { %v4026_v45 = vadd.f32 %v10849_v8, %v11721_v32  ;;  %6604 = vmatpush.bf16.msra.mxu1 %v8562_v17  ;;  %v6023_v17 = vld [vmem:[#allocation4 + $0x22] sm:$0xff]  ;;  %v6258_v32 = vld [vmem:[#allocation4 + $0x38] sm:$0xff] }
 0x5df   : > { %v4794_v29 = vadd.f32 %v10994_v15, %v4760_v11  ;;  %6140 = vmatpush.bf16.msra.mxu3 %v8541_v24  ;;  %v8547_v11 = vld [vmem:[#allocation5 + $0x180] sm:$0xff] }
 0x5e0   : > { %v5133_v57 = vpop.f32.mrf.mxu2  ;;  %6375 = vmatpush.bf16.msra.mxu0 %v8549_v43 }
 0x5e1   : > { %v5267_v53 = vpop.f32.mrf.mxu3  ;;  %v4826_v30 = vmax.f32 %v4794_v29, 0.0 }
 0x5e2   : > { %v5268_v52 = vadd.f32 %v5267_v53, %v5130_v51  ;;  %v4690_v41 = vpop.f32.mrf.mxu1  ;;  %v4946_v14 = vld [vmem:[#allocation4 + $0x158] sm:$0xff]  ;;  %v8570_v51 = vld [vmem:[#allocation5 + $0x238] sm:$0xff] }
 0x5e3   : > { %v5348_v34 = vld [vmem:[#allocation4 + $0x152] sm:$0xff]  ;;  %v5349_v50 = vld [vmem:[#allocation4 + $0x15a] sm:$0xff]  ;;  %4913 = vst [vmem:[#allocation4 + $0x169] sm:$0xff] %v4826_v30  ;;  %v4727_v44 = vadd.f32 %v4690_v41, %v4493_v48  ;;  %v10998_v31 = vpack.c.bf16 %v4946_v14, %v4945_v21  ;;  %6838 = vmatpush.bf16.msra.mxu2 %v8570_v51  ;;  %6141 = vmatpush.bf16.msra.mxu3 %v8540_v33 }
 0x5e4   : > { %v5472_v5 = vpop.f32.mrf.mxu0  ;;  %v5366_v58 = vpack.c.bf16 %v5349_v50, %v5348_v34  ;;  %v11000_v12 = vadd.f32 %v5469_v4, %v5268_v52  ;;  %v4494_v4 = vadd.f32 %v10839_v55, %v4260_v59  ;;  %6376 = vmatpush.bf16.msra.mxu0 %v8548_v47  ;;  %v4261_v55 = vadd.f32 %v10852_v27, %v4026_v45 }
 0x5e5   : > { %v4761_v61 = vmul.f32 %v10987_v1, %v4727_v44 }
 0x5e6   : > { %5309 = vmatmul.bf16.gmra.mxu3 %v10998_v31  ;;  %v4495_v48 = vadd.f32 %v10854_v60, %v4261_v55 }
 0x5e7   : > { %5511 = vmatmul.bf16.gmra.mxu0 %v5366_v58  ;;  %v4795_v9 = vadd.f32 %v10994_v15, %v4761_v61  ;;  %6142 = vmatpush.bf16.msra.mxu3 %v8539_v40  ;;  %v5789_v61 = vld [vmem:[#allocation4 + $0x21] sm:$0xff] }
 0x5e8   : > { %v5135_v2 = vpop.f32.mrf.mxu2  ;;  %6377 = vmatpush.bf16.msra.mxu0 %v8547_v11  ;;  %v6257_v11 = vld [vmem:[#allocation4 + $0x30] sm:$0xff] }
 0x5e9   : > { %v5270_v42 = vpop.f32.mrf.mxu3  ;;  %v4827_v0 = vmax.f32 %v4795_v9, 0.0  ;;  %v6289_v55 = vpack.c.bf16 %v6258_v32, %v6257_v11  ;;  %v6026_v32 = vld [vmem:[#allocation4 + $0x4a] sm:$0xff] }
 0x5ea   : > { %v5271_v39 = vadd.f32 %v5270_v42, %v5133_v57  ;;  %v4693_v56 = vpop.f32.mrf.mxu1  ;;  %v4947_v24 = vld [vmem:[#allocation4 + $0x168] sm:$0xff]  ;;  %v5788_v42 = vld [vmem:[#allocation4 + $0x19] sm:$0xff] }
 0x5eb   : > { %4914 = vst [vmem:[#allocation4 + $0x171] sm:$0xff] %v4827_v0  ;;  %v4728_v7 = vadd.f32 %v4693_v56, %v4494_v4  ;;  %v5028_v36 = vpack.c.bf16 %v4827_v0, %v4826_v30  ;;  %v5820_v4 = vpack.c.bf16 %v5789_v61, %v5788_v42 }
 0x5ec   : > { %v5474_v49 = vpop.f32.mrf.mxu0  ;;  %v11010_v29 = vadd.f32 %v5472_v5, %v5271_v39  ;;  %v6022_v39 = vld [vmem:[#allocation4 + $0x1a] sm:$0xff] }
 0x5ed   : > { %v4762_v53 = vmul.f32 %v10987_v1, %v4728_v7  ;;  %5710 = vmatmul.bf16.gmra.mxu1 %v10874_v16  ;;  %5177 = vmatmul.bf16.gmra.mxu2 %v5028_v36  ;;  %v6054_v36 = vpack.c.bf16 %v6023_v17, %v6022_v39 }
 0x5ef   : > { %v4796_v8 = vadd.f32 %v10994_v15, %v4762_v53 }
 0x5f0   : > { %v5138_v52 = vpop.f32.mrf.mxu2 }
 0x5f1   : > { %v5272_v57 = vpop.f32.mrf.mxu3  ;;  %v4828_v21 = vmax.f32 %v4796_v8, 0.0  ;;  %v5791_v8 = vld [vmem:[#allocation4 + $0x39] sm:$0xff] }
 0x5f2   : > { %v5273_v30 = vadd.f32 %v5272_v57, %v5135_v2  ;;  %v4695_v43 = vpop.f32.mrf.mxu1  ;;  %v4948_v5 = vld [vmem:[#allocation4 + $0x170] sm:$0xff] }
 0x5f3   : > { %v5350_v27 = vld [vmem:[#allocation4 + $0x16a] sm:$0xff]  ;;  %v5351_v14 = vld [vmem:[#allocation4 + $0x172] sm:$0xff]  ;;  %4915 = vst [vmem:[#allocation4 + $0x181] sm:$0xff] %v4828_v21  ;;  %v4729_v34 = vadd.f32 %v4695_v43, %v4495_v48  ;;  %v11017_v16 = vpack.c.bf16 %v4948_v5, %v4947_v24 }
 0x5f4   : > { %v5477_v41 = vpop.f32.mrf.mxu0  ;;  %v5367_v50 = vpack.c.bf16 %v5351_v14, %v5350_v27  ;;  %v11019_v44 = vadd.f32 %v5474_v49, %v5273_v30  ;;  %v5790_v21 = vld [vmem:[#allocation4 + $0x31] sm:$0xff]  ;;  %v6025_v27 = vld [vmem:[#allocation4 + $0x3a] sm:$0xff] }
 0x5f5   : > { %v4763_v58 = vmul.f32 %v10987_v1, %v4729_v34  ;;  %v5243_v1 = vadd.f32 %v10892_v6, %v10881_v13  ;;  %v8569_v13 = vld [vmem:[#allocation5 + $0x230] sm:$0xff]  ;;  %v11040_v24 = vpack.c.bf16 %v5791_v8, %v5790_v21  ;;  %v6024_v5 = vld [vmem:[#allocation4 + $0x32] sm:$0xff] }
 0x5f6   : > { %5314 = vmatmul.bf16.gmra.mxu3 %v11017_v16  ;;  %6839 = vmatpush.bf16.msra.mxu2 %v8569_v13  ;;  %v6260_v14 = vld [vmem:[#allocation4 + $0x50] sm:$0xff] }
 0x5f7   : > { %5516 = vmatmul.bf16.gmra.mxu0 %v5367_v50  ;;  %v4797_v60 = vadd.f32 %v10994_v15, %v4763_v58  ;;  %v5523_v56 = vadd.f32 %v10884_v19, %v5243_v1  ;;  %v5792_v1 = vld [vmem:[#allocation4 + $0x49] sm:$0xff] }
 0x5f8   : > { %v5140_v59 = vpop.f32.mrf.mxu2 }
 0x5f9   : > { %v5275_v62 = vpop.f32.mrf.mxu3  ;;  %v4829_v51 = vmax.f32 %v4797_v60, 0.0 }
 0x5fa   : > { %v5276_v33 = vadd.f32 %v5275_v62, %v5138_v52  ;;  %v5676_v9 = vpop.f32.mrf.mxu1  ;;  %v8561_v52 = vld [vmem:[#allocation5 + $0x1f0] sm:$0xff]  ;;  %v6259_v62 = vld [vmem:[#allocation4 + $0x48] sm:$0xff] }
 0x5fb   : > { %4916 = vst [vmem:[#allocation4 + $0x189] sm:$0xff] %v4829_v51  ;;  %v11025_v2 = vadd.f32 %v5676_v9, %v10867_v3  ;;  %6605 = vmatpush.bf16.msra.mxu1 %v8561_v52  ;;  %v6290_v61 = vpack.c.bf16 %v6260_v14, %v6259_v62 }
 0x5fc   : > { %v5479_v47 = vpop.f32.mrf.mxu0  ;;  %v11027_v0 = vadd.f32 %v5477_v41, %v5276_v33 }
 0x5fd   : > { %5715 = vmatmul.bf16.gmra.mxu1 %v10895_v63  ;;  %5909 = vmatmul.bf16.vlgmr.msrb.gmra.mxu2 %v5820_v4 }
 0x600   : > { %v5143_v45 = vpop.f32.mrf.mxu2 }
 0x601   : > { %v5277_v15 = vpop.f32.mrf.mxu3 }
 0x602   : > { %v5278_v49 = vadd.f32 %v5277_v15, %v5140_v59  ;;  %v5678_v3 = vpop.f32.mrf.mxu1  ;;  %v6055_v59 = vpack.c.bf16 %v6025_v27, %v6024_v5 }
 0x603   : > { %v11033_v7 = vadd.f32 %v5678_v3, %v5523_v56  ;;  %v6262_v56 = vld [vmem:[#allocation4 + $0x68] sm:$0xff] }
 0x604   : > { %v5482_v40 = vpop.f32.mrf.mxu0  ;;  %v11035_v53 = vadd.f32 %v5479_v47, %v5278_v49  ;;  %v5793_v47 = vld [vmem:[#allocation4 + $0x51] sm:$0xff] }
 0x605   : > { %v11054_v39 = vpack.c.bf16 %v5793_v47, %v5792_v1 }
 0x606   : > { %6143 = vmatmul.bf16.vlgmr.msra.gmra.mxu3 %v6054_v36  ;;  %v6261_v36 = vld [vmem:[#allocation4 + $0x60] sm:$0xff] }
 0x607   : > { %6378 = vmatmul.bf16.vlgmr.msra.gmra.mxu0 %v6289_v55  ;;  %v6291_v13 = vpack.c.bf16 %v6262_v56, %v6261_v36  ;;  %v6266_v36 = vld [vmem:[#allocation4 + $0x98] sm:$0xff] }
 0x608   : > { %v5145_v63 = vpop.f32.mrf.mxu2 }
 0x609   : > { %v5280_v6 = vpop.f32.mrf.mxu3 }
 0x60a   : > { %v5281_v57 = vadd.f32 %v5280_v6, %v5143_v45  ;;  %v5681_v48 = vpop.f32.mrf.mxu1  ;;  %v6027_v45 = vld [vmem:[#allocation4 + $0x52] sm:$0xff] }
 0x60b   : > { %v11038_v30 = vadd.f32 %v5681_v48, %v10905_v28  ;;  %v11063_v55 = vpack.c.bf16 %v6027_v45, %v6026_v32  ;;  %v5796_v45 = vld [vmem:[#allocation4 + $0x79] sm:$0xff] }
 0x60c   : > { %v5484_v19 = vpop.f32.mrf.mxu0  ;;  %v11042_v43 = vadd.f32 %v5482_v40, %v5281_v57  ;;  %v5795_v57 = vld [vmem:[#allocation4 + $0x69] sm:$0xff] }
 0x60d   : > { %5720 = vmatmul.bf16.gmra.mxu1 %v10912_v35  ;;  %5914 = vmatmul.bf16.gmra.mxu2 %v11040_v24 }
 0x610   : > { %v5148_v34 = vpop.f32.mrf.mxu2 }
 0x611   : > { %v5282_v41 = vpop.f32.mrf.mxu3 }
 0x612   : > { %v5283_v50 = vadd.f32 %v5282_v41, %v5145_v63  ;;  %v5683_v60 = vpop.f32.mrf.mxu1  ;;  %v5794_v41 = vld [vmem:[#allocation4 + $0x61] sm:$0xff] }
 0x613   : > { %v11047_v28 = vadd.f32 %v5683_v60, %v10914_v54  ;;  %v11071_v5 = vpack.c.bf16 %v5795_v57, %v5794_v41  ;;  %v6265_v57 = vld [vmem:[#allocation4 + $0x90] sm:$0xff] }
 0x614   : > { %v5487_v58 = vpop.f32.mrf.mxu0  ;;  %v11049_v51 = vadd.f32 %v5484_v19, %v5283_v50  ;;  %v8560_v19 = vld [vmem:[#allocation5 + $0x1e8] sm:$0xff]  ;;  %v6029_v50 = vld [vmem:[#allocation4 + $0x6a] sm:$0xff] }
 0x615   : > { %6606 = vmatpush.bf16.msra.mxu1 %v8560_v19  ;;  %v6293_v19 = vpack.c.bf16 %v6266_v36, %v6265_v57 }
 0x616   : > { %6148 = vmatmul.bf16.gmra.mxu3 %v6055_v59 }
 0x617   : > { %6383 = vmatmul.bf16.gmra.mxu0 %v6290_v61 }
 0x618   : > { %v5150_v33 = vpop.f32.mrf.mxu2 }
 0x619   : > { %v5285_v35 = vpop.f32.mrf.mxu3 }
 0x61a   : > { %v5286_v9 = vadd.f32 %v5285_v35, %v5148_v34  ;;  %v5686_v4 = vpop.f32.mrf.mxu1  ;;  %v6028_v34 = vld [vmem:[#allocation4 + $0x62] sm:$0xff]  ;;  %v6263_v35 = vld [vmem:[#allocation4 + $0x78] sm:$0xff] }
 0x61b   : > { %v11052_v15 = vadd.f32 %v5686_v4, %v10924_v20  ;;  %v5797_v4 = vld [vmem:[#allocation4 + $0x81] sm:$0xff] }
 0x61c   : > { %v5489_v42 = vpop.f32.mrf.mxu0  ;;  %v11056_v54 = vadd.f32 %v5487_v58, %v5286_v9  ;;  %v6264_v58 = vld [vmem:[#allocation4 + $0x80] sm:$0xff] }
 0x61d   : > { %5725 = vmatmul.bf16.gmra.mxu1 %v10931_v25  ;;  %5919 = vmatmul.bf16.gmra.mxu2 %v11054_v39  ;;  %v8568_v25 = vld [vmem:[#allocation5 + $0x228] sm:$0xff]  ;;  %v6292_v47 = vpack.c.bf16 %v6264_v58, %v6263_v35  ;;  %v8558_v35 = vld [vmem:[#allocation5 + $0x1d8] sm:$0xff] }
 0x61e   : > { %6840 = vmatpush.bf16.msra.mxu2 %v8568_v25 }
 0x620   : > { %v5153_v49 = vpop.f32.mrf.mxu2 }
 0x621   : > { %v5287_v17 = vpop.f32.mrf.mxu3 }
 0x622   : > { %v5288_v40 = vadd.f32 %v5287_v17, %v5150_v33  ;;  %v5688_v11 = vpop.f32.mrf.mxu1  ;;  %v11080_v33 = vpack.c.bf16 %v6029_v50, %v6028_v34  ;;  %v8559_v50 = vld [vmem:[#allocation5 + $0x1e0] sm:$0xff] }
 0x623   : > { %v11061_v20 = vadd.f32 %v5688_v11, %v10933_v23  ;;  %v6031_v11 = vld [vmem:[#allocation4 + $0x82] sm:$0xff]  ;;  %6607 = vmatpush.bf16.msra.mxu1 %v8559_v50 }
 0x624   : > { %v5492_v3 = vpop.f32.mrf.mxu0  ;;  %v11065_v6 = vadd.f32 %v5489_v42, %v5288_v40 }
 0x626   : > { %6153 = vmatmul.bf16.gmra.mxu3 %v11063_v55 }
 0x627   : > { %6388 = vmatmul.bf16.gmra.mxu0 %v6291_v13  ;;  %6608 = vmatpush.bf16.msra.mxu1 %v8558_v35 }
 0x628   : > { %v5155_v8 = vpop.f32.mrf.mxu2 }
 0x629   : > { %v5290_v63 = vpop.f32.mrf.mxu3 }
 0x62a   : > { %v5291_v52 = vadd.f32 %v5290_v63, %v5153_v49  ;;  %v5691_v21 = vpop.f32.mrf.mxu1 }
 0x62b   : > { %v11069_v23 = vadd.f32 %v5691_v21, %v10943_v46 }
 0x62c   : > { %v5494_v48 = vpop.f32.mrf.mxu0  ;;  %v11073_v27 = vadd.f32 %v5492_v3, %v5291_v52  ;;  %v6030_v3 = vld [vmem:[#allocation4 + $0x7a] sm:$0xff] }
 0x62d   : > { %5730 = vmatmul.bf16.gmra.mxu1 %v10950_v10  ;;  %5924 = vmatmul.bf16.gmra.mxu2 %v11071_v5  ;;  %v11097_v52 = vpack.c.bf16 %v6031_v11, %v6030_v3 }
 0x630   : > { %v5158_v60 = vpop.f32.mrf.mxu2 }
 0x631   : > { %v5292_v14 = vpop.f32.mrf.mxu3 }
 0x632   : > { %v5293_v62 = vadd.f32 %v5292_v14, %v5155_v8  ;;  %v5693_v61 = vpop.f32.mrf.mxu1  ;;  %v5799_v14 = vld [vmem:[#allocation4 + $0x99] sm:$0xff] }
 0x633   : > { %v11078_v46 = vadd.f32 %v5693_v61, %v10952_v18  ;;  %v11088_v18 = vpack.c.bf16 %v5797_v4, %v5796_v45  ;;  %v6268_v4 = vld [vmem:[#allocation4 + $0xb0] sm:$0xff]  ;;  %v6267_v45 = vld [vmem:[#allocation4 + $0xa8] sm:$0xff] }
 0x634   : > { %v5497_v59 = vpop.f32.mrf.mxu0  ;;  %v11082_v9 = vadd.f32 %v5494_v48, %v5293_v62  ;;  %v5798_v62 = vld [vmem:[#allocation4 + $0x91] sm:$0xff]  ;;  %v6294_v11 = vpack.c.bf16 %v6268_v4, %v6267_v45  ;;  %v5585_v45 = vld [vmem:[#allocation4 + $0x188] sm:$0xff] }
 0x636   : > { %6158 = vmatmul.bf16.gmra.mxu3 %v11080_v33 }
 0x637   : > { %6393 = vmatmul.bf16.gmra.mxu0 %v6292_v47 }
 0x638   : > { %v5160_v42 = vpop.f32.mrf.mxu2 }
 0x639   : > { %v5295_v10 = vpop.f32.mrf.mxu3 }
 0x63a   : > { %v5296_v1 = vadd.f32 %v5295_v10, %v5158_v60  ;;  %v5696_v32 = vpop.f32.mrf.mxu1  ;;  %v6032_v10 = vld [vmem:[#allocation4 + $0x92] sm:$0xff] }
 0x63b   : > { %v11086_v56 = vadd.f32 %v5696_v32, %v10962_v22 }
 0x63c   : > { %v5499_v17 = vpop.f32.mrf.mxu0  ;;  %v11090_v49 = vadd.f32 %v5497_v59, %v5296_v1  ;;  %v11105_v59 = vpack.c.bf16 %v5799_v14, %v5798_v62  ;;  %v8555_v14 = vld [vmem:[#allocation5 + $0x1c0] sm:$0xff]  ;;  %v6270_v62 = vld [vmem:[#allocation4 + $0xc8] sm:$0xff] }
 0x63d   : > { %5735 = vmatmul.bf16.gmra.mxu1 %v10969_v38  ;;  %5929 = vmatmul.bf16.gmra.mxu2 %v11088_v18  ;;  %v8567_v38 = vld [vmem:[#allocation5 + $0x220] sm:$0xff] }
 0x63e   : > { %6841 = vmatpush.bf16.msra.mxu2 %v8567_v38 }
 0x640   : > { %v5163_v13 = vpop.f32.mrf.mxu2 }
 0x641   : > { %v5297_v40 = vpop.f32.mrf.mxu3 }
 0x642   : > { %v5298_v25 = vadd.f32 %v5297_v40, %v5160_v42  ;;  %v5698_v8 = vpop.f32.mrf.mxu1  ;;  %v6033_v42 = vld [vmem:[#allocation4 + $0x9a] sm:$0xff] }
 0x643   : > { %v11095_v22 = vadd.f32 %v5698_v8, %v10971_v37  ;;  %v11114_v3 = vpack.c.bf16 %v6033_v42, %v6032_v10  ;;  %v5801_v8 = vld [vmem:[#allocation4 + $0xb1] sm:$0xff] }
 0x644   : > { %v5502_v63 = vpop.f32.mrf.mxu0  ;;  %v11099_v48 = vadd.f32 %v5499_v17, %v5298_v25 }
 0x646   : > { %6163 = vmatmul.bf16.gmra.mxu3 %v11097_v52 }
 0x647   : > { %6398 = vmatmul.bf16.gmra.mxu0 %v6293_v19 }
 0x648   : > { %v5165_v41 = vpop.f32.mrf.mxu2 }
 0x649   : > { %v5300_v21 = vpop.f32.mrf.mxu3 }
 0x64a   : > { %v5301_v34 = vadd.f32 %v5300_v21, %v5163_v13  ;;  %v5701_v60 = vpop.f32.mrf.mxu1  ;;  %v8556_v13 = vld [vmem:[#allocation5 + $0x1c8] sm:$0xff]  ;;  %v5800_v21 = vld [vmem:[#allocation4 + $0xa9] sm:$0xff] }
 0x64b   : > { %v11103_v37 = vadd.f32 %v5701_v60, %v10981_v26  ;;  %v6035_v60 = vld [vmem:[#allocation4 + $0xb2] sm:$0xff] }
 0x64c   : > { %v5504_v58 = vpop.f32.mrf.mxu0  ;;  %v11107_v61 = vadd.f32 %v5502_v63, %v5301_v34 }
 0x64d   : > { %5740 = vmatmul.bf16.gmra.mxu1 %v10998_v31  ;;  %5934 = vmatmul.bf16.gmra.mxu2 %v11105_v59  ;;  %v8557_v31 = vld [vmem:[#allocation5 + $0x1d0] sm:$0xff] }
 0x64e   : > { %6609 = vmatpush.bf16.msra.mxu1 %v8557_v31  ;;  %v5803_v31 = vld [vmem:[#allocation4 + $0xc9] sm:$0xff] }
 0x650   : > { %v5168_v1 = vpop.f32.mrf.mxu2 }
 0x651   : > { %v5302_v47 = vpop.f32.mrf.mxu3 }
 0x652   : > { %v5303_v17 = vadd.f32 %v5302_v47, %v5165_v41  ;;  %v5703_v26 = vpop.f32.mrf.mxu1  ;;  %6610 = vmatpush.bf16.msra.mxu1 %v8556_v13  ;;  %v11122_v41 = vpack.c.bf16 %v5801_v8, %v5800_v21  ;;  %v5584_v8 = vld [vmem:[#allocation4 + $0x180] sm:$0xff] }
 0x653   : > { %v11112_v40 = vadd.f32 %v5703_v26, %v11000_v12 }
 0x654   : > { %v5507_v32 = vpop.f32.mrf.mxu0  ;;  %v11116_v36 = vadd.f32 %v5504_v58, %v5303_v17  ;;  %v6034_v58 = vld [vmem:[#allocation4 + $0xaa] sm:$0xff] }
 0x656   : > { %6168 = vmatmul.bf16.gmra.mxu3 %v11114_v3  ;;  %6611 = vmatpush.bf16.msra.mxu1 %v8555_v14 }
 0x657   : > { %6403 = vmatmul.bf16.gmra.mxu0 %v6294_v11 }
 0x658   : > { %v5170_v63 = vpop.f32.mrf.mxu2 }
 0x659   : > { %v5305_v25 = vpop.f32.mrf.mxu3 }
 0x65a   : > { %v5306_v57 = vadd.f32 %v5305_v25, %v5168_v1  ;;  %v5706_v38 = vpop.f32.mrf.mxu1  ;;  %v11131_v1 = vpack.c.bf16 %v6035_v60, %v6034_v58  ;;  %v6037_v58 = vld [vmem:[#allocation4 + $0xca] sm:$0xff]  ;;  %v6272_v60 = vld [vmem:[#allocation4 + $0xe0] sm:$0xff] }
 0x65b   : > { %v11120_v12 = vadd.f32 %v5706_v38, %v11010_v29  ;;  %v6269_v29 = vld [vmem:[#allocation4 + $0xc0] sm:$0xff]  ;;  %v11139_v38 = vpack.c.bf16 %v5585_v45, %v5584_v8 }
 0x65c   : > { %v5509_v19 = vpop.f32.mrf.mxu0  ;;  %v11124_v34 = vadd.f32 %v5507_v32, %v5306_v57  ;;  %v6295_v17 = vpack.c.bf16 %v6270_v62, %v6269_v29  ;;  %v5804_v8 = vld [vmem:[#allocation4 + $0xd9] sm:$0xff] }
 0x65d   : > { %5745 = vmatmul.bf16.gmra.mxu1 %v11017_v16  ;;  %5939 = vmatmul.bf16.gmra.mxu2 %v11122_v41  ;;  %v8566_v16 = vld [vmem:[#allocation5 + $0x218] sm:$0xff] }
 0x65e   : > { %6842 = vmatpush.bf16.msra.mxu2 %v8566_v16 }
 0x660   : > { %v5173_v35 = vpop.f32.mrf.mxu2 }
 0x661   : > { %v5307_v50 = vpop.f32.mrf.mxu3 }
 0x662   : > { %v5308_v47 = vadd.f32 %v5307_v50, %v5170_v63  ;;  %v5708_v42 = vpop.f32.mrf.mxu1  ;;  %v6036_v50 = vld [vmem:[#allocation4 + $0xc2] sm:$0xff] }
 0x663   : > { %v11129_v4 = vadd.f32 %v5708_v42, %v11019_v44  ;;  %v5802_v44 = vld [vmem:[#allocation4 + $0xc1] sm:$0xff] }
 0x664   : > { %v5512_v10 = vpop.f32.mrf.mxu0  ;;  %v11133_v32 = vadd.f32 %v5509_v19, %v5308_v47  ;;  %v11141_v19 = vpack.c.bf16 %v5803_v31, %v5802_v44  ;;  %v5805_v31 = vld [vmem:[#allocation4 + $0xe1] sm:$0xff] }
 0x666   : > { %6173 = vmatmul.bf16.gmra.mxu3 %v11131_v1 }
 0x667   : > { %6408 = vmatmul.bf16.gmra.mxu0 %v6295_v17  ;;  %v11150_v17 = vpack.c.bf16 %v6037_v58, %v6036_v50  ;;  %v6038_v50 = vld [vmem:[#allocation4 + $0xda] sm:$0xff]  ;;  %v6039_v58 = vld [vmem:[#allocation4 + $0xe2] sm:$0xff] }
 0x668   : > { %v5175_v11 = vpop.f32.mrf.mxu2 }
 0x669   : > { %v5310_v26 = vpop.f32.mrf.mxu3  ;;  %11722 = vst [vmem:[#allocation25_spill] sm:$0xff] %v11150_v17 }
 0x66a   : > { %v5311_v13 = vadd.f32 %v5310_v26, %v5173_v35  ;;  %v5711_v63 = vpop.f32.mrf.mxu1 }
 0x66b   : > { %v11137_v57 = vadd.f32 %v5711_v63, %v11027_v0  ;;  %v6271_v0 = vld [vmem:[#allocation4 + $0xd8] sm:$0xff] }
 0x66c   : > { %v5514_v25 = vpop.f32.mrf.mxu0  ;;  %v11143_v21 = vadd.f32 %v5512_v10, %v5311_v13  ;;  %v6296_v10 = vpack.c.bf16 %v6272_v60, %v6271_v0  ;;  %v6274_v60 = vld [vmem:[#allocation4 + $0xf8] sm:$0xff] }
 0x66d   : > { %5750 = vmatmul.bf16.gmra.mxu1 %v11139_v38  ;;  %5944 = vmatmul.bf16.gmra.mxu2 %v11141_v19 }
 0x670   : > { %v5178_v62 = vpop.f32.mrf.mxu2 }
 0x671   : > { %v5312_v14 = vpop.f32.mrf.mxu3 }
 0x672   : > { %v5313_v35 = vadd.f32 %v5312_v14, %v5175_v11  ;;  %v5713_v42 = vpop.f32.mrf.mxu1 }
 0x673   : > { %v11148_v29 = vadd.f32 %v5713_v42, %v11035_v53  ;;  %v11158_v53 = vpack.c.bf16 %v5805_v31, %v5804_v8  ;;  %v5807_v8 = vld [vmem:[#allocation4 + $0xf9] sm:$0xff] }
 0x674   : > { %v5517_v47 = vpop.f32.mrf.mxu0  ;;  %v11152_v16 = vadd.f32 %v5514_v25, %v5313_v35 }
 0x676   : > { %6178 = vmatmul.bf16.gmra.mxu3 %v11150_v17 }
 0x677   : > { %6413 = vmatmul.bf16.gmra.mxu0 %v6296_v10 }
 0x678   : > { %v5180_v45 = vpop.f32.mrf.mxu2 }
 0x679   : > { %v5315_v26 = vpop.f32.mrf.mxu3 }
 0x67a   : > { %v5316_v13 = vadd.f32 %v5315_v26, %v5178_v62  ;;  %v5716_v11 = vpop.f32.mrf.mxu1 }
 0x67b   : > { %v11156_v44 = vadd.f32 %v5716_v11, %v11042_v43  ;;  %v6273_v43 = vld [vmem:[#allocation4 + $0xf0] sm:$0xff] }
 0x67c   : > { %v5519_v63 = vpop.f32.mrf.mxu0  ;;  %v11160_v14 = vadd.f32 %v5517_v47, %v5316_v13  ;;  %v11168_v47 = vpack.c.bf16 %v6039_v58, %v6038_v50  ;;  %v6297_v31 = vpack.c.bf16 %v6274_v60, %v6273_v43  ;;  %v8565_v13 = vld [vmem:[#allocation5 + $0x210] sm:$0xff] }
 0x67d   : > { %6612 = vmatmul.bf16.vlgmr.msra.gmra.mxu1 %v11040_v24  ;;  %5949 = vmatmul.bf16.gmra.mxu2 %v11158_v53 }
 0x67e   : > { %11723 = vst [vmem:[#allocation11_spill] sm:$0xff] %v11168_v47  ;;  %6843 = vmatpush.bf16.msra.mxu2 %v8565_v13 }
 0x680   : > { %v5910_v35 = vpop.f32.mrf.mxu2 }
 0x681   : > { %v5317_v25 = vpop.f32.mrf.mxu3  ;;  %v5990_v42 = vadd.f32 %v5910_v35, %v11025_v2 }
 0x682   : > { %v5318_v62 = vadd.f32 %v5317_v25, %v5180_v45  ;;  %v5718_v0 = vpop.f32.mrf.mxu1 }
 0x683   : > { %v11166_v26 = vadd.f32 %v5718_v0, %v11049_v51  ;;  %v5806_v51 = vld [vmem:[#allocation4 + $0xf1] sm:$0xff]  ;;  %v6041_v0 = vld [vmem:[#allocation4 + $0xfa] sm:$0xff] }
 0x684   : > { %v6379_v10 = vpop.f32.mrf.mxu0  ;;  %v11170_v24 = vadd.f32 %v5519_v63, %v5318_v62  ;;  %v11177_v58 = vpack.c.bf16 %v5807_v8, %v5806_v51  ;;  %v6040_v62 = vld [vmem:[#allocation4 + $0xf2] sm:$0xff] }
 0x685   : > { %v5809_v51 = vld [vmem:[#allocation4 + $0x111] sm:$0xff] }
 0x686   : > { %6183 = vmatmul.bf16.gmra.mxu3 %v11168_v47  ;;  %v5808_v47 = vld [vmem:[#allocation4 + $0x109] sm:$0xff] }
 0x687   : > { %6418 = vmatmul.bf16.gmra.mxu0 %v6297_v31 }
 0x688   : > { %v5912_v45 = vpop.f32.mrf.mxu2 }
 0x689   : > { %v6144_v11 = vpop.f32.mrf.mxu3  ;;  %v5991_v25 = vadd.f32 %v5912_v45, %v11033_v7 }
 0x68a   : > { %v6224_v2 = vadd.f32 %v6144_v11, %v5990_v42  ;;  %v5721_v35 = vpop.f32.mrf.mxu1  ;;  %v6276_v42 = vld [vmem:[#allocation4 + $0x110] sm:$0xff] }
 0x68b   : > { %v11175_v50 = vadd.f32 %v5721_v35, %v11056_v54  ;;  %v6275_v54 = vld [vmem:[#allocation4 + $0x108] sm:$0xff] }
 0x68c   : > { %v6381_v17 = vpop.f32.mrf.mxu0  ;;  %v11179_v63 = vadd.f32 %v6379_v10, %v6224_v2  ;;  %v11187_v10 = vpack.c.bf16 %v6041_v0, %v6040_v62  ;;  %v6298_v8 = vpack.c.bf16 %v6276_v42, %v6275_v54  ;;  %v11196_v62 = vpack.c.bf16 %v5809_v51, %v5808_v47  ;;  %v6042_v42 = vld [vmem:[#allocation4 + $0x10a] sm:$0xff]  ;;  %v8564_v51 = vld [vmem:[#allocation5 + $0x208] sm:$0xff] }
 0x68d   : > { %6617 = vmatmul.bf16.gmra.mxu1 %v11054_v39  ;;  %5954 = vmatmul.bf16.gmra.mxu2 %v11177_v58 }
 0x68e   : > { %6844 = vmatpush.bf16.msra.mxu2 %v8564_v51 }
 0x690   : > { %v5915_v43 = vpop.f32.mrf.mxu2 }
 0x691   : > { %v6146_v60 = vpop.f32.mrf.mxu3  ;;  %v5992_v31 = vadd.f32 %v5915_v43, %v11038_v30 }
 0x692   : > { %v6225_v7 = vadd.f32 %v6146_v60, %v5991_v25  ;;  %v5723_v13 = vpop.f32.mrf.mxu1 }
 0x693   : > { %v11185_v45 = vadd.f32 %v5723_v13, %v11065_v6 }
 0x694   : > { %v6384_v11 = vpop.f32.mrf.mxu0  ;;  %v11189_v39 = vadd.f32 %v6381_v17, %v6225_v7  ;;  %v6043_v7 = vld [vmem:[#allocation4 + $0x112] sm:$0xff] }
 0x696   : > { %6188 = vmatmul.bf16.gmra.mxu3 %v11187_v10 }
 0x697   : > { %6423 = vmatmul.bf16.gmra.mxu0 %v6298_v8 }
 0x698   : > { %v5917_v35 = vpop.f32.mrf.mxu2 }
 0x699   : > { %v6149_v2 = vpop.f32.mrf.mxu3  ;;  %v5993_v30 = vadd.f32 %v5917_v35, %v11047_v28 }
 0x69a   : > { %v6226_v25 = vadd.f32 %v6149_v2, %v5992_v31  ;;  %v5726_v60 = vpop.f32.mrf.mxu1  ;;  %v6278_v31 = vld [vmem:[#allocation4 + $0x128] sm:$0xff]  ;;  %v6277_v2 = vld [vmem:[#allocation4 + $0x120] sm:$0xff] }
 0x69b   : > { %v11194_v6 = vadd.f32 %v5726_v60, %v11073_v27  ;;  %v6299_v35 = vpack.c.bf16 %v6278_v31, %v6277_v2  ;;  %v5811_v60 = vld [vmem:[#allocation4 + $0x129] sm:$0xff] }
 0x69c   : > { %v6386_v43 = vpop.f32.mrf.mxu0  ;;  %v11198_v0 = vadd.f32 %v6384_v11, %v6226_v25  ;;  %v11206_v11 = vpack.c.bf16 %v6043_v7, %v6042_v42  ;;  %v6045_v2 = vld [vmem:[#allocation4 + $0x12a] sm:$0xff] }
 0x69d   : > { %6622 = vmatmul.bf16.gmra.mxu1 %v11071_v5  ;;  %5959 = vmatmul.bf16.gmra.mxu2 %v11196_v62 }
 0x69e   : > { %11724 = vst [vmem:[#allocation14_spill] sm:$0xff] %v11206_v11 }
 0x6a0   : > { %v5920_v13 = vpop.f32.mrf.mxu2 }
 0x6a1   : > { %v6151_v17 = vpop.f32.mrf.mxu3  ;;  %v5994_v54 = vadd.f32 %v5920_v13, %v11052_v15 }
 0x6a2   : > { %v6227_v28 = vadd.f32 %v6151_v17, %v5993_v30  ;;  %v5728_v8 = vpop.f32.mrf.mxu1 }
 0x6a3   : > { %v11204_v27 = vadd.f32 %v5728_v8, %v11082_v9  ;;  %v5810_v9 = vld [vmem:[#allocation4 + $0x121] sm:$0xff] }
 0x6a4   : > { %v6389_v47 = vpop.f32.mrf.mxu0  ;;  %v11208_v5 = vadd.f32 %v6386_v43, %v6227_v28  ;;  %v11215_v42 = vpack.c.bf16 %v5811_v60, %v5810_v9  ;;  %v6044_v28 = vld [vmem:[#allocation4 + $0x122] sm:$0xff] }
 0x6a6   : > { %6193 = vmatmul.bf16.gmra.mxu3 %v11206_v11  ;;  %v5813_v11 = vld [vmem:[#allocation4 + $0x141] sm:$0xff] }
 0x6a7   : > { %6428 = vmatmul.bf16.gmra.mxu0 %v6299_v35 }
 0x6a8   : > { %v5922_v30 = vpop.f32.mrf.mxu2 }
 0x6a9   : > { %v6154_v25 = vpop.f32.mrf.mxu3  ;;  %v5995_v17 = vadd.f32 %v5922_v30, %v11061_v20 }
 0x6aa   : > { %v6228_v15 = vadd.f32 %v6154_v25, %v5994_v54  ;;  %v5731_v13 = vpop.f32.mrf.mxu1  ;;  %v6280_v54 = vld [vmem:[#allocation4 + $0x140] sm:$0xff] }
 0x6ab   : > { %v11213_v8 = vadd.f32 %v5731_v13, %v11090_v49  ;;  %v6279_v49 = vld [vmem:[#allocation4 + $0x138] sm:$0xff] }
 0x6ac   : > { %v11217_v43 = vadd.f32 %v6389_v47, %v6228_v15  ;;  %v6391_v7 = vpop.f32.mrf.mxu0  ;;  %v11225_v47 = vpack.c.bf16 %v6045_v2, %v6044_v28  ;;  %v6300_v60 = vpack.c.bf16 %v6280_v54, %v6279_v49  ;;  %v6046_v54 = vld [vmem:[#allocation4 + $0x13a] sm:$0xff] }
 0x6ad   : > { %6627 = vmatmul.bf16.gmra.mxu1 %v11088_v18  ;;  %5964 = vmatmul.bf16.gmra.mxu2 %v11215_v42 }
 0x6b0   : > { %v5925_v35 = vpop.f32.mrf.mxu2 }
 0x6b1   : > { %v6156_v31 = vpop.f32.mrf.mxu3  ;;  %v5996_v51 = vadd.f32 %v5925_v35, %v11069_v23  ;;  %v5812_v35 = vld [vmem:[#allocation4 + $0x139] sm:$0xff] }
 0x6b2   : > { %v6229_v20 = vadd.f32 %v6156_v31, %v5995_v17  ;;  %v5733_v25 = vpop.f32.mrf.mxu1  ;;  %v11234_v28 = vpack.c.bf16 %v5813_v11, %v5812_v35 }
 0x6b3   : > { %v11223_v30 = vadd.f32 %v5733_v25, %v11099_v48  ;;  %v6282_v25 = vld [vmem:[#allocation4 + $0x158] sm:$0xff] }
 0x6b4   : > { %v11227_v15 = vadd.f32 %v6391_v7, %v6229_v20  ;;  %v6394_v18 = vpop.f32.mrf.mxu0  ;;  %v6047_v20 = vld [vmem:[#allocation4 + $0x142] sm:$0xff] }
 0x6b6   : > { %6198 = vmatmul.bf16.gmra.mxu3 %v11225_v47 }
 0x6b7   : > { %6433 = vmatmul.bf16.gmra.mxu0 %v6300_v60 }
 0x6b8   : > { %v5927_v9 = vpop.f32.mrf.mxu2 }
 0x6b9   : > { %v6159_v13 = vpop.f32.mrf.mxu3  ;;  %v5997_v23 = vadd.f32 %v5927_v9, %v11078_v46 }
 0x6ba   : > { %v6230_v17 = vadd.f32 %v6159_v13, %v5996_v51  ;;  %v5736_v31 = vpop.f32.mrf.mxu1  ;;  %v6281_v13 = vld [vmem:[#allocation4 + $0x150] sm:$0xff] }
 0x6bb   : > { %v11232_v48 = vadd.f32 %v5736_v31, %v11107_v61  ;;  %v5815_v31 = vld [vmem:[#allocation4 + $0x159] sm:$0xff] }
 0x6bc   : > { %v11236_v2 = vadd.f32 %v6394_v18, %v6230_v17  ;;  %v6396_v60 = vpop.f32.mrf.mxu0  ;;  %v11246_v18 = vpack.c.bf16 %v6047_v20, %v6046_v54  ;;  %v8563_v17 = vld [vmem:[#allocation5 + $0x200] sm:$0xff] }
 0x6bd   : > { %6632 = vmatmul.bf16.gmra.mxu1 %v11105_v59  ;;  %5969 = vmatmul.bf16.gmra.mxu2 %v11234_v28  ;;  %v6301_v59 = vpack.c.bf16 %v6282_v25, %v6281_v13  ;;  %v6048_v20 = vld [vmem:[#allocation4 + $0x152] sm:$0xff]  ;;  %v6049_v25 = vld [vmem:[#allocation4 + $0x15a] sm:$0xff] }
 0x6be   : > { %6845 = vmatpush.bf16.msra.mxu2 %v8563_v17  ;;  %v5817_v17 = vld [vmem:[#allocation4 + $0x171] sm:$0xff] }
 0x6c0   : > { %v5930_v51 = vpop.f32.mrf.mxu2 }
 0x6c1   : > { %v6161_v7 = vpop.f32.mrf.mxu3  ;;  %v11241_v46 = vadd.f32 %v5930_v51, %v11086_v56  ;;  %v6284_v51 = vld [vmem:[#allocation4 + $0x170] sm:$0xff] }
 0x6c2   : > { %v6231_v49 = vadd.f32 %v6161_v7, %v5997_v23  ;;  %v5738_v61 = vpop.f32.mrf.mxu1  ;;  %v5814_v7 = vld [vmem:[#allocation4 + $0x151] sm:$0xff] }
 0x6c3   : > { %v11244_v11 = vadd.f32 %v5738_v61, %v11116_v36  ;;  %v11257_v54 = vpack.c.bf16 %v5815_v31, %v5814_v7  ;;  %v6283_v61 = vld [vmem:[#allocation4 + $0x168] sm:$0xff] }
 0x6c4   : > { %v11248_v9 = vadd.f32 %v6396_v60, %v6231_v49 }
 0x6c6   : > { %6203 = vmatmul.bf16.gmra.mxu3 %v11246_v18 }
 0x6c7   : > { %6438 = vmatmul.bf16.gmra.mxu0 %v6301_v59  ;;  %v6302_v59 = vpack.c.bf16 %v6284_v51, %v6283_v61 }
 0x6c8   : > { %v5932_v23 = vpop.f32.mrf.mxu2 }
 0x6c9   : > { %v11252_v56 = vadd.f32 %v5932_v23, %v11095_v22 }
 0x6ca   : > { %v5741_v35 = vpop.f32.mrf.mxu1 }
 0x6cb   : > { %v11255_v36 = vadd.f32 %v5741_v35, %v11124_v34  ;;  %v11267_v34 = vpack.c.bf16 %v6049_v25, %v6048_v20  ;;  %v5816_v35 = vld [vmem:[#allocation4 + $0x169] sm:$0xff]  ;;  %v6051_v20 = vld [vmem:[#allocation4 + $0x172] sm:$0xff] }
 0x6cc   : > { %v11276_v7 = vpack.c.bf16 %v5817_v17, %v5816_v35 }
 0x6cd   : > { %6637 = vmatmul.bf16.gmra.mxu1 %v11122_v41  ;;  %5974 = vmatmul.bf16.gmra.mxu2 %v11257_v54 }
 0x6d0   : > { %v5935_v49 = vpop.f32.mrf.mxu2 }
 0x6d1   : > { %v11262_v60 = vadd.f32 %v5935_v49, %v11103_v37 }
 0x6d2   : > { %v5743_v22 = vpop.f32.mrf.mxu1 }
 0x6d3   : > { %v11265_v13 = vadd.f32 %v5743_v22, %v11133_v32  ;;  %v6050_v32 = vld [vmem:[#allocation4 + $0x16a] sm:$0xff] }
 0x6d4   : > { %v11286_v22 = vpack.c.bf16 %v6051_v20, %v6050_v32  ;;  %v8682_v32 = vld [vmem:[#allocation3] sm:$0xff] }
 0x6d6   : > { %6208 = vmatmul.bf16.gmra.mxu3 %v11267_v34 }
 0x6d7   : > { %6443 = vmatmul.bf16.gmra.mxu0 %v6302_v59 }
 0x6d8   : > { %v5937_v41 = vpop.f32.mrf.mxu2 }
 0x6d9   : > { %v11271_v23 = vadd.f32 %v5937_v41, %v11112_v40  ;;  %v5818_v41 = vld [vmem:[#allocation4 + $0x181] sm:$0xff] }
 0x6da   : > { %v5746_v31 = vpop.f32.mrf.mxu1 }
 0x6db   : > { %v11274_v37 = vadd.f32 %v5746_v31, %v11143_v21  ;;  %v6053_v31 = vld [vmem:[#allocation4 + $0x18a] sm:$0xff] }
 0x6dd   : > { %6642 = vmatmul.bf16.gmra.mxu1 %v11141_v19  ;;  %5979 = vmatmul.bf16.gmra.mxu2 %v11276_v7  ;;  %v5819_v19 = vld [vmem:[#allocation4 + $0x189] sm:$0xff] }
 0x6de   : > { %v11296_v17 = vpack.c.bf16 %v5819_v19, %v5818_v41 }
 0x6e0   : > { %v5940_v25 = vpop.f32.mrf.mxu2 }
 0x6e1   : > { %v11281_v51 = vadd.f32 %v5940_v25, %v11120_v12 }
 0x6e2   : > { %v5748_v49 = vpop.f32.mrf.mxu1 }
 0x6e3   : > { %v11284_v40 = vadd.f32 %v5748_v49, %v11152_v16  ;;  %v6052_v16 = vld [vmem:[#allocation4 + $0x182] sm:$0xff]  ;;  %v6725_v49 = vld [vmem:[#allocation4 + $0x32] sm:$0xff] }
 0x6e6   : > { %6213 = vmatmul.bf16.gmra.mxu3 %v11286_v22 }
 0x6e7   : > { %6448 = vmatmul.bf16.gmra.mxu0 %v11139_v38 }
 0x6e8   : > { %v5942_v21 = vpop.f32.mrf.mxu2 }
 0x6e9   : > { %v11291_v61 = vadd.f32 %v5942_v21, %v11129_v4  ;;  %v6304_v4 = vpack.c.bf16 %v8682_v32, %v8682_v32  ;;  %v6726_v21 = vld [vmem:[#allocation4 + $0x3a] sm:$0xff] }
 0x6ea   : > { %v5751_v59 = vpop.f32.mrf.mxu1  ;;  %v6757_v41 = vpack.c.bf16 %v6726_v21, %v6725_v49 }
 0x6eb   : > { %v11294_v12 = vadd.f32 %v5751_v59, %v11160_v14  ;;  %v11306_v14 = vpack.c.bf16 %v6053_v31, %v6052_v16 }
 0x6ed   : > { %6647 = vmatmul.bf16.gmra.mxu1 %v11158_v53  ;;  %5984 = vmatmul.bf16.gmra.mxu2 %v11296_v17 }
 0x6f0   : > { %v5945_v35 = vpop.f32.mrf.mxu2 }
 0x6f1   : > { %v11301_v38 = vadd.f32 %v5945_v35, %v11137_v57 }
 0x6f2   : > { %v5753_v20 = vpop.f32.mrf.mxu1 }
 0x6f3   : > { %v11304_v25 = vadd.f32 %v5753_v20, %v11170_v24 }
 0x6f6   : > { %6218 = vmatmul.bf16.gmra.mxu3 %v11306_v14 }
 0x6f7   : > { %6453 = vmatmul.bf16.gmra.mxu0 %v6304_v4 }
 0x6f8   : > { %v5947_v53 = vpop.f32.mrf.mxu2 }
 0x6f9   : > { %v11310_v19 = vadd.f32 %v5947_v53, %v11148_v29 }
 0x6fa   : > { %v6613_v59 = vpop.f32.mrf.mxu1 }
 0x6fb   : > { %v11313_v57 = vadd.f32 %v6613_v59, %v11179_v63 }
 0x6fd   : > { %6652 = vmatmul.bf16.gmra.mxu1 %v11177_v58  ;;  %6846 = vmatmul.bf16.vlgmr.msra.gmra.mxu2 %v6757_v41 }
 0x700   : > { %v5950_v24 = vpop.f32.mrf.mxu2 }
 0x701   : > { %v11317_v16 = vadd.f32 %v5950_v24, %v11156_v44 }
 0x702   : > { %v6615_v31 = vpop.f32.mrf.mxu1 }
 0x703   : > { %v11320_v35 = vadd.f32 %v6615_v31, %v11189_v39  ;;  %v6521_v31 = vld [vmem:[#allocation4 + $0x199] sm:$0xff] }
 0x708   : > { %v5952_v32 = vpop.f32.mrf.mxu2 }
 0x709   : > { %v11323_v29 = vadd.f32 %v5952_v32, %v11166_v26 }
 0x70a   : > { %v6618_v4 = vpop.f32.mrf.mxu1 }
 0x70b   : > { %v11326_v63 = vadd.f32 %v6618_v4, %v11198_v0  ;;  %v11726_v4 = vld [vmem:[#allocation11_spill] sm:$0xff] }
 0x70d   : > { %6657 = vmatmul.bf16.gmra.mxu1 %v11196_v62  ;;  %6851 = vmatmul.bf16.gmra.mxu2 %v11063_v55 }
 0x710   : > { %v5955_v58 = vpop.f32.mrf.mxu2 }
 0x711   : > { %v11331_v44 = vadd.f32 %v5955_v58, %v11175_v50 }
 0x712   : > { %v6620_v20 = vpop.f32.mrf.mxu1 }
 0x713   : > { %v11334_v39 = vadd.f32 %v6620_v20, %v11208_v5 }
 0x718   : > { %v5957_v53 = vpop.f32.mrf.mxu2 }
 0x719   : > { %v11337_v26 = vadd.f32 %v5957_v53, %v11185_v45 }
 0x71a   : > { %v6623_v49 = vpop.f32.mrf.mxu1 }
 0x71b   : > { %v11340_v0 = vadd.f32 %v6623_v49, %v11217_v43  ;;  %v11408_v49 = vld [vmem:[%s11627_s6 + $0x1] ss:$0 sm:$0xff] }
 0x71d   : > { %6662 = vmatmul.bf16.gmra.mxu1 %v11215_v42  ;;  %6856 = vmatmul.bf16.gmra.mxu2 %v11080_v33 }
 0x720   : > { %v5960_v55 = vpop.f32.mrf.mxu2 }
 0x721   : > { %v11345_v50 = vadd.f32 %v5960_v55, %v11194_v6  ;;  %v7027_v55 = vld [vmem:[#allocation2 + $0x19] sm:$0xff] }
 0x722   : > { %v6625_v62 = vpop.f32.mrf.mxu1 }
 0x723   : > { %v11348_v5 = vadd.f32 %v6625_v62, %v11227_v15  ;;  %v11413_v62 = vpop.f32.mrf.mxu3 }
 0x728   : > { %v5962_v21 = vpop.f32.mrf.mxu2 }
 0x729   : > { %v11351_v45 = vadd.f32 %v5962_v21, %v11204_v27 }
 0x72a   : > { %v6628_v59 = vpop.f32.mrf.mxu1 }
 0x72b   : > { %v11354_v43 = vadd.f32 %v6628_v59, %v11236_v2 }
 0x72d   : > { %6667 = vmatmul.bf16.gmra.mxu1 %v11234_v28  ;;  %6861 = vmatmul.bf16.gmra.mxu2 %v11097_v52 }
 0x730   : > { %v5965_v33 = vpop.f32.mrf.mxu2 }
 0x731   : > { %v11359_v6 = vadd.f32 %v5965_v33, %v11213_v8 }
 0x732   : > { %v6630_v42 = vpop.f32.mrf.mxu1 }
 0x733   : > { %v11362_v15 = vadd.f32 %v6630_v42, %v11248_v9  ;;  %v7028_v42 = vld [vmem:[#allocation2 + $0x21] sm:$0xff] }
 0x738   : > { %v5967_v41 = vpop.f32.mrf.mxu2 }
 0x739   : > { %v11365_v27 = vadd.f32 %v5967_v41, %v11223_v30  ;;  %v11423_v41 = vpop.f32.mrf.mxu0 }
 0x73d   : > { %6672 = vmatmul.bf16.gmra.mxu1 %v11257_v54  ;;  %6866 = vmatmul.bf16.gmra.mxu2 %v11114_v3  ;;  %v11725_v3 = vld [vmem:[#allocation25_spill] sm:$0xff] }
 0x740   : > { %v5970_v2 = vpop.f32.mrf.mxu2 }
 0x741   : > { %v11370_v28 = vadd.f32 %v5970_v2, %v11232_v48 }
 0x748   : > { %v5972_v52 = vpop.f32.mrf.mxu2 }
 0x749   : > { %v11373_v8 = vadd.f32 %v5972_v52, %v11244_v11  ;;  %v11727_v52 = vld [vmem:[#allocation14_spill] sm:$0xff] }
 0x74d   : > { %6677 = vmatmul.bf16.gmra.mxu1 %v11276_v7  ;;  %6871 = vmatmul.bf16.gmra.mxu2 %v11131_v1  ;;  %v6522_v7 = vld [vmem:[#allocation4 + $0x1a1] sm:$0xff] }
 0x74e   : > { %v6538_v1 = vpack.c.bf16 %v6522_v7, %v6521_v31  ;;  %v11430_v7 = vpop.f32.mrf.mxu3 }
 0x750   : > { %v5975_v9 = vpop.f32.mrf.mxu2 }
 0x751   : > { %v11378_v30 = vadd.f32 %v5975_v9, %v11255_v36  ;;  %v11427_v9 = vpop.f32.mrf.mxu1 }
 0x758   : > { %v5977_v24 = vpop.f32.mrf.mxu2 }
 0x759   : > { %v11381_v54 = vadd.f32 %v5977_v24, %v11265_v13 }
 0x75d   : > { %6682 = vmatmul.bf16.gmra.mxu1 %v11296_v17  ;;  %6876 = vmatmul.bf16.gmra.mxu2 %v11725_v3 }
 0x760   : > { %v5980_v48 = vpop.f32.mrf.mxu2 }
 0x761   : > { %v11386_v11 = vadd.f32 %v5980_v48, %v11274_v37  ;;  %v11402_v37 = vld [vmem:[%s11627_s6] ss:$0 sm:$0xff] }
 0x768   : > { %v5982_v32 = vpop.f32.mrf.mxu2 }
 0x769   : > { %v11389_v36 = vadd.f32 %v5982_v32, %v11284_v40  ;;  %v7029_v32 = vld [vmem:[#allocation2 + $0x31] sm:$0xff] }
 0x76d   : > { %6687 = vmatmul.bf16.gmra.mxu1 %v6538_v1  ;;  %6881 = vmatmul.bf16.gmra.mxu2 %v11726_v4  ;;  %v11435_v4 = vpop.f32.mrf.mxu0 }
 0x770   : > { %v5985_v13 = vpop.f32.mrf.mxu2 }
 0x771   : > { %v11393_v17 = vadd.f32 %v5985_v13, %v11294_v12 }
 0x778   : > { %v5987_v58 = vpop.f32.mrf.mxu2 }
 0x779   : > { %v11396_v20 = vadd.f32 %v5987_v58, %v11304_v25  ;;  %v11437_v58 = vpop.f32.mrf.mxu1 }
 0x77d   : > { %6886 = vmatmul.bf16.gmra.mxu2 %v11187_v10 }
 0x780   : > { %v6847_v40 = vpop.f32.mrf.mxu2 }
 0x781   : > { %v6927_v53 = vadd.f32 %v6847_v40, %v11313_v57 }
 0x783   : > { %v6961_v12 = vmul.f32 %v11402_v37, %v6927_v53 }
 0x785   : > { %v6995_v25 = vadd.f32 %v11408_v49, %v6961_v12 }
 0x787   : > { %v7059_v10 = vadd.f32 %v7027_v55, %v6995_v25  ;;  %v11442_v55 = vpop.f32.mrf.mxu3  ;;  %v7030_v25 = vld [vmem:[#allocation2 + $0x39] sm:$0xff] }
 0x788   : > { %v6849_v57 = vpop.f32.mrf.mxu2 }
 0x789   : > { %v7091_v21 = vmax.f32 %v7059_v10, 0.0  ;;  %v6928_v59 = vadd.f32 %v6849_v57, %v11320_v35 }
 0x78b   : > { %7123 = vst [vmem:[%s11418_s18] sm:$0xff] %v7091_v21  ;;  %v6962_v33 = vmul.f32 %v11402_v37, %v6928_v59  ;;  %v11446_v59 = vpop.f32.mrf.mxu0 }
 0x78d   : > { %v6996_v2 = vadd.f32 %v11408_v49, %v6962_v33  ;;  %6891 = vmatmul.bf16.gmra.mxu2 %v11727_v52  ;;  %v7031_v52 = vld [vmem:[#allocation2 + $0x49] sm:$0xff] }
 0x78f   : > { %v7060_v24 = vadd.f32 %v7028_v42, %v6996_v2  ;;  %v11449_v2 = vpop.f32.mrf.mxu1 }
 0x790   : > { %v6852_v3 = vpop.f32.mrf.mxu2 }
 0x791   : > { %v7092_v48 = vmax.f32 %v7060_v24, 0.0  ;;  %v6929_v31 = vadd.f32 %v6852_v3, %v11326_v63  ;;  %v11454_v3 = vpop.f32.mrf.mxu3 }
 0x793   : > { %7124 = vst [vmem:[%s11418_s18 + $0x8] sm:$0xff] %v7092_v48  ;;  %v6963_v35 = vmul.f32 %v11402_v37, %v6929_v31 }
 0x795   : > { %v6997_v1 = vadd.f32 %v11408_v49, %v6963_v35 }
 0x797   : > { %v7061_v13 = vadd.f32 %v7029_v32, %v6997_v1  ;;  %v11457_v32 = vpop.f32.mrf.mxu0  ;;  %v11461_v1 = vpop.f32.mrf.mxu1 }
 0x798   : > { %v6854_v40 = vpop.f32.mrf.mxu2 }
 0x799   : > { %v7093_v53 = vmax.f32 %v7061_v13, 0.0  ;;  %v6930_v12 = vadd.f32 %v6854_v40, %v11334_v39  ;;  %v7032_v13 = vld [vmem:[#allocation2 + $0x51] sm:$0xff] }
 0x79b   : > { %7125 = vst [vmem:[%s11418_s18 + $0x10] sm:$0xff] %v7093_v53  ;;  %v6964_v63 = vmul.f32 %v11402_v37, %v6930_v12  ;;  %v11465_v12 = vpop.f32.mrf.mxu3 }
 0x79d   : > { %v6998_v10 = vadd.f32 %v11408_v49, %v6964_v63  ;;  %6896 = vmatmul.bf16.gmra.mxu2 %v11225_v47 }
 0x79f   : > { %v7062_v57 = vadd.f32 %v7030_v25, %v6998_v10 }
 0x7a0   : > { %v6857_v21 = vpop.f32.mrf.mxu2 }
 0x7a1   : > { %v7094_v33 = vmax.f32 %v7062_v57, 0.0  ;;  %v6931_v42 = vadd.f32 %v6857_v21, %v11340_v0  ;;  %v7033_v57 = vld [vmem:[#allocation2 + $0x61] sm:$0xff]  ;;  %v11470_v21 = vpop.f32.mrf.mxu0 }
 0x7a3   : > { %7126 = vst [vmem:[%s11418_s18 + $0x18] sm:$0xff] %v7094_v33  ;;  %v6965_v39 = vmul.f32 %v11402_v37, %v6931_v42  ;;  %v11473_v42 = vpop.f32.mrf.mxu1 }
 0x7a5   : > { %v6999_v24 = vadd.f32 %v11408_v49, %v6965_v39 }
 0x7a7   : > { %v7063_v48 = vadd.f32 %v7031_v52, %v6999_v24  ;;  %v6232_v52 = vadd.f32 %v11413_v62, %v11241_v46 }
 0x7a8   : > { %v6859_v47 = vpop.f32.mrf.mxu2 }
 0x7a9   : > { %v7095_v31 = vmax.f32 %v7063_v48, 0.0  ;;  %v6932_v35 = vadd.f32 %v6859_v47, %v11348_v5 }
 0x7ab   : > { %7127 = vst [vmem:[%s11418_s18 + $0x20] sm:$0xff] %v7095_v31  ;;  %v6966_v0 = vmul.f32 %v11402_v37, %v6932_v35  ;;  %v7034_v31 = vld [vmem:[#allocation2 + $0x69] sm:$0xff]  ;;  %v6467_v35 = vadd.f32 %v11423_v41, %v6232_v52 }
 0x7ad   : > { %v7000_v40 = vadd.f32 %v11408_v49, %v6966_v0  ;;  %6901 = vmatmul.bf16.gmra.mxu2 %v11246_v18  ;;  %v6701_v46 = vadd.f32 %v11427_v9, %v6467_v35 }
 0x7af   : > { %v7064_v53 = vadd.f32 %v7032_v13, %v7000_v40  ;;  %v11485_v13 = vpop.f32.mrf.mxu0  ;;  %v11488_v40 = vpop.f32.mrf.mxu1 }
 0x7b0   : > { %v6862_v63 = vpop.f32.mrf.mxu2 }
 0x7b1   : > { %v7096_v25 = vmax.f32 %v7064_v53, 0.0  ;;  %v6933_v5 = vadd.f32 %v6862_v63, %v11354_v43  ;;  %v11478_v43 = vpop.f32.mrf.mxu3  ;;  %v6233_v53 = vadd.f32 %v11430_v7, %v11252_v56  ;;  %v6234_v56 = vadd.f32 %v11442_v55, %v11262_v60 }
 0x7b3   : > { %7128 = vst [vmem:[%s11418_s18 + $0x28] sm:$0xff] %v7096_v25  ;;  %v6967_v10 = vmul.f32 %v11402_v37, %v6933_v5 }
 0x7b5   : > { %v7001_v33 = vadd.f32 %v11408_v49, %v6967_v10  ;;  %v6468_v10 = vadd.f32 %v11435_v4, %v6233_v53  ;;  %v7036_v4 = vld [vmem:[#allocation2 + $0x81] sm:$0xff] }
 0x7b7   : > { %v7065_v39 = vadd.f32 %v7033_v57, %v7001_v33  ;;  %v6702_v57 = vadd.f32 %v11437_v58, %v6468_v10  ;;  %v11501_v7 = vpop.f32.mrf.mxu0 }
 0x7b8   : > { %v6864_v18 = vpop.f32.mrf.mxu2 }
 0x7b9   : > { %v7097_v24 = vmax.f32 %v7065_v39, 0.0  ;;  %v6934_v48 = vadd.f32 %v6864_v18, %v11362_v15  ;;  %v11494_v5 = vpop.f32.mrf.mxu3 }
 0x7bb   : > { %7129 = vst [vmem:[%s11418_s18 + $0x30] sm:$0xff] %v7097_v24  ;;  %v6968_v47 = vmul.f32 %v11402_v37, %v6934_v48  ;;  %v11503_v24 = vpop.f32.mrf.mxu1 }
 0x7bd   : > { %v7002_v0 = vadd.f32 %v11408_v49, %v6968_v47  ;;  %6906 = vmatmul.bf16.gmra.mxu2 %v11267_v34  ;;  %v7035_v34 = vld [vmem:[#allocation2 + $0x79] sm:$0xff]  ;;  %v6469_v47 = vadd.f32 %v11446_v59, %v6234_v56 }
 0x7bf   : > { %v7066_v62 = vadd.f32 %v7034_v31, %v7002_v0  ;;  %v6703_v60 = vadd.f32 %v11449_v2, %v6469_v47  ;;  %v6235_v0 = vadd.f32 %v11454_v3, %v11271_v23  ;;  %v6236_v3 = vadd.f32 %v11465_v12, %v11281_v51 }
 0x7c0   : > { %v6867_v15 = vpop.f32.mrf.mxu2  ;;  %v6237_v51 = vadd.f32 %v11478_v43, %v11291_v61  ;;  %v6238_v43 = vadd.f32 %v11494_v5, %v11301_v38 }
 0x7c1   : > { %v7098_v63 = vmax.f32 %v7066_v62, 0.0  ;;  %v6935_v25 = vadd.f32 %v6867_v15, %v6701_v46  ;;  %v6181_v31 = vpop.f32.mrf.mxu3  ;;  %v11513_v15 = vpop.f32.mrf.mxu0 }
 0x7c2   : > { %v6239_v38 = vadd.f32 %v6181_v31, %v11310_v19 }
 0x7c3   : > { %7130 = vst [vmem:[%s11418_s18 + $0x38] sm:$0xff] %v7098_v63  ;;  %v6969_v41 = vmul.f32 %v11402_v37, %v6935_v25  ;;  %v11517_v53 = vpop.f32.mrf.mxu1  ;;  %v7037_v63 = vld [vmem:[#allocation2 + $0x91] sm:$0xff] }
 0x7c5   : > { %v7003_v9 = vadd.f32 %v11408_v49, %v6969_v41 }
 0x7c7   : > { %v7067_v33 = vadd.f32 %v7035_v34, %v7003_v9 }
 0x7c8   : > { %v6869_v39 = vpop.f32.mrf.mxu2 }
 0x7c9   : > { %v7099_v18 = vmax.f32 %v7067_v33, 0.0  ;;  %v6936_v52 = vadd.f32 %v6869_v39, %v6702_v57  ;;  %v6184_v34 = vpop.f32.mrf.mxu3  ;;  %v7038_v33 = vld [vmem:[#allocation2 + $0x99] sm:$0xff]  ;;  %v6419_v39 = vpop.f32.mrf.mxu0 }
 0x7ca   : > { %v6240_v19 = vadd.f32 %v6184_v34, %v11317_v16 }
 0x7cb   : > { %7131 = vst [vmem:[%s11418_s18 + $0x40] sm:$0xff] %v7099_v18  ;;  %v6970_v48 = vmul.f32 %v11402_v37, %v6936_v52 }
 0x7cd   : > { %v7004_v58 = vadd.f32 %v11408_v49, %v6970_v48  ;;  %6911 = vmatmul.bf16.gmra.mxu2 %v11286_v22  ;;  %v6470_v22 = vadd.f32 %v11457_v32, %v6235_v0  ;;  %v6471_v32 = vadd.f32 %v11470_v21, %v6236_v3  ;;  %v7039_v21 = vld [vmem:[#allocation2 + $0xa9] sm:$0xff] }
 0x7cf   : > { %v7068_v55 = vadd.f32 %v7036_v4, %v7004_v58  ;;  %v6704_v25 = vadd.f32 %v11461_v1, %v6470_v22  ;;  %v6653_v1 = vpop.f32.mrf.mxu1  ;;  %v6705_v18 = vadd.f32 %v11473_v42, %v6471_v32 }
 0x7d0   : > { %v6872_v35 = vpop.f32.mrf.mxu2 }
 0x7d1   : > { %v7100_v46 = vmax.f32 %v7068_v55, 0.0  ;;  %v6937_v62 = vadd.f32 %v6872_v35, %v6703_v60  ;;  %v6186_v47 = vpop.f32.mrf.mxu3  ;;  %v6472_v60 = vadd.f32 %v11485_v13, %v6237_v51  ;;  %v6755_v55 = vld [vmem:[#allocation4 + $0x19a] sm:$0xff]  ;;  %v6756_v35 = vld [vmem:[#allocation4 + $0x1a2] sm:$0xff]  ;;  %v6421_v42 = vpop.f32.mrf.mxu0 }
 0x7d2   : > { %v6772_v22 = vpack.c.bf16 %v6756_v35, %v6755_v55 }
 0x7d3   : > { %7132 = vst [vmem:[%s11418_s18 + $0x48] sm:$0xff] %v7100_v46  ;;  %v6971_v59 = vmul.f32 %v11402_v37, %v6937_v62  ;;  %v6706_v0 = vadd.f32 %v11488_v40, %v6472_v60  ;;  %v7042_v60 = vld [vmem:[#allocation2 + $0xc9] sm:$0xff] }
 0x7d5   : > { %v7005_v2 = vadd.f32 %v11408_v49, %v6971_v59 }
 0x7d7   : > { %v7069_v41 = vadd.f32 %v7037_v63, %v7005_v2  ;;  %v6655_v62 = vpop.f32.mrf.mxu1 }
 0x7d8   : > { %v6874_v23 = vpop.f32.mrf.mxu2 }
 0x7d9   : > { %v7101_v10 = vmax.f32 %v7069_v41, 0.0  ;;  %v6938_v9 = vadd.f32 %v6874_v23, %v6704_v25  ;;  %v6189_v2 = vpop.f32.mrf.mxu3  ;;  %v7040_v25 = vld [vmem:[#allocation2 + $0xb1] sm:$0xff]  ;;  %v6473_v41 = vadd.f32 %v11501_v7, %v6238_v43  ;;  %v6424_v5 = vpop.f32.mrf.mxu0  ;;  %v6474_v7 = vadd.f32 %v11513_v15, %v6239_v38  ;;  %v7043_v43 = vld [vmem:[#allocation2 + $0xd9] sm:$0xff] }
 0x7db   : > { %7133 = vst [vmem:[%s11418_s18 + $0x50] sm:$0xff] %v7101_v10  ;;  %v6972_v57 = vmul.f32 %v11402_v37, %v6938_v9  ;;  %v6707_v40 = vadd.f32 %v11503_v24, %v6473_v41  ;;  %v6708_v24 = vadd.f32 %v11517_v53, %v6474_v7  ;;  %v6242_v41 = vadd.f32 %v6189_v2, %v11331_v44 }
 0x7dd   : > { %v7006_v56 = vadd.f32 %v11408_v49, %v6972_v57  ;;  %6916 = vmatmul.bf16.gmra.mxu2 %v11306_v14 }
 0x7df   : > { %v7070_v52 = vadd.f32 %v7038_v33, %v7006_v56  ;;  %v6658_v33 = vpop.f32.mrf.mxu1  ;;  %v7041_v56 = vld [vmem:[#allocation2 + $0xc1] sm:$0xff] }
 0x7e0   : > { %v6877_v48 = vpop.f32.mrf.mxu2 }
 0x7e1   : > { %v7102_v12 = vmax.f32 %v7070_v52, 0.0  ;;  %v6939_v4 = vadd.f32 %v6877_v48, %v6705_v18  ;;  %v6191_v52 = vpop.f32.mrf.mxu3 }
 0x7e3   : > { %7134 = vst [vmem:[%s11418_s18 + $0x58] sm:$0xff] %v7102_v12  ;;  %v6973_v58 = vmul.f32 %v11402_v37, %v6939_v4  ;;  %v6426_v4 = vpop.f32.mrf.mxu0 }
 0x7e5   : > { %v7007_v14 = vadd.f32 %v11408_v49, %v6973_v58 }
 0x7e7   : > { %v7071_v46 = vadd.f32 %v7039_v21, %v7007_v14  ;;  %v6660_v21 = vpop.f32.mrf.mxu1  ;;  %v6475_v14 = vadd.f32 %v6419_v39, %v6240_v19 }
 0x7e8   : > { %v6879_v61 = vpop.f32.mrf.mxu2 }
 0x7e9   : > { %v7103_v59 = vmax.f32 %v7071_v46, 0.0  ;;  %v6940_v63 = vadd.f32 %v6879_v61, %v6706_v0  ;;  %v6709_v55 = vadd.f32 %v6653_v1, %v6475_v14  ;;  %v6194_v0 = vpop.f32.mrf.mxu3  ;;  %v6241_v46 = vadd.f32 %v6186_v47, %v11323_v29  ;;  %v7046_v14 = vld [vmem:[#allocation2 + $0xf9] sm:$0xff] }
 0x7eb   : > { %7135 = vst [vmem:[%s11418_s18 + $0x60] sm:$0xff] %v7103_v59  ;;  %v6974_v13 = vmul.f32 %v11402_v37, %v6940_v63  ;;  %v6429_v59 = vpop.f32.mrf.mxu0  ;;  %v6476_v63 = vadd.f32 %v6421_v42, %v6241_v46 }
 0x7ed   : > { %v7008_v23 = vadd.f32 %v11408_v49, %v6974_v13  ;;  %6921 = vmatmul.bf16.gmra.mxu2 %v6772_v22  ;;  %v6710_v13 = vadd.f32 %v6655_v62, %v6476_v63 }
 0x7ef   : > { %v7072_v3 = vadd.f32 %v7040_v25, %v7008_v23  ;;  %v6663_v39 = vpop.f32.mrf.mxu1 }
 0x7f0   : > { %v6882_v10 = vpop.f32.mrf.mxu2 }
 0x7f1   : > { %v7104_v9 = vmax.f32 %v7072_v3, 0.0  ;;  %v6941_v57 = vadd.f32 %v6882_v10, %v6707_v40  ;;  %v6196_v47 = vpop.f32.mrf.mxu3  ;;  %v7044_v3 = vld [vmem:[#allocation2 + $0xe1] sm:$0xff]  ;;  %v6477_v10 = vadd.f32 %v6424_v5, %v6242_v41 }
 0x7f2   : > { %v6245_v46 = vadd.f32 %v6196_v47, %v11351_v45 }
 0x7f3   : > { %7136 = vst [vmem:[%s11418_s18 + $0x68] sm:$0xff] %v7104_v9  ;;  %v6975_v32 = vmul.f32 %v11402_v37, %v6941_v57  ;;  %v6431_v42 = vpop.f32.mrf.mxu0  ;;  %v6711_v9 = vadd.f32 %v6658_v33, %v6477_v10  ;;  %v6244_v33 = vadd.f32 %v6194_v0, %v11345_v50 }
 0x7f4   : > { %v6480_v63 = vadd.f32 %v6431_v42, %v6245_v46  ;;  %v7051_v46 = vld [vmem:[#allocation2 + $0x139] sm:$0xff] }
 0x7f5   : > { %v7009_v18 = vadd.f32 %v11408_v49, %v6975_v32 }
 0x7f7   : > { %v7073_v48 = vadd.f32 %v7041_v56, %v7009_v18  ;;  %v6665_v32 = vpop.f32.mrf.mxu1  ;;  %v6243_v56 = vadd.f32 %v6191_v52, %v11337_v26 }
 0x7f8   : > { %v6884_v51 = vpop.f32.mrf.mxu2 }
 0x7f9   : > { %v7105_v31 = vmax.f32 %v7073_v48, 0.0  ;;  %v6942_v12 = vadd.f32 %v6884_v51, %v6708_v24  ;;  %v6199_v18 = vpop.f32.mrf.mxu3  ;;  %v7045_v24 = vld [vmem:[#allocation2 + $0xf1] sm:$0xff]  ;;  %v6478_v48 = vadd.f32 %v6426_v4, %v6243_v56 }
 0x7fb   : > { %7137 = vst [vmem:[%s11418_s18 + $0x70] sm:$0xff] %v7105_v31  ;;  %v6976_v58 = vmul.f32 %v11402_v37, %v6942_v12  ;;  %v6712_v51 = vadd.f32 %v6660_v21, %v6478_v48  ;;  %v6434_v12 = vpop.f32.mrf.mxu0 }
 0x7fd   : > { %v7010_v15 = vadd.f32 %v11408_v49, %v6976_v58 }
 0x7ff   : > { %v7074_v35 = vadd.f32 %v7042_v60, %v7010_v15  ;;  %v6668_v52 = vpop.f32.mrf.mxu1  ;;  %v6479_v15 = vadd.f32 %v6429_v59, %v6244_v33 }
 0x800   : > { %v6887_v53 = vpop.f32.mrf.mxu2 }
 0x801   : > { %v7106_v61 = vmax.f32 %v7074_v35, 0.0  ;;  %v6943_v16 = vadd.f32 %v6887_v53, %v6709_v55  ;;  %v6201_v4 = vpop.f32.mrf.mxu3  ;;  %v6713_v35 = vadd.f32 %v6663_v39, %v6479_v15 }
 0x803   : > { %7138 = vst [vmem:[%s11418_s18 + $0x78] sm:$0xff] %v7106_v61  ;;  %v6977_v34 = vmul.f32 %v11402_v37, %v6943_v16  ;;  %v6436_v0 = vpop.f32.mrf.mxu0 }
 0x805   : > { %v7011_v22 = vadd.f32 %v11408_v49, %v6977_v34 }
 0x807   : > { %v7075_v25 = vadd.f32 %v7043_v43, %v7011_v22  ;;  %v6670_v34 = vpop.f32.mrf.mxu1  ;;  %v7047_v43 = vld [vmem:[#allocation2 + $0x109] sm:$0xff]  ;;  %v6714_v22 = vadd.f32 %v6665_v32, %v6480_v63 }
 0x808   : > { %v6889_v1 = vpop.f32.mrf.mxu2 }
 0x809   : > { %v7107_v23 = vmax.f32 %v7075_v25, 0.0  ;;  %v6944_v29 = vadd.f32 %v6889_v1, %v6710_v13  ;;  %v6204_v25 = vpop.f32.mrf.mxu3  ;;  %v6246_v1 = vadd.f32 %v6199_v18, %v11359_v6 }
 0x80b   : > { %7139 = vst [vmem:[%s11418_s18 + $0x80] sm:$0xff] %v7107_v23  ;;  %v6978_v40 = vmul.f32 %v11402_v37, %v6944_v29  ;;  %v7048_v29 = vld [vmem:[#allocation2 + $0x111] sm:$0xff]  ;;  %v6439_v47 = vpop.f32.mrf.mxu0 }
 0x80d   : > { %v7012_v38 = vadd.f32 %v11408_v49, %v6978_v40  ;;  %v6481_v40 = vadd.f32 %v6434_v12, %v6246_v1 }
 0x80f   : > { %v7076_v57 = vadd.f32 %v7044_v3, %v7012_v38  ;;  %v6673_v10 = vpop.f32.mrf.mxu1  ;;  %v6715_v38 = vadd.f32 %v6668_v52, %v6481_v40 }
 0x810   : > { %v6892_v62 = vpop.f32.mrf.mxu2 }
 0x811   : > { %v7108_v7 = vmax.f32 %v7076_v57, 0.0  ;;  %v6945_v44 = vadd.f32 %v6892_v62, %v6711_v9  ;;  %v6247_v57 = vadd.f32 %v6201_v4, %v11365_v27  ;;  %v6206_v62 = vpop.f32.mrf.mxu3 }
 0x813   : > { %7140 = vst [vmem:[%s11418_s18 + $0x88] sm:$0xff] %v7108_v7  ;;  %v6979_v2 = vmul.f32 %v11402_v37, %v6945_v44  ;;  %v7049_v7 = vld [vmem:[#allocation2 + $0x121] sm:$0xff]  ;;  %v6482_v44 = vadd.f32 %v6436_v0, %v6247_v57  ;;  %v6441_v18 = vpop.f32.mrf.mxu0 }
 0x815   : > { %v7013_v5 = vadd.f32 %v11408_v49, %v6979_v2 }
 0x817   : > { %v7077_v19 = vadd.f32 %v7045_v24, %v7013_v5  ;;  %v6716_v24 = vadd.f32 %v6670_v34, %v6482_v44  ;;  %v6675_v5 = vpop.f32.mrf.mxu1 }
 0x818   : > { %v6894_v31 = vpop.f32.mrf.mxu2 }
 0x819   : > { %v7109_v58 = vmax.f32 %v7077_v19, 0.0  ;;  %v6946_v26 = vadd.f32 %v6894_v31, %v6712_v51  ;;  %v6248_v19 = vadd.f32 %v6204_v25, %v11370_v28  ;;  %v6209_v12 = vpop.f32.mrf.mxu3 }
 0x81a   : > { %v6250_v63 = vadd.f32 %v6209_v12, %v11378_v30 }
 0x81b   : > { %7141 = vst [vmem:[%s11418_s18 + $0x90] sm:$0xff] %v7109_v58  ;;  %v6980_v60 = vmul.f32 %v11402_v37, %v6946_v26  ;;  %v7050_v58 = vld [vmem:[#allocation2 + $0x129] sm:$0xff]  ;;  %v6483_v26 = vadd.f32 %v6439_v47, %v6248_v19  ;;  %v6444_v4 = vpop.f32.mrf.mxu0 }
 0x81c   : > { %v6485_v1 = vadd.f32 %v6444_v4, %v6250_v63 }
 0x81d   : > { %v7014_v55 = vadd.f32 %v11408_v49, %v6980_v60  ;;  %v6717_v60 = vadd.f32 %v6673_v10, %v6483_v26 }
 0x81f   : > { %v7078_v53 = vadd.f32 %v7046_v14, %v7014_v55  ;;  %v6249_v55 = vadd.f32 %v6206_v62, %v11373_v8 }
 0x820   : > { %v6897_v21 = vpop.f32.mrf.mxu2 }
 0x821   : > { %v7110_v61 = vmax.f32 %v7078_v53, 0.0  ;;  %v6947_v50 = vadd.f32 %v6897_v21, %v6713_v35  ;;  %v6678_v53 = vpop.f32.mrf.mxu1  ;;  %v6211_v0 = vpop.f32.mrf.mxu3 }
 0x822   : > { %v6251_v40 = vadd.f32 %v6211_v0, %v11381_v54 }
 0x823   : > { %7142 = vst [vmem:[%s11418_s18 + $0x98] sm:$0xff] %v7110_v61  ;;  %v6981_v16 = vmul.f32 %v11402_v37, %v6947_v50  ;;  %v6484_v61 = vadd.f32 %v6441_v18, %v6249_v55 }
 0x825   : > { %v7015_v59 = vadd.f32 %v11408_v49, %v6981_v16  ;;  %v6718_v16 = vadd.f32 %v6675_v5, %v6484_v61 }
 0x827   : > { %v7079_v13 = vadd.f32 %v7047_v43, %v7015_v59 }
 0x828   : > { %v6899_v39 = vpop.f32.mrf.mxu2 }
 0x829   : > { %v7111_v41 = vmax.f32 %v7079_v13, 0.0  ;;  %v6948_v45 = vadd.f32 %v6899_v39, %v6714_v22  ;;  %v6446_v22 = vpop.f32.mrf.mxu0  ;;  %v6680_v25 = vpop.f32.mrf.mxu1  ;;  %v7052_v39 = vld [vmem:[#allocation2 + $0x141] sm:$0xff] }
 0x82b   : > { %7143 = vst [vmem:[%s11418_s18 + $0xa0] sm:$0xff] %v7111_v41  ;;  %v6982_v23 = vmul.f32 %v11402_v37, %v6948_v45  ;;  %v6719_v45 = vadd.f32 %v6678_v53, %v6485_v1  ;;  %v7057_v1 = vld [vmem:[#allocation2 + $0x181] sm:$0xff] }
 0x82d   : > { %v7016_v3 = vadd.f32 %v11408_v49, %v6982_v23 }
 0x82f   : > { %v7080_v42 = vadd.f32 %v7048_v29, %v7016_v3  ;;  %v6214_v29 = vpop.f32.mrf.mxu3 }
 0x830   : > { %v6902_v9 = vpop.f32.mrf.mxu2 }
 0x831   : > { %v7112_v32 = vmax.f32 %v7080_v42, 0.0  ;;  %v6949_v6 = vadd.f32 %v6902_v9, %v6715_v38  ;;  %v7053_v38 = vld [vmem:[#allocation2 + $0x151] sm:$0xff]  ;;  %v6449_v42 = vpop.f32.mrf.mxu0  ;;  %v6486_v9 = vadd.f32 %v6446_v22, %v6251_v40 }
 0x833   : > { %7144 = vst [vmem:[%s11418_s18 + $0xa8] sm:$0xff] %v7112_v32  ;;  %v6983_v56 = vmul.f32 %v11402_v37, %v6949_v6  ;;  %v6683_v32 = vpop.f32.mrf.mxu1  ;;  %v6720_v6 = vadd.f32 %v6680_v25, %v6486_v9 }
 0x835   : > { %v7017_v2 = vadd.f32 %v11408_v49, %v6983_v56 }
 0x837   : > { %v7081_v48 = vadd.f32 %v7049_v7, %v7017_v2  ;;  %v6252_v7 = vadd.f32 %v6214_v29, %v11386_v11  ;;  %v6216_v2 = vpop.f32.mrf.mxu3 }
 0x838   : > { %v6904_v51 = vpop.f32.mrf.mxu2  ;;  %v6253_v12 = vadd.f32 %v6216_v2, %v11389_v36 }
 0x839   : > { %v7113_v31 = vmax.f32 %v7081_v48, 0.0  ;;  %v6950_v27 = vadd.f32 %v6904_v51, %v6716_v24  ;;  %v7054_v24 = vld [vmem:[#allocation2 + $0x159] sm:$0xff]  ;;  %v6487_v48 = vadd.f32 %v6449_v42, %v6252_v7  ;;  %v6451_v51 = vpop.f32.mrf.mxu0 }
 0x83b   : > { %7145 = vst [vmem:[%s11418_s18 + $0xb0] sm:$0xff] %v7113_v31  ;;  %v6984_v33 = vmul.f32 %v11402_v37, %v6950_v27  ;;  %v6721_v19 = vadd.f32 %v6683_v32, %v6487_v48  ;;  %v6685_v27 = vpop.f32.mrf.mxu1 }
 0x83d   : > { %v7018_v52 = vadd.f32 %v11408_v49, %v6984_v33 }
 0x83f   : > { %v7082_v14 = vadd.f32 %v7050_v58, %v7018_v52  ;;  %v6219_v52 = vpop.f32.mrf.mxu3 }
 0x840   : > { %v6907_v15 = vpop.f32.mrf.mxu2  ;;  %v6254_v53 = vadd.f32 %v6219_v52, %v11393_v17 }
 0x841   : > { %v7114_v35 = vmax.f32 %v7082_v14, 0.0  ;;  %v6951_v28 = vadd.f32 %v6907_v15, %v6717_v60  ;;  %v7055_v60 = vld [vmem:[#allocation2 + $0x169] sm:$0xff]  ;;  %v6488_v14 = vadd.f32 %v6451_v51, %v6253_v12 }
 0x843   : > { %7146 = vst [vmem:[%s11418_s18 + $0xb8] sm:$0xff] %v7114_v35  ;;  %v6985_v21 = vmul.f32 %v11402_v37, %v6951_v28  ;;  %v6722_v55 = vadd.f32 %v6685_v27, %v6488_v14  ;;  %v6454_v35 = vpop.f32.mrf.mxu0 }
 0x844   : > { %v6489_v0 = vadd.f32 %v6454_v35, %v6254_v53 }
 0x845   : > { %v7019_v50 = vadd.f32 %v11408_v49, %v6985_v21 }
 0x847   : > { %v7083_v34 = vadd.f32 %v7051_v46, %v7019_v50  ;;  %v6688_v46 = vpop.f32.mrf.mxu1  ;;  %v7056_v50 = vld [vmem:[#allocation2 + $0x171] sm:$0xff] }
 0x848   : > { %v6909_v43 = vpop.f32.mrf.mxu2 }
 0x849   : > { %v7115_v59 = vmax.f32 %v7083_v34, 0.0  ;;  %v6952_v8 = vadd.f32 %v6909_v43, %v6718_v16  ;;  %v6221_v34 = vpop.f32.mrf.mxu3  ;;  %v6723_v43 = vadd.f32 %v6688_v46, %v6489_v0 }
 0x84b   : > { %7147 = vst [vmem:[%s11418_s18 + $0xc0] sm:$0xff] %v7115_v59  ;;  %v6986_v13 = vmul.f32 %v11402_v37, %v6952_v8  ;;  %v6255_v8 = vadd.f32 %v6221_v34, %v11396_v20 }
 0x84d   : > { %v7020_v41 = vadd.f32 %v11408_v49, %v6986_v13  ;;  %v6456_v13 = vpop.f32.mrf.mxu0 }
 0x84f   : > { %v7084_v23 = vadd.f32 %v7052_v39, %v7020_v41  ;;  %v6690_v39 = vpop.f32.mrf.mxu1  ;;  %v6490_v41 = vadd.f32 %v6456_v13, %v6255_v8 }
 0x850   : > { %v6912_v47 = vpop.f32.mrf.mxu2 }
 0x851   : > { %v7116_v3 = vmax.f32 %v7084_v23, 0.0  ;;  %v6953_v30 = vadd.f32 %v6912_v47, %v6719_v45  ;;  %v6724_v23 = vadd.f32 %v6690_v39, %v6490_v41 }
 0x853   : > { %7148 = vst [vmem:[%s11418_s18 + $0xc8] sm:$0xff] %v7116_v3  ;;  %v6987_v10 = vmul.f32 %v11402_v37, %v6953_v30  ;;  %v7058_v30 = vld [vmem:[#allocation2 + $0x189] sm:$0xff] }
 0x855   : > { %v7021_v57 = vadd.f32 %v11408_v49, %v6987_v10 }
 0x857   : > { %v7085_v62 = vadd.f32 %v7053_v38, %v7021_v57 }
 0x858   : > { %v6914_v56 = vpop.f32.mrf.mxu2 }
 0x859   : > { %v7117_v44 = vmax.f32 %v7085_v62, 0.0  ;;  %v6954_v54 = vadd.f32 %v6914_v56, %v6720_v6 }
 0x85b   : > { %7149 = vst [vmem:[%s11418_s18 + $0xd0] sm:$0xff] %v7117_v44  ;;  %v6988_v18 = vmul.f32 %v11402_v37, %v6954_v54 }
 0x85d   : > { %v7022_v5 = vadd.f32 %v11408_v49, %v6988_v18 }
 0x85f   : > { %v7086_v31 = vadd.f32 %v7054_v24, %v7022_v5 }
 0x860   : > { %v6917_v33 = vpop.f32.mrf.mxu2 }
 0x861   : > { %v7118_v58 = vmax.f32 %v7086_v31, 0.0  ;;  %v6955_v11 = vadd.f32 %v6917_v33, %v6721_v19 }
 0x863   : > { %7150 = vst [vmem:[%s11418_s18 + $0xd8] sm:$0xff] %v7118_v58  ;;  %v6989_v26 = vmul.f32 %v11402_v37, %v6955_v11 }
 0x865   : > { %v7023_v15 = vadd.f32 %v11408_v49, %v6989_v26 }
 0x867   : > { %v7087_v4 = vadd.f32 %v7055_v60, %v7023_v15 }
 0x868   : > { %v6919_v28 = vpop.f32.mrf.mxu2 }
 0x869   : > { %v7119_v21 = vmax.f32 %v7087_v4, 0.0  ;;  %v6956_v36 = vadd.f32 %v6919_v28, %v6722_v55 }
 0x86b   : > { %7151 = vst [vmem:[%s11418_s18 + $0xe0] sm:$0xff] %v7119_v21  ;;  %v6990_v61 = vmul.f32 %v11402_v37, %v6956_v36 }
 0x86d   : > { %v7024_v16 = vadd.f32 %v11408_v49, %v6990_v61 }
 0x86f   : > { %v7088_v63 = vadd.f32 %v7056_v50, %v7024_v16 }
 0x870   : > { %v6922_v59 = vpop.f32.mrf.mxu2 }
 0x871   : > { %v7120_v22 = vmax.f32 %v7088_v63, 0.0  ;;  %v6957_v17 = vadd.f32 %v6922_v59, %v6723_v43 }
 0x873   : > { %7152 = vst [vmem:[%s11418_s18 + $0xe8] sm:$0xff] %v7120_v22  ;;  %v6991_v25 = vmul.f32 %v11402_v37, %v6957_v17 }
 0x875   : > { %v7025_v45 = vadd.f32 %v11408_v49, %v6991_v25 }
 0x877   : > { %v7089_v29 = vadd.f32 %v7057_v1, %v7025_v45 }
 0x878   : > { %v6924_v47 = vpop.f32.mrf.mxu2 }
 0x879   : > { %v7121_v40 = vmax.f32 %v7089_v29, 0.0  ;;  %v6958_v3 = vadd.f32 %v6924_v47, %v6724_v23 }
 0x87b   : > { %7153 = vst [vmem:[%s11418_s18 + $0xf0] sm:$0xff] %v7121_v40  ;;  %v6992_v20 = vmul.f32 %v11402_v37, %v6958_v3 }
 0x87d   : > { %v7026_v10 = vadd.f32 %v11408_v49, %v6992_v20 }
 0x87f   : > { %v7090_v38 = vadd.f32 %v7058_v30, %v7026_v10 }
 0x881   : > { %v7122_v42 = vmax.f32 %v7090_v38, 0.0 }
 0x883   : > { %7154 = vst [vmem:[%s11418_s18 + $0xf8] sm:$0xff] %v7122_v42 }
 0x884 PF: > { %s18_s24 = sadd.s32 1, %s8723_s24  }
 0x885   : > { %p15_p7 = scmp.ge.s32.totalorder %s18_s24, 4  }
 0x887   :  { %17 = sbr.rel (!%p15_p7) target bundleno = 1 (0x1), region = 113 }
 0x88c   :  { %7176 = vsyncpa [#allocation6], 1 }
 0x88d   :  { %7178 = vsyncpa [#allocation6 + $0x1], 1 }

</bundles_post_ra>
